<compile_context>
chip_gen: v7x
topology: tpu7x:2x2x1
jax: 0.10.0
libtpu: 0.0.40
codegen_flags: <defaults>
</compile_context>

<pallas_src>
import functools
import math

import jax
import jax.numpy as jnp
from jax.experimental import pallas as pl
from jax.experimental.pallas import tpu as pltpu

NF = 32      # PyTorch module hardcodes 256; scaled down for a small runnable example
EPS = 1e-5   # nn.BatchNorm2d default


def _round_up(x, m):
    return (x + m - 1) // m * m


def _pick_tile(dim, cap, align):
    """Largest tile <= cap covering `dim`; single (possibly padded) block if dim <= cap."""
    if dim <= cap:
        return _round_up(dim, align)
    return cap


# ----------------------------- Pallas kernels ------------------------------

def _mm_kernel(x_ref, w_ref, o_ref, sum_ref, sq_ref, *, act):
    """Tiled bf16 matmul with f32 accumulation into the resident output block.

    On the last K step it emits per-column sum / sum-of-squares of the raw
    (pre-activation) result and applies the optional tanh epilogue in place.
    """
    k = pl.program_id(1)

    @pl.when(k == 0)
    def _():
        o_ref[...] = jnp.zeros_like(o_ref)

    o_ref[...] += jnp.dot(x_ref[...], w_ref[...],
                          preferred_element_type=jnp.float32)

    @pl.when(k == pl.num_programs(1) - 1)
    def _():
        acc = o_ref[...]                                      # raw conv output, f32
        s = jnp.sum(acc, axis=0, keepdims=True)               # (1, N)
        sq = jnp.sum(acc * acc, axis=0, keepdims=True)        # (1, N)
        row = jax.lax.broadcasted_iota(jnp.int32, sum_ref.shape, 0)
        sum_ref[...] = jnp.where(row == 0, s, 0.0)            # row 0 holds the partial
        sq_ref[...] = jnp.where(row == 0, sq, 0.0)
        if act == "tanh":
            o_ref[...] = jnp.tanh(acc)


def matmul_stats(x, w, act="none"):
    """raw = act(x @ w)  plus per-column partial sum / sumsq of the raw result.

    x: (M, K) bf16, w: (K, N) bf16.  Returns (raw f32 (M, N), sums, sumsqs),
    where sums/sumsqs are (num_i_blocks * 8, N) f32 partials (sum over axis 0
    gives the true column totals; padded rows contribute exact zeros).
    """
    M, K = x.shape
    K2, N = w.shape
    assert K == K2
    tm = _pick_tile(M, 256, 8)      # 256 feeds the 256-wide MXU on v6e/v7x
    tk = _pick_tile(K, 1024, 128)   # big K tiles: few reduction steps, big DMAs
    Mp, Kp = _round_up(M, tm), _round_up(K, tk)
    if Mp != M or Kp != K:          # no-op for every layer shape in this model
        x = jnp.pad(x, ((0, Mp - M), (0, Kp - K)))
    if Kp != K:
        w = jnp.pad(w, ((0, Kp - K), (0, 0)))
    ni, nk = Mp // tm, Kp // tk

    raw, sums, sqs = pl.pallas_call(
        functools.partial(_mm_kernel, act=act),
        out_shape=(jax.ShapeDtypeStruct((Mp, N), jnp.float32),
                   jax.ShapeDtypeStruct((ni * 8, N), jnp.float32),
                   jax.ShapeDtypeStruct((ni * 8, N), jnp.float32)),
        grid_spec=pltpu.PrefetchScalarGridSpec(
            num_scalar_prefetch=0,
            grid=(ni, nk),
            in_specs=[
                pl.BlockSpec((tm, tk), lambda i, k: (i, k)),
                pl.BlockSpec((tk, N), lambda i, k: (k, 0)),   # tn = full N: A read once
            ],
            out_specs=(
                pl.BlockSpec((tm, N), lambda i, k: (i, 0)),   # resident f32 accumulator
                pl.BlockSpec((8, N), lambda i, k: (i, 0)),
                pl.BlockSpec((8, N), lambda i, k: (i, 0)),
            ),
        ),
        compiler_params=pltpu.CompilerParams(
            dimension_semantics=("parallel", "arbitrary")),
    )(x, w)
    if Mp != M:
        raw = raw[:M]
    return raw, sums, sqs


def _bn_relu_kernel(x_ref, scale_ref, shift_ref, o_ref):
    y = jnp.maximum(x_ref[...] * scale_ref[...] + shift_ref[...], 0.0)
    o_ref[...] = y.astype(o_ref.dtype)


def _bn_relu_call(x, scale, shift):
    R, C = x.shape
    bm = math.gcd(R, 512)
    if bm % 8 != 0:
        bm = R
    return pl.pallas_call(
        _bn_relu_kernel,
        out_shape=jax.ShapeDtypeStruct((R, C), jnp.bfloat16),
        grid_spec=pltpu.PrefetchScalarGridSpec(
            num_scalar_prefetch=0,
            grid=(R // bm,),
            in_specs=[
                pl.BlockSpec((bm, C), lambda i: (i, 0)),
                pl.BlockSpec((1, C), lambda i: (0, 0)),
                pl.BlockSpec((1, C), lambda i: (0, 0)),
            ],
            out_specs=pl.BlockSpec((bm, C), lambda i: (i, 0)),
        ),
        compiler_params=pltpu.CompilerParams(
            dimension_semantics=("parallel",)),
    )(x, scale.reshape(1, C), shift.reshape(1, C))


def bn_relu(x, scale, shift):
    """relu(x * scale + shift) with per-channel scale/shift; returns bf16.

    For C < 128 the activation is reshaped to a lane-dense (M*C/128, 128)
    layout (scale/shift tiled to 128) so stores are unmasked full-lane vst.
    """
    M, C = x.shape
    if C < 128 and 128 % C == 0 and (M * C) % 128 == 0:
        rep = 128 // C
        out = _bn_relu_call(x.reshape(M // rep, 128),
                            jnp.tile(scale, rep), jnp.tile(shift, rep))
        return out.reshape(M, C)
    return _bn_relu_call(x, scale, shift)


# ------------------------------ JAX glue -----------------------------------

def conv_transpose_im2col(y_nhwc, stride, padding, k=4):
    """Lower ConvTranspose2d(k, stride, padding, bias=False) to im2col patches.

    y_nhwc: (N, H, W, Cin) (bf16).  Returns patches (N*Ho*Wo, k*k*Cin) in the
    input dtype plus output spatial metadata.  Column order is (kh, kw, cin),
    matching the prepared weight matrix layout.
    """
    n, h, wdim, cin = y_nhwc.shape
    if stride > 1:
        z = jnp.zeros((n, h, stride, wdim, stride, cin), y_nhwc.dtype)
        z = z.at[:, :, 0, :, 0, :].set(y_nhwc)
        z = z.reshape(n, h * stride, wdim * stride, cin)
        z = z[:, : (h - 1) * stride + 1, : (wdim - 1) * stride + 1, :]
    else:
        z = y_nhwc
    pp = k - 1 - padding
    z = jnp.pad(z, ((0, 0), (pp, pp), (pp, pp), (0, 0)))
    hout = (h - 1) * stride - 2 * padding + k
    wout = (wdim - 1) * stride - 2 * padding + k
    cols = [z[:, kh:kh + hout, kw:kw + wout, :]
            for kh in range(k) for kw in range(k)]
    patches = jnp.stack(cols, axis=3).reshape(n * hout * wout, k * k * cin)
    return patches, (n, hout, wout)


def init_params(key, latent_size, nf=NF):
    """Deterministic synthetic parameters in PyTorch layout (Cin, Cout, k, k)."""
    specs = [(latent_size, nf * 8), (nf * 8, nf * 4), (nf * 4, nf * 2),
             (nf * 2, nf), (nf, 3)]
    keys = jax.random.split(key, len(specs))
    params = []
    for kk, (cin, cout) in zip(keys, specs):
        w = 0.05 * jax.random.normal(kk, (cin, cout, 4, 4), jnp.float32)
        gamma = jnp.ones((cout,), jnp.float32)   # BatchNorm2d default init
        beta = jnp.zeros((cout,), jnp.float32)
        params.append((w, gamma, beta))
    return params


def prepare_params(raw_params):
    """Hoisted, one-time weight prep: spatial flip + transpose + reshape + bf16 cast."""
    prepped = []
    for w, gamma, beta in raw_params:
        cin, cout, k, _ = w.shape
        wmat = jnp.transpose(w[:, :, ::-1, ::-1], (2, 3, 0, 1))   # (k,k,Cin,Cout)
        wmat = wmat.reshape(k * k * cin, cout).astype(jnp.bfloat16)
        prepped.append((wmat, gamma, beta))
    return prepped


def generator_forward(params, x_nchw):
    """Forward pass of Generator.  x_nchw: (N, latent, 1, 1) -> (N, 3, 64, 64)."""
    y = jnp.transpose(x_nchw, (0, 2, 3, 1)).astype(jnp.bfloat16)  # NHWC, bf16 operands
    strides = [1, 2, 2, 2, 2]
    pads = [0, 1, 1, 1, 1]
    n_layers = len(params)
    for li, ((wmat, gamma, beta), s, p) in enumerate(zip(params, strides, pads)):
        patches, (n, ho, wo) = conv_transpose_im2col(y, s, p, k=4)
        cout = wmat.shape[1]
        m_rows = patches.shape[0]
        last = li == n_layers - 1
        # ConvTranspose2d as a single fused Pallas matmul (+tanh on the last layer,
        # + per-column sum/sumsq partials for BatchNorm on the other layers).
        raw, csum, csq = matmul_stats(patches, wmat, act="tanh" if last else "none")
        if last:
            out = raw                                   # f32, tanh already applied
        else:
            # Finish BN batch statistics (training mode, biased variance) from the
            # fused partial sums -- a tiny XLA reduce, no extra pass over `raw`.
            mean = csum.sum(axis=0) / m_rows
            var = jnp.maximum(csq.sum(axis=0) / m_rows - mean * mean, 0.0)
            scale = gamma * jax.lax.rsqrt(var + EPS)
            shift = beta - mean * scale
            out = bn_relu(raw, scale, shift)            # bf16, feeds next bf16 matmul
        y = out.reshape(n, ho, wo, cout)
    return jnp.transpose(y.astype(jnp.float32), (0, 3, 1, 2))  # back to NCHW


if __name__ == "__main__":
    latent_size = 16
    batch = 2
    key = jax.random.PRNGKey(0)
    kp, kx = jax.random.split(key)
    params = prepare_params(init_params(kp, latent_size))   # weight prep hoisted out of jit
    x = jax.random.normal(kx, (batch, latent_size, 1, 1), jnp.float32)

    out = jax.jit(generator_forward)(params, x)
    out = jax.block_until_ready(out)

    assert out.shape == (batch, 3, 64, 64), out.shape
    assert bool(jnp.all(jnp.isfinite(out)))
    assert bool(jnp.all(jnp.abs(out) <= 1.0 + 1e-6))  # tanh output range
    print("KERNEL_OK")
</pallas_src>

<mosaic_0001>
module attributes {stable_mosaic.version = 11 : i64} {
  func.func @_bn_relu_kernel(%arg0: i32, %arg1: memref<32x256xf32, #tpu.memory_space<vmem>>, %arg2: memref<1x256xf32, #tpu.memory_space<vmem>>, %arg3: memref<1x256xf32, #tpu.memory_space<vmem>>, %arg4: memref<32x256xbf16, #tpu.memory_space<vmem>>) attributes {dimension_semantics = [#tpu.dimension_semantics<parallel>], iteration_bounds = array<i64: 1>, scalar_prefetch = 0 : i64, scratch_operands = 0 : i64, tpu.core_type = #tpu.core_type<tc>, window_params = [{transform_indices = @transform_0, window_bounds = array<i64: 32, 256>}, {pipeline_mode = #tpu.pipeline_mode<synchronous>, transform_indices = @transform_1, window_bounds = array<i64: 1, 256>}, {pipeline_mode = #tpu.pipeline_mode<synchronous>, transform_indices = @transform_2, window_bounds = array<i64: 1, 256>}, {transform_indices = @transform_3, window_bounds = array<i64: 32, 256>}]} {
    %c0 = arith.constant 0 : index
    %c0_0 = arith.constant 0 : index
    %0 = vector.load %arg1[%c0, %c0_0] : memref<32x256xf32, #tpu.memory_space<vmem>>, vector<32x256xf32>
    %c0_1 = arith.constant 0 : index
    %c0_2 = arith.constant 0 : index
    %1 = vector.load %arg2[%c0_1, %c0_2] : memref<1x256xf32, #tpu.memory_space<vmem>>, vector<1x256xf32>
    %2 = vector.broadcast %1 : vector<1x256xf32> to vector<32x256xf32>
    %3 = arith.mulf %0, %2 : vector<32x256xf32>
    %c0_3 = arith.constant 0 : index
    %c0_4 = arith.constant 0 : index
    %4 = vector.load %arg3[%c0_3, %c0_4] : memref<1x256xf32, #tpu.memory_space<vmem>>, vector<1x256xf32>
    %5 = vector.broadcast %4 : vector<1x256xf32> to vector<32x256xf32>
    %6 = arith.addf %3, %5 : vector<32x256xf32>
    %cst = arith.constant 0.000000e+00 : f32
    %7 = vector.broadcast %cst : f32 to vector<32x256xf32>
    %8 = arith.maximumf %6, %7 : vector<32x256xf32>
    %9 = arith.truncf %8 : vector<32x256xf32> to vector<32x256xbf16>
    %c0_5 = arith.constant 0 : index
    %c0_6 = arith.constant 0 : index
    %10 = vector.load %arg4[%c0_5, %c0_6] : memref<32x256xbf16, #tpu.memory_space<vmem>>, vector<32x256xbf16>
    tpu.vector_store %arg4[%c0_5, %c0_6], %9 {strides = array<i32>} : memref<32x256xbf16, #tpu.memory_space<vmem>>, vector<32x256xbf16>,
    return
  }
  func.func @transform_0(%arg0: i32) -> (i32, i32) {
    %c0_i32 = arith.constant 0 : i32
    %c0_i32_0 = arith.constant 0 : i32
    return %arg0, %c0_i32 : i32, i32
  }
  func.func @transform_1(%arg0: i32) -> (i32, i32) {
    %c0_i32 = arith.constant 0 : i32
    %c0_i32_0 = arith.constant 0 : i32
    %c0_i32_1 = arith.constant 0 : i32
    return %c0_i32, %c0_i32_0 : i32, i32
  }
  func.func @transform_2(%arg0: i32) -> (i32, i32) {
    %c0_i32 = arith.constant 0 : i32
    %c0_i32_0 = arith.constant 0 : i32
    %c0_i32_1 = arith.constant 0 : i32
    return %c0_i32, %c0_i32_0 : i32, i32
  }
  func.func @transform_3(%arg0: i32) -> (i32, i32) {
    %c0_i32 = arith.constant 0 : i32
    %c0_i32_0 = arith.constant 0 : i32
    return %arg0, %c0_i32 : i32, i32
  }
}

module attributes {stable_mosaic.version = 11 : i64} {
  func.func @_mm_kernel(%arg0: i32, %arg1: i32, %arg2: memref<32x256xbf16, #tpu.memory_space<vmem>>, %arg3: memref<256x256xbf16, #tpu.memory_space<vmem>>, %arg4: memref<32x256xf32, #tpu.memory_space<vmem>>, %arg5: memref<8x256xf32, #tpu.memory_space<vmem>>, %arg6: memref<8x256xf32, #tpu.memory_space<vmem>>) attributes {dimension_semantics = [#tpu.dimension_semantics<parallel>, #tpu.dimension_semantics<arbitrary>], iteration_bounds = array<i64: 1, 1>, scalar_prefetch = 0 : i64, scratch_operands = 0 : i64, tpu.core_type = #tpu.core_type<tc>, window_params = [{transform_indices = @transform_0, window_bounds = array<i64: 32, 256>}, {transform_indices = @transform_1, window_bounds = array<i64: 256, 256>}, {transform_indices = @transform_2, window_bounds = array<i64: 32, 256>}, {transform_indices = @transform_3, window_bounds = array<i64: 8, 256>}, {transform_indices = @transform_4, window_bounds = array<i64: 8, 256>}]} {
    %c0_i32 = arith.constant 0 : i32
    %0 = arith.cmpi eq, %arg1, %c0_i32 : i32
    %1 = arith.extui %0 : i1 to i32
    %c0_i32_0 = arith.constant 0 : i32
    %2 = arith.cmpi ne, %1, %c0_i32_0 : i32
    scf.if %2 {
      %cst_10 = arith.constant 0.000000e+00 : f32
      %12 = vector.broadcast %cst_10 : f32 to vector<32x256xf32>
      %c0_11 = arith.constant 0 : index
      %c0_12 = arith.constant 0 : index
      %13 = vector.load %arg4[%c0_11, %c0_12] : memref<32x256xf32, #tpu.memory_space<vmem>>, vector<32x256xf32>
      tpu.vector_store %arg4[%c0_11, %c0_12], %12 {strides = array<i32>} : memref<32x256xf32, #tpu.memory_space<vmem>>, vector<32x256xf32>,
    } else {
    }
    %c0 = arith.constant 0 : index
    %c0_1 = arith.constant 0 : index
    %3 = vector.load %arg4[%c0, %c0_1] : memref<32x256xf32, #tpu.memory_space<vmem>>, vector<32x256xf32>
    %c0_2 = arith.constant 0 : index
    %c0_3 = arith.constant 0 : index
    %4 = vector.load %arg2[%c0_2, %c0_3] : memref<32x256xbf16, #tpu.memory_space<vmem>>, vector<32x256xbf16>
    %c0_4 = arith.constant 0 : index
    %c0_5 = arith.constant 0 : index
    %5 = vector.load %arg3[%c0_4, %c0_5] : memref<256x256xbf16, #tpu.memory_space<vmem>>, vector<256x256xbf16>
    %cst = arith.constant dense<0.000000e+00> : vector<32x256xf32>
    %6 = tpu.matmul %4, %5, %cst {dimension_numbers = #tpu.dot_dimension_numbers<[1], [0], [0], [1], [0, 0, 1, 1], [], []>} : vector<32x256xbf16>, vector<256x256xbf16>, vector<32x256xf32> -> vector<32x256xf32>
    %7 = arith.addf %3, %6 : vector<32x256xf32>
    %c0_6 = arith.constant 0 : index
    %c0_7 = arith.constant 0 : index
    %8 = vector.load %arg4[%c0_6, %c0_7] : memref<32x256xf32, #tpu.memory_space<vmem>>, vector<32x256xf32>
    tpu.vector_store %arg4[%c0_6, %c0_7], %7 {strides = array<i32>} : memref<32x256xf32, #tpu.memory_space<vmem>>, vector<32x256xf32>,
    %c0_i32_8 = arith.constant 0 : i32
    %9 = arith.cmpi eq, %arg1, %c0_i32_8 : i32
    %10 = arith.extui %9 : i1 to i32
    %c0_i32_9 = arith.constant 0 : i32
    %11 = arith.cmpi ne, %10, %c0_i32_9 : i32
    scf.if %11 {
      %c0_10 = arith.constant 0 : index
      %c0_11 = arith.constant 0 : index
      %12 = vector.load %arg4[%c0_10, %c0_11] : memref<32x256xf32, #tpu.memory_space<vmem>>, vector<32x256xf32>
      %cst_12 = arith.constant dense<0.000000e+00> : vector<256xf32>
      %13 = vector.multi_reduction <add>, %12, %cst_12 [0] : vector<32x256xf32> to vector<256xf32>
      %14 = vector.shape_cast %13 : vector<256xf32> to vector<1x256xf32>
      %15 = arith.mulf %12, %12 : vector<32x256xf32>
      %cst_13 = arith.constant dense<0.000000e+00> : vector<256xf32>
      %16 = vector.multi_reduction <add>, %15, %cst_13 [0] : vector<32x256xf32> to vector<256xf32>
      %17 = vector.shape_cast %16 : vector<256xf32> to vector<1x256xf32>
      %18 = tpu.iota {dimensions = array<i32: 0>} : vector<8x256xi32>
      %c0_i32_14 = arith.constant 0 : i32
      %19 = vector.broadcast %c0_i32_14 : i32 to vector<8x256xi32>
      %20 = arith.cmpi eq, %18, %19 : vector<8x256xi32>
      %cst_15 = arith.constant 0.000000e+00 : f32
      %21 = vector.shape_cast %14 : vector<1x256xf32> to vector<1x256xf32>
      %22 = vector.broadcast %21 : vector<1x256xf32> to vector<8x256xf32>
      %23 = vector.broadcast %cst_15 : f32 to vector<8x256xf32>
      %24 = arith.select %20, %22, %23 : vector<8x256xi1>, vector<8x256xf32>
      %c0_16 = arith.constant 0 : index
      %c0_17 = arith.constant 0 : index
      %25 = vector.load %arg5[%c0_16, %c0_17] : memref<8x256xf32, #tpu.memory_space<vmem>>, vector<8x256xf32>
      tpu.vector_store %arg5[%c0_16, %c0_17], %24 {strides = array<i32>} : memref<8x256xf32, #tpu.memory_space<vmem>>, vector<8x256xf32>,
      %c0_i32_18 = arith.constant 0 : i32
      %26 = vector.broadcast %c0_i32_18 : i32 to vector<8x256xi32>
      %27 = arith.cmpi eq, %18, %26 : vector<8x256xi32>
      %cst_19 = arith.constant 0.000000e+00 : f32
      %28 = vector.shape_cast %17 : vector<1x256xf32> to vector<1x256xf32>
      %29 = vector.broadcast %28 : vector<1x256xf32> to vector<8x256xf32>
      %30 = vector.broadcast %cst_19 : f32 to vector<8x256xf32>
      %31 = arith.select %27, %29, %30 : vector<8x256xi1>, vector<8x256xf32>
      %c0_20 = arith.constant 0 : index
      %c0_21 = arith.constant 0 : index
      %32 = vector.load %arg6[%c0_20, %c0_21] : memref<8x256xf32, #tpu.memory_space<vmem>>, vector<8x256xf32>
      tpu.vector_store %arg6[%c0_20, %c0_21], %31 {strides = array<i32>} : memref<8x256xf32, #tpu.memory_space<vmem>>, vector<8x256xf32>,
    } else {
    }
    return
  }
  func.func @transform_0(%arg0: i32, %arg1: i32) -> (i32, i32) {
    %c0_i32 = arith.constant 0 : i32
    return %arg0, %arg1 : i32, i32
  }
  func.func @transform_1(%arg0: i32, %arg1: i32) -> (i32, i32) {
    %c0_i32 = arith.constant 0 : i32
    %c0_i32_0 = arith.constant 0 : i32
    return %arg1, %c0_i32 : i32, i32
  }
  func.func @transform_2(%arg0: i32, %arg1: i32) -> (i32, i32) {
    %c0_i32 = arith.constant 0 : i32
    %c0_i32_0 = arith.constant 0 : i32
    return %arg0, %c0_i32 : i32, i32
  }
  func.func @transform_3(%arg0: i32, %arg1: i32) -> (i32, i32) {
    %c0_i32 = arith.constant 0 : i32
    %c0_i32_0 = arith.constant 0 : i32
    return %arg0, %c0_i32 : i32, i32
  }
  func.func @transform_4(%arg0: i32, %arg1: i32) -> (i32, i32) {
    %c0_i32 = arith.constant 0 : i32
    %c0_i32_0 = arith.constant 0 : i32
    return %arg0, %c0_i32 : i32, i32
  }
}

module attributes {stable_mosaic.version = 11 : i64} {
  func.func @_mm_kernel(%arg0: i32, %arg1: i32, %arg2: memref<128x1024xbf16, #tpu.memory_space<vmem>>, %arg3: memref<1024x128xbf16, #tpu.memory_space<vmem>>, %arg4: memref<128x128xf32, #tpu.memory_space<vmem>>, %arg5: memref<8x128xf32, #tpu.memory_space<vmem>>, %arg6: memref<8x128xf32, #tpu.memory_space<vmem>>) attributes {dimension_semantics = [#tpu.dimension_semantics<parallel>, #tpu.dimension_semantics<arbitrary>], iteration_bounds = array<i64: 1, 4>, scalar_prefetch = 0 : i64, scratch_operands = 0 : i64, tpu.core_type = #tpu.core_type<tc>, window_params = [{transform_indices = @transform_0, window_bounds = array<i64: 128, 1024>}, {transform_indices = @transform_1, window_bounds = array<i64: 1024, 128>}, {transform_indices = @transform_2, window_bounds = array<i64: 128, 128>}, {transform_indices = @transform_3, window_bounds = array<i64: 8, 128>}, {transform_indices = @transform_4, window_bounds = array<i64: 8, 128>}]} {
    %c0_i32 = arith.constant 0 : i32
    %0 = arith.cmpi eq, %arg1, %c0_i32 : i32
    %1 = arith.extui %0 : i1 to i32
    %c0_i32_0 = arith.constant 0 : i32
    %2 = arith.cmpi ne, %1, %c0_i32_0 : i32
    scf.if %2 {
      %cst_9 = arith.constant 0.000000e+00 : f32
      %12 = vector.broadcast %cst_9 : f32 to vector<128x128xf32>
      %c0_10 = arith.constant 0 : index
      %c0_11 = arith.constant 0 : index
      %13 = vector.load %arg4[%c0_10, %c0_11] : memref<128x128xf32, #tpu.memory_space<vmem>>, vector<128x128xf32>
      tpu.vector_store %arg4[%c0_10, %c0_11], %12 {strides = array<i32>} : memref<128x128xf32, #tpu.memory_space<vmem>>, vector<128x128xf32>,
    } else {
    }
    %c0 = arith.constant 0 : index
    %c0_1 = arith.constant 0 : index
    %3 = vector.load %arg4[%c0, %c0_1] : memref<128x128xf32, #tpu.memory_space<vmem>>, vector<128x128xf32>
    %c0_2 = arith.constant 0 : index
    %c0_3 = arith.constant 0 : index
    %4 = vector.load %arg2[%c0_2, %c0_3] : memref<128x1024xbf16, #tpu.memory_space<vmem>>, vector<128x1024xbf16>
    %c0_4 = arith.constant 0 : index
    %c0_5 = arith.constant 0 : index
    %5 = vector.load %arg3[%c0_4, %c0_5] : memref<1024x128xbf16, #tpu.memory_space<vmem>>, vector<1024x128xbf16>
    %cst = arith.constant dense<0.000000e+00> : vector<128x128xf32>
    %6 = tpu.matmul %4, %5, %cst {dimension_numbers = #tpu.dot_dimension_numbers<[1], [0], [0], [1], [0, 0, 1, 1], [], []>} : vector<128x1024xbf16>, vector<1024x128xbf16>, vector<128x128xf32> -> vector<128x128xf32>
    %7 = arith.addf %3, %6 : vector<128x128xf32>
    %c0_6 = arith.constant 0 : index
    %c0_7 = arith.constant 0 : index
    %8 = vector.load %arg4[%c0_6, %c0_7] : memref<128x128xf32, #tpu.memory_space<vmem>>, vector<128x128xf32>
    tpu.vector_store %arg4[%c0_6, %c0_7], %7 {strides = array<i32>} : memref<128x128xf32, #tpu.memory_space<vmem>>, vector<128x128xf32>,
    %c3_i32 = arith.constant 3 : i32
    %9 = arith.cmpi eq, %arg1, %c3_i32 : i32
    %10 = arith.extui %9 : i1 to i32
    %c0_i32_8 = arith.constant 0 : i32
    %11 = arith.cmpi ne, %10, %c0_i32_8 : i32
    scf.if %11 {
      %c0_9 = arith.constant 0 : index
      %c0_10 = arith.constant 0 : index
      %12 = vector.load %arg4[%c0_9, %c0_10] : memref<128x128xf32, #tpu.memory_space<vmem>>, vector<128x128xf32>
      %cst_11 = arith.constant dense<0.000000e+00> : vector<128xf32>
      %13 = vector.multi_reduction <add>, %12, %cst_11 [0] : vector<128x128xf32> to vector<128xf32>
      %14 = vector.shape_cast %13 : vector<128xf32> to vector<1x128xf32>
      %15 = arith.mulf %12, %12 : vector<128x128xf32>
      %cst_12 = arith.constant dense<0.000000e+00> : vector<128xf32>
      %16 = vector.multi_reduction <add>, %15, %cst_12 [0] : vector<128x128xf32> to vector<128xf32>
      %17 = vector.shape_cast %16 : vector<128xf32> to vector<1x128xf32>
      %18 = tpu.iota {dimensions = array<i32: 0>} : vector<8x128xi32>
      %c0_i32_13 = arith.constant 0 : i32
      %19 = vector.broadcast %c0_i32_13 : i32 to vector<8x128xi32>
      %20 = arith.cmpi eq, %18, %19 : vector<8x128xi32>
      %cst_14 = arith.constant 0.000000e+00 : f32
      %21 = vector.shape_cast %14 : vector<1x128xf32> to vector<1x128xf32>
      %22 = vector.broadcast %21 : vector<1x128xf32> to vector<8x128xf32>
      %23 = vector.broadcast %cst_14 : f32 to vector<8x128xf32>
      %24 = arith.select %20, %22, %23 : vector<8x128xi1>, vector<8x128xf32>
      %c0_15 = arith.constant 0 : index
      %c0_16 = arith.constant 0 : index
      %25 = vector.load %arg5[%c0_15, %c0_16] : memref<8x128xf32, #tpu.memory_space<vmem>>, vector<8x128xf32>
      tpu.vector_store %arg5[%c0_15, %c0_16], %24 {strides = array<i32>} : memref<8x128xf32, #tpu.memory_space<vmem>>, vector<8x128xf32>,
      %c0_i32_17 = arith.constant 0 : i32
      %26 = vector.broadcast %c0_i32_17 : i32 to vector<8x128xi32>
      %27 = arith.cmpi eq, %18, %26 : vector<8x128xi32>
      %cst_18 = arith.constant 0.000000e+00 : f32
      %28 = vector.shape_cast %17 : vector<1x128xf32> to vector<1x128xf32>
      %29 = vector.broadcast %28 : vector<1x128xf32> to vector<8x128xf32>
      %30 = vector.broadcast %cst_18 : f32 to vector<8x128xf32>
      %31 = arith.select %27, %29, %30 : vector<8x128xi1>, vector<8x128xf32>
      %c0_19 = arith.constant 0 : index
      %c0_20 = arith.constant 0 : index
      %32 = vector.load %arg6[%c0_19, %c0_20] : memref<8x128xf32, #tpu.memory_space<vmem>>, vector<8x128xf32>
      tpu.vector_store %arg6[%c0_19, %c0_20], %31 {strides = array<i32>} : memref<8x128xf32, #tpu.memory_space<vmem>>, vector<8x128xf32>,
    } else {
    }
    return
  }
  func.func @transform_0(%arg0: i32, %arg1: i32) -> (i32, i32) {
    %c0_i32 = arith.constant 0 : i32
    return %arg0, %arg1 : i32, i32
  }
  func.func @transform_1(%arg0: i32, %arg1: i32) -> (i32, i32) {
    %c0_i32 = arith.constant 0 : i32
    %c0_i32_0 = arith.constant 0 : i32
    return %arg1, %c0_i32 : i32, i32
  }
  func.func @transform_2(%arg0: i32, %arg1: i32) -> (i32, i32) {
    %c0_i32 = arith.constant 0 : i32
    %c0_i32_0 = arith.constant 0 : i32
    return %arg0, %c0_i32 : i32, i32
  }
  func.func @transform_3(%arg0: i32, %arg1: i32) -> (i32, i32) {
    %c0_i32 = arith.constant 0 : i32
    %c0_i32_0 = arith.constant 0 : i32
    return %arg0, %c0_i32 : i32, i32
  }
  func.func @transform_4(%arg0: i32, %arg1: i32) -> (i32, i32) {
    %c0_i32 = arith.constant 0 : i32
    %c0_i32_0 = arith.constant 0 : i32
    return %arg0, %c0_i32 : i32, i32
  }
}

module attributes {stable_mosaic.version = 11 : i64} {
  func.func @_bn_relu_kernel(%arg0: i32, %arg1: memref<128x128xf32, #tpu.memory_space<vmem>>, %arg2: memref<1x128xf32, #tpu.memory_space<vmem>>, %arg3: memref<1x128xf32, #tpu.memory_space<vmem>>, %arg4: memref<128x128xbf16, #tpu.memory_space<vmem>>) attributes {dimension_semantics = [#tpu.dimension_semantics<parallel>], iteration_bounds = array<i64: 1>, scalar_prefetch = 0 : i64, scratch_operands = 0 : i64, tpu.core_type = #tpu.core_type<tc>, window_params = [{transform_indices = @transform_0, window_bounds = array<i64: 128, 128>}, {pipeline_mode = #tpu.pipeline_mode<synchronous>, transform_indices = @transform_1, window_bounds = array<i64: 1, 128>}, {pipeline_mode = #tpu.pipeline_mode<synchronous>, transform_indices = @transform_2, window_bounds = array<i64: 1, 128>}, {transform_indices = @transform_3, window_bounds = array<i64: 128, 128>}]} {
    %c0 = arith.constant 0 : index
    %c0_0 = arith.constant 0 : index
    %0 = vector.load %arg1[%c0, %c0_0] : memref<128x128xf32, #tpu.memory_space<vmem>>, vector<128x128xf32>
    %c0_1 = arith.constant 0 : index
    %c0_2 = arith.constant 0 : index
    %1 = vector.load %arg2[%c0_1, %c0_2] : memref<1x128xf32, #tpu.memory_space<vmem>>, vector<1x128xf32>
    %2 = vector.broadcast %1 : vector<1x128xf32> to vector<128x128xf32>
    %3 = arith.mulf %0, %2 : vector<128x128xf32>
    %c0_3 = arith.constant 0 : index
    %c0_4 = arith.constant 0 : index
    %4 = vector.load %arg3[%c0_3, %c0_4] : memref<1x128xf32, #tpu.memory_space<vmem>>, vector<1x128xf32>
    %5 = vector.broadcast %4 : vector<1x128xf32> to vector<128x128xf32>
    %6 = arith.addf %3, %5 : vector<128x128xf32>
    %cst = arith.constant 0.000000e+00 : f32
    %7 = vector.broadcast %cst : f32 to vector<128x128xf32>
    %8 = arith.maximumf %6, %7 : vector<128x128xf32>
    %9 = arith.truncf %8 : vector<128x128xf32> to vector<128x128xbf16>
    %c0_5 = arith.constant 0 : index
    %c0_6 = arith.constant 0 : index
    %10 = vector.load %arg4[%c0_5, %c0_6] : memref<128x128xbf16, #tpu.memory_space<vmem>>, vector<128x128xbf16>
    tpu.vector_store %arg4[%c0_5, %c0_6], %9 {strides = array<i32>} : memref<128x128xbf16, #tpu.memory_space<vmem>>, vector<128x128xbf16>,
    return
  }
  func.func @transform_0(%arg0: i32) -> (i32, i32) {
    %c0_i32 = arith.constant 0 : i32
    %c0_i32_0 = arith.constant 0 : i32
    return %arg0, %c0_i32 : i32, i32
  }
  func.func @transform_1(%arg0: i32) -> (i32, i32) {
    %c0_i32 = arith.constant 0 : i32
    %c0_i32_0 = arith.constant 0 : i32
    %c0_i32_1 = arith.constant 0 : i32
    return %c0_i32, %c0_i32_0 : i32, i32
  }
  func.func @transform_2(%arg0: i32) -> (i32, i32) {
    %c0_i32 = arith.constant 0 : i32
    %c0_i32_0 = arith.constant 0 : i32
    %c0_i32_1 = arith.constant 0 : i32
    return %c0_i32, %c0_i32_0 : i32, i32
  }
  func.func @transform_3(%arg0: i32) -> (i32, i32) {
    %c0_i32 = arith.constant 0 : i32
    %c0_i32_0 = arith.constant 0 : i32
    return %arg0, %c0_i32 : i32, i32
  }
}

module attributes {stable_mosaic.version = 11 : i64} {
  func.func @_mm_kernel(%arg0: i32, %arg1: i32, %arg2: memref<256x1024xbf16, #tpu.memory_space<vmem>>, %arg3: memref<1024x64xbf16, #tpu.memory_space<vmem>>, %arg4: memref<256x64xf32, #tpu.memory_space<vmem>>, %arg5: memref<8x64xf32, #tpu.memory_space<vmem>>, %arg6: memref<8x64xf32, #tpu.memory_space<vmem>>) attributes {dimension_semantics = [#tpu.dimension_semantics<parallel>, #tpu.dimension_semantics<arbitrary>], iteration_bounds = array<i64: 2, 2>, scalar_prefetch = 0 : i64, scratch_operands = 0 : i64, tpu.core_type = #tpu.core_type<tc>, window_params = [{transform_indices = @transform_0, window_bounds = array<i64: 256, 1024>}, {transform_indices = @transform_1, window_bounds = array<i64: 1024, 64>}, {transform_indices = @transform_2, window_bounds = array<i64: 256, 64>}, {transform_indices = @transform_3, window_bounds = array<i64: 8, 64>}, {transform_indices = @transform_4, window_bounds = array<i64: 8, 64>}]} {
    %c0_i32 = arith.constant 0 : i32
    %0 = arith.cmpi eq, %arg1, %c0_i32 : i32
    %1 = arith.extui %0 : i1 to i32
    %c0_i32_0 = arith.constant 0 : i32
    %2 = arith.cmpi ne, %1, %c0_i32_0 : i32
    scf.if %2 {
      %cst_9 = arith.constant 0.000000e+00 : f32
      %12 = vector.broadcast %cst_9 : f32 to vector<256x64xf32>
      %c0_10 = arith.constant 0 : index
      %c0_11 = arith.constant 0 : index
      %13 = vector.load %arg4[%c0_10, %c0_11] : memref<256x64xf32, #tpu.memory_space<vmem>>, vector<256x64xf32>
      tpu.vector_store %arg4[%c0_10, %c0_11], %12 {strides = array<i32>} : memref<256x64xf32, #tpu.memory_space<vmem>>, vector<256x64xf32>,
    } else {
    }
    %c0 = arith.constant 0 : index
    %c0_1 = arith.constant 0 : index
    %3 = vector.load %arg4[%c0, %c0_1] : memref<256x64xf32, #tpu.memory_space<vmem>>, vector<256x64xf32>
    %c0_2 = arith.constant 0 : index
    %c0_3 = arith.constant 0 : index
    %4 = vector.load %arg2[%c0_2, %c0_3] : memref<256x1024xbf16, #tpu.memory_space<vmem>>, vector<256x1024xbf16>
    %c0_4 = arith.constant 0 : index
    %c0_5 = arith.constant 0 : index
    %5 = vector.load %arg3[%c0_4, %c0_5] : memref<1024x64xbf16, #tpu.memory_space<vmem>>, vector<1024x64xbf16>
    %cst = arith.constant dense<0.000000e+00> : vector<256x64xf32>
    %6 = tpu.matmul %4, %5, %cst {dimension_numbers = #tpu.dot_dimension_numbers<[1], [0], [0], [1], [0, 0, 1, 1], [], []>} : vector<256x1024xbf16>, vector<1024x64xbf16>, vector<256x64xf32> -> vector<256x64xf32>
    %7 = arith.addf %3, %6 : vector<256x64xf32>
    %c0_6 = arith.constant 0 : index
    %c0_7 = arith.constant 0 : index
    %8 = vector.load %arg4[%c0_6, %c0_7] : memref<256x64xf32, #tpu.memory_space<vmem>>, vector<256x64xf32>
    tpu.vector_store %arg4[%c0_6, %c0_7], %7 {strides = array<i32>} : memref<256x64xf32, #tpu.memory_space<vmem>>, vector<256x64xf32>,
    %c1_i32 = arith.constant 1 : i32
    %9 = arith.cmpi eq, %arg1, %c1_i32 : i32
    %10 = arith.extui %9 : i1 to i32
    %c0_i32_8 = arith.constant 0 : i32
    %11 = arith.cmpi ne, %10, %c0_i32_8 : i32
    scf.if %11 {
      %c0_9 = arith.constant 0 : index
      %c0_10 = arith.constant 0 : index
      %12 = vector.load %arg4[%c0_9, %c0_10] : memref<256x64xf32, #tpu.memory_space<vmem>>, vector<256x64xf32>
      %cst_11 = arith.constant dense<0.000000e+00> : vector<64xf32>
      %13 = vector.multi_reduction <add>, %12, %cst_11 [0] : vector<256x64xf32> to vector<64xf32>
      %14 = vector.shape_cast %13 : vector<64xf32> to vector<1x64xf32>
      %15 = arith.mulf %12, %12 : vector<256x64xf32>
      %cst_12 = arith.constant dense<0.000000e+00> : vector<64xf32>
      %16 = vector.multi_reduction <add>, %15, %cst_12 [0] : vector<256x64xf32> to vector<64xf32>
      %17 = vector.shape_cast %16 : vector<64xf32> to vector<1x64xf32>
      %18 = tpu.iota {dimensions = array<i32: 0>} : vector<8x64xi32>
      %c0_i32_13 = arith.constant 0 : i32
      %19 = vector.broadcast %c0_i32_13 : i32 to vector<8x64xi32>
      %20 = arith.cmpi eq, %18, %19 : vector<8x64xi32>
      %cst_14 = arith.constant 0.000000e+00 : f32
      %21 = vector.shape_cast %14 : vector<1x64xf32> to vector<1x64xf32>
      %22 = vector.broadcast %21 : vector<1x64xf32> to vector<8x64xf32>
      %23 = vector.broadcast %cst_14 : f32 to vector<8x64xf32>
      %24 = arith.select %20, %22, %23 : vector<8x64xi1>, vector<8x64xf32>
      %c0_15 = arith.constant 0 : index
      %c0_16 = arith.constant 0 : index
      %25 = vector.load %arg5[%c0_15, %c0_16] : memref<8x64xf32, #tpu.memory_space<vmem>>, vector<8x64xf32>
      tpu.vector_store %arg5[%c0_15, %c0_16], %24 {strides = array<i32>} : memref<8x64xf32, #tpu.memory_space<vmem>>, vector<8x64xf32>,
      %c0_i32_17 = arith.constant 0 : i32
      %26 = vector.broadcast %c0_i32_17 : i32 to vector<8x64xi32>
      %27 = arith.cmpi eq, %18, %26 : vector<8x64xi32>
      %cst_18 = arith.constant 0.000000e+00 : f32
      %28 = vector.shape_cast %17 : vector<1x64xf32> to vector<1x64xf32>
      %29 = vector.broadcast %28 : vector<1x64xf32> to vector<8x64xf32>
      %30 = vector.broadcast %cst_18 : f32 to vector<8x64xf32>
      %31 = arith.select %27, %29, %30 : vector<8x64xi1>, vector<8x64xf32>
      %c0_19 = arith.constant 0 : index
      %c0_20 = arith.constant 0 : index
      %32 = vector.load %arg6[%c0_19, %c0_20] : memref<8x64xf32, #tpu.memory_space<vmem>>, vector<8x64xf32>
      tpu.vector_store %arg6[%c0_19, %c0_20], %31 {strides = array<i32>} : memref<8x64xf32, #tpu.memory_space<vmem>>, vector<8x64xf32>,
    } else {
    }
    return
  }
  func.func @transform_0(%arg0: i32, %arg1: i32) -> (i32, i32) {
    %c0_i32 = arith.constant 0 : i32
    return %arg0, %arg1 : i32, i32
  }
  func.func @transform_1(%arg0: i32, %arg1: i32) -> (i32, i32) {
    %c0_i32 = arith.constant 0 : i32
    %c0_i32_0 = arith.constant 0 : i32
    return %arg1, %c0_i32 : i32, i32
  }
  func.func @transform_2(%arg0: i32, %arg1: i32) -> (i32, i32) {
    %c0_i32 = arith.constant 0 : i32
    %c0_i32_0 = arith.constant 0 : i32
    return %arg0, %c0_i32 : i32, i32
  }
  func.func @transform_3(%arg0: i32, %arg1: i32) -> (i32, i32) {
    %c0_i32 = arith.constant 0 : i32
    %c0_i32_0 = arith.constant 0 : i32
    return %arg0, %c0_i32 : i32, i32
  }
  func.func @transform_4(%arg0: i32, %arg1: i32) -> (i32, i32) {
    %c0_i32 = arith.constant 0 : i32
    %c0_i32_0 = arith.constant 0 : i32
    return %arg0, %c0_i32 : i32, i32
  }
}

module attributes {stable_mosaic.version = 11 : i64} {
  func.func @_bn_relu_kernel(%arg0: i32, %arg1: memref<256x128xf32, #tpu.memory_space<vmem>>, %arg2: memref<1x128xf32, #tpu.memory_space<vmem>>, %arg3: memref<1x128xf32, #tpu.memory_space<vmem>>, %arg4: memref<256x128xbf16, #tpu.memory_space<vmem>>) attributes {dimension_semantics = [#tpu.dimension_semantics<parallel>], iteration_bounds = array<i64: 1>, scalar_prefetch = 0 : i64, scratch_operands = 0 : i64, tpu.core_type = #tpu.core_type<tc>, window_params = [{transform_indices = @transform_0, window_bounds = array<i64: 256, 128>}, {pipeline_mode = #tpu.pipeline_mode<synchronous>, transform_indices = @transform_1, window_bounds = array<i64: 1, 128>}, {pipeline_mode = #tpu.pipeline_mode<synchronous>, transform_indices = @transform_2, window_bounds = array<i64: 1, 128>}, {transform_indices = @transform_3, window_bounds = array<i64: 256, 128>}]} {
    %c0 = arith.constant 0 : index
    %c0_0 = arith.constant 0 : index
    %0 = vector.load %arg1[%c0, %c0_0] : memref<256x128xf32, #tpu.memory_space<vmem>>, vector<256x128xf32>
    %c0_1 = arith.constant 0 : index
    %c0_2 = arith.constant 0 : index
    %1 = vector.load %arg2[%c0_1, %c0_2] : memref<1x128xf32, #tpu.memory_space<vmem>>, vector<1x128xf32>
    %2 = vector.broadcast %1 : vector<1x128xf32> to vector<256x128xf32>
    %3 = arith.mulf %0, %2 : vector<256x128xf32>
    %c0_3 = arith.constant 0 : index
    %c0_4 = arith.constant 0 : index
    %4 = vector.load %arg3[%c0_3, %c0_4] : memref<1x128xf32, #tpu.memory_space<vmem>>, vector<1x128xf32>
    %5 = vector.broadcast %4 : vector<1x128xf32> to vector<256x128xf32>
    %6 = arith.addf %3, %5 : vector<256x128xf32>
    %cst = arith.constant 0.000000e+00 : f32
    %7 = vector.broadcast %cst : f32 to vector<256x128xf32>
    %8 = arith.maximumf %6, %7 : vector<256x128xf32>
    %9 = arith.truncf %8 : vector<256x128xf32> to vector<256x128xbf16>
    %c0_5 = arith.constant 0 : index
    %c0_6 = arith.constant 0 : index
    %10 = vector.load %arg4[%c0_5, %c0_6] : memref<256x128xbf16, #tpu.memory_space<vmem>>, vector<256x128xbf16>
    tpu.vector_store %arg4[%c0_5, %c0_6], %9 {strides = array<i32>} : memref<256x128xbf16, #tpu.memory_space<vmem>>, vector<256x128xbf16>,
    return
  }
  func.func @transform_0(%arg0: i32) -> (i32, i32) {
    %c0_i32 = arith.constant 0 : i32
    %c0_i32_0 = arith.constant 0 : i32
    return %arg0, %c0_i32 : i32, i32
  }
  func.func @transform_1(%arg0: i32) -> (i32, i32) {
    %c0_i32 = arith.constant 0 : i32
    %c0_i32_0 = arith.constant 0 : i32
    %c0_i32_1 = arith.constant 0 : i32
    return %c0_i32, %c0_i32_0 : i32, i32
  }
  func.func @transform_2(%arg0: i32) -> (i32, i32) {
    %c0_i32 = arith.constant 0 : i32
    %c0_i32_0 = arith.constant 0 : i32
    %c0_i32_1 = arith.constant 0 : i32
    return %c0_i32, %c0_i32_0 : i32, i32
  }
  func.func @transform_3(%arg0: i32) -> (i32, i32) {
    %c0_i32 = arith.constant 0 : i32
    %c0_i32_0 = arith.constant 0 : i32
    return %arg0, %c0_i32 : i32, i32
  }
}

module attributes {stable_mosaic.version = 11 : i64} {
  func.func @_mm_kernel(%arg0: i32, %arg1: i32, %arg2: memref<256x1024xbf16, #tpu.memory_space<vmem>>, %arg3: memref<1024x32xbf16, #tpu.memory_space<vmem>>, %arg4: memref<256x32xf32, #tpu.memory_space<vmem>>, %arg5: memref<8x32xf32, #tpu.memory_space<vmem>>, %arg6: memref<8x32xf32, #tpu.memory_space<vmem>>) attributes {dimension_semantics = [#tpu.dimension_semantics<parallel>, #tpu.dimension_semantics<arbitrary>], iteration_bounds = array<i64: 8, 1>, scalar_prefetch = 0 : i64, scratch_operands = 0 : i64, tpu.core_type = #tpu.core_type<tc>, window_params = [{transform_indices = @transform_0, window_bounds = array<i64: 256, 1024>}, {transform_indices = @transform_1, window_bounds = array<i64: 1024, 32>}, {transform_indices = @transform_2, window_bounds = array<i64: 256, 32>}, {transform_indices = @transform_3, window_bounds = array<i64: 8, 32>}, {transform_indices = @transform_4, window_bounds = array<i64: 8, 32>}]} {
    %c0_i32 = arith.constant 0 : i32
    %0 = arith.cmpi eq, %arg1, %c0_i32 : i32
    %1 = arith.extui %0 : i1 to i32
    %c0_i32_0 = arith.constant 0 : i32
    %2 = arith.cmpi ne, %1, %c0_i32_0 : i32
    scf.if %2 {
      %cst_10 = arith.constant 0.000000e+00 : f32
      %12 = vector.broadcast %cst_10 : f32 to vector<256x32xf32>
      %c0_11 = arith.constant 0 : index
      %c0_12 = arith.constant 0 : index
      %13 = vector.load %arg4[%c0_11, %c0_12] : memref<256x32xf32, #tpu.memory_space<vmem>>, vector<256x32xf32>
      tpu.vector_store %arg4[%c0_11, %c0_12], %12 {strides = array<i32>} : memref<256x32xf32, #tpu.memory_space<vmem>>, vector<256x32xf32>,
    } else {
    }
    %c0 = arith.constant 0 : index
    %c0_1 = arith.constant 0 : index
    %3 = vector.load %arg4[%c0, %c0_1] : memref<256x32xf32, #tpu.memory_space<vmem>>, vector<256x32xf32>
    %c0_2 = arith.constant 0 : index
    %c0_3 = arith.constant 0 : index
    %4 = vector.load %arg2[%c0_2, %c0_3] : memref<256x1024xbf16, #tpu.memory_space<vmem>>, vector<256x1024xbf16>
    %c0_4 = arith.constant 0 : index
    %c0_5 = arith.constant 0 : index
    %5 = vector.load %arg3[%c0_4, %c0_5] : memref<1024x32xbf16, #tpu.memory_space<vmem>>, vector<1024x32xbf16>
    %cst = arith.constant dense<0.000000e+00> : vector<256x32xf32>
    %6 = tpu.matmul %4, %5, %cst {dimension_numbers = #tpu.dot_dimension_numbers<[1], [0], [0], [1], [0, 0, 1, 1], [], []>} : vector<256x1024xbf16>, vector<1024x32xbf16>, vector<256x32xf32> -> vector<256x32xf32>
    %7 = arith.addf %3, %6 : vector<256x32xf32>
    %c0_6 = arith.constant 0 : index
    %c0_7 = arith.constant 0 : index
    %8 = vector.load %arg4[%c0_6, %c0_7] : memref<256x32xf32, #tpu.memory_space<vmem>>, vector<256x32xf32>
    tpu.vector_store %arg4[%c0_6, %c0_7], %7 {strides = array<i32>} : memref<256x32xf32, #tpu.memory_space<vmem>>, vector<256x32xf32>,
    %c0_i32_8 = arith.constant 0 : i32
    %9 = arith.cmpi eq, %arg1, %c0_i32_8 : i32
    %10 = arith.extui %9 : i1 to i32
    %c0_i32_9 = arith.constant 0 : i32
    %11 = arith.cmpi ne, %10, %c0_i32_9 : i32
    scf.if %11 {
      %c0_10 = arith.constant 0 : index
      %c0_11 = arith.constant 0 : index
      %12 = vector.load %arg4[%c0_10, %c0_11] : memref<256x32xf32, #tpu.memory_space<vmem>>, vector<256x32xf32>
      %cst_12 = arith.constant dense<0.000000e+00> : vector<32xf32>
      %13 = vector.multi_reduction <add>, %12, %cst_12 [0] : vector<256x32xf32> to vector<32xf32>
      %14 = vector.shape_cast %13 : vector<32xf32> to vector<1x32xf32>
      %15 = arith.mulf %12, %12 : vector<256x32xf32>
      %cst_13 = arith.constant dense<0.000000e+00> : vector<32xf32>
      %16 = vector.multi_reduction <add>, %15, %cst_13 [0] : vector<256x32xf32> to vector<32xf32>
      %17 = vector.shape_cast %16 : vector<32xf32> to vector<1x32xf32>
      %18 = tpu.iota {dimensions = array<i32: 0>} : vector<8x32xi32>
      %c0_i32_14 = arith.constant 0 : i32
      %19 = vector.broadcast %c0_i32_14 : i32 to vector<8x32xi32>
      %20 = arith.cmpi eq, %18, %19 : vector<8x32xi32>
      %cst_15 = arith.constant 0.000000e+00 : f32
      %21 = vector.shape_cast %14 : vector<1x32xf32> to vector<1x32xf32>
      %22 = vector.broadcast %21 : vector<1x32xf32> to vector<8x32xf32>
      %23 = vector.broadcast %cst_15 : f32 to vector<8x32xf32>
      %24 = arith.select %20, %22, %23 : vector<8x32xi1>, vector<8x32xf32>
      %c0_16 = arith.constant 0 : index
      %c0_17 = arith.constant 0 : index
      %25 = vector.load %arg5[%c0_16, %c0_17] : memref<8x32xf32, #tpu.memory_space<vmem>>, vector<8x32xf32>
      tpu.vector_store %arg5[%c0_16, %c0_17], %24 {strides = array<i32>} : memref<8x32xf32, #tpu.memory_space<vmem>>, vector<8x32xf32>,
      %c0_i32_18 = arith.constant 0 : i32
      %26 = vector.broadcast %c0_i32_18 : i32 to vector<8x32xi32>
      %27 = arith.cmpi eq, %18, %26 : vector<8x32xi32>
      %cst_19 = arith.constant 0.000000e+00 : f32
      %28 = vector.shape_cast %17 : vector<1x32xf32> to vector<1x32xf32>
      %29 = vector.broadcast %28 : vector<1x32xf32> to vector<8x32xf32>
      %30 = vector.broadcast %cst_19 : f32 to vector<8x32xf32>
      %31 = arith.select %27, %29, %30 : vector<8x32xi1>, vector<8x32xf32>
      %c0_20 = arith.constant 0 : index
      %c0_21 = arith.constant 0 : index
      %32 = vector.load %arg6[%c0_20, %c0_21] : memref<8x32xf32, #tpu.memory_space<vmem>>, vector<8x32xf32>
      tpu.vector_store %arg6[%c0_20, %c0_21], %31 {strides = array<i32>} : memref<8x32xf32, #tpu.memory_space<vmem>>, vector<8x32xf32>,
    } else {
    }
    return
  }
  func.func @transform_0(%arg0: i32, %arg1: i32) -> (i32, i32) {
    %c0_i32 = arith.constant 0 : i32
    return %arg0, %arg1 : i32, i32
  }
  func.func @transform_1(%arg0: i32, %arg1: i32) -> (i32, i32) {
    %c0_i32 = arith.constant 0 : i32
    %c0_i32_0 = arith.constant 0 : i32
    return %arg1, %c0_i32 : i32, i32
  }
  func.func @transform_2(%arg0: i32, %arg1: i32) -> (i32, i32) {
    %c0_i32 = arith.constant 0 : i32
    %c0_i32_0 = arith.constant 0 : i32
    return %arg0, %c0_i32 : i32, i32
  }
  func.func @transform_3(%arg0: i32, %arg1: i32) -> (i32, i32) {
    %c0_i32 = arith.constant 0 : i32
    %c0_i32_0 = arith.constant 0 : i32
    return %arg0, %c0_i32 : i32, i32
  }
  func.func @transform_4(%arg0: i32, %arg1: i32) -> (i32, i32) {
    %c0_i32 = arith.constant 0 : i32
    %c0_i32_0 = arith.constant 0 : i32
    return %arg0, %c0_i32 : i32, i32
  }
}

module attributes {stable_mosaic.version = 11 : i64} {
  func.func @_bn_relu_kernel(%arg0: i32, %arg1: memref<512x128xf32, #tpu.memory_space<vmem>>, %arg2: memref<1x128xf32, #tpu.memory_space<vmem>>, %arg3: memref<1x128xf32, #tpu.memory_space<vmem>>, %arg4: memref<512x128xbf16, #tpu.memory_space<vmem>>) attributes {dimension_semantics = [#tpu.dimension_semantics<parallel>], iteration_bounds = array<i64: 1>, scalar_prefetch = 0 : i64, scratch_operands = 0 : i64, tpu.core_type = #tpu.core_type<tc>, window_params = [{transform_indices = @transform_0, window_bounds = array<i64: 512, 128>}, {pipeline_mode = #tpu.pipeline_mode<synchronous>, transform_indices = @transform_1, window_bounds = array<i64: 1, 128>}, {pipeline_mode = #tpu.pipeline_mode<synchronous>, transform_indices = @transform_2, window_bounds = array<i64: 1, 128>}, {transform_indices = @transform_3, window_bounds = array<i64: 512, 128>}]} {
    %c0 = arith.constant 0 : index
    %c0_0 = arith.constant 0 : index
    %0 = vector.load %arg1[%c0, %c0_0] : memref<512x128xf32, #tpu.memory_space<vmem>>, vector<512x128xf32>
    %c0_1 = arith.constant 0 : index
    %c0_2 = arith.constant 0 : index
    %1 = vector.load %arg2[%c0_1, %c0_2] : memref<1x128xf32, #tpu.memory_space<vmem>>, vector<1x128xf32>
    %2 = vector.broadcast %1 : vector<1x128xf32> to vector<512x128xf32>
    %3 = arith.mulf %0, %2 : vector<512x128xf32>
    %c0_3 = arith.constant 0 : index
    %c0_4 = arith.constant 0 : index
    %4 = vector.load %arg3[%c0_3, %c0_4] : memref<1x128xf32, #tpu.memory_space<vmem>>, vector<1x128xf32>
    %5 = vector.broadcast %4 : vector<1x128xf32> to vector<512x128xf32>
    %6 = arith.addf %3, %5 : vector<512x128xf32>
    %cst = arith.constant 0.000000e+00 : f32
    %7 = vector.broadcast %cst : f32 to vector<512x128xf32>
    %8 = arith.maximumf %6, %7 : vector<512x128xf32>
    %9 = arith.truncf %8 : vector<512x128xf32> to vector<512x128xbf16>
    %c0_5 = arith.constant 0 : index
    %c0_6 = arith.constant 0 : index
    %10 = vector.load %arg4[%c0_5, %c0_6] : memref<512x128xbf16, #tpu.memory_space<vmem>>, vector<512x128xbf16>
    tpu.vector_store %arg4[%c0_5, %c0_6], %9 {strides = array<i32>} : memref<512x128xbf16, #tpu.memory_space<vmem>>, vector<512x128xbf16>,
    return
  }
  func.func @transform_0(%arg0: i32) -> (i32, i32) {
    %c0_i32 = arith.constant 0 : i32
    %c0_i32_0 = arith.constant 0 : i32
    return %arg0, %c0_i32 : i32, i32
  }
  func.func @transform_1(%arg0: i32) -> (i32, i32) {
    %c0_i32 = arith.constant 0 : i32
    %c0_i32_0 = arith.constant 0 : i32
    %c0_i32_1 = arith.constant 0 : i32
    return %c0_i32, %c0_i32_0 : i32, i32
  }
  func.func @transform_2(%arg0: i32) -> (i32, i32) {
    %c0_i32 = arith.constant 0 : i32
    %c0_i32_0 = arith.constant 0 : i32
    %c0_i32_1 = arith.constant 0 : i32
    return %c0_i32, %c0_i32_0 : i32, i32
  }
  func.func @transform_3(%arg0: i32) -> (i32, i32) {
    %c0_i32 = arith.constant 0 : i32
    %c0_i32_0 = arith.constant 0 : i32
    return %arg0, %c0_i32 : i32, i32
  }
}

module attributes {stable_mosaic.version = 11 : i64} {
  func.func @_mm_kernel(%arg0: i32, %arg1: i32, %arg2: memref<256x512xbf16, #tpu.memory_space<vmem>>, %arg3: memref<512x3xbf16, #tpu.memory_space<vmem>>, %arg4: memref<256x3xf32, #tpu.memory_space<vmem>>, %arg5: memref<8x3xf32, #tpu.memory_space<vmem>>, %arg6: memref<8x3xf32, #tpu.memory_space<vmem>>) attributes {dimension_semantics = [#tpu.dimension_semantics<parallel>, #tpu.dimension_semantics<arbitrary>], iteration_bounds = array<i64: 32, 1>, scalar_prefetch = 0 : i64, scratch_operands = 0 : i64, tpu.core_type = #tpu.core_type<tc>, window_params = [{transform_indices = @transform_0, window_bounds = array<i64: 256, 512>}, {transform_indices = @transform_1, window_bounds = array<i64: 512, 3>}, {transform_indices = @transform_2, window_bounds = array<i64: 256, 3>}, {transform_indices = @transform_3, window_bounds = array<i64: 8, 3>}, {transform_indices = @transform_4, window_bounds = array<i64: 8, 3>}]} {
    %c0_i32 = arith.constant 0 : i32
    %0 = arith.cmpi eq, %arg1, %c0_i32 : i32
    %1 = arith.extui %0 : i1 to i32
    %c0_i32_0 = arith.constant 0 : i32
    %2 = arith.cmpi ne, %1, %c0_i32_0 : i32
    scf.if %2 {
      %cst_10 = arith.constant 0.000000e+00 : f32
      %12 = vector.broadcast %cst_10 : f32 to vector<256x3xf32>
      %c0_11 = arith.constant 0 : index
      %c0_12 = arith.constant 0 : index
      %13 = vector.load %arg4[%c0_11, %c0_12] : memref<256x3xf32, #tpu.memory_space<vmem>>, vector<256x3xf32>
      tpu.vector_store %arg4[%c0_11, %c0_12], %12 {strides = array<i32>} : memref<256x3xf32, #tpu.memory_space<vmem>>, vector<256x3xf32>,
    } else {
    }
    %c0 = arith.constant 0 : index
    %c0_1 = arith.constant 0 : index
    %3 = vector.load %arg4[%c0, %c0_1] : memref<256x3xf32, #tpu.memory_space<vmem>>, vector<256x3xf32>
    %c0_2 = arith.constant 0 : index
    %c0_3 = arith.constant 0 : index
    %4 = vector.load %arg2[%c0_2, %c0_3] : memref<256x512xbf16, #tpu.memory_space<vmem>>, vector<256x512xbf16>
    %c0_4 = arith.constant 0 : index
    %c0_5 = arith.constant 0 : index
    %5 = vector.load %arg3[%c0_4, %c0_5] : memref<512x3xbf16, #tpu.memory_space<vmem>>, vector<512x3xbf16>
    %cst = arith.constant dense<0.000000e+00> : vector<256x3xf32>
    %6 = tpu.matmul %4, %5, %cst {dimension_numbers = #tpu.dot_dimension_numbers<[1], [0], [0], [1], [0, 0, 1, 1], [], []>} : vector<256x512xbf16>, vector<512x3xbf16>, vector<256x3xf32> -> vector<256x3xf32>
    %7 = arith.addf %3, %6 : vector<256x3xf32>
    %c0_6 = arith.constant 0 : index
    %c0_7 = arith.constant 0 : index
    %8 = vector.load %arg4[%c0_6, %c0_7] : memref<256x3xf32, #tpu.memory_space<vmem>>, vector<256x3xf32>
    tpu.vector_store %arg4[%c0_6, %c0_7], %7 {strides = array<i32>} : memref<256x3xf32, #tpu.memory_space<vmem>>, vector<256x3xf32>,
    %c0_i32_8 = arith.constant 0 : i32
    %9 = arith.cmpi eq, %arg1, %c0_i32_8 : i32
    %10 = arith.extui %9 : i1 to i32
    %c0_i32_9 = arith.constant 0 : i32
    %11 = arith.cmpi ne, %10, %c0_i32_9 : i32
    scf.if %11 {
      %c0_10 = arith.constant 0 : index
      %c0_11 = arith.constant 0 : index
      %12 = vector.load %arg4[%c0_10, %c0_11] : memref<256x3xf32, #tpu.memory_space<vmem>>, vector<256x3xf32>
      %cst_12 = arith.constant dense<0.000000e+00> : vector<3xf32>
      %13 = vector.multi_reduction <add>, %12, %cst_12 [0] : vector<256x3xf32> to vector<3xf32>
      %14 = vector.shape_cast %13 : vector<3xf32> to vector<1x3xf32>
      %15 = arith.mulf %12, %12 : vector<256x3xf32>
      %cst_13 = arith.constant dense<0.000000e+00> : vector<3xf32>
      %16 = vector.multi_reduction <add>, %15, %cst_13 [0] : vector<256x3xf32> to vector<3xf32>
      %17 = vector.shape_cast %16 : vector<3xf32> to vector<1x3xf32>
      %18 = tpu.iota {dimensions = array<i32: 0>} : vector<8x3xi32>
      %c0_i32_14 = arith.constant 0 : i32
      %19 = vector.broadcast %c0_i32_14 : i32 to vector<8x3xi32>
      %20 = arith.cmpi eq, %18, %19 : vector<8x3xi32>
      %cst_15 = arith.constant 0.000000e+00 : f32
      %21 = vector.shape_cast %14 : vector<1x3xf32> to vector<1x3xf32>
      %22 = vector.broadcast %21 : vector<1x3xf32> to vector<8x3xf32>
      %23 = vector.broadcast %cst_15 : f32 to vector<8x3xf32>
      %24 = arith.select %20, %22, %23 : vector<8x3xi1>, vector<8x3xf32>
      %c0_16 = arith.constant 0 : index
      %c0_17 = arith.constant 0 : index
      %25 = vector.load %arg5[%c0_16, %c0_17] : memref<8x3xf32, #tpu.memory_space<vmem>>, vector<8x3xf32>
      tpu.vector_store %arg5[%c0_16, %c0_17], %24 {strides = array<i32>} : memref<8x3xf32, #tpu.memory_space<vmem>>, vector<8x3xf32>,
      %c0_i32_18 = arith.constant 0 : i32
      %26 = vector.broadcast %c0_i32_18 : i32 to vector<8x3xi32>
      %27 = arith.cmpi eq, %18, %26 : vector<8x3xi32>
      %cst_19 = arith.constant 0.000000e+00 : f32
      %28 = vector.shape_cast %17 : vector<1x3xf32> to vector<1x3xf32>
      %29 = vector.broadcast %28 : vector<1x3xf32> to vector<8x3xf32>
      %30 = vector.broadcast %cst_19 : f32 to vector<8x3xf32>
      %31 = arith.select %27, %29, %30 : vector<8x3xi1>, vector<8x3xf32>
      %c0_20 = arith.constant 0 : index
      %c0_21 = arith.constant 0 : index
      %32 = vector.load %arg6[%c0_20, %c0_21] : memref<8x3xf32, #tpu.memory_space<vmem>>, vector<8x3xf32>
      tpu.vector_store %arg6[%c0_20, %c0_21], %31 {strides = array<i32>} : memref<8x3xf32, #tpu.memory_space<vmem>>, vector<8x3xf32>,
      %33 = math.tanh %12 : vector<256x3xf32>
      %c0_22 = arith.constant 0 : index
      %c0_23 = arith.constant 0 : index
      %34 = vector.load %arg4[%c0_22, %c0_23] : memref<256x3xf32, #tpu.memory_space<vmem>>, vector<256x3xf32>
      tpu.vector_store %arg4[%c0_22, %c0_23], %33 {strides = array<i32>} : memref<256x3xf32, #tpu.memory_space<vmem>>, vector<256x3xf32>,
    } else {
    }
    return
  }
  func.func @transform_0(%arg0: i32, %arg1: i32) -> (i32, i32) {
    %c0_i32 = arith.constant 0 : i32
    return %arg0, %arg1 : i32, i32
  }
  func.func @transform_1(%arg0: i32, %arg1: i32) -> (i32, i32) {
    %c0_i32 = arith.constant 0 : i32
    %c0_i32_0 = arith.constant 0 : i32
    return %arg1, %c0_i32 : i32, i32
  }
  func.func @transform_2(%arg0: i32, %arg1: i32) -> (i32, i32) {
    %c0_i32 = arith.constant 0 : i32
    %c0_i32_0 = arith.constant 0 : i32
    return %arg0, %c0_i32 : i32, i32
  }
  func.func @transform_3(%arg0: i32, %arg1: i32) -> (i32, i32) {
    %c0_i32 = arith.constant 0 : i32
    %c0_i32_0 = arith.constant 0 : i32
    return %arg0, %c0_i32 : i32, i32
  }
  func.func @transform_4(%arg0: i32, %arg1: i32) -> (i32, i32) {
    %c0_i32 = arith.constant 0 : i32
    %c0_i32_0 = arith.constant 0 : i32
    return %arg0, %c0_i32 : i32, i32
  }
}

</mosaic_0001>

<bundles_post_ra>
// kernel: generator_forward.10
= control target key start
LH: loop header
LB: loop body
LE: loop exit
PB: predicated region body
PF: predicated region fallthrough
CT: control target
= control target key end

     0   :  { %v24_v0 = vlaneseq  ;;  %s172_s1 = inlined_call_operand.vmem [shape: f32[1,256], index: 1, kind: input, shape index: {}]   ;;  %s173_s2 = inlined_call_operand.vmem [shape: f32[1,256], index: 2, kind: input, shape index: {}]   ;;  %s174_s0 = inlined_call_operand.vmem [shape: f32[32,256], index: 0, kind: input, shape index: {}]   ;;  %s175_s3 = inlined_call_operand.vmem [shape: bf16[32,256], index: 3, kind: output, shape index: {}]  }
   0x1   :  { %v22_v2 = vld [vmem:[%s172_s1] sm:$0x3]  ;;  %v15_v5 = vld [vmem:[%s174_s0 + $0x8] sm:$0xff]  ;;  %v16_v8 = vld [vmem:[%s174_s0 + $0x10] sm:$0xff] }
   0x2   :  { %v25_v1 = vshrl.u32 %v24_v0, 7  ;;  %v42_v3 = vld [vmem:[%s173_s2] sm:$0x3]  ;;  %v17_v9 = vld [vmem:[%s174_s0 + $0x18] sm:$0xff]  ;;  %v19_v15 = vld [vmem:[%s174_s0 + $0x28] sm:$0xff] }
   0x3   :  { %v14_v4 = vld [vmem:[%s174_s0] sm:$0xff]  ;;  %v20_v16 = vld [vmem:[%s174_s0 + $0x30] sm:$0xff]  ;;  %v21_v17 = vld [vmem:[%s174_s0 + $0x38] sm:$0xff] }
   0x4   :  { %v26_v6 = vsub.s32 0, %v25_v1  ;;  %v30_v7 = vsub.s32 1, %v25_v1  ;;  %v18_v10 = vld [vmem:[%s174_s0 + $0x20] sm:$0xff] }
   0x6   :  { %v27_v11 = vrot.slane %v22_v2, %v26_v6  ;;  %v31_v12 = vrot.slane %v22_v2, %v30_v7  ;;  %v47_v13 = vrot.slane %v42_v3, %v26_v6  ;;  %v51_v14 = vrot.slane %v42_v3, %v30_v7 }
   0x8   :  { %v34_v18 = vmul.f32 %v27_v11, %v14_v4  ;;  %v35_v19 = vmul.f32 %v31_v12, %v15_v5  ;;  %v36_v20 = vmul.f32 %v27_v11, %v16_v8  ;;  %v37_v21 = vmul.f32 %v31_v12, %v17_v9 }
   0x9   :  { %v38_v22 = vmul.f32 %v27_v11, %v18_v10  ;;  %v39_v23 = vmul.f32 %v31_v12, %v19_v15  ;;  %v40_v24 = vmul.f32 %v27_v11, %v20_v16  ;;  %v41_v25 = vmul.f32 %v31_v12, %v21_v17 }
   0xa   :  { %v54_v26 = vadd.f32 %v47_v13, %v34_v18  ;;  %v55_v27 = vadd.f32 %v51_v14, %v35_v19  ;;  %v56_v28 = vadd.f32 %v47_v13, %v36_v20  ;;  %v57_v29 = vadd.f32 %v51_v14, %v37_v21 }
   0xb   :  { %v58_v30 = vadd.f32 %v47_v13, %v38_v22  ;;  %v59_v31 = vadd.f32 %v51_v14, %v39_v23  ;;  %v60_v32 = vadd.f32 %v47_v13, %v40_v24  ;;  %v61_v33 = vadd.f32 %v51_v14, %v41_v25 }
   0xc   :  { %v62_v34 = vmax.f32 %v54_v26, 0.0  ;;  %v63_v35 = vmax.f32 %v55_v27, 0.0  ;;  %v64_v36 = vmax.f32 %v56_v28, 0.0  ;;  %v65_v37 = vmax.f32 %v57_v29, 0.0 }
   0xd   :  { %v66_v38 = vmax.f32 %v58_v30, 0.0  ;;  %v67_v39 = vmax.f32 %v59_v31, 0.0  ;;  %v68_v40 = vmax.f32 %v60_v32, 0.0  ;;  %v69_v41 = vmax.f32 %v61_v33, 0.0 }
   0xe   :  { %v106_v42 = vpack.c.bf16 %v63_v35, %v62_v34  ;;  %v107_v43 = vpack.c.bf16 %v65_v37, %v64_v36 }
   0xf   :  { %v108_v44 = vpack.c.bf16 %v67_v39, %v66_v38  ;;  %v109_v45 = vpack.c.bf16 %v69_v41, %v68_v40 }
  0x10   :  { %94 = vst [vmem:[%s175_s3] sm:$0xff] %v106_v42  ;;  %95 = vst [vmem:[%s175_s3 + $0x8] sm:$0xff] %v107_v43 }
  0x11   :  { %96 = vst [vmem:[%s175_s3 + $0x10] sm:$0xff] %v108_v44  ;;  %97 = vst [vmem:[%s175_s3 + $0x18] sm:$0xff] %v109_v45 }

// kernel: generator_forward.9
= control target key start
LH: loop header
LB: loop body
LE: loop exit
PB: predicated region body
PF: predicated region fallthrough
CT: control target
= control target key end

     0   :  { %10 = vsyncpa [#allocation3], 0  ;;  %s562_s15 = smov [#allocation2]   ;;  %s650_s0 = inlined_call_operand.vmem [shape: bf16[32,256], index: 0, kind: input, shape index: {}]   ;;  %s651_s1 = inlined_call_operand.hbm [shape: bf16[256,256], index: 1, kind: input, shape index: {}]   ;;  %s652_s2 = inlined_call_operand.vmem [shape: f32[32,256], index: 2, kind: output, shape index: {0}]   ;;  %s653_s3 = inlined_call_operand.vmem [shape: f32[8,256], index: 3, kind: output, shape index: {1}]   ;;  %s654_s4 = inlined_call_operand.vmem [shape: f32[8,256], index: 4, kind: output, shape index: {2}]  }
   0x1   :  { %s18_s16 = sshll.u32 %s562_s15, 4  ;;  %s538_s19 = scalar_lea.hbm %s651_s1, 4096  ;;  %s19_s16 = int_to_ptr.vmem [resolvable:$true] %s18_s16 }
   0x2   :  { %p539_p0 = scmp.ne.s32.totalorder %s651_s1, %s538_s19  ;;  %p542_p1 = scmp.lt.u32.totalorder %s538_s19, %s651_s1 }
   0x4   :  { %p544_p2 = pnand %p542_p1, %p539_p0 }
   0x6   :  { %547 = shalt.err (!%p544_p2)
}
   0x7   :  { %s548_s24 = scalar_lea.vmem %s19_s16, 4096  ;;  %p553_p4 = scmp.lt.s32.totalorder %s19_s16, %s19_s16 }
   0x8   :  { %p549_p3 = scmp.ne.s32.totalorder %s19_s16, %s548_s24  ;;  %p554_p5 = scmp.lt.s32.totalorder %s548_s24, %s548_s24 }
   0xa   :  { %p555_p6 = por %p554_p5, %p553_p4 }
   0xc   :  { %p556_p7 = pnand %p555_p6, %p549_p3 }
   0xe   :  { %559 = shalt.err (!%p556_p7)
}
   0xf   :  { %s563_s25 = smov 128   ;;  %s564_s26 = smov 8  }
  0x10   :  { %24 = dma.hbm_to_vmem [thread:$0]  %s651_s1, 4096, %s19_s16, [#allocation3], %s563_s25, %s563_s25, %s564_s26  }
  0x11   :  { %560 = dma.done.wait [#allocation3], 4096  }
  0x12   :  { %561 = vsyncadd [#allocation3], 4294963200  ;;  %v484_v0 = vld [vmem:[#allocation2 + $0x4] ss:$8 sps:$4 sm:$0xff]   ;;  %v486_v1 = vld [vmem:[#allocation2] ss:$8 sps:$4 sm:$0xff]  }
  0x13   :  { %264 = vmatprep.subr.bf16.mxu0 %v484_v0  ;;  %448 = vmatprep.subr.bf16.mxu1 %v484_v0  ;;  %v487_v2 = vld [vmem:[#allocation2 + $0x14] ss:$8 sps:$4 sm:$0xff]   ;;  %v489_v3 = vld [vmem:[#allocation2 + $0x10] ss:$8 sps:$4 sm:$0xff]   ;;  %v490_v4 = vld [vmem:[#allocation2 + $0x24] ss:$8 sps:$4 sm:$0xff]   ;;  %v388_v0 = vlaneseq }
  0x14   :  { %265 = vmatpush1.bf16.msra.mxu0 %v486_v1  ;;  %464 = vmatpush1.bf16.msra.mxu1 %v486_v1  ;;  %v492_v5 = vld [vmem:[#allocation2 + $0x20] ss:$8 sps:$4 sm:$0xff]   ;;  %v493_v6 = vld [vmem:[#allocation2 + $0x34] ss:$8 sps:$4 sm:$0xff]   ;;  %v495_v7 = vld [vmem:[#allocation2 + $0x30] ss:$8 sps:$4 sm:$0xff]  }
  0x15   :  { %266 = vmatprep.subr.bf16.mxu0 %v487_v2  ;;  %449 = vmatprep.subr.bf16.mxu1 %v487_v2  ;;  %v496_v8 = vld [vmem:[#allocation2 + $0x44] ss:$8 sps:$4 sm:$0xff]   ;;  %v498_v9 = vld [vmem:[#allocation2 + $0x40] ss:$8 sps:$4 sm:$0xff]   ;;  %v499_v10 = vld [vmem:[#allocation2 + $0x54] ss:$8 sps:$4 sm:$0xff]  }
  0x16   :  { %v501_v11 = vld [vmem:[#allocation2 + $0x50] ss:$8 sps:$4 sm:$0xff]   ;;  %v502_v12 = vld [vmem:[#allocation2 + $0x64] ss:$8 sps:$4 sm:$0xff]   ;;  %v504_v14 = vld [vmem:[#allocation2 + $0x60] ss:$8 sps:$4 sm:$0xff]  }
  0x17   :  { %v534_v13 = vld [vmem:[%s650_s0 + $0x4] ss:$8 sps:$4 sm:$0xff]   ;;  %v537_v15 = vld [vmem:[%s650_s0 + $0x14] ss:$8 sps:$4 sm:$0xff]   ;;  %v507_v17 = vld [vmem:[#allocation2 + $0x70] ss:$8 sps:$4 sm:$0xff]  }
  0x18   :  { %267 = vmatpush1.bf16.msra.mxu0 %v489_v3  ;;  %465 = vmatpush1.bf16.msra.mxu1 %v489_v3  ;;  %v505_v16 = vld [vmem:[#allocation2 + $0x74] ss:$8 sps:$4 sm:$0xff]   ;;  %v508_v18 = vld [vmem:[#allocation2 + $0x84] ss:$8 sps:$4 sm:$0xff]   ;;  %v510_v19 = vld [vmem:[#allocation2 + $0x80] ss:$8 sps:$4 sm:$0xff]  }
  0x19   :  { %268 = vmatprep.subr.bf16.mxu0 %v490_v4  ;;  %450 = vmatprep.subr.bf16.mxu1 %v490_v4  ;;  %v511_v20 = vld [vmem:[#allocation2 + $0x94] ss:$8 sps:$4 sm:$0xff]   ;;  %v513_v21 = vld [vmem:[#allocation2 + $0x90] ss:$8 sps:$4 sm:$0xff]   ;;  %v514_v22 = vld [vmem:[#allocation2 + $0xa4] ss:$8 sps:$4 sm:$0xff]  }
  0x1a   :  { %296 = vmatprep.mubr.bf16.mxu0 %v534_v13  ;;  %306 = vmatprep.mubr.bf16.mxu1 %v537_v15  ;;  %v516_v23 = vld [vmem:[#allocation2 + $0xa0] ss:$8 sps:$4 sm:$0xff]   ;;  %v517_v24 = vld [vmem:[#allocation2 + $0xb4] ss:$8 sps:$4 sm:$0xff]   ;;  %v519_v25 = vld [vmem:[#allocation2 + $0xb0] ss:$8 sps:$4 sm:$0xff]  }
  0x1b   :  { %v520_v26 = vld [vmem:[#allocation2 + $0xc4] ss:$8 sps:$4 sm:$0xff]   ;;  %v522_v27 = vld [vmem:[#allocation2 + $0xc0] ss:$8 sps:$4 sm:$0xff]   ;;  %v523_v28 = vld [vmem:[#allocation2 + $0xd4] ss:$8 sps:$4 sm:$0xff]  }
  0x1c   :  { %269 = vmatpush1.bf16.msra.mxu0 %v492_v5  ;;  %466 = vmatpush1.bf16.msra.mxu1 %v492_v5  ;;  %v525_v29 = vld [vmem:[#allocation2 + $0xd0] ss:$8 sps:$4 sm:$0xff]   ;;  %v526_v30 = vld [vmem:[#allocation2 + $0xe4] ss:$8 sps:$4 sm:$0xff]   ;;  %v528_v31 = vld [vmem:[#allocation2 + $0xe0] ss:$8 sps:$4 sm:$0xff]  }
  0x1d   :  { %270 = vmatprep.subr.bf16.mxu0 %v493_v6  ;;  %451 = vmatprep.subr.bf16.mxu1 %v493_v6  ;;  %v529_v32 = vld [vmem:[#allocation2 + $0xf4] ss:$8 sps:$4 sm:$0xff]   ;;  %v531_v33 = vld [vmem:[#allocation2 + $0xf0] ss:$8 sps:$4 sm:$0xff]   ;;  %v532_v34 = vld [vmem:[%s650_s0] ss:$8 sps:$4 sm:$0xff]  }
  0x1e   :  { %v535_v35 = vld [vmem:[%s650_s0 + $0x10] ss:$8 sps:$4 sm:$0xff]  }
  0x20   :  { %271 = vmatpush1.bf16.msra.mxu0 %v495_v7  ;;  %467 = vmatpush1.bf16.msra.mxu1 %v495_v7 }
  0x21   :  { %272 = vmatprep.subr.bf16.mxu0 %v496_v8  ;;  %452 = vmatprep.subr.bf16.mxu1 %v496_v8 }
  0x24   :  { %273 = vmatpush1.bf16.msra.mxu0 %v498_v9  ;;  %468 = vmatpush1.bf16.msra.mxu1 %v498_v9  ;;  %v389_v9 = vshrl.u32 %v388_v0, 7 }
  0x25   :  { %274 = vmatprep.subr.bf16.mxu0 %v499_v10  ;;  %453 = vmatprep.subr.bf16.mxu1 %v499_v10 }
  0x26   :  { %vm390_vm0 = vcmp.eq.s32.totalorder %v389_v9, 0 }
  0x28   :  { %275 = vmatpush1.bf16.msra.mxu0 %v501_v11  ;;  %469 = vmatpush1.bf16.msra.mxu1 %v501_v11 }
  0x29   :  { %276 = vmatprep.subr.bf16.mxu0 %v502_v12  ;;  %454 = vmatprep.subr.bf16.mxu1 %v502_v12 }
  0x2c   :  { %277 = vmatpush1.bf16.msra.mxu0 %v504_v14  ;;  %470 = vmatpush1.bf16.msra.mxu1 %v504_v14 }
  0x2d   :  { %278 = vmatprep.subr.bf16.mxu0 %v505_v16  ;;  %455 = vmatprep.subr.bf16.mxu1 %v505_v16 }
  0x30   :  { %279 = vmatpush1.bf16.msra.mxu0 %v507_v17  ;;  %471 = vmatpush1.bf16.msra.mxu1 %v507_v17 }
  0x31   :  { %280 = vmatprep.subr.bf16.mxu0 %v508_v18  ;;  %456 = vmatprep.subr.bf16.mxu1 %v508_v18 }
  0x34   :  { %281 = vmatpush1.bf16.msra.mxu0 %v510_v19  ;;  %472 = vmatpush1.bf16.msra.mxu1 %v510_v19 }
  0x35   :  { %282 = vmatprep.subr.bf16.mxu0 %v511_v20  ;;  %457 = vmatprep.subr.bf16.mxu1 %v511_v20 }
  0x38   :  { %283 = vmatpush1.bf16.msra.mxu0 %v513_v21  ;;  %473 = vmatpush1.bf16.msra.mxu1 %v513_v21 }
  0x39   :  { %284 = vmatprep.subr.bf16.mxu0 %v514_v22  ;;  %458 = vmatprep.subr.bf16.mxu1 %v514_v22 }
  0x3c   :  { %285 = vmatpush1.bf16.msra.mxu0 %v516_v23  ;;  %474 = vmatpush1.bf16.msra.mxu1 %v516_v23 }
  0x3d   :  { %286 = vmatprep.subr.bf16.mxu0 %v517_v24  ;;  %459 = vmatprep.subr.bf16.mxu1 %v517_v24 }
  0x40   :  { %287 = vmatpush1.bf16.msra.mxu0 %v519_v25  ;;  %475 = vmatpush1.bf16.msra.mxu1 %v519_v25 }
  0x41   :  { %288 = vmatprep.subr.bf16.mxu0 %v520_v26  ;;  %460 = vmatprep.subr.bf16.mxu1 %v520_v26 }
  0x44   :  { %289 = vmatpush1.bf16.msra.mxu0 %v522_v27  ;;  %476 = vmatpush1.bf16.msra.mxu1 %v522_v27 }
  0x45   :  { %290 = vmatprep.subr.bf16.mxu0 %v523_v28  ;;  %461 = vmatprep.subr.bf16.mxu1 %v523_v28 }
  0x48   :  { %291 = vmatpush1.bf16.msra.mxu0 %v525_v29  ;;  %477 = vmatpush1.bf16.msra.mxu1 %v525_v29 }
  0x49   :  { %292 = vmatprep.subr.bf16.mxu0 %v526_v30  ;;  %462 = vmatprep.subr.bf16.mxu1 %v526_v30 }
  0x4c   :  { %293 = vmatpush1.bf16.msra.mxu0 %v528_v31  ;;  %478 = vmatpush1.bf16.msra.mxu1 %v528_v31 }
  0x4d   :  { %294 = vmatprep.subr.bf16.mxu0 %v529_v32  ;;  %463 = vmatprep.subr.bf16.mxu1 %v529_v32 }
  0x50   :  { %295 = vmatpush1.bf16.msra.mxu0 %v531_v33  ;;  %479 = vmatpush1.bf16.msra.mxu1 %v531_v33 }
  0x53   :  { %297 = vmatmul.mubr.bf16.vlgmr.msra.gmra.mrb[0].mxu0 %v532_v34  ;;  %307 = vmatmul.mubr.bf16.vlgmr.msra.gmra.mrb[0].mxu1 %v535_v35 }
 0x126   :  { %v298_v36 = vpop.f32.mrb[0].mxu0  ;;  %v308_v37 = vpop.f32.mrb[0].mxu1 }
 0x127   :  { %v300_v38 = vpop.f32.mrb[1].mxu0  ;;  %v310_v39 = vpop.f32.mrb[1].mxu1  ;;  %325 = vst [vmem:[%s652_s2] sm:$0xff] %v298_v36  ;;  %329 = vst [vmem:[%s652_s2 + $0x20] sm:$0xff] %v308_v37  ;;  %v362_v44 = vmul.f32 %v298_v36, %v298_v36  ;;  %v366_v45 = vmul.f32 %v308_v37, %v308_v37 }
 0x128   :  { %v302_v40 = vpop.f32.mrb[2].mxu0  ;;  %v312_v41 = vpop.f32.mrb[2].mxu1  ;;  %326 = vst [vmem:[%s652_s2 + $0x8] sm:$0xff] %v300_v38  ;;  %330 = vst [vmem:[%s652_s2 + $0x28] sm:$0xff] %v310_v39  ;;  %v363_v48 = vmul.f32 %v300_v38, %v300_v38  ;;  %v367_v49 = vmul.f32 %v310_v39, %v310_v39 }
 0x129   :  { %v304_v42 = vpop.f32.mrb[3].mxu0  ;;  %v314_v43 = vpop.f32.mrb[3].mxu1  ;;  %327 = vst [vmem:[%s652_s2 + $0x10] sm:$0xff] %v302_v40  ;;  %v344_v46 = vadd.f32 %v302_v40, %v298_v36  ;;  %v364_v47 = vmul.f32 %v302_v40, %v302_v40  ;;  %331 = vst [vmem:[%s652_s2 + $0x30] sm:$0xff] %v312_v41  ;;  %v368_v57 = vmul.f32 %v312_v41, %v312_v41 }
 0x12a   :  { %328 = vst [vmem:[%s652_s2 + $0x18] sm:$0xff] %v304_v42  ;;  %v353_v50 = vadd.f32 %v304_v42, %v300_v38  ;;  %v365_v51 = vmul.f32 %v304_v42, %v304_v42  ;;  %332 = vst [vmem:[%s652_s2 + $0x38] sm:$0xff] %v314_v43  ;;  %v369_v60 = vmul.f32 %v314_v43, %v314_v43 }
 0x12b   :  { %v370_v52 = vadd.f32 %v364_v47, %v362_v44  ;;  %v345_v53 = vadd.f32 %v344_v46, %v308_v37 }
 0x12c   :  { %v379_v54 = vadd.f32 %v365_v51, %v363_v48  ;;  %v354_v55 = vadd.f32 %v353_v50, %v310_v39 }
 0x12d   :  { %v346_v56 = vadd.f32 %v345_v53, %v312_v41  ;;  %v371_v58 = vadd.f32 %v370_v52, %v366_v45 }
 0x12e   :  { %v355_v59 = vadd.f32 %v354_v55, %v314_v43  ;;  %v380_v61 = vadd.f32 %v379_v54, %v367_v49 }
 0x12f   :  { %v347_v62 = vrot.slane %v346_v56, 4  ;;  %v372_v63 = vadd.f32 %v371_v58, %v368_v57 }
 0x130   :  { %v356_v1 = vrot.slane %v355_v59, 4  ;;  %v381_v2 = vadd.f32 %v380_v61, %v369_v60 }
 0x131   :  { %v348_v3 = vadd.f32 %v347_v62, %v346_v56  ;;  %v373_v4 = vrot.slane %v372_v63, 4 }
 0x132   :  { %v357_v5 = vadd.f32 %v356_v1, %v355_v59  ;;  %v382_v6 = vrot.slane %v381_v2, 4 }
 0x133   :  { %v349_v7 = vrot.slane %v348_v3, 2  ;;  %v374_v8 = vadd.f32 %v373_v4, %v372_v63 }
 0x134   :  { %v358_v10 = vrot.slane %v357_v5, 2  ;;  %v383_v11 = vadd.f32 %v382_v6, %v381_v2 }
 0x135   :  { %v350_v12 = vadd.f32 %v349_v7, %v348_v3  ;;  %v375_v13 = vrot.slane %v374_v8, 2 }
 0x136   :  { %v359_v14 = vadd.f32 %v358_v10, %v357_v5  ;;  %v384_v15 = vrot.slane %v383_v11, 2 }
 0x137   :  { %v351_v16 = vrot.slane %v350_v12, 1  ;;  %v376_v17 = vadd.f32 %v375_v13, %v374_v8 }
 0x138   :  { %v360_v18 = vrot.slane %v359_v14, 1  ;;  %v385_v19 = vadd.f32 %v384_v15, %v383_v11 }
 0x139   :  { %v352_v20 = vadd.f32 %v351_v16, %v350_v12  ;;  %v377_v21 = vrot.slane %v376_v17, 1 }
 0x13a   :  { %v361_v22 = vadd.f32 %v360_v18, %v359_v14  ;;  %v386_v23 = vrot.slane %v385_v19, 1 }
 0x13b   :  { %v378_v24 = vadd.f32 %v377_v21, %v376_v17  ;;  %v391_v25 = vsel %vm390_vm0, %v352_v20, 0.0 }
 0x13c   :  { %393 = vst [vmem:[%s653_s3] sm:$0xff] %v391_v25  ;;  %v387_v26 = vadd.f32 %v386_v23, %v385_v19  ;;  %v392_v27 = vsel %vm390_vm0, %v361_v22, 0.0 }
 0x13d   :  { %v395_v28 = vsel %vm390_vm0, %v378_v24, 0.0  ;;  %394 = vst [vmem:[%s653_s3 + $0x8] sm:$0xff] %v392_v27 }
 0x13e   :  { %397 = vst [vmem:[%s654_s4] sm:$0xff] %v395_v28  ;;  %v396_v29 = vsel %vm390_vm0, %v387_v26, 0.0 }
 0x13f   :  { %398 = vst [vmem:[%s654_s4 + $0x8] sm:$0xff] %v396_v29 }
 0x140   :  { %411 = vsyncpa [#allocation3], 1 }

// kernel: generator_forward.12
= control target key start
LH: loop header
LB: loop body
LE: loop exit
PB: predicated region body
PF: predicated region fallthrough
CT: control target
= control target key end

     0   :  { %s391_s0 = inlined_call_operand.vmem [shape: f32[128,128], index: 0, kind: input, shape index: {}]   ;;  %s392_s1 = inlined_call_operand.vmem [shape: f32[1,128], index: 1, kind: input, shape index: {}]   ;;  %s393_s2 = inlined_call_operand.vmem [shape: f32[1,128], index: 2, kind: input, shape index: {}]   ;;  %s394_s3 = inlined_call_operand.vmem [shape: bf16[128,128], index: 3, kind: output, shape index: {}]  }
   0x1   :  { %v14_v0 = vld [vmem:[%s391_s0] sm:$0xff]  ;;  %v15_v1 = vld [vmem:[%s391_s0 + $0x8] sm:$0xff]  ;;  %v16_v6 = vld [vmem:[%s391_s0 + $0x10] sm:$0xff] }
   0x2   :  { %v286_v2 = vld [vmem:[%s392_s1] ss:$0 sm:$0xff]  ;;  %v17_v7 = vld [vmem:[%s391_s0 + $0x18] sm:$0xff]  ;;  %v19_v11 = vld [vmem:[%s391_s0 + $0x28] sm:$0xff] }
   0x3   :  { %v37_v3 = vmul.f32 %v286_v2, %v14_v0  ;;  %v38_v4 = vmul.f32 %v286_v2, %v15_v1  ;;  %v293_v5 = vld [vmem:[%s393_s2] ss:$0 sm:$0xff]  ;;  %v39_v8 = vmul.f32 %v286_v2, %v16_v6  ;;  %v40_v9 = vmul.f32 %v286_v2, %v17_v7  ;;  %v20_v12 = vld [vmem:[%s391_s0 + $0x30] sm:$0xff]  ;;  %v21_v17 = vld [vmem:[%s391_s0 + $0x38] sm:$0xff] }
   0x4   :  { %v18_v10 = vld [vmem:[%s391_s0 + $0x20] sm:$0xff]  ;;  %v42_v16 = vmul.f32 %v286_v2, %v19_v11  ;;  %v43_v20 = vmul.f32 %v286_v2, %v20_v12  ;;  %v44_v21 = vmul.f32 %v286_v2, %v21_v17  ;;  %v23_v27 = vld [vmem:[%s391_s0 + $0x48] sm:$0xff]  ;;  %v24_v32 = vld [vmem:[%s391_s0 + $0x50] sm:$0xff] }
   0x5   :  { %v60_v13 = vadd.f32 %v293_v5, %v37_v3  ;;  %v61_v14 = vadd.f32 %v293_v5, %v38_v4  ;;  %v41_v15 = vmul.f32 %v286_v2, %v18_v10  ;;  %v62_v18 = vadd.f32 %v293_v5, %v39_v8  ;;  %v22_v22 = vld [vmem:[%s391_s0 + $0x40] sm:$0xff]  ;;  %v25_v33 = vld [vmem:[%s391_s0 + $0x58] sm:$0xff]  ;;  %v27_v39 = vld [vmem:[%s391_s0 + $0x68] sm:$0xff] }
   0x6   :  { %v63_v19 = vadd.f32 %v293_v5, %v40_v9  ;;  %v65_v26 = vadd.f32 %v293_v5, %v42_v16  ;;  %v66_v30 = vadd.f32 %v293_v5, %v43_v20  ;;  %v67_v31 = vadd.f32 %v293_v5, %v44_v21  ;;  %v26_v38 = vld [vmem:[%s391_s0 + $0x60] sm:$0xff]  ;;  %v28_v44 = vld [vmem:[%s391_s0 + $0x70] sm:$0xff]  ;;  %v29_v49 = vld [vmem:[%s391_s0 + $0x78] sm:$0xff] }
   0x7   :  { %v76_v23 = vmax.f32 %v60_v13, 0.0  ;;  %v77_v24 = vmax.f32 %v61_v14, 0.0  ;;  %v64_v25 = vadd.f32 %v293_v5, %v41_v15  ;;  %v78_v28 = vmax.f32 %v62_v18, 0.0 }
   0x8   :  { %v79_v29 = vmax.f32 %v63_v19, 0.0  ;;  %v81_v36 = vmax.f32 %v65_v26, 0.0  ;;  %v45_v37 = vmul.f32 %v286_v2, %v22_v22  ;;  %v82_v41 = vmax.f32 %v66_v30, 0.0 }
   0x9   :  { %v213_v34 = vpack.c.bf16 %v77_v24, %v76_v23  ;;  %v80_v35 = vmax.f32 %v64_v25, 0.0  ;;  %v83_v42 = vmax.f32 %v67_v31, 0.0  ;;  %v46_v43 = vmul.f32 %v286_v2, %v23_v27 }
   0xa   :  { %v218_v40 = vpack.c.bf16 %v79_v29, %v78_v28  ;;  %v68_v46 = vadd.f32 %v293_v5, %v45_v37  ;;  %v47_v47 = vmul.f32 %v286_v2, %v24_v32  ;;  %v48_v48 = vmul.f32 %v286_v2, %v25_v33 }
   0xb   :  { %214 = vst [vmem:[%s394_s3] sm:$0xff] %v213_v34   ;;  %v223_v45 = vpack.c.bf16 %v81_v36, %v80_v35  ;;  %v228_v50 = vpack.c.bf16 %v83_v42, %v82_v41  ;;  %v69_v51 = vadd.f32 %v293_v5, %v46_v43  ;;  %v49_v52 = vmul.f32 %v286_v2, %v26_v38 }
   0xc   :  { %250 = vst [vmem:[%s394_s3 + $0x8] sm:$0xff] %v218_v40   ;;  %v50_v53 = vmul.f32 %v286_v2, %v27_v39  ;;  %v84_v54 = vmax.f32 %v68_v46, 0.0  ;;  %v70_v55 = vadd.f32 %v293_v5, %v47_v47  ;;  %v71_v56 = vadd.f32 %v293_v5, %v48_v48 }
   0xd   :  { %251 = vst [vmem:[%s394_s3 + $0x10] sm:$0xff] %v223_v45   ;;  %v51_v57 = vmul.f32 %v286_v2, %v28_v44  ;;  %252 = vst [vmem:[%s394_s3 + $0x18] sm:$0xff] %v228_v50   ;;  %v85_v58 = vmax.f32 %v69_v51, 0.0  ;;  %v72_v59 = vadd.f32 %v293_v5, %v49_v52  ;;  %v52_v61 = vmul.f32 %v286_v2, %v29_v49 }
   0xe   :  { %v73_v60 = vadd.f32 %v293_v5, %v50_v53  ;;  %v86_v62 = vmax.f32 %v70_v55, 0.0  ;;  %v87_v63 = vmax.f32 %v71_v56, 0.0 }
   0xf   :  { %v74_v0 = vadd.f32 %v293_v5, %v51_v57  ;;  %v233_v1 = vpack.c.bf16 %v85_v58, %v84_v54  ;;  %v88_v3 = vmax.f32 %v72_v59, 0.0  ;;  %v75_v6 = vadd.f32 %v293_v5, %v52_v61 }
  0x10   :  { %v89_v4 = vmax.f32 %v73_v60, 0.0  ;;  %v238_v7 = vpack.c.bf16 %v87_v63, %v86_v62 }
  0x11   :  { %v90_v8 = vmax.f32 %v74_v0, 0.0  ;;  %253 = vst [vmem:[%s394_s3 + $0x20] sm:$0xff] %v233_v1   ;;  %v91_v10 = vmax.f32 %v75_v6, 0.0 }
  0x12   :  { %v243_v9 = vpack.c.bf16 %v89_v4, %v88_v3  ;;  %254 = vst [vmem:[%s394_s3 + $0x28] sm:$0xff] %v238_v7  }
  0x13   :  { %v248_v2 = vpack.c.bf16 %v91_v10, %v90_v8 }
  0x14   :  { %255 = vst [vmem:[%s394_s3 + $0x30] sm:$0xff] %v243_v9  }
  0x15   :  { %256 = vst [vmem:[%s394_s3 + $0x38] sm:$0xff] %v248_v2  }

// kernel: generator_forward.11
= control target key start
LH: loop header
LB: loop body
LE: loop exit
PB: predicated region body
PF: predicated region fallthrough
CT: control target
= control target key end

     0   :  { %10 = vsyncpa [#allocation4], 0  ;;  %s3274_s0 = inlined_call_operand.vmem [shape: bf16[128,4096], index: 0, kind: input, shape index: {}]   ;;  %s3275_s1 = inlined_call_operand.hbm [shape: bf16[4096,128], index: 1, kind: input, shape index: {}]   ;;  %s3276_s2 = inlined_call_operand.vmem [shape: f32[128,128], index: 2, kind: output, shape index: {0}]   ;;  %s3277_s3 = inlined_call_operand.vmem [shape: f32[8,128], index: 3, kind: output, shape index: {1}]   ;;  %s3278_s4 = inlined_call_operand.vmem [shape: f32[8,128], index: 4, kind: output, shape index: {2}]  }
   0x1   :  { %12 = vsyncpa [#allocation4 + $0x1], 0  ;;  %s2646_s15 = smov 0   ;;  %s2648_s16 = smov 0  }
   0x2   :  { %s2650_s17 = smov 0   ;;  %s2652_s18 = smov 0  }
   0x3   :  { %s2654_s19 = smov 0   ;;  %s2656_s20 = smov 0  }
   0x4 LB: > { %s2014_s21 = sadd.s32 4294967295, %s2615_s20   ;;  %s27_s22 = sadd.s32 1, %s2611_s19  ;;  %s2615_s20 = sphi %s2656_s20, %s18_s20   ;;  %s2611_s19 = sphi %s2654_s19, %s3285_s19   ;;  %s2607_s18 = sphi %s2652_s18, %s3284_s18   ;;  %s2603_s17 = sphi %s2650_s17, %s3283_s17   ;;  %s2599_s16 = sphi %s2648_s16, %s3282_s16   ;;  %s2595_s15 = sphi %s2646_s15, %s3281_s15  }
   0x5   : > { %p28_p0 = scmp.ge.s32.totalorder %s27_s22, 4  ;;  %s39_s23 = sadd.s32 1, %s2603_s17 }
   0x6   : > { %p46_p1 = scmp.ne.s32.totalorder %s2603_s17, %s2599_s16  ;;  %p47_p2 = scmp.eq.s32.totalorder %s2615_s20, 0 }
   0x7   : > { %s3287_s22 = smov (%p28_p0, %s27_s22), 0  ;;  %p78_p4 = scmp.ne.s32.totalorder %s2599_s16, %s2595_s15 }
   0x8   : > { %p2682_p3 = por %p47_p2, %p46_p1  ;;  %s35_s25 = ssub.s32 %s2611_s19, %s3287_s22 }
   0x9   : > { %p79_p5 = scmp.eq.s32.totalorder %s2014_s21, 0  ;;  %p37_p6 = scmp.eq.s32.totalorder %s35_s25, 0 }
   0xa   : > { %p2016_p8 = scmp.ge.s32.totalorder %s2615_s20, 4 }
   0xb   : > { %p2689_p7 = por %p79_p5, %p78_p4 }
   0xc   : > { %s2694_s27 = scalar_select %p37_p6, %s2603_s17, %s39_s23  }
   0xd   : > { %176 = sbr.rel (%p2016_p8) target bundleno = 82 (0x52), region = 16 }
  0x14   : > { %179 = sbr.rel (!%p2682_p3) target bundleno = 56 (0x38), region = 20  ;;  %s181_s28 = sand.u32 (%p2682_p3), 1, %s2603_s17  }
  0x15   : > { %s2162_s29 = sshll.u32 (%p2682_p3), %s2611_s19, 5  ;;  %s2017_s30 = sshll.u32 (%p2682_p3), %s181_s28, 9 }
  0x16   : > { %s2704_s7 = scalar_lea.vmem (%p2682_p3), %s3274_s0, %s2162_s29  ;;  %s2709_s8 = scalar_lea.vmem (%p2682_p3), [#allocation2], %s2017_s30 }
  0x17   : > { %v202_v0 = vld [vmem:[%s2704_s7] sm:$0xff] (%p2682_p3)  ;;  %v204_v1 = vld [vmem:[%s2704_s7 + $0x8] sm:$0xff] (%p2682_p3)  ;;  %v206_v2 = vld [vmem:[%s2704_s7 + $0x10] sm:$0xff] (%p2682_p3) }
  0x18   : > { %203 = vst [vmem:[%s2709_s8] sm:$0xff] (%p2682_p3), %v202_v0  ;;  %205 = vst [vmem:[%s2709_s8 + $0x8] sm:$0xff] (%p2682_p3), %v204_v1  ;;  %v208_v3 = vld [vmem:[%s2704_s7 + $0x18] sm:$0xff] (%p2682_p3)  ;;  %v210_v4 = vld [vmem:[%s2704_s7 + $0x80] sm:$0xff] (%p2682_p3) }
  0x19   : > { %207 = vst [vmem:[%s2709_s8 + $0x10] sm:$0xff] (%p2682_p3), %v206_v2  ;;  %v212_v5 = vld [vmem:[%s2704_s7 + $0x88] sm:$0xff] (%p2682_p3)  ;;  %209 = vst [vmem:[%s2709_s8 + $0x18] sm:$0xff] (%p2682_p3), %v208_v3  ;;  %v214_v6 = vld [vmem:[%s2704_s7 + $0x90] sm:$0xff] (%p2682_p3) }
  0x1a   : > { %211 = vst [vmem:[%s2709_s8 + $0x20] sm:$0xff] (%p2682_p3), %v210_v4  ;;  %213 = vst [vmem:[%s2709_s8 + $0x28] sm:$0xff] (%p2682_p3), %v212_v5  ;;  %v216_v7 = vld [vmem:[%s2704_s7 + $0x98] sm:$0xff] (%p2682_p3)  ;;  %v218_v8 = vld [vmem:[%s2704_s7 + $0x100] sm:$0xff] (%p2682_p3) }
  0x1b   : > { %215 = vst [vmem:[%s2709_s8 + $0x30] sm:$0xff] %v214_v6  ;;  %217 = vst [vmem:[%s2709_s8 + $0x38] sm:$0xff] %v216_v7  ;;  %v220_v9 = vld [vmem:[%s2704_s7 + $0x108] sm:$0xff]  ;;  %v222_v10 = vld [vmem:[%s2704_s7 + $0x110] sm:$0xff] }
  0x1c   : > { %219 = vst [vmem:[%s2709_s8 + $0x40] sm:$0xff] %v218_v8  ;;  %v224_v11 = vld [vmem:[%s2704_s7 + $0x118] sm:$0xff]  ;;  %221 = vst [vmem:[%s2709_s8 + $0x48] sm:$0xff] %v220_v9  ;;  %v226_v12 = vld [vmem:[%s2704_s7 + $0x180] sm:$0xff] }
  0x1d   : > { %223 = vst [vmem:[%s2709_s8 + $0x50] sm:$0xff] %v222_v10  ;;  %225 = vst [vmem:[%s2709_s8 + $0x58] sm:$0xff] %v224_v11  ;;  %v228_v13 = vld [vmem:[%s2704_s7 + $0x188] sm:$0xff]  ;;  %v230_v14 = vld [vmem:[%s2704_s7 + $0x190] sm:$0xff] }
  0x1e   : > { %227 = vst [vmem:[%s2709_s8 + $0x60] sm:$0xff] %v226_v12  ;;  %229 = vst [vmem:[%s2709_s8 + $0x68] sm:$0xff] %v228_v13  ;;  %v232_v15 = vld [vmem:[%s2704_s7 + $0x198] sm:$0xff]  ;;  %v234_v16 = vld [vmem:[%s2704_s7 + $0x200] sm:$0xff] }
  0x1f   : > { %231 = vst [vmem:[%s2709_s8 + $0x70] sm:$0xff] %v230_v14  ;;  %v236_v17 = vld [vmem:[%s2704_s7 + $0x208] sm:$0xff]  ;;  %233 = vst [vmem:[%s2709_s8 + $0x78] sm:$0xff] %v232_v15  ;;  %v238_v18 = vld [vmem:[%s2704_s7 + $0x210] sm:$0xff] }
  0x20   : > { %235 = vst [vmem:[%s2709_s8 + $0x80] sm:$0xff] %v234_v16  ;;  %237 = vst [vmem:[%s2709_s8 + $0x88] sm:$0xff] %v236_v17  ;;  %v240_v19 = vld [vmem:[%s2704_s7 + $0x218] sm:$0xff]  ;;  %v242_v20 = vld [vmem:[%s2704_s7 + $0x280] sm:$0xff] }
  0x21   : > { %239 = vst [vmem:[%s2709_s8 + $0x90] sm:$0xff] %v238_v18  ;;  %241 = vst [vmem:[%s2709_s8 + $0x98] sm:$0xff] %v240_v19  ;;  %v244_v21 = vld [vmem:[%s2704_s7 + $0x288] sm:$0xff]  ;;  %v246_v22 = vld [vmem:[%s2704_s7 + $0x290] sm:$0xff] }
  0x22   : > { %243 = vst [vmem:[%s2709_s8 + $0xa0] sm:$0xff] %v242_v20  ;;  %v248_v23 = vld [vmem:[%s2704_s7 + $0x298] sm:$0xff]  ;;  %245 = vst [vmem:[%s2709_s8 + $0xa8] sm:$0xff] %v244_v21  ;;  %v250_v24 = vld [vmem:[%s2704_s7 + $0x300] sm:$0xff] }
  0x23   : > { %247 = vst [vmem:[%s2709_s8 + $0xb0] sm:$0xff] %v246_v22  ;;  %249 = vst [vmem:[%s2709_s8 + $0xb8] sm:$0xff] %v248_v23  ;;  %v252_v25 = vld [vmem:[%s2704_s7 + $0x308] sm:$0xff]  ;;  %v254_v26 = vld [vmem:[%s2704_s7 + $0x310] sm:$0xff] }
  0x24   : > { %251 = vst [vmem:[%s2709_s8 + $0xc0] sm:$0xff] %v250_v24  ;;  %253 = vst [vmem:[%s2709_s8 + $0xc8] sm:$0xff] %v252_v25  ;;  %v256_v27 = vld [vmem:[%s2704_s7 + $0x318] sm:$0xff]  ;;  %v258_v28 = vld [vmem:[%s2704_s7 + $0x380] sm:$0xff] }
  0x25   : > { %255 = vst [vmem:[%s2709_s8 + $0xd0] sm:$0xff] %v254_v26  ;;  %v260_v29 = vld [vmem:[%s2704_s7 + $0x388] sm:$0xff]  ;;  %257 = vst [vmem:[%s2709_s8 + $0xd8] sm:$0xff] %v256_v27  ;;  %v262_v30 = vld [vmem:[%s2704_s7 + $0x390] sm:$0xff] }
  0x26   : > { %259 = vst [vmem:[%s2709_s8 + $0xe0] sm:$0xff] %v258_v28  ;;  %261 = vst [vmem:[%s2709_s8 + $0xe8] sm:$0xff] %v260_v29  ;;  %v264_v31 = vld [vmem:[%s2704_s7 + $0x398] sm:$0xff]  ;;  %v266_v32 = vld [vmem:[%s2704_s7 + $0x400] sm:$0xff] }
  0x27   : > { %263 = vst [vmem:[%s2709_s8 + $0xf0] sm:$0xff] %v262_v30  ;;  %265 = vst [vmem:[%s2709_s8 + $0xf8] sm:$0xff] %v264_v31  ;;  %v268_v33 = vld [vmem:[%s2704_s7 + $0x408] sm:$0xff]  ;;  %v270_v34 = vld [vmem:[%s2704_s7 + $0x410] sm:$0xff] }
  0x28   : > { %267 = vst [vmem:[%s2709_s8 + $0x100] sm:$0xff] %v266_v32  ;;  %v272_v35 = vld [vmem:[%s2704_s7 + $0x418] sm:$0xff]  ;;  %269 = vst [vmem:[%s2709_s8 + $0x108] sm:$0xff] %v268_v33  ;;  %v274_v36 = vld [vmem:[%s2704_s7 + $0x480] sm:$0xff] }
  0x29   : > { %271 = vst [vmem:[%s2709_s8 + $0x110] sm:$0xff] %v270_v34  ;;  %273 = vst [vmem:[%s2709_s8 + $0x118] sm:$0xff] %v272_v35  ;;  %v276_v37 = vld [vmem:[%s2704_s7 + $0x488] sm:$0xff]  ;;  %v278_v38 = vld [vmem:[%s2704_s7 + $0x490] sm:$0xff] }
  0x2a   : > { %275 = vst [vmem:[%s2709_s8 + $0x120] sm:$0xff] %v274_v36  ;;  %277 = vst [vmem:[%s2709_s8 + $0x128] sm:$0xff] %v276_v37  ;;  %v280_v39 = vld [vmem:[%s2704_s7 + $0x498] sm:$0xff]  ;;  %v282_v40 = vld [vmem:[%s2704_s7 + $0x500] sm:$0xff] }
  0x2b   : > { %279 = vst [vmem:[%s2709_s8 + $0x130] sm:$0xff] %v278_v38  ;;  %v284_v41 = vld [vmem:[%s2704_s7 + $0x508] sm:$0xff]  ;;  %281 = vst [vmem:[%s2709_s8 + $0x138] sm:$0xff] %v280_v39  ;;  %v286_v42 = vld [vmem:[%s2704_s7 + $0x510] sm:$0xff] }
  0x2c   : > { %283 = vst [vmem:[%s2709_s8 + $0x140] sm:$0xff] %v282_v40  ;;  %285 = vst [vmem:[%s2709_s8 + $0x148] sm:$0xff] %v284_v41  ;;  %v288_v43 = vld [vmem:[%s2704_s7 + $0x518] sm:$0xff]  ;;  %v290_v44 = vld [vmem:[%s2704_s7 + $0x580] sm:$0xff] }
  0x2d   : > { %287 = vst [vmem:[%s2709_s8 + $0x150] sm:$0xff] %v286_v42  ;;  %289 = vst [vmem:[%s2709_s8 + $0x158] sm:$0xff] %v288_v43  ;;  %v292_v45 = vld [vmem:[%s2704_s7 + $0x588] sm:$0xff]  ;;  %v294_v46 = vld [vmem:[%s2704_s7 + $0x590] sm:$0xff] }
  0x2e   : > { %291 = vst [vmem:[%s2709_s8 + $0x160] sm:$0xff] %v290_v44  ;;  %v296_v47 = vld [vmem:[%s2704_s7 + $0x598] sm:$0xff]  ;;  %293 = vst [vmem:[%s2709_s8 + $0x168] sm:$0xff] %v292_v45  ;;  %v298_v48 = vld [vmem:[%s2704_s7 + $0x600] sm:$0xff] }
  0x2f   : > { %295 = vst [vmem:[%s2709_s8 + $0x170] sm:$0xff] %v294_v46  ;;  %297 = vst [vmem:[%s2709_s8 + $0x178] sm:$0xff] %v296_v47  ;;  %v300_v49 = vld [vmem:[%s2704_s7 + $0x608] sm:$0xff]  ;;  %v302_v50 = vld [vmem:[%s2704_s7 + $0x610] sm:$0xff] }
  0x30   : > { %299 = vst [vmem:[%s2709_s8 + $0x180] sm:$0xff] %v298_v48  ;;  %301 = vst [vmem:[%s2709_s8 + $0x188] sm:$0xff] %v300_v49  ;;  %v304_v51 = vld [vmem:[%s2704_s7 + $0x618] sm:$0xff]  ;;  %v306_v52 = vld [vmem:[%s2704_s7 + $0x680] sm:$0xff] }
  0x31   : > { %303 = vst [vmem:[%s2709_s8 + $0x190] sm:$0xff] %v302_v50  ;;  %v308_v53 = vld [vmem:[%s2704_s7 + $0x688] sm:$0xff]  ;;  %305 = vst [vmem:[%s2709_s8 + $0x198] sm:$0xff] %v304_v51  ;;  %v310_v54 = vld [vmem:[%s2704_s7 + $0x690] sm:$0xff] }
  0x32   : > { %307 = vst [vmem:[%s2709_s8 + $0x1a0] sm:$0xff] %v306_v52  ;;  %309 = vst [vmem:[%s2709_s8 + $0x1a8] sm:$0xff] %v308_v53  ;;  %v312_v55 = vld [vmem:[%s2704_s7 + $0x698] sm:$0xff]  ;;  %v314_v56 = vld [vmem:[%s2704_s7 + $0x700] sm:$0xff] }
  0x33   : > { %311 = vst [vmem:[%s2709_s8 + $0x1b0] sm:$0xff] %v310_v54  ;;  %313 = vst [vmem:[%s2709_s8 + $0x1b8] sm:$0xff] %v312_v55  ;;  %v316_v57 = vld [vmem:[%s2704_s7 + $0x708] sm:$0xff]  ;;  %v318_v58 = vld [vmem:[%s2704_s7 + $0x710] sm:$0xff] }
  0x34   : > { %315 = vst [vmem:[%s2709_s8 + $0x1c0] sm:$0xff] %v314_v56  ;;  %v320_v59 = vld [vmem:[%s2704_s7 + $0x718] sm:$0xff]  ;;  %317 = vst [vmem:[%s2709_s8 + $0x1c8] sm:$0xff] %v316_v57  ;;  %v322_v60 = vld [vmem:[%s2704_s7 + $0x780] sm:$0xff] }
  0x35   : > { %319 = vst [vmem:[%s2709_s8 + $0x1d0] sm:$0xff] %v318_v58  ;;  %321 = vst [vmem:[%s2709_s8 + $0x1d8] sm:$0xff] %v320_v59  ;;  %v324_v61 = vld [vmem:[%s2704_s7 + $0x788] sm:$0xff]  ;;  %v326_v62 = vld [vmem:[%s2704_s7 + $0x790] sm:$0xff] }
  0x36   : > { %323 = vst [vmem:[%s2709_s8 + $0x1e0] sm:$0xff] %v322_v60  ;;  %325 = vst [vmem:[%s2709_s8 + $0x1e8] sm:$0xff] %v324_v61  ;;  %v328_v63 = vld [vmem:[%s2704_s7 + $0x798] sm:$0xff] }
  0x37   : > { %327 = vst [vmem:[%s2709_s8 + $0x1f0] sm:$0xff] %v326_v62  ;;  %329 = vst [vmem:[%s2709_s8 + $0x1f8] sm:$0xff] %v328_v63 }
  0x38 PF: > { %s336_s9 = sand.u32 1, %s2603_s17   ;;  %s2163_s10 = sshll.u32 %s2611_s19, 13 }
  0x39   : > { %s2020_s11 = sshll.u32 %s336_s9, 9  ;;  %s2841_s14 = scalar_lea.hbm %s3275_s1, %s2163_s10 }
  0x3a   : > { %s340_s15 = scalar_lea.vmem [#allocation3], %s2020_s11  ;;  %s2845_s23 = scalar_lea.sflag [#allocation4], %s336_s9 }
  0x3b   : > { %s347_s21 = sshll.u32 %s340_s15, 4  ;;  %s2537_s25 = scalar_lea.hbm %s2841_s14, 8192  ;;  %s2843_s21 = int_to_ptr.vmem [resolvable:$true] %s347_s21 }
  0x3c   : > { %p2538_p9 = scmp.ne.s32.totalorder %s2841_s14, %s2537_s25  ;;  %s2541_s30 = scalar_lea.hbm %s3275_s1, 32768 }
  0x3d   : > { %p2542_p12 = scmp.lt.u32.totalorder %s2841_s14, %s3275_s1  ;;  %p2543_p13 = scmp.lt.u32.totalorder %s2541_s30, %s2537_s25 }
  0x3e   : > { %p2539_p10 = pnand %p2538_p9, %p2682_p3  ;;  %p2545_p1 = scmp.lt.u32.totalorder %s2537_s25, %s2841_s14 }
  0x3f   : > { %p2544_p0 = por %p2543_p13, %p2542_p12 }
  0x40   : > { %p2540_p11 = pneg %p2539_p10 }
  0x41   : > { %p2546_p2 = por %p2545_p1, %p2544_p0 }
  0x43   : > { %p2547_p4 = pnand %p2546_p2, %p2540_p11 }
  0x45   : > { %2550 = shalt.err (!%p2547_p4)
}
  0x46   : > { %s2551_s7 = scalar_lea.vmem %s2843_s21, 8192  ;;  %s2617_s8 = smov [#allocation3]  }
  0x47   : > { %p2552_p5 = scmp.ne.s32.totalorder %s2843_s21, %s2551_s7  ;;  %s2555_s9 = sshll.u32 %s2617_s8, 4  ;;  %s2556_s9 = int_to_ptr.vmem [resolvable:$false] %s2555_s9 }
  0x48   : > { %s2557_s10 = scalar_lea.vmem %s2556_s9, 16384  ;;  %p2558_p9 = scmp.lt.s32.totalorder %s2843_s21, %s2556_s9 }
  0x49   : > { %p2553_p6 = pnand %p2552_p5, %p2682_p3  ;;  %p2559_p10 = scmp.lt.s32.totalorder %s2557_s10, %s2551_s7 }
  0x4b   : > { %p2554_p8 = pneg %p2553_p6  ;;  %p2560_p12 = por %p2559_p10, %p2558_p9 }
  0x4d   : > { %p2561_p13 = pnand %p2560_p12, %p2554_p8 }
  0x4f   : > { %2564 = shalt.err (!%p2561_p13)
}
  0x50   : > { %s2618_s11 = smov 64   ;;  %s2619_s12 = smov 4  }
  0x51   : > { %2420 = dma.hbm_to_vmem [thread:$0]  (%p2682_p3), %s2841_s14, 8192, %s2843_s21, %s2845_s23, %s2618_s11, %s2618_s11, %s2619_s12  }
  0x52 PF: > { %p2023_p11 = scmp.ge.s32.totalorder %s2615_s20, 1  ;;  %p355_p0 = scmp.lt.s32.totalorder %s2615_s20, 5 }
  0x54   : > { %p356_p1 = pnand %p2023_p11, %p355_p0 }
  0x55   : > { %s362_s13 = sand.u32 (!%p356_p1), 1, %s2599_s16  }
  0x56   : > { %359 = sbr.rel (%p356_p1) target bundleno = 522 (0x20a), region = 47  ;;  %s2024_s15 = sshll.u32 (!%p356_p1), %s362_s13, 9 }
  0x57   : > { %s2872_s25 = scalar_lea.vmem (!%p356_p1), [#allocation2], %s2024_s15  ;;  %s369_s28 = scalar_lea.sflag (!%p356_p1), [#allocation4], %s362_s13 }
  0x58   : > { %s2874_s29 = scalar_lea.vmem (!%p356_p1), [#allocation3], %s2024_s15 }
  0x5d   : > { %2590 = dma.done.wait (%p2689_p7), %s369_s28, 8192  }
  0x5e   : > { %2592 = vsyncadd (%p2689_p7), %s369_s28, 4294959104  ;;  %p2026_p3 = scmp.ne.s32.totalorder %s2607_s18, 0 }
  0x5f   : > { %v2620_v0 = vmov (!%p2026_p3), 0.0  }
  0x60   : > { %430 = sbr.rel (%p2026_p3) target bundleno = 104 (0x68), region = 59  ;;  %431 = vst [vmem:[%s3276_s2] sm:$0xff] (!%p2026_p3), %v2620_v0  ;;  %432 = vst [vmem:[%s3276_s2 + $0x8] sm:$0xff] (!%p2026_p3), %v2620_v0 }
  0x61   : > { %433 = vst [vmem:[%s3276_s2 + $0x10] sm:$0xff] (!%p2026_p3), %v2620_v0  ;;  %434 = vst [vmem:[%s3276_s2 + $0x18] sm:$0xff] (!%p2026_p3), %v2620_v0 }
  0x62   : > { %435 = vst [vmem:[%s3276_s2 + $0x20] sm:$0xff] (!%p2026_p3), %v2620_v0  ;;  %436 = vst [vmem:[%s3276_s2 + $0x28] sm:$0xff] (!%p2026_p3), %v2620_v0 }
  0x63   : > { %437 = vst [vmem:[%s3276_s2 + $0x30] sm:$0xff] (!%p2026_p3), %v2620_v0  ;;  %438 = vst [vmem:[%s3276_s2 + $0x38] sm:$0xff] (!%p2026_p3), %v2620_v0 }
  0x64   : > { %439 = vst [vmem:[%s3276_s2 + $0x40] sm:$0xff] (!%p2026_p3), %v2620_v0  ;;  %440 = vst [vmem:[%s3276_s2 + $0x48] sm:$0xff] (!%p2026_p3), %v2620_v0 }
  0x65   : > { %441 = vst [vmem:[%s3276_s2 + $0x50] sm:$0xff] (!%p2026_p3), %v2620_v0  ;;  %442 = vst [vmem:[%s3276_s2 + $0x58] sm:$0xff] (!%p2026_p3), %v2620_v0 }
  0x66   : > { %443 = vst [vmem:[%s3276_s2 + $0x60] sm:$0xff] (!%p2026_p3), %v2620_v0  ;;  %444 = vst [vmem:[%s3276_s2 + $0x68] sm:$0xff] (!%p2026_p3), %v2620_v0 }
  0x67   : > { %445 = vst [vmem:[%s3276_s2 + $0x70] sm:$0xff] %v2620_v0  ;;  %446 = vst [vmem:[%s3276_s2 + $0x78] sm:$0xff] %v2620_v0 }
  0x68 PF: > { %v2473_v1 = vld [vmem:[%s2874_s29 + $0x40] sm:$0xff]   ;;  %v2477_v5 = vld [vmem:[%s2874_s29 + $0x48] sm:$0xff]   ;;  %v2481_v9 = vld [vmem:[%s2874_s29 + $0x50] sm:$0xff]   ;;  %p2155_p7 = scmp.ne.s32.totalorder %s2607_s18, 3 }
  0x69   : > { %v2474_v2 = vld [vmem:[%s2874_s29 + $0xc0] sm:$0xff]   ;;  %2164 = vmatprep.subr.bf16.mxu0 %v2473_v1  ;;  %v2478_v6 = vld [vmem:[%s2874_s29 + $0xc8] sm:$0xff]   ;;  %v2482_v10 = vld [vmem:[%s2874_s29 + $0xd0] sm:$0xff]  }
  0x6a   : > { %v2475_v3 = vld [vmem:[%s2874_s29] sm:$0xff]   ;;  %2228 = vmatprep.subr.bf16.mxu1 %v2474_v2  ;;  %v2479_v7 = vld [vmem:[%s2874_s29 + $0x8] sm:$0xff]   ;;  %v2483_v11 = vld [vmem:[%s2874_s29 + $0x10] sm:$0xff]  }
  0x6b   : > { %v2476_v4 = vld [vmem:[%s2874_s29 + $0x80] sm:$0xff]   ;;  %2165 = vmatpush3.bf16.msra.mxu0 %v2475_v3  ;;  %v2480_v8 = vld [vmem:[%s2874_s29 + $0x88] sm:$0xff]   ;;  %v2484_v12 = vld [vmem:[%s2874_s29 + $0x90] sm:$0xff]  }
  0x6c   : > { %2229 = vmatpush3.bf16.msra.mxu1 %v2476_v4  ;;  %2166 = vmatprep.subr.bf16.mxu0 %v2477_v5  ;;  %v2485_v13 = vld [vmem:[%s2874_s29 + $0x58] sm:$0xff]   ;;  %v2489_v17 = vld [vmem:[%s2874_s29 + $0x60] sm:$0xff]   ;;  %v2493_v21 = vld [vmem:[%s2874_s29 + $0x68] sm:$0xff]  }
  0x6d   : > { %2230 = vmatprep.subr.bf16.mxu1 %v2478_v6  ;;  %v2486_v14 = vld [vmem:[%s2874_s29 + $0xd8] sm:$0xff]   ;;  %v2490_v18 = vld [vmem:[%s2874_s29 + $0xe0] sm:$0xff]   ;;  %v2494_v22 = vld [vmem:[%s2874_s29 + $0xe8] sm:$0xff]  }
  0x6e   : > { %v2487_v15 = vld [vmem:[%s2874_s29 + $0x18] sm:$0xff]   ;;  %v2491_v19 = vld [vmem:[%s2874_s29 + $0x20] sm:$0xff]   ;;  %v2495_v23 = vld [vmem:[%s2874_s29 + $0x28] sm:$0xff]  }
  0x6f   : > { %2167 = vmatpush3.bf16.msra.mxu0 %v2479_v7  ;;  %v2488_v16 = vld [vmem:[%s2874_s29 + $0x98] sm:$0xff]   ;;  %v2492_v20 = vld [vmem:[%s2874_s29 + $0xa0] sm:$0xff]   ;;  %v2496_v24 = vld [vmem:[%s2874_s29 + $0xa8] sm:$0xff]  }
  0x70   : > { %2231 = vmatpush3.bf16.msra.mxu1 %v2480_v8  ;;  %2168 = vmatprep.subr.bf16.mxu0 %v2481_v9  ;;  %v2497_v25 = vld [vmem:[%s2874_s29 + $0x70] sm:$0xff]   ;;  %v2501_v29 = vld [vmem:[%s2874_s29 + $0x78] sm:$0xff]   ;;  %v463_v33 = vld [vmem:[%s2872_s25] sm:$0xff] }
  0x71   : > { %2232 = vmatprep.subr.bf16.mxu1 %v2482_v10  ;;  %v2498_v26 = vld [vmem:[%s2874_s29 + $0xf0] sm:$0xff]   ;;  %v2502_v30 = vld [vmem:[%s2874_s29 + $0xf8] sm:$0xff]   ;;  %v467_v34 = vld [vmem:[%s2872_s25 + $0x20] sm:$0xff] }
  0x72   : > { %v2499_v27 = vld [vmem:[%s2874_s29 + $0x30] sm:$0xff]   ;;  %v2503_v31 = vld [vmem:[%s2874_s29 + $0x38] sm:$0xff]   ;;  %v464_v35 = vld [vmem:[%s2872_s25 + $0x8] sm:$0xff]  ;;  %v2027_v36 = vcombine.low %v463_v33, %v467_v34  ;;  %v2028_v37 = vcombine.high %v463_v33, %v467_v34 }
  0x73   : > { %2169 = vmatpush3.bf16.msra.mxu0 %v2483_v11  ;;  %v2500_v28 = vld [vmem:[%s2874_s29 + $0xb0] sm:$0xff]   ;;  %v2504_v32 = vld [vmem:[%s2874_s29 + $0xb8] sm:$0xff]   ;;  %v468_v38 = vld [vmem:[%s2872_s25 + $0x28] sm:$0xff] }
  0x74   : > { %2233 = vmatpush3.bf16.msra.mxu1 %v2484_v12  ;;  %2170 = vmatprep.subr.bf16.mxu0 %v2485_v13  ;;  %v2029_v39 = vcombine.low %v464_v35, %v468_v38  ;;  %v2030_v40 = vcombine.high %v464_v35, %v468_v38  ;;  %v2505_v41 = vld [vmem:[%s2874_s29 + $0x140] sm:$0xff]   ;;  %v472_v48 = vld [vmem:[%s2872_s25 + $0x48] sm:$0xff]  ;;  %v2513_v63 = vld [vmem:[%s2874_s29 + $0x150] sm:$0xff]  }
  0x75   : > { %2234 = vmatprep.subr.bf16.mxu1 %v2486_v14  ;;  %1391 = vmatprep.mubr.bf16.mxu0 %v2028_v37  ;;  %v2506_v42 = vld [vmem:[%s2874_s29 + $0x100] sm:$0xff]   ;;  %v476_v49 = vld [vmem:[%s2872_s25 + $0x68] sm:$0xff]  ;;  %v2514_v0 = vld [vmem:[%s2874_s29 + $0x110] sm:$0xff]  }
  0x76   : > { %1488 = vmatprep.mubr.bf16.mxu1 %v2030_v40  ;;  %v2507_v43 = vld [vmem:[%s2874_s29 + $0x1c0] sm:$0xff]   ;;  %v2038_v50 = vcombine.high %v472_v48, %v476_v49  ;;  %v2509_v51 = vld [vmem:[%s2874_s29 + $0x148] sm:$0xff]   ;;  %v2037_v54 = vcombine.low %v472_v48, %v476_v49  ;;  %v2515_v1 = vld [vmem:[%s2874_s29 + $0x1d0] sm:$0xff]  }
  0x77   : > { %2171 = vmatpush3.bf16.msra.mxu0 %v2487_v15  ;;  %v2508_v44 = vld [vmem:[%s2874_s29 + $0x180] sm:$0xff]   ;;  %v2510_v53 = vld [vmem:[%s2874_s29 + $0x108] sm:$0xff]   ;;  %v2516_v2 = vld [vmem:[%s2874_s29 + $0x190] sm:$0xff]  }
  0x78   : > { %2235 = vmatpush3.bf16.msra.mxu1 %v2488_v16  ;;  %2172 = vmatprep.subr.bf16.mxu0 %v2489_v17  ;;  %v471_v45 = vld [vmem:[%s2872_s25 + $0x40] sm:$0xff]  ;;  %v2511_v55 = vld [vmem:[%s2874_s29 + $0x1c8] sm:$0xff]   ;;  %v2517_v11 = vld [vmem:[%s2874_s29 + $0x158] sm:$0xff]  }
  0x79   : > { %2236 = vmatprep.subr.bf16.mxu1 %v2490_v18  ;;  %v475_v46 = vld [vmem:[%s2872_s25 + $0x60] sm:$0xff]  ;;  %v2512_v56 = vld [vmem:[%s2874_s29 + $0x188] sm:$0xff]   ;;  %v2518_v12 = vld [vmem:[%s2874_s29 + $0x118] sm:$0xff]  }
  0x7a   : > { %v2036_v47 = vcombine.high %v471_v45, %v475_v46  ;;  %v2035_v52 = vcombine.low %v471_v45, %v475_v46  ;;  %v479_v57 = vld [vmem:[%s2872_s25 + $0x80] sm:$0xff]  ;;  %v480_v59 = vld [vmem:[%s2872_s25 + $0x88] sm:$0xff]  ;;  %v2519_v13 = vld [vmem:[%s2874_s29 + $0x1d8] sm:$0xff]  }
  0x7b   : > { %2173 = vmatpush3.bf16.msra.mxu0 %v2491_v19  ;;  %v483_v58 = vld [vmem:[%s2872_s25 + $0xa0] sm:$0xff]  ;;  %v484_v60 = vld [vmem:[%s2872_s25 + $0xa8] sm:$0xff]  ;;  %v2520_v14 = vld [vmem:[%s2874_s29 + $0x198] sm:$0xff]  }
  0x7c   : > { %2237 = vmatpush3.bf16.msra.mxu1 %v2492_v20  ;;  %2174 = vmatprep.subr.bf16.mxu0 %v2493_v21  ;;  %v2044_v61 = vcombine.high %v479_v57, %v483_v58  ;;  %v2046_v62 = vcombine.high %v480_v59, %v484_v60  ;;  %v2043_v3 = vcombine.low %v479_v57, %v483_v58  ;;  %v487_v4 = vld [vmem:[%s2872_s25 + $0xc0] sm:$0xff]  ;;  %v488_v6 = vld [vmem:[%s2872_s25 + $0xc8] sm:$0xff]  ;;  %v2530_v40 = vld [vmem:[%s2874_s29 + $0x130] sm:$0xff]  }
  0x7d   : > { %2238 = vmatprep.subr.bf16.mxu1 %v2494_v22  ;;  %v491_v5 = vld [vmem:[%s2872_s25 + $0xe0] sm:$0xff]  ;;  %v2045_v7 = vcombine.low %v480_v59, %v484_v60  ;;  %v492_v9 = vld [vmem:[%s2872_s25 + $0xe8] sm:$0xff]  ;;  %v2534_v49 = vld [vmem:[%s2874_s29 + $0x138] sm:$0xff]  }
  0x7e   : > { %v2052_v8 = vcombine.high %v487_v4, %v491_v5  ;;  %v2054_v10 = vcombine.high %v488_v6, %v492_v9  ;;  %v495_v15 = vld [vmem:[%s2872_s25 + $0x100] sm:$0xff]  ;;  %v496_v17 = vld [vmem:[%s2872_s25 + $0x108] sm:$0xff]  ;;  %v2051_v20 = vcombine.low %v487_v4, %v491_v5  ;;  %v2053_v22 = vcombine.low %v488_v6, %v492_v9  ;;  %v474_v9 = vld [vmem:[%s2872_s25 + $0x58] sm:$0xff] }
  0x7f   : > { %2175 = vmatpush3.bf16.msra.mxu0 %v2495_v23  ;;  %v499_v16 = vld [vmem:[%s2872_s25 + $0x120] sm:$0xff]  ;;  %v500_v18 = vld [vmem:[%s2872_s25 + $0x128] sm:$0xff] }
  0x80   : > { %2239 = vmatpush3.bf16.msra.mxu1 %v2496_v24  ;;  %2176 = vmatprep.subr.bf16.mxu0 %v2497_v25  ;;  %v2521_v19 = vld [vmem:[%s2874_s29 + $0x160] sm:$0xff]   ;;  %v2060_v23 = vcombine.high %v495_v15, %v499_v16  ;;  %v2062_v25 = vcombine.high %v496_v17, %v500_v18  ;;  %v2527_v33 = vld [vmem:[%s2874_s29 + $0x1e8] sm:$0xff]   ;;  %v2059_v35 = vcombine.low %v495_v15, %v499_v16  ;;  %v481_v15 = vld [vmem:[%s2872_s25 + $0x90] sm:$0xff] }
  0x81   : > { %2240 = vmatprep.subr.bf16.mxu1 %v2498_v26  ;;  %v2522_v21 = vld [vmem:[%s2874_s29 + $0x120] sm:$0xff]   ;;  %v2528_v34 = vld [vmem:[%s2874_s29 + $0x1a8] sm:$0xff]   ;;  %v485_v16 = vld [vmem:[%s2872_s25 + $0xb0] sm:$0xff] }
  0x82   : > { %v2523_v24 = vld [vmem:[%s2874_s29 + $0x1e0] sm:$0xff]   ;;  %v512_v45 = vld [vmem:[%s2872_s25 + $0x188] sm:$0xff] }
  0x83   : > { %2177 = vmatpush3.bf16.msra.mxu0 %v2499_v27  ;;  %v2524_v26 = vld [vmem:[%s2874_s29 + $0x1a0] sm:$0xff]   ;;  %v516_v46 = vld [vmem:[%s2872_s25 + $0x1a8] sm:$0xff] }
  0x84   : > { %2241 = vmatpush3.bf16.msra.mxu1 %v2500_v28  ;;  %2178 = vmatprep.subr.bf16.mxu0 %v2501_v29  ;;  %v503_v27 = vld [vmem:[%s2872_s25 + $0x140] sm:$0xff]  ;;  %v2525_v29 = vld [vmem:[%s2874_s29 + $0x168] sm:$0xff]   ;;  %v2077_v60 = vcombine.low %v512_v45, %v516_v46 }
  0x85   : > { %2242 = vmatprep.subr.bf16.mxu1 %v2502_v30  ;;  %v507_v28 = vld [vmem:[%s2872_s25 + $0x160] sm:$0xff]  ;;  %v504_v30 = vld [vmem:[%s2872_s25 + $0x148] sm:$0xff] }
  0x86   : > { %v2068_v37 = vcombine.high %v503_v27, %v507_v28  ;;  %v2067_v48 = vcombine.low %v503_v27, %v507_v28  ;;  %v520_v57 = vld [vmem:[%s2872_s25 + $0x1c8] sm:$0xff]  ;;  %v2047_v27 = vcombine.low %v481_v15, %v485_v16 }
  0x87   : > { %2179 = vmatpush3.bf16.msra.mxu0 %v2503_v31  ;;  %v508_v31 = vld [vmem:[%s2872_s25 + $0x168] sm:$0xff] }
  0x88   : > { %2243 = vmatpush3.bf16.msra.mxu1 %v2504_v32  ;;  %2292 = vmatprep.subr.bf16.mxu0 %v2505_v41  ;;  %v2526_v32 = vld [vmem:[%s2874_s29 + $0x128] sm:$0xff]   ;;  %v2070_v38 = vcombine.high %v504_v30, %v508_v31  ;;  %v2531_v41 = vld [vmem:[%s2874_s29 + $0x1f0] sm:$0xff]  }
  0x89   : > { %2356 = vmatprep.subr.bf16.mxu1 %v2507_v43  ;;  %v515_v43 = vld [vmem:[%s2872_s25 + $0x1a0] sm:$0xff]  ;;  %v524_v58 = vld [vmem:[%s2872_s25 + $0x1e8] sm:$0xff] }
  0x8a   : > { %1392 = vmatmul.mubr.bf16.vlgmr.msra.gmra.mrb[0].mxu0 %v2027_v36  ;;  %v2061_v36 = vcombine.low %v496_v17, %v500_v18  ;;  %v2085_v4 = vcombine.low %v520_v57, %v524_v58  ;;  %v482_v17 = vld [vmem:[%s2872_s25 + $0x98] sm:$0xff] }
  0x8b   : > { %1489 = vmatmul.mubr.bf16.vlgmr.msra.gmra.mrb[0].mxu1 %v2029_v39  ;;  %2293 = vmatpush3.bf16.msra.mxu0 %v2506_v42  ;;  %v2529_v39 = vld [vmem:[%s2874_s29 + $0x170] sm:$0xff]   ;;  %v511_v42 = vld [vmem:[%s2872_s25 + $0x180] sm:$0xff]  ;;  %v486_v18 = vld [vmem:[%s2872_s25 + $0xb8] sm:$0xff] }
  0x8c   : > { %2357 = vmatpush3.bf16.msra.mxu1 %v2508_v44  ;;  %1399 = vmatprep.mubr.bf16.mxu0 %v2036_v47  ;;  %v2532_v44 = vld [vmem:[%s2874_s29 + $0x1b0] sm:$0xff]   ;;  %v2533_v47 = vld [vmem:[%s2874_s29 + $0x178] sm:$0xff]   ;;  %v2075_v59 = vcombine.low %v511_v42, %v515_v43  ;;  %v2049_v28 = vcombine.low %v482_v17, %v486_v18 }
  0x8d   : > { %1496 = vmatprep.mubr.bf16.mxu1 %v2038_v50  ;;  %2294 = vmatprep.subr.bf16.mxu0 %v2509_v51  ;;  %v2069_v50 = vcombine.low %v504_v30, %v508_v31  ;;  %v2076_v51 = vcombine.high %v511_v42, %v515_v43  ;;  %v497_v31 = vld [vmem:[%s2872_s25 + $0x110] sm:$0xff]  ;;  %v510_v42 = vld [vmem:[%s2872_s25 + $0x178] sm:$0xff] }
  0x8e   : > { %2358 = vmatprep.subr.bf16.mxu1 %v2511_v55  ;;  %v519_v55 = vld [vmem:[%s2872_s25 + $0x1c0] sm:$0xff] }
  0x8f   : > { %2295 = vmatpush3.bf16.msra.mxu0 %v2510_v53  ;;  %v2078_v53 = vcombine.high %v512_v45, %v516_v46 }
  0x90   : > { %2359 = vmatpush3.bf16.msra.mxu1 %v2512_v56  ;;  %2296 = vmatprep.subr.bf16.mxu0 %v2513_v63  ;;  %v523_v56 = vld [vmem:[%s2872_s25 + $0x1e0] sm:$0xff]  ;;  %v465_v63 = vld [vmem:[%s2872_s25 + $0x10] sm:$0xff] }
  0x91   : > { %2360 = vmatprep.subr.bf16.mxu1 %v2515_v1  ;;  %v466_v1 = vld [vmem:[%s2872_s25 + $0x18] sm:$0xff] }
  0x92   : > { %1400 = vmatmul.mubr.bf16.gmra.mrb[4].mxu0 %v2035_v52  ;;  %v2535_v52 = vld [vmem:[%s2874_s29 + $0x1f8] sm:$0xff]  }
  0x93   : > { %1497 = vmatmul.mubr.bf16.gmra.mrb[4].mxu1 %v2037_v54  ;;  %1407 = vmatprep.mubr.bf16.mxu0 %v2044_v61  ;;  %v2536_v54 = vld [vmem:[%s2874_s29 + $0x1b8] sm:$0xff]   ;;  %v2084_v61 = vcombine.high %v519_v55, %v523_v56 }
  0x94   : > { %1504 = vmatprep.mubr.bf16.mxu1 %v2046_v62  ;;  %2297 = vmatpush3.bf16.msra.mxu0 %v2514_v0  ;;  %v2086_v62 = vcombine.high %v520_v57, %v524_v58  ;;  %v469_v0 = vld [vmem:[%s2872_s25 + $0x30] sm:$0xff]  ;;  %v522_v57 = vld [vmem:[%s2872_s25 + $0x1d8] sm:$0xff] }
  0x95   : > { %2361 = vmatpush3.bf16.msra.mxu1 %v2516_v2  ;;  %2298 = vmatprep.subr.bf16.mxu0 %v2517_v11  ;;  %v470_v2 = vld [vmem:[%s2872_s25 + $0x38] sm:$0xff]  ;;  %v2032_v5 = vcombine.high %v465_v63, %v469_v0  ;;  %v2031_v11 = vcombine.low %v465_v63, %v469_v0 }
  0x96   : > { %2362 = vmatprep.subr.bf16.mxu1 %v2519_v13  ;;  %v2034_v6 = vcombine.high %v466_v1, %v470_v2  ;;  %v526_v58 = vld [vmem:[%s2872_s25 + $0x1f8] sm:$0xff] }
  0x97   : > { %v2089_v0 = vcombine.low %v522_v57, %v526_v58 }
  0x98   : > { %2299 = vmatpush3.bf16.msra.mxu0 %v2518_v12  ;;  %v2033_v12 = vcombine.low %v466_v1, %v470_v2 }
  0x99   : > { %2363 = vmatpush3.bf16.msra.mxu1 %v2520_v14  ;;  %2300 = vmatprep.subr.bf16.mxu0 %v2521_v19 }
  0x9a   : > { %1408 = vmatmul.mubr.bf16.gmra.mrb[8].mxu0 %v2043_v3  ;;  %2364 = vmatprep.subr.bf16.mxu1 %v2523_v24  ;;  %v2083_v3 = vcombine.low %v519_v55, %v523_v56  ;;  %v493_v24 = vld [vmem:[%s2872_s25 + $0xf0] sm:$0xff] }
  0x9b   : > { %1505 = vmatmul.mubr.bf16.gmra.mrb[8].mxu1 %v2045_v7  ;;  %1415 = vmatprep.mubr.bf16.mxu0 %v2052_v8  ;;  %v473_v7 = vld [vmem:[%s2872_s25 + $0x50] sm:$0xff] }
  0x9c   : > { %1512 = vmatprep.mubr.bf16.mxu1 %v2054_v10  ;;  %2301 = vmatpush3.bf16.msra.mxu0 %v2522_v21  ;;  %v477_v8 = vld [vmem:[%s2872_s25 + $0x70] sm:$0xff]  ;;  %v478_v10 = vld [vmem:[%s2872_s25 + $0x78] sm:$0xff]  ;;  %v2048_v21 = vcombine.high %v481_v15, %v485_v16 }
  0x9d   : > { %2365 = vmatpush3.bf16.msra.mxu1 %v2524_v26  ;;  %2302 = vmatprep.subr.bf16.mxu0 %v2525_v29  ;;  %v2040_v13 = vcombine.high %v473_v7, %v477_v8  ;;  %v2042_v14 = vcombine.high %v474_v9, %v478_v10  ;;  %v2039_v19 = vcombine.low %v473_v7, %v477_v8  ;;  %v494_v26 = vld [vmem:[%s2872_s25 + $0xf8] sm:$0xff]  ;;  %v521_v55 = vld [vmem:[%s2872_s25 + $0x1d0] sm:$0xff] }
  0x9e   : > { %2366 = vmatprep.subr.bf16.mxu1 %v2527_v33  ;;  %v498_v33 = vld [vmem:[%s2872_s25 + $0x118] sm:$0xff]  ;;  %v525_v56 = vld [vmem:[%s2872_s25 + $0x1f0] sm:$0xff] }
  0x9f   : > { %v2087_v63 = vcombine.low %v521_v55, %v525_v56 }
  0xa0   : > { %2303 = vmatpush3.bf16.msra.mxu0 %v2526_v32  ;;  %v501_v32 = vld [vmem:[%s2872_s25 + $0x130] sm:$0xff] }
  0xa1   : > { %2367 = vmatpush3.bf16.msra.mxu1 %v2528_v34  ;;  %2304 = vmatprep.subr.bf16.mxu0 %v2529_v39  ;;  %v502_v34 = vld [vmem:[%s2872_s25 + $0x138] sm:$0xff]  ;;  %v505_v39 = vld [vmem:[%s2872_s25 + $0x150] sm:$0xff]  ;;  %v2063_v43 = vcombine.low %v497_v31, %v501_v32 }
  0xa2   : > { %1416 = vmatmul.mubr.bf16.gmra.mrb[12].mxu0 %v2051_v20  ;;  %2368 = vmatprep.subr.bf16.mxu1 %v2531_v41  ;;  %v2041_v20 = vcombine.low %v474_v9, %v478_v10  ;;  %v506_v41 = vld [vmem:[%s2872_s25 + $0x158] sm:$0xff] }
  0xa3   : > { %1513 = vmatmul.mubr.bf16.gmra.mrb[12].mxu1 %v2053_v22  ;;  %1423 = vmatprep.mubr.bf16.mxu0 %v2060_v23  ;;  %v2050_v22 = vcombine.high %v482_v17, %v486_v18  ;;  %v489_v23 = vld [vmem:[%s2872_s25 + $0xd0] sm:$0xff]  ;;  %v2074_v46 = vcombine.high %v506_v41, %v510_v42 }
  0xa4   : > { %1520 = vmatprep.mubr.bf16.mxu1 %v2062_v25  ;;  %2305 = vmatpush3.bf16.msra.mxu0 %v2530_v40  ;;  %v490_v25 = vld [vmem:[%s2872_s25 + $0xd8] sm:$0xff]  ;;  %v2056_v29 = vcombine.high %v489_v23, %v493_v24  ;;  %v509_v40 = vld [vmem:[%s2872_s25 + $0x170] sm:$0xff] }
  0xa5   : > { %2369 = vmatpush3.bf16.msra.mxu1 %v2532_v44  ;;  %2306 = vmatprep.subr.bf16.mxu0 %v2533_v47  ;;  %v2058_v30 = vcombine.high %v490_v25, %v494_v26  ;;  %v2065_v44 = vcombine.low %v498_v33, %v502_v34  ;;  %v2072_v45 = vcombine.high %v505_v39, %v509_v40  ;;  %v513_v47 = vld [vmem:[%s2872_s25 + $0x190] sm:$0xff] }
  0xa6   : > { %2370 = vmatprep.subr.bf16.mxu1 %v2535_v52  ;;  %v2073_v52 = vcombine.low %v506_v41, %v510_v42 }
  0xa8   : > { %2307 = vmatpush3.bf16.msra.mxu0 %v2534_v49  ;;  %v514_v49 = vld [vmem:[%s2872_s25 + $0x198] sm:$0xff] }
  0xa9   : > { %2371 = vmatpush3.bf16.msra.mxu1 %v2536_v54 }
  0xaa   : > { %1424 = vmatmul.mubr.bf16.gmra.mrb[16].mxu0 %v2059_v35  ;;  %v2055_v35 = vcombine.low %v489_v23, %v493_v24 }
  0xab   : > { %1521 = vmatmul.mubr.bf16.gmra.mrb[16].mxu1 %v2061_v36  ;;  %1431 = vmatprep.mubr.bf16.mxu0 %v2068_v37  ;;  %v2057_v36 = vcombine.low %v490_v25, %v494_v26  ;;  %v2064_v37 = vcombine.high %v497_v31, %v501_v32 }
  0xac   : > { %1528 = vmatprep.mubr.bf16.mxu1 %v2070_v38  ;;  %v2066_v38 = vcombine.high %v498_v33, %v502_v34 }
  0xb2   : > { %1432 = vmatmul.mubr.bf16.gmra.mrb[20].mxu0 %v2067_v48  ;;  %v517_v48 = vld [vmem:[%s2872_s25 + $0x1b0] sm:$0xff] }
  0xb3   : > { %1529 = vmatmul.mubr.bf16.gmra.mrb[20].mxu1 %v2069_v50  ;;  %1439 = vmatprep.mubr.bf16.mxu0 %v2076_v51  ;;  %v518_v50 = vld [vmem:[%s2872_s25 + $0x1b8] sm:$0xff]  ;;  %v2071_v51 = vcombine.low %v505_v39, %v509_v40 }
  0xb4   : > { %1536 = vmatprep.mubr.bf16.mxu1 %v2078_v53  ;;  %v2080_v53 = vcombine.high %v513_v47, %v517_v48  ;;  %v2082_v54 = vcombine.high %v514_v49, %v518_v50 }
  0xba   : > { %1440 = vmatmul.mubr.bf16.gmra.mrb[24].mxu0 %v2075_v59  ;;  %v2079_v59 = vcombine.low %v513_v47, %v517_v48 }
  0xbb   : > { %1537 = vmatmul.mubr.bf16.gmra.mrb[24].mxu1 %v2077_v60  ;;  %1447 = vmatprep.mubr.bf16.mxu0 %v2084_v61  ;;  %v2081_v60 = vcombine.low %v514_v49, %v518_v50  ;;  %v2088_v61 = vcombine.high %v521_v55, %v525_v56 }
  0xbc   : > { %1544 = vmatprep.mubr.bf16.mxu1 %v2086_v62  ;;  %v2090_v62 = vcombine.high %v522_v57, %v526_v58 }
  0xc2   : > { %1448 = vmatmul.mubr.bf16.gmra.mrb[28].mxu0 %v2083_v3 }
  0xc3   : > { %1545 = vmatmul.mubr.bf16.gmra.mrb[28].mxu1 %v2085_v4  ;;  %1585 = vmatprep.mubr.bf16.mxu0 %v2032_v5 }
  0xc4   : > { %1682 = vmatprep.mubr.bf16.mxu1 %v2034_v6 }
  0xca   : > { %1586 = vmatmul.mubr.bf16.vlgmr.msra.gmra.mrb[32].mxu0 %v2031_v11 }
  0xcb   : > { %1683 = vmatmul.mubr.bf16.vlgmr.msra.gmra.mrb[32].mxu1 %v2033_v12  ;;  %1593 = vmatprep.mubr.bf16.mxu0 %v2040_v13 }
  0xcc   : > { %1690 = vmatprep.mubr.bf16.mxu1 %v2042_v14 }
  0xd2   : > { %1594 = vmatmul.mubr.bf16.gmra.mrb[36].mxu0 %v2039_v19 }
  0xd3   : > { %1691 = vmatmul.mubr.bf16.gmra.mrb[36].mxu1 %v2041_v20  ;;  %1601 = vmatprep.mubr.bf16.mxu0 %v2048_v21 }
  0xd4   : > { %1698 = vmatprep.mubr.bf16.mxu1 %v2050_v22 }
  0xda   : > { %1602 = vmatmul.mubr.bf16.gmra.mrb[40].mxu0 %v2047_v27 }
  0xdb   : > { %1699 = vmatmul.mubr.bf16.gmra.mrb[40].mxu1 %v2049_v28  ;;  %1609 = vmatprep.mubr.bf16.mxu0 %v2056_v29 }
  0xdc   : > { %1706 = vmatprep.mubr.bf16.mxu1 %v2058_v30 }
  0xe2   : > { %1610 = vmatmul.mubr.bf16.gmra.mrb[44].mxu0 %v2055_v35 }
  0xe3   : > { %1707 = vmatmul.mubr.bf16.gmra.mrb[44].mxu1 %v2057_v36  ;;  %1617 = vmatprep.mubr.bf16.mxu0 %v2064_v37 }
  0xe4   : > { %1714 = vmatprep.mubr.bf16.mxu1 %v2066_v38 }
  0xea   : > { %1618 = vmatmul.mubr.bf16.gmra.mrb[48].mxu0 %v2063_v43 }
  0xeb   : > { %1715 = vmatmul.mubr.bf16.gmra.mrb[48].mxu1 %v2065_v44  ;;  %1625 = vmatprep.mubr.bf16.mxu0 %v2072_v45 }
  0xec   : > { %1722 = vmatprep.mubr.bf16.mxu1 %v2074_v46 }
  0xf2   : > { %1626 = vmatmul.mubr.bf16.gmra.mrb[52].mxu0 %v2071_v51 }
  0xf3   : > { %1723 = vmatmul.mubr.bf16.gmra.mrb[52].mxu1 %v2073_v52  ;;  %1633 = vmatprep.mubr.bf16.mxu0 %v2080_v53 }
  0xf4   : > { %1730 = vmatprep.mubr.bf16.mxu1 %v2082_v54 }
  0xfa   : > { %1634 = vmatmul.mubr.bf16.gmra.mrb[56].mxu0 %v2079_v59 }
  0xfb   : > { %1731 = vmatmul.mubr.bf16.gmra.mrb[56].mxu1 %v2081_v60  ;;  %1641 = vmatprep.mubr.bf16.mxu0 %v2088_v61 }
  0xfc   : > { %1738 = vmatprep.mubr.bf16.mxu1 %v2090_v62 }
 0x102   : > { %1642 = vmatmul.mubr.bf16.gmra.mrb[60].mxu0 %v2087_v63 }
 0x103   : > { %1739 = vmatmul.mubr.bf16.gmra.mrb[60].mxu1 %v2089_v0 }
 0x15d   : > { %v2180_v1 = vpop.f32.mrb[0].mxu0 }
 0x15e   : > { %v2244_v2 = vpop.f32.mrb[0].mxu1  ;;  %v2181_v3 = vpop.f32.mrb[1].mxu0 }
 0x15f   : > { %v2182_v4 = vadd.f32 %v2181_v3, %v2180_v1  ;;  %v2245_v5 = vpop.f32.mrb[1].mxu1  ;;  %v2183_v6 = vpop.f32.mrb[2].mxu0 }
 0x160   : > { %v2246_v7 = vadd.f32 %v2245_v5, %v2244_v2  ;;  %v2247_v8 = vpop.f32.mrb[2].mxu1  ;;  %v2184_v9 = vpop.f32.mrb[3].mxu0 }
 0x161   : > { %v2185_v10 = vadd.f32 %v2184_v9, %v2183_v6  ;;  %v2248_v11 = vpop.f32.mrb[3].mxu1 }
 0x162   : > { %v3057_v12 = vadd.f32 %v2246_v7, %v2182_v4  ;;  %v2249_v13 = vadd.f32 %v2248_v11, %v2247_v8 }
 0x164   : > { %v3059_v14 = vadd.f32 %v2249_v13, %v2185_v10 }
 0x165   : > { %v2186_v15 = vpop.f32.mrb[4].mxu0 }
 0x166   : > { %v2250_v16 = vpop.f32.mrb[4].mxu1  ;;  %v2187_v17 = vpop.f32.mrb[5].mxu0 }
 0x167   : > { %v2188_v18 = vadd.f32 %v2187_v17, %v2186_v15  ;;  %v2251_v19 = vpop.f32.mrb[5].mxu1  ;;  %v2189_v20 = vpop.f32.mrb[6].mxu0 }
 0x168   : > { %v2252_v21 = vadd.f32 %v2251_v19, %v2250_v16  ;;  %v2253_v22 = vpop.f32.mrb[6].mxu1  ;;  %v2190_v23 = vpop.f32.mrb[7].mxu0 }
 0x169   : > { %v2191_v24 = vadd.f32 %v2190_v23, %v2189_v20  ;;  %v2254_v25 = vpop.f32.mrb[7].mxu1 }
 0x16a   : > { %v3061_v26 = vadd.f32 %v2252_v21, %v2188_v18  ;;  %v2255_v27 = vadd.f32 %v2254_v25, %v2253_v22 }
 0x16c   : > { %v3063_v28 = vadd.f32 %v2255_v27, %v2191_v24 }
 0x16d   : > { %v2192_v29 = vpop.f32.mrb[8].mxu0 }
 0x16e   : > { %v2256_v30 = vpop.f32.mrb[8].mxu1  ;;  %v2193_v31 = vpop.f32.mrb[9].mxu0 }
 0x16f   : > { %v2194_v32 = vadd.f32 %v2193_v31, %v2192_v29  ;;  %v2257_v33 = vpop.f32.mrb[9].mxu1  ;;  %v2195_v34 = vpop.f32.mrb[10].mxu0 }
 0x170   : > { %v2258_v35 = vadd.f32 %v2257_v33, %v2256_v30  ;;  %v2259_v36 = vpop.f32.mrb[10].mxu1  ;;  %v2196_v37 = vpop.f32.mrb[11].mxu0 }
 0x171   : > { %v2197_v38 = vadd.f32 %v2196_v37, %v2195_v34  ;;  %v2260_v39 = vpop.f32.mrb[11].mxu1 }
 0x172   : > { %v3065_v40 = vadd.f32 %v2258_v35, %v2194_v32  ;;  %v2261_v41 = vadd.f32 %v2260_v39, %v2259_v36 }
 0x174   : > { %v3067_v42 = vadd.f32 %v2261_v41, %v2197_v38 }
 0x175   : > { %v2198_v43 = vpop.f32.mrb[12].mxu0 }
 0x176   : > { %v2262_v44 = vpop.f32.mrb[12].mxu1  ;;  %v2199_v45 = vpop.f32.mrb[13].mxu0 }
 0x177   : > { %v2200_v46 = vadd.f32 %v2199_v45, %v2198_v43  ;;  %v2263_v47 = vpop.f32.mrb[13].mxu1  ;;  %v2201_v48 = vpop.f32.mrb[14].mxu0 }
 0x178   : > { %v2264_v49 = vadd.f32 %v2263_v47, %v2262_v44  ;;  %v2265_v50 = vpop.f32.mrb[14].mxu1  ;;  %v2202_v51 = vpop.f32.mrb[15].mxu0 }
 0x179   : > { %v2203_v52 = vadd.f32 %v2202_v51, %v2201_v48  ;;  %v2266_v53 = vpop.f32.mrb[15].mxu1 }
 0x17a   : > { %v3069_v54 = vadd.f32 %v2264_v49, %v2200_v46  ;;  %v2267_v55 = vadd.f32 %v2266_v53, %v2265_v50 }
 0x17c   : > { %v3071_v56 = vadd.f32 %v2267_v55, %v2203_v52 }
 0x17d   : > { %v2204_v57 = vpop.f32.mrb[16].mxu0 }
 0x17e   : > { %v2268_v58 = vpop.f32.mrb[16].mxu1  ;;  %v2205_v59 = vpop.f32.mrb[17].mxu0 }
 0x17f   : > { %v2206_v60 = vadd.f32 %v2205_v59, %v2204_v57  ;;  %v2269_v61 = vpop.f32.mrb[17].mxu1  ;;  %v2207_v62 = vpop.f32.mrb[18].mxu0 }
 0x180   : > { %v2270_v63 = vadd.f32 %v2269_v61, %v2268_v58  ;;  %v2271_v0 = vpop.f32.mrb[18].mxu1  ;;  %v2208_v1 = vpop.f32.mrb[19].mxu0 }
 0x181   : > { %v2209_v2 = vadd.f32 %v2208_v1, %v2207_v62  ;;  %v2272_v3 = vpop.f32.mrb[19].mxu1 }
 0x182   : > { %v3073_v4 = vadd.f32 %v2270_v63, %v2206_v60  ;;  %v2273_v5 = vadd.f32 %v2272_v3, %v2271_v0 }
 0x184   : > { %v3075_v6 = vadd.f32 %v2273_v5, %v2209_v2 }
 0x185   : > { %v2210_v7 = vpop.f32.mrb[20].mxu0 }
 0x186   : > { %v2274_v8 = vpop.f32.mrb[20].mxu1  ;;  %v2211_v9 = vpop.f32.mrb[21].mxu0 }
 0x187   : > { %v2212_v10 = vadd.f32 %v2211_v9, %v2210_v7  ;;  %v2275_v11 = vpop.f32.mrb[21].mxu1  ;;  %v2213_v13 = vpop.f32.mrb[22].mxu0  ;;  %v447_v7 = vld [vmem:[%s3276_s2] sm:$0xff] }
 0x188   : > { %v2276_v15 = vadd.f32 %v2275_v11, %v2274_v8  ;;  %v2277_v16 = vpop.f32.mrb[22].mxu1  ;;  %v2214_v17 = vpop.f32.mrb[23].mxu0  ;;  %v448_v11 = vld [vmem:[%s3276_s2 + $0x8] sm:$0xff] }
 0x189   : > { %v2215_v18 = vadd.f32 %v2214_v17, %v2213_v13  ;;  %v2278_v19 = vpop.f32.mrb[23].mxu1 }
 0x18a   : > { %v3077_v20 = vadd.f32 %v2276_v15, %v2212_v10  ;;  %v2279_v21 = vadd.f32 %v2278_v19, %v2277_v16 }
 0x18c   : > { %v3079_v22 = vadd.f32 %v2279_v21, %v2215_v18 }
 0x18d   : > { %v2216_v23 = vpop.f32.mrb[24].mxu0 }
 0x18e   : > { %v2280_v24 = vpop.f32.mrb[24].mxu1  ;;  %v2217_v25 = vpop.f32.mrb[25].mxu0 }
 0x18f   : > { %v2218_v27 = vadd.f32 %v2217_v25, %v2216_v23  ;;  %v2281_v29 = vpop.f32.mrb[25].mxu1  ;;  %v2219_v30 = vpop.f32.mrb[26].mxu0 }
 0x190   : > { %v2282_v31 = vadd.f32 %v2281_v29, %v2280_v24  ;;  %v2283_v32 = vpop.f32.mrb[26].mxu1  ;;  %v2220_v33 = vpop.f32.mrb[27].mxu0 }
 0x191   : > { %v2221_v34 = vadd.f32 %v2220_v33, %v2219_v30  ;;  %v2284_v35 = vpop.f32.mrb[27].mxu1 }
 0x192   : > { %v3081_v36 = vadd.f32 %v2282_v31, %v2218_v27  ;;  %v2285_v37 = vadd.f32 %v2284_v35, %v2283_v32  ;;  %v449_v31 = vld [vmem:[%s3276_s2 + $0x10] sm:$0xff]  ;;  %v450_v35 = vld [vmem:[%s3276_s2 + $0x18] sm:$0xff] }
 0x194   : > { %v3083_v38 = vadd.f32 %v2285_v37, %v2221_v34 }
 0x195   : > { %v2222_v39 = vpop.f32.mrb[28].mxu0 }
 0x196   : > { %v2286_v41 = vpop.f32.mrb[28].mxu1  ;;  %v2223_v43 = vpop.f32.mrb[29].mxu0 }
 0x197   : > { %v2224_v44 = vadd.f32 %v2223_v43, %v2222_v39  ;;  %v2287_v45 = vpop.f32.mrb[29].mxu1  ;;  %v2225_v46 = vpop.f32.mrb[30].mxu0 }
 0x198   : > { %v2288_v47 = vadd.f32 %v2287_v45, %v2286_v41  ;;  %v2289_v48 = vpop.f32.mrb[30].mxu1  ;;  %v2226_v49 = vpop.f32.mrb[31].mxu0 }
 0x199   : > { %v2227_v50 = vadd.f32 %v2226_v49, %v2225_v46  ;;  %v2290_v51 = vpop.f32.mrb[31].mxu1 }
 0x19a   : > { %v3085_v52 = vadd.f32 %v2288_v47, %v2224_v44  ;;  %v2291_v53 = vadd.f32 %v2290_v51, %v2289_v48 }
 0x19c   : > { %v3087_v55 = vadd.f32 %v2291_v53, %v2227_v50 }
 0x19d   : > { %v2308_v57 = vpop.f32.mrb[32].mxu0 }
 0x19e   : > { %v2372_v58 = vpop.f32.mrb[32].mxu1  ;;  %v2309_v59 = vpop.f32.mrb[33].mxu0 }
 0x19f   : > { %v2310_v60 = vadd.f32 %v2309_v59, %v2308_v57  ;;  %v2373_v61 = vpop.f32.mrb[33].mxu1  ;;  %v2311_v62 = vpop.f32.mrb[34].mxu0  ;;  %v451_v57 = vld [vmem:[%s3276_s2 + $0x20] sm:$0xff] }
 0x1a0   : > { %v2374_v63 = vadd.f32 %v2373_v61, %v2372_v58  ;;  %v2375_v0 = vpop.f32.mrb[34].mxu1  ;;  %v2312_v1 = vpop.f32.mrb[35].mxu0  ;;  %v452_v61 = vld [vmem:[%s3276_s2 + $0x28] sm:$0xff] }
 0x1a1   : > { %v1588_v2 = vadd.f32 %v2310_v60, %v3057_v12  ;;  %v2313_v3 = vadd.f32 %v2312_v1, %v2311_v62  ;;  %v2376_v5 = vpop.f32.mrb[35].mxu1 }
 0x1a2   : > { %v2377_v8 = vadd.f32 %v2376_v5, %v2375_v0 }
 0x1a3   : > { %v1685_v9 = vadd.f32 %v2374_v63, %v1588_v2  ;;  %v1591_v10 = vadd.f32 %v2313_v3, %v3059_v14 }
 0x1a5   : > { %v1747_v13 = vadd.f32 %v1685_v9, %v447_v7  ;;  %v1688_v15 = vadd.f32 %v2377_v8, %v1591_v10  ;;  %v2314_v16 = vpop.f32.mrb[36].mxu0 }
 0x1a6   : > { %v2378_v17 = vpop.f32.mrb[36].mxu1  ;;  %v2315_v18 = vpop.f32.mrb[37].mxu0 }
 0x1a7   : > { %1763 = vst [vmem:[%s3276_s2] sm:$0xff] %v1747_v13  ;;  %v1748_v12 = vadd.f32 %v1688_v15, %v448_v11  ;;  %v2316_v19 = vadd.f32 %v2315_v18, %v2314_v16  ;;  %v2379_v21 = vpop.f32.mrb[37].mxu1  ;;  %v2317_v23 = vpop.f32.mrb[38].mxu0  ;;  %v453_v15 = vld [vmem:[%s3276_s2 + $0x30] sm:$0xff] }
 0x1a8   : > { %v2380_v24 = vadd.f32 %v2379_v21, %v2378_v17  ;;  %v2381_v25 = vpop.f32.mrb[38].mxu1  ;;  %v2318_v14 = vpop.f32.mrb[39].mxu0 }
 0x1a9   : > { %1764 = vst [vmem:[%s3276_s2 + $0x8] sm:$0xff] %v1748_v12  ;;  %v1596_v27 = vadd.f32 %v2316_v19, %v3061_v26  ;;  %v2319_v29 = vadd.f32 %v2318_v14, %v2317_v23  ;;  %v2382_v30 = vpop.f32.mrb[39].mxu1  ;;  %v454_v12 = vld [vmem:[%s3276_s2 + $0x38] sm:$0xff] }
 0x1aa   : > { %v2383_v32 = vadd.f32 %v2382_v30, %v2381_v25 }
 0x1ab   : > { %v1693_v33 = vadd.f32 %v2380_v24, %v1596_v27  ;;  %v1599_v34 = vadd.f32 %v2319_v29, %v3063_v28 }
 0x1ad   : > { %v1749_v37 = vadd.f32 %v1693_v33, %v449_v31  ;;  %v1696_v39 = vadd.f32 %v2383_v32, %v1599_v34  ;;  %v2320_v41 = vpop.f32.mrb[40].mxu0 }
 0x1ae   : > { %v2384_v43 = vpop.f32.mrb[40].mxu1  ;;  %v2321_v44 = vpop.f32.mrb[41].mxu0 }
 0x1af   : > { %1765 = vst [vmem:[%s3276_s2 + $0x10] sm:$0xff] %v1749_v37  ;;  %v1750_v26 = vadd.f32 %v1696_v39, %v450_v35  ;;  %v2322_v45 = vadd.f32 %v2321_v44, %v2320_v41  ;;  %v2385_v46 = vpop.f32.mrb[41].mxu1  ;;  %v2323_v47 = vpop.f32.mrb[42].mxu0  ;;  %v455_v35 = vld [vmem:[%s3276_s2 + $0x40] sm:$0xff] }
 0x1b0   : > { %v2386_v48 = vadd.f32 %v2385_v46, %v2384_v43  ;;  %v2387_v49 = vpop.f32.mrb[42].mxu1  ;;  %v2324_v28 = vpop.f32.mrb[43].mxu0  ;;  %v456_v43 = vld [vmem:[%s3276_s2 + $0x48] sm:$0xff] }
 0x1b1   : > { %1766 = vst [vmem:[%s3276_s2 + $0x18] sm:$0xff] %v1750_v26  ;;  %v1604_v50 = vadd.f32 %v2322_v45, %v3065_v40  ;;  %v2325_v51 = vadd.f32 %v2324_v28, %v2323_v47  ;;  %v2388_v53 = vpop.f32.mrb[43].mxu1 }
 0x1b2   : > { %v2389_v58 = vadd.f32 %v2388_v53, %v2387_v49 }
 0x1b3   : > { %v1701_v59 = vadd.f32 %v2386_v48, %v1604_v50  ;;  %v1607_v60 = vadd.f32 %v2325_v51, %v3067_v42 }
 0x1b5   : > { %v1751_v62 = vadd.f32 %v1701_v59, %v451_v57  ;;  %v1704_v63 = vadd.f32 %v2389_v58, %v1607_v60  ;;  %v2326_v0 = vpop.f32.mrb[44].mxu0  ;;  %v457_v59 = vld [vmem:[%s3276_s2 + $0x50] sm:$0xff] }
 0x1b6   : > { %v2390_v1 = vpop.f32.mrb[44].mxu1  ;;  %v2327_v2 = vpop.f32.mrb[45].mxu0 }
 0x1b7   : > { %1767 = vst [vmem:[%s3276_s2 + $0x20] sm:$0xff] %v1751_v62  ;;  %v1752_v40 = vadd.f32 %v1704_v63, %v452_v61  ;;  %v2328_v3 = vadd.f32 %v2327_v2, %v2326_v0  ;;  %v2391_v5 = vpop.f32.mrb[45].mxu1  ;;  %v2329_v7 = vpop.f32.mrb[46].mxu0  ;;  %v458_v63 = vld [vmem:[%s3276_s2 + $0x58] sm:$0xff] }
 0x1b8   : > { %v2392_v8 = vadd.f32 %v2391_v5, %v2390_v1  ;;  %v2393_v9 = vpop.f32.mrb[46].mxu1  ;;  %v2330_v42 = vpop.f32.mrb[47].mxu0 }
 0x1b9   : > { %1768 = vst [vmem:[%s3276_s2 + $0x28] sm:$0xff] %v1752_v40  ;;  %v1612_v10 = vadd.f32 %v2328_v3, %v3069_v54  ;;  %v2331_v11 = vadd.f32 %v2330_v42, %v2329_v7  ;;  %v2394_v13 = vpop.f32.mrb[47].mxu1 }
 0x1ba   : > { %v2395_v16 = vadd.f32 %v2394_v13, %v2393_v9 }
 0x1bb   : > { %v1709_v17 = vadd.f32 %v2392_v8, %v1612_v10  ;;  %v1615_v18 = vadd.f32 %v2331_v11, %v3071_v56 }
 0x1bd   : > { %v1753_v19 = vadd.f32 %v1709_v17, %v453_v15  ;;  %v1712_v21 = vadd.f32 %v2395_v16, %v1615_v18  ;;  %v2332_v23 = vpop.f32.mrb[48].mxu0  ;;  %v459_v15 = vld [vmem:[%s3276_s2 + $0x60] sm:$0xff] }
 0x1be   : > { %v2396_v24 = vpop.f32.mrb[48].mxu1  ;;  %v2333_v25 = vpop.f32.mrb[49].mxu0 }
 0x1bf   : > { %1769 = vst [vmem:[%s3276_s2 + $0x30] sm:$0xff] %v1753_v19  ;;  %v1754_v54 = vadd.f32 %v1712_v21, %v454_v12  ;;  %v2334_v14 = vadd.f32 %v2333_v25, %v2332_v23  ;;  %v2397_v27 = vpop.f32.mrb[49].mxu1  ;;  %v2335_v29 = vpop.f32.mrb[50].mxu0  ;;  %v460_v12 = vld [vmem:[%s3276_s2 + $0x68] sm:$0xff] }
 0x1c0   : > { %v2398_v30 = vadd.f32 %v2397_v27, %v2396_v24  ;;  %v2399_v31 = vpop.f32.mrb[50].mxu1  ;;  %v2336_v56 = vpop.f32.mrb[51].mxu0 }
 0x1c1   : > { %1770 = vst [vmem:[%s3276_s2 + $0x38] sm:$0xff] %v1754_v54  ;;  %v1620_v32 = vadd.f32 %v2334_v14, %v3073_v4  ;;  %v2337_v33 = vadd.f32 %v2336_v56, %v2335_v29  ;;  %v2400_v34 = vpop.f32.mrb[51].mxu1 }
 0x1c2   : > { %v2401_v37 = vadd.f32 %v2400_v34, %v2399_v31 }
 0x1c3   : > { %v1717_v39 = vadd.f32 %v2398_v30, %v1620_v32  ;;  %v1623_v41 = vadd.f32 %v2337_v33, %v3075_v6  ;;  %v461_v33 = vld [vmem:[%s3276_s2 + $0x70] sm:$0xff] }
 0x1c5   : > { %v1755_v44 = vadd.f32 %v1717_v39, %v455_v35  ;;  %v1720_v26 = vadd.f32 %v2401_v37, %v1623_v41  ;;  %v2338_v45 = vpop.f32.mrb[52].mxu0  ;;  %v462_v39 = vld [vmem:[%s3276_s2 + $0x78] sm:$0xff] }
 0x1c6   : > { %v2402_v46 = vpop.f32.mrb[52].mxu1  ;;  %v2339_v47 = vpop.f32.mrb[53].mxu0 }
 0x1c7   : > { %1771 = vst [vmem:[%s3276_s2 + $0x40] sm:$0xff] %v1755_v44  ;;  %v1756_v4 = vadd.f32 %v1720_v26, %v456_v43  ;;  %v2340_v48 = vadd.f32 %v2339_v47, %v2338_v45  ;;  %v2403_v49 = vpop.f32.mrb[53].mxu1  ;;  %v2341_v28 = vpop.f32.mrb[54].mxu0  ;;  %v1784_v44 = vld [vmem:[%s3276_s2 + $0x8] sm:$0xff] (!%p2155_p7)  ;;  %v1785_v26 = vld [vmem:[%s3276_s2 + $0x10] sm:$0xff] (!%p2155_p7) }
 0x1c8   : > { %v2404_v50 = vadd.f32 %v2403_v49, %v2402_v46  ;;  %v2405_v51 = vpop.f32.mrb[54].mxu1  ;;  %v2342_v6 = vpop.f32.mrb[55].mxu0  ;;  %v1821_v47 = vmul.f32 (!%p2155_p7), %v1784_v44, %v1784_v44  ;;  %v1822_v49 = vmul.f32 (!%p2155_p7), %v1785_v26, %v1785_v26 }
 0x1c9   : > { %1772 = vst [vmem:[%s3276_s2 + $0x48] sm:$0xff] %v1756_v4  ;;  %v1628_v53 = vadd.f32 %v2340_v48, %v3077_v20  ;;  %v2343_v57 = vadd.f32 %v2342_v6, %v2341_v28  ;;  %v2406_v58 = vpop.f32.mrb[55].mxu1  ;;  %v1786_v4 = vld [vmem:[%s3276_s2 + $0x18] sm:$0xff] (!%p2155_p7)  ;;  %v1787_v28 = vld [vmem:[%s3276_s2 + $0x20] sm:$0xff] (!%p2155_p7) }
 0x1ca   : > { %v2407_v60 = vadd.f32 %v2406_v58, %v2405_v51  ;;  %v1823_v51 = vmul.f32 (!%p2155_p7), %v1786_v4, %v1786_v4  ;;  %v1824_v58 = vmul.f32 (!%p2155_p7), %v1787_v28, %v1787_v28 }
 0x1cb   : > { %v1725_v61 = vadd.f32 %v2404_v50, %v1628_v53  ;;  %v1631_v62 = vadd.f32 %v2343_v57, %v3079_v22  ;;  %v1788_v53 = vld [vmem:[%s3276_s2 + $0x28] sm:$0xff] (!%p2155_p7) }
 0x1cd   : > { %v1757_v0 = vadd.f32 %v1725_v61, %v457_v59  ;;  %v1728_v1 = vadd.f32 %v2407_v60, %v1631_v62  ;;  %v2344_v2 = vpop.f32.mrb[56].mxu0  ;;  %v1789_v60 = vld [vmem:[%s3276_s2 + $0x30] sm:$0xff] (!%p2155_p7)  ;;  %v1825_v62 = vmul.f32 (!%p2155_p7), %v1788_v53, %v1788_v53 }
 0x1ce   : > { %v2408_v40 = vpop.f32.mrb[56].mxu1  ;;  %v2345_v3 = vpop.f32.mrb[57].mxu0 }
 0x1cf   : > { %1773 = vst [vmem:[%s3276_s2 + $0x50] sm:$0xff] %v1757_v0  ;;  %v1758_v20 = vadd.f32 %v1728_v1, %v458_v63  ;;  %v2346_v5 = vadd.f32 %v2345_v3, %v2344_v2  ;;  %v2409_v7 = vpop.f32.mrb[57].mxu1  ;;  %v2347_v8 = vpop.f32.mrb[58].mxu0  ;;  %v1790_v0 = vld [vmem:[%s3276_s2 + $0x38] sm:$0xff] (!%p2155_p7)  ;;  %v1826_v2 = vmul.f32 (!%p2155_p7), %v1789_v60, %v1789_v60  ;;  %v1791_v3 = vld [vmem:[%s3276_s2 + $0x40] sm:$0xff] (!%p2155_p7) }
 0x1d0   : > { %v2410_v9 = vadd.f32 %v2409_v7, %v2408_v40  ;;  %v2411_v42 = vpop.f32.mrb[58].mxu1  ;;  %v2348_v22 = vpop.f32.mrb[59].mxu0 }
 0x1d1   : > { %1774 = vst [vmem:[%s3276_s2 + $0x58] sm:$0xff] %v1758_v20  ;;  %v1636_v10 = vadd.f32 %v2346_v5, %v3081_v36  ;;  %v2349_v11 = vadd.f32 %v2348_v22, %v2347_v8  ;;  %v2412_v13 = vpop.f32.mrb[59].mxu1  ;;  %v1827_v5 = vmul.f32 (!%p2155_p7), %v1790_v0, %v1790_v0  ;;  %v1792_v8 = vld [vmem:[%s3276_s2 + $0x48] sm:$0xff] (!%p2155_p7) }
 0x1d2   : > { %v2413_v16 = vadd.f32 %v2412_v13, %v2411_v42  ;;  %v1828_v42 = vmul.f32 (!%p2155_p7), %v1791_v3, %v1791_v3  ;;  %v1829_v13 = vmul.f32 (!%p2155_p7), %v1792_v8, %v1792_v8 }
 0x1d3   : > { %v1733_v17 = vadd.f32 %v2410_v9, %v1636_v10  ;;  %v1639_v18 = vadd.f32 %v2349_v11, %v3083_v38 }
 0x1d5   : > { %v1759_v19 = vadd.f32 %v1733_v17, %v459_v15  ;;  %v1736_v21 = vadd.f32 %v2413_v16, %v1639_v18  ;;  %v2350_v23 = vpop.f32.mrb[60].mxu0 }
 0x1d6   : > { %v2414_v24 = vpop.f32.mrb[60].mxu1  ;;  %v2351_v25 = vpop.f32.mrb[61].mxu0  ;;  %v1793_v10 = vld [vmem:[%s3276_s2 + $0x50] sm:$0xff] (!%p2155_p7) }
 0x1d7   : > { %1775 = vst [vmem:[%s3276_s2 + $0x60] sm:$0xff] %v1759_v19  ;;  %v1760_v36 = vadd.f32 %v1736_v21, %v460_v12  ;;  %v2352_v54 = vadd.f32 %v2351_v25, %v2350_v23  ;;  %v2415_v14 = vpop.f32.mrb[61].mxu1  ;;  %v2353_v27 = vpop.f32.mrb[62].mxu0  ;;  %v1830_v18 = vmul.f32 (!%p2155_p7), %v1793_v10, %v1793_v10 }
 0x1d8   : > { %v2416_v29 = vadd.f32 %v2415_v14, %v2414_v24  ;;  %v2417_v30 = vpop.f32.mrb[62].mxu1  ;;  %v2354_v38 = vpop.f32.mrb[63].mxu0  ;;  %v1794_v16 = vld [vmem:[%s3276_s2 + $0x58] sm:$0xff] (!%p2155_p7) }
 0x1d9   : > { %1776 = vst [vmem:[%s3276_s2 + $0x68] sm:$0xff] %v1760_v36  ;;  %v1644_v31 = vadd.f32 %v2352_v54, %v3085_v52  ;;  %v2355_v56 = vadd.f32 %v2354_v38, %v2353_v27  ;;  %v2418_v32 = vpop.f32.mrb[63].mxu1  ;;  %v1831_v23 = vmul.f32 (!%p2155_p7), %v1794_v16, %v1794_v16 }
 0x1da   : > { %v2419_v34 = vadd.f32 %v2418_v32, %v2417_v30 }
 0x1db   : > { %v1741_v35 = vadd.f32 %v2416_v29, %v1644_v31  ;;  %v1647_v37 = vadd.f32 %v2355_v56, %v3087_v55  ;;  %1782 = sbr.rel (%p2155_p7) target bundleno = 522 (0x20a), region = 63  ;;  %v1783_v55 = vld [vmem:[%s3276_s2] sm:$0xff] (!%p2155_p7) }
 0x1dc   : > { %v1799_v45 = vadd.f32 (!%p2155_p7), %v1784_v44, %v1783_v55  ;;  %v1820_v46 = vmul.f32 (!%p2155_p7), %v1783_v55, %v1783_v55 }
 0x1dd   : > { %v1761_v41 = vadd.f32 %v1741_v35, %v461_v33  ;;  %v1744_v43 = vadd.f32 %v2419_v34, %v1647_v37 }
 0x1de   : > { %v1800_v48 = vadd.f32 (!%p2155_p7), %v1799_v45, %v1785_v26  ;;  %v1836_v6 = vadd.f32 (!%p2155_p7), %v1821_v47, %v1820_v46  ;;  %v1795_v19 = vld [vmem:[%s3276_s2 + $0x60] sm:$0xff] (!%p2155_p7) }
 0x1df   : > { %1777 = vst [vmem:[%s3276_s2 + $0x70] sm:$0xff] %v1761_v41  ;;  %v1762_v52 = vadd.f32 %v1744_v43, %v462_v39  ;;  %v1832_v54 = vmul.f32 (!%p2155_p7), %v1795_v19, %v1795_v19  ;;  %v1857_v41 = vlaneseq (!%p2155_p7) }
 0x1e0   : > { %v1801_v50 = vadd.f32 (!%p2155_p7), %v1800_v48, %v1786_v4  ;;  %v1837_v59 = vadd.f32 (!%p2155_p7), %v1836_v6, %v1822_v49  ;;  %v1796_v25 = vld [vmem:[%s3276_s2 + $0x68] sm:$0xff] (!%p2155_p7) }
 0x1e1   : > { %1778 = vst [vmem:[%s3276_s2 + $0x78] sm:$0xff] %v1762_v52  ;;  %v1833_v30 = vmul.f32 (!%p2155_p7), %v1796_v25, %v1796_v25  ;;  %v1858_v26 = vshrl.u32 (!%p2155_p7), %v1857_v41, 7 }
 0x1e2   : > { %v1802_v57 = vadd.f32 %v1801_v50, %v1787_v28  ;;  %v1838_v63 = vadd.f32 %v1837_v59, %v1823_v51 }
 0x1e3   : > { %vm1859_vm0 = vcmp.eq.s32.totalorder %v1858_v26, 0 }
 0x1e4   : > { %v1803_v61 = vadd.f32 %v1802_v57, %v1788_v53  ;;  %v1839_v40 = vadd.f32 %v1838_v63, %v1824_v58 }
 0x1e6   : > { %v1804_v1 = vadd.f32 %v1803_v61, %v1789_v60  ;;  %v1840_v7 = vadd.f32 %v1839_v40, %v1825_v62  ;;  %v1797_v27 = vld [vmem:[%s3276_s2 + $0x70] sm:$0xff] }
 0x1e7   : > { %v1834_v32 = vmul.f32 %v1797_v27, %v1797_v27 }
 0x1e8   : > { %v1805_v20 = vadd.f32 %v1804_v1, %v1790_v0  ;;  %v1841_v22 = vadd.f32 %v1840_v7, %v1826_v2  ;;  %v1798_v31 = vld [vmem:[%s3276_s2 + $0x78] sm:$0xff] }
 0x1e9   : > { %v1835_v35 = vmul.f32 %v1798_v31, %v1798_v31 }
 0x1ea   : > { %v1806_v9 = vadd.f32 %v1805_v20, %v1791_v3  ;;  %v1842_v15 = vadd.f32 %v1841_v22, %v1827_v5 }
 0x1ec   : > { %v1807_v11 = vadd.f32 %v1806_v9, %v1792_v8  ;;  %v1843_v12 = vadd.f32 %v1842_v15, %v1828_v42 }
 0x1ee   : > { %v1808_v17 = vadd.f32 %v1807_v11, %v1793_v10  ;;  %v1844_v24 = vadd.f32 %v1843_v12, %v1829_v13 }
 0x1f0   : > { %v1809_v21 = vadd.f32 %v1808_v17, %v1794_v16  ;;  %v1845_v14 = vadd.f32 %v1844_v24, %v1830_v18 }
 0x1f2   : > { %v1810_v36 = vadd.f32 %v1809_v21, %v1795_v19  ;;  %v1846_v38 = vadd.f32 %v1845_v14, %v1831_v23 }
 0x1f4   : > { %v1811_v29 = vadd.f32 %v1810_v36, %v1796_v25  ;;  %v1847_v33 = vadd.f32 %v1846_v38, %v1832_v54 }
 0x1f6   : > { %v1812_v56 = vadd.f32 %v1811_v29, %v1797_v27  ;;  %v1848_v37 = vadd.f32 %v1847_v33, %v1833_v30 }
 0x1f8   : > { %v1813_v34 = vadd.f32 %v1812_v56, %v1798_v31  ;;  %v1849_v43 = vadd.f32 %v1848_v37, %v1834_v32 }
 0x1fa   : > { %v1814_v39 = vrot.slane %v1813_v34, 4  ;;  %v1850_v55 = vadd.f32 %v1849_v43, %v1835_v35 }
 0x1fc   : > { %v1815_v52 = vadd.f32 %v1814_v39, %v1813_v34  ;;  %v1851_v45 = vrot.slane %v1850_v55, 4 }
 0x1fe   : > { %v1816_v44 = vrot.slane %v1815_v52, 2  ;;  %v1852_v47 = vadd.f32 %v1851_v45, %v1850_v55 }
 0x200   : > { %v1817_v46 = vadd.f32 %v1816_v44, %v1815_v52  ;;  %v1853_v48 = vrot.slane %v1852_v47, 2 }
 0x202   : > { %v1818_v4 = vrot.slane %v1817_v46, 1  ;;  %v1854_v28 = vadd.f32 %v1853_v48, %v1852_v47 }
 0x204   : > { %v1819_v49 = vadd.f32 %v1818_v4, %v1817_v46  ;;  %v1855_v51 = vrot.slane %v1854_v28, 1 }
 0x206   : > { %v1860_v50 = vsel %vm1859_vm0, %v1819_v49, 0.0  ;;  %v1856_v6 = vadd.f32 %v1855_v51, %v1854_v28 }
 0x207   : > { %1861 = vst [vmem:[%s3277_s3] sm:$0xff] %v1860_v50 }
 0x208   : > { %v1862_v53 = vsel %vm1859_vm0, %v1856_v6, 0.0 }
 0x209   : > { %1863 = vst [vmem:[%s3278_s4] sm:$0xff] %v1862_v53 }
 0x20a PF: > { %s18_s20 = sadd.s32 1, %s2615_s20   ;;  %s3281_s15 = smov %s2599_s16 }
 0x20b   : > { %p15_p2 = scmp.ge.s32.totalorder %s18_s20, 6   ;;  %s3282_s16 = smov %s2603_s17 }
 0x20c   : > { %s3283_s17 = smov %s2694_s27  ;;  %s3284_s18 = smov %s2611_s19 }
 0x20d   : > { %s3285_s19 = smov %s3287_s22  ;;  %17 = sbr.rel (!%p15_p2) target bundleno = 4 (0x4), region = 131 }
 0x214   :  { %1914 = vsyncpa [#allocation4], 1 }
 0x215   :  { %1916 = vsyncpa [#allocation4 + $0x1], 1 }

// kernel: tile.23
= control target key start
LH: loop header
LB: loop body
LE: loop exit
PB: predicated region body
PF: predicated region fallthrough
CT: control target
= control target key end

     0   :  { %s22_s0 = inlined_call_operand.vmem [shape: f32[64], index: 0, kind: input, shape index: {}]   ;;  %s23_s1 = inlined_call_operand.vmem [shape: f32[2,64], index: 1, kind: output, shape index: {}]  }
   0x1   :  { %v4_v0 = vld [vmem:[%s22_s0] ss:$0 sm:$0xff] }
   0x2   :  { %5 = vst [vmem:[%s23_s1] sm:$0x3] %v4_v0 }

// kernel: tile.28
= control target key start
LH: loop header
LB: loop body
LE: loop exit
PB: predicated region body
PF: predicated region fallthrough
CT: control target
= control target key end

     0   :  { %vm7_vm0 = vcmask 523264   ;;  %vm13_vm1 = vcmask 1048064   ;;  %s39_s0 = inlined_call_operand.vmem [shape: f32[2,64], index: 0, kind: input, shape index: {}]   ;;  %s40_s1 = inlined_call_operand.vmem [shape: f32[1,128], index: 1, kind: output, shape index: {}]  }
   0x1   :  { %v4_v0 = vld [vmem:[%s39_s0] sm:$0x3]  ;;  %s22_s0 = smov 64  }
   0x2   :  { %5 = vst [vmem:[#allocation1] sm:$0x3] %v4_v0 }
   0x9   :  { %v10_v1 = vld [vmem:[#allocation1 + $0x1] sm:$0x1]   ;;  %v6_v2 = vld [vmem:[#allocation1] sm:$0x1]  }
   0xa   :  { %11 = vrot.lane.b32.xlu0 %v10_v1, %s22_s0  ;;  %8 = vst.msk [vmem:[#allocation0] sm:$0x1] %vm7_vm0, %v6_v2  }
  0x7c   :  { %v12_v3 = vpop.permute.xlu0 %11  }
  0x7d   :  { %14 = vst.msk [vmem:[#allocation0] sm:$0x1] %vm13_vm1, %v12_v3  }
  0x84   :  { %v18_v4 = vld [vmem:[#allocation0] sm:$0x1] }
  0x85   :  { %20 = vst [vmem:[%s40_s1] sm:$0x1] %v18_v4 }

// kernel: generator_forward.14
= control target key start
LH: loop header
LB: loop body
LE: loop exit
PB: predicated region body
PF: predicated region fallthrough
CT: control target
= control target key end

     0   :  { %s719_s0 = inlined_call_operand.vmem [shape: f32[256,128], index: 0, kind: input, shape index: {}]   ;;  %s720_s1 = inlined_call_operand.vmem [shape: f32[1,128], index: 1, kind: input, shape index: {}]   ;;  %s721_s2 = inlined_call_operand.vmem [shape: f32[1,128], index: 2, kind: input, shape index: {}]   ;;  %s722_s3 = inlined_call_operand.vmem [shape: bf16[256,128], index: 3, kind: output, shape index: {}]  }
   0x1   :  { %v14_v0 = vld [vmem:[%s719_s0] sm:$0xff]  ;;  %v15_v1 = vld [vmem:[%s719_s0 + $0x8] sm:$0xff]  ;;  %v16_v6 = vld [vmem:[%s719_s0 + $0x10] sm:$0xff] }
   0x2   :  { %v510_v2 = vld [vmem:[%s720_s1] ss:$0 sm:$0xff]  ;;  %v17_v7 = vld [vmem:[%s719_s0 + $0x18] sm:$0xff]  ;;  %v19_v11 = vld [vmem:[%s719_s0 + $0x28] sm:$0xff] }
   0x3   :  { %v53_v3 = vmul.f32 %v510_v2, %v14_v0  ;;  %v54_v4 = vmul.f32 %v510_v2, %v15_v1  ;;  %v517_v5 = vld [vmem:[%s721_s2] ss:$0 sm:$0xff]  ;;  %v55_v8 = vmul.f32 %v510_v2, %v16_v6  ;;  %v56_v9 = vmul.f32 %v510_v2, %v17_v7  ;;  %v20_v12 = vld [vmem:[%s719_s0 + $0x30] sm:$0xff]  ;;  %v21_v17 = vld [vmem:[%s719_s0 + $0x38] sm:$0xff] }
   0x4   :  { %v18_v10 = vld [vmem:[%s719_s0 + $0x20] sm:$0xff]  ;;  %v58_v16 = vmul.f32 %v510_v2, %v19_v11  ;;  %v59_v20 = vmul.f32 %v510_v2, %v20_v12  ;;  %v60_v21 = vmul.f32 %v510_v2, %v21_v17  ;;  %v23_v27 = vld [vmem:[%s719_s0 + $0x48] sm:$0xff]  ;;  %v24_v32 = vld [vmem:[%s719_s0 + $0x50] sm:$0xff] }
   0x5   :  { %v92_v13 = vadd.f32 %v517_v5, %v53_v3  ;;  %v93_v14 = vadd.f32 %v517_v5, %v54_v4  ;;  %v57_v15 = vmul.f32 %v510_v2, %v18_v10  ;;  %v94_v18 = vadd.f32 %v517_v5, %v55_v8  ;;  %v22_v22 = vld [vmem:[%s719_s0 + $0x40] sm:$0xff]  ;;  %v25_v33 = vld [vmem:[%s719_s0 + $0x58] sm:$0xff]  ;;  %v27_v39 = vld [vmem:[%s719_s0 + $0x68] sm:$0xff] }
   0x6   :  { %v95_v19 = vadd.f32 %v517_v5, %v56_v9  ;;  %v97_v26 = vadd.f32 %v517_v5, %v58_v16  ;;  %v98_v30 = vadd.f32 %v517_v5, %v59_v20  ;;  %v99_v31 = vadd.f32 %v517_v5, %v60_v21  ;;  %v26_v38 = vld [vmem:[%s719_s0 + $0x60] sm:$0xff]  ;;  %v28_v44 = vld [vmem:[%s719_s0 + $0x70] sm:$0xff]  ;;  %v29_v49 = vld [vmem:[%s719_s0 + $0x78] sm:$0xff] }
   0x7   :  { %v124_v23 = vmax.f32 %v92_v13, 0.0  ;;  %v125_v24 = vmax.f32 %v93_v14, 0.0  ;;  %v96_v25 = vadd.f32 %v517_v5, %v57_v15  ;;  %v126_v28 = vmax.f32 %v94_v18, 0.0  ;;  %v30_v54 = vld [vmem:[%s719_s0 + $0x80] sm:$0xff]  ;;  %v31_v63 = vld [vmem:[%s719_s0 + $0x88] sm:$0xff]  ;;  %v32_v6 = vld [vmem:[%s719_s0 + $0x90] sm:$0xff] }
   0x8   :  { %v127_v29 = vmax.f32 %v95_v19, 0.0  ;;  %v129_v36 = vmax.f32 %v97_v26, 0.0  ;;  %v61_v37 = vmul.f32 %v510_v2, %v22_v22  ;;  %v130_v41 = vmax.f32 %v98_v30, 0.0  ;;  %v33_v7 = vld [vmem:[%s719_s0 + $0x98] sm:$0xff]  ;;  %v34_v12 = vld [vmem:[%s719_s0 + $0xa0] sm:$0xff]  ;;  %v35_v13 = vld [vmem:[%s719_s0 + $0xa8] sm:$0xff] }
   0x9   :  { %v389_v34 = vpack.c.bf16 %v125_v24, %v124_v23  ;;  %v128_v35 = vmax.f32 %v96_v25, 0.0  ;;  %v131_v42 = vmax.f32 %v99_v31, 0.0  ;;  %v62_v43 = vmul.f32 %v510_v2, %v23_v27  ;;  %v36_v18 = vld [vmem:[%s719_s0 + $0xb0] sm:$0xff]  ;;  %v37_v23 = vld [vmem:[%s719_s0 + $0xb8] sm:$0xff] }
   0xa   :  { %v394_v40 = vpack.c.bf16 %v127_v29, %v126_v28  ;;  %v100_v46 = vadd.f32 %v517_v5, %v61_v37  ;;  %v63_v47 = vmul.f32 %v510_v2, %v24_v32  ;;  %v64_v48 = vmul.f32 %v510_v2, %v25_v33  ;;  %v38_v28 = vld [vmem:[%s719_s0 + $0xc0] sm:$0xff]  ;;  %v39_v37 = vld [vmem:[%s719_s0 + $0xc8] sm:$0xff] }
   0xb   :  { %390 = vst [vmem:[%s722_s3] sm:$0xff] %v389_v34   ;;  %v399_v45 = vpack.c.bf16 %v129_v36, %v128_v35  ;;  %v404_v50 = vpack.c.bf16 %v131_v42, %v130_v41  ;;  %v101_v51 = vadd.f32 %v517_v5, %v62_v43  ;;  %v65_v52 = vmul.f32 %v510_v2, %v26_v38  ;;  %v40_v42 = vld [vmem:[%s719_s0 + $0xd0] sm:$0xff]  ;;  %v41_v43 = vld [vmem:[%s719_s0 + $0xd8] sm:$0xff] }
   0xc   :  { %466 = vst [vmem:[%s722_s3 + $0x8] sm:$0xff] %v394_v40   ;;  %v66_v53 = vmul.f32 %v510_v2, %v27_v39  ;;  %v132_v55 = vmax.f32 %v100_v46, 0.0  ;;  %v102_v56 = vadd.f32 %v517_v5, %v63_v47  ;;  %v103_v57 = vadd.f32 %v517_v5, %v64_v48  ;;  %v42_v48 = vld [vmem:[%s719_s0 + $0xe0] sm:$0xff] }
   0xd   :  { %467 = vst [vmem:[%s722_s3 + $0x10] sm:$0xff] %v399_v45   ;;  %v67_v58 = vmul.f32 %v510_v2, %v28_v44  ;;  %468 = vst [vmem:[%s722_s3 + $0x18] sm:$0xff] %v404_v50   ;;  %v133_v59 = vmax.f32 %v101_v51, 0.0  ;;  %v104_v60 = vadd.f32 %v517_v5, %v65_v52  ;;  %v68_v62 = vmul.f32 %v510_v2, %v29_v49  ;;  %v43_v49 = vld [vmem:[%s719_s0 + $0xe8] sm:$0xff] }
   0xe   :  { %v105_v61 = vadd.f32 %v517_v5, %v66_v53  ;;  %v134_v0 = vmax.f32 %v102_v56, 0.0  ;;  %v135_v1 = vmax.f32 %v103_v57, 0.0  ;;  %v69_v4 = vmul.f32 %v510_v2, %v30_v54  ;;  %v44_v54 = vld [vmem:[%s719_s0 + $0xf0] sm:$0xff] }
   0xf   :  { %v106_v3 = vadd.f32 %v517_v5, %v67_v58  ;;  %v409_v8 = vpack.c.bf16 %v133_v59, %v132_v55  ;;  %v136_v9 = vmax.f32 %v104_v60, 0.0  ;;  %v107_v11 = vadd.f32 %v517_v5, %v68_v62  ;;  %v45_v59 = vld [vmem:[%s719_s0 + $0xf8] sm:$0xff] }
  0x10   :  { %v137_v10 = vmax.f32 %v105_v61, 0.0  ;;  %v414_v14 = vpack.c.bf16 %v135_v1, %v134_v0  ;;  %v70_v16 = vmul.f32 %v510_v2, %v31_v63  ;;  %v108_v17 = vadd.f32 %v517_v5, %v69_v4 }
  0x11   :  { %v138_v15 = vmax.f32 %v106_v3, 0.0  ;;  %469 = vst [vmem:[%s722_s3 + $0x20] sm:$0xff] %v409_v8   ;;  %v139_v20 = vmax.f32 %v107_v11, 0.0  ;;  %v71_v21 = vmul.f32 %v510_v2, %v32_v6  ;;  %v72_v22 = vmul.f32 %v510_v2, %v33_v7 }
  0x12   :  { %v419_v19 = vpack.c.bf16 %v137_v10, %v136_v9  ;;  %470 = vst [vmem:[%s722_s3 + $0x28] sm:$0xff] %v414_v14   ;;  %v109_v24 = vadd.f32 %v517_v5, %v70_v16  ;;  %v140_v25 = vmax.f32 %v108_v17, 0.0  ;;  %v73_v26 = vmul.f32 %v510_v2, %v34_v12 }
  0x13   :  { %v74_v27 = vmul.f32 %v510_v2, %v35_v13  ;;  %v424_v29 = vpack.c.bf16 %v139_v20, %v138_v15  ;;  %v110_v30 = vadd.f32 %v517_v5, %v71_v21  ;;  %v111_v31 = vadd.f32 %v517_v5, %v72_v22 }
  0x14   :  { %471 = vst [vmem:[%s722_s3 + $0x30] sm:$0xff] %v419_v19   ;;  %v75_v32 = vmul.f32 %v510_v2, %v36_v18  ;;  %v141_v33 = vmax.f32 %v109_v24, 0.0  ;;  %v112_v34 = vadd.f32 %v517_v5, %v73_v26  ;;  %v76_v36 = vmul.f32 %v510_v2, %v37_v23 }
  0x15   :  { %v113_v35 = vadd.f32 %v517_v5, %v74_v27  ;;  %472 = vst [vmem:[%s722_s3 + $0x38] sm:$0xff] %v424_v29   ;;  %v142_v38 = vmax.f32 %v110_v30, 0.0  ;;  %v143_v39 = vmax.f32 %v111_v31, 0.0  ;;  %v77_v41 = vmul.f32 %v510_v2, %v38_v28 }
  0x16   :  { %v114_v40 = vadd.f32 %v517_v5, %v75_v32  ;;  %v429_v44 = vpack.c.bf16 %v141_v33, %v140_v25  ;;  %v144_v45 = vmax.f32 %v112_v34, 0.0  ;;  %v115_v47 = vadd.f32 %v517_v5, %v76_v36 }
  0x17   :  { %v145_v46 = vmax.f32 %v113_v35, 0.0  ;;  %v434_v50 = vpack.c.bf16 %v143_v39, %v142_v38  ;;  %v78_v52 = vmul.f32 %v510_v2, %v39_v37  ;;  %v116_v53 = vadd.f32 %v517_v5, %v77_v41 }
  0x18   :  { %v146_v51 = vmax.f32 %v114_v40, 0.0  ;;  %473 = vst [vmem:[%s722_s3 + $0x40] sm:$0xff] %v429_v44   ;;  %v147_v56 = vmax.f32 %v115_v47, 0.0  ;;  %v79_v57 = vmul.f32 %v510_v2, %v40_v42  ;;  %v80_v58 = vmul.f32 %v510_v2, %v41_v43 }
  0x19   :  { %v439_v55 = vpack.c.bf16 %v145_v46, %v144_v45  ;;  %474 = vst [vmem:[%s722_s3 + $0x48] sm:$0xff] %v434_v50   ;;  %v117_v60 = vadd.f32 %v517_v5, %v78_v52  ;;  %v148_v61 = vmax.f32 %v116_v53, 0.0  ;;  %v81_v62 = vmul.f32 %v510_v2, %v42_v48 }
  0x1a   :  { %v82_v63 = vmul.f32 %v510_v2, %v43_v49  ;;  %v444_v0 = vpack.c.bf16 %v147_v56, %v146_v51  ;;  %v118_v1 = vadd.f32 %v517_v5, %v79_v57  ;;  %v119_v3 = vadd.f32 %v517_v5, %v80_v58 }
  0x1b   :  { %475 = vst [vmem:[%s722_s3 + $0x50] sm:$0xff] %v439_v55   ;;  %v83_v4 = vmul.f32 %v510_v2, %v44_v54  ;;  %v149_v6 = vmax.f32 %v117_v60, 0.0  ;;  %v120_v7 = vadd.f32 %v517_v5, %v81_v62  ;;  %v84_v9 = vmul.f32 %v510_v2, %v45_v59 }
  0x1c   :  { %v121_v8 = vadd.f32 %v517_v5, %v82_v63  ;;  %476 = vst [vmem:[%s722_s3 + $0x58] sm:$0xff] %v444_v0   ;;  %v150_v10 = vmax.f32 %v118_v1, 0.0  ;;  %v151_v11 = vmax.f32 %v119_v3, 0.0 }
  0x1d   :  { %v122_v12 = vadd.f32 %v517_v5, %v83_v4  ;;  %v449_v13 = vpack.c.bf16 %v149_v6, %v148_v61  ;;  %v152_v14 = vmax.f32 %v120_v7, 0.0  ;;  %v123_v16 = vadd.f32 %v517_v5, %v84_v9 }
  0x1e   :  { %v153_v15 = vmax.f32 %v121_v8, 0.0  ;;  %v454_v17 = vpack.c.bf16 %v151_v11, %v150_v10 }
  0x1f   :  { %v154_v18 = vmax.f32 %v122_v12, 0.0  ;;  %477 = vst [vmem:[%s722_s3 + $0x60] sm:$0xff] %v449_v13   ;;  %v155_v19 = vmax.f32 %v123_v16, 0.0 }
  0x20   :  { %v459_v2 = vpack.c.bf16 %v153_v15, %v152_v14  ;;  %478 = vst [vmem:[%s722_s3 + $0x68] sm:$0xff] %v454_v17  }
  0x21   :  { %v464_v20 = vpack.c.bf16 %v155_v19, %v154_v18 }
  0x22   :  { %479 = vst [vmem:[%s722_s3 + $0x70] sm:$0xff] %v459_v2  }
  0x23   :  { %480 = vst [vmem:[%s722_s3 + $0x78] sm:$0xff] %v464_v20  }

// kernel: generator_forward.13
= control target key start
LH: loop header
LB: loop body
LE: loop exit
PB: predicated region body
PF: predicated region fallthrough
CT: control target
= control target key end

     0   :  { %s3823_s15 = smov 0   ;;  %s3825_s16 = smov 0   ;;  %s4745_s0 = inlined_call_operand.vmem [shape: bf16[512,2048], index: 0, kind: input, shape index: {}]   ;;  %s4746_s1 = inlined_call_operand.vmem [shape: bf16[2048,64], index: 1, kind: input, shape index: {}]   ;;  %s4747_s2 = inlined_call_operand.vmem [shape: f32[512,64], index: 2, kind: output, shape index: {0}]   ;;  %s4748_s3 = inlined_call_operand.vmem [shape: f32[16,64], index: 3, kind: output, shape index: {1}]   ;;  %s4749_s4 = inlined_call_operand.vmem [shape: f32[16,64], index: 4, kind: output, shape index: {2}]  }
   0x1   :  { %s3827_s17 = smov 0   ;;  %s3829_s18 = smov 0  }
   0x2   :  { %s3831_s19 = smov 0   ;;  %s3833_s20 = smov 0  }
   0x3   :  { %s3835_s21 = smov 0  }
   0x4 LB: > { %s24_s22 = sadd.s32 1, %s3787_s19  ;;  %s27_s23 = sadd.s32 1, %s3791_s20  ;;  %s3795_s21 = sphi %s3835_s21, %s15_s21   ;;  %s3791_s20 = sphi %s3833_s20, %s4755_s20   ;;  %s3787_s19 = sphi %s3831_s19, %s4754_s19   ;;  %s3783_s18 = sphi %s3829_s18, %s4753_s18   ;;  %s3779_s17 = sphi %s3827_s17, %s4752_s17   ;;  %s3775_s16 = sphi %s3825_s16, %s4751_s16   ;;  %s3771_s15 = sphi %s3823_s15, %s4750_s15  }
   0x5   : > { %p25_p0 = scmp.ge.s32.totalorder %s24_s22, 2  ;;  %p43_p1 = scmp.ne.s32.totalorder %s3775_s16, %s3771_s15 }
   0x6   : > { %p44_p2 = scmp.eq.s32.totalorder %s3795_s21, 0  ;;  %s36_s27 = sadd.s32 1, %s3775_s16 }
   0x7   : > { %s4757_s22 = smov (%p25_p0, %s24_s22), 0  ;;  %s4759_s23 = smov (!%p25_p0, %s27_s23), %s3791_s20 }
   0x8   : > { %p45_p3 = por %p44_p2, %p43_p1  ;;  %p29_p4 = scmp.ge.s32.totalorder %s4759_s23, 2 }
   0x9   : > { %s32_s24 = ssub.s32 %s3787_s19, %s4757_s22  ;;  %p2961_p6 = scmp.ge.s32.totalorder %s3795_s21, 4 }
   0xa   : > { %s4761_s23 = smov (%p29_p4, %s4759_s23), 0 }
   0xb   : > { %s31_s25 = ssub.s32 %s3791_s20, %s4761_s23  ;;  %173 = sbr.rel (%p2961_p6) target bundleno = 89 (0x59), region = 16 }
   0xc   : > { %s33_s26 = sor.u32 %s32_s24, %s31_s25 }
   0xd   : > { %p34_p5 = scmp.eq.s32.totalorder %s33_s26, 0 }
   0xf   : > { %s3874_s28 = scalar_select %p34_p5, %s3775_s16, %s36_s27  }
  0x12   : > { %176 = sbr.rel (!%p45_p3) target bundleno = 89 (0x59), region = 20  ;;  %s178_s29 = sand.u32 (%p45_p3), 1, %s3775_s16  }
  0x13   : > { %s2964_s30 = sshll.u32 (%p45_p3), %s3787_s19, 3  ;;  %s2962_s5 = sshll.u32 (%p45_p3), %s178_s29, 10 }
  0x14   : > { %s3171_s6 = sshll.u32 (%p45_p3), %s3791_s20, 9  ;;  %s3888_s12 = scalar_lea.vmem (%p45_p3), [#allocation2], %s2962_s5 }
  0x15   : > { %s184_s7 = sadd.s32 (%p45_p3), %s3171_s6, %s2964_s30 }
  0x16   : > { %s2966_s8 = sshll.u32 (%p45_p3), %s184_s7, 2 }
  0x17   : > { %s3883_s11 = scalar_lea.vmem (%p45_p3), %s4745_s0, %s2966_s8 }
  0x18   : > { %v199_v0 = vld [vmem:[%s3883_s11] sm:$0xff] (%p45_p3)  ;;  %v201_v1 = vld [vmem:[%s3883_s11 + $0x8] sm:$0xff] (%p45_p3)  ;;  %v203_v2 = vld [vmem:[%s3883_s11 + $0x10] sm:$0xff] (%p45_p3) }
  0x19   : > { %200 = vst [vmem:[%s3888_s12] sm:$0xff] %v199_v0  ;;  %202 = vst [vmem:[%s3888_s12 + $0x8] sm:$0xff] %v201_v1  ;;  %v205_v3 = vld [vmem:[%s3883_s11 + $0x18] sm:$0xff]  ;;  %v207_v4 = vld [vmem:[%s3883_s11 + $0x40] sm:$0xff] }
  0x1a   : > { %204 = vst [vmem:[%s3888_s12 + $0x10] sm:$0xff] %v203_v2  ;;  %v209_v5 = vld [vmem:[%s3883_s11 + $0x48] sm:$0xff]  ;;  %206 = vst [vmem:[%s3888_s12 + $0x18] sm:$0xff] %v205_v3  ;;  %v211_v6 = vld [vmem:[%s3883_s11 + $0x50] sm:$0xff] }
  0x1b   : > { %208 = vst [vmem:[%s3888_s12 + $0x20] sm:$0xff] %v207_v4  ;;  %210 = vst [vmem:[%s3888_s12 + $0x28] sm:$0xff] %v209_v5  ;;  %v213_v7 = vld [vmem:[%s3883_s11 + $0x58] sm:$0xff]  ;;  %v215_v8 = vld [vmem:[%s3883_s11 + $0x80] sm:$0xff] }
  0x1c   : > { %212 = vst [vmem:[%s3888_s12 + $0x30] sm:$0xff] %v211_v6  ;;  %214 = vst [vmem:[%s3888_s12 + $0x38] sm:$0xff] %v213_v7  ;;  %v217_v9 = vld [vmem:[%s3883_s11 + $0x88] sm:$0xff]  ;;  %v219_v10 = vld [vmem:[%s3883_s11 + $0x90] sm:$0xff] }
  0x1d   : > { %216 = vst [vmem:[%s3888_s12 + $0x40] sm:$0xff] %v215_v8  ;;  %v221_v11 = vld [vmem:[%s3883_s11 + $0x98] sm:$0xff]  ;;  %218 = vst [vmem:[%s3888_s12 + $0x48] sm:$0xff] %v217_v9  ;;  %v223_v12 = vld [vmem:[%s3883_s11 + $0xc0] sm:$0xff] }
  0x1e   : > { %220 = vst [vmem:[%s3888_s12 + $0x50] sm:$0xff] %v219_v10  ;;  %222 = vst [vmem:[%s3888_s12 + $0x58] sm:$0xff] %v221_v11  ;;  %v225_v13 = vld [vmem:[%s3883_s11 + $0xc8] sm:$0xff]  ;;  %v227_v14 = vld [vmem:[%s3883_s11 + $0xd0] sm:$0xff] }
  0x1f   : > { %224 = vst [vmem:[%s3888_s12 + $0x60] sm:$0xff] %v223_v12  ;;  %226 = vst [vmem:[%s3888_s12 + $0x68] sm:$0xff] %v225_v13  ;;  %v229_v15 = vld [vmem:[%s3883_s11 + $0xd8] sm:$0xff]  ;;  %v231_v16 = vld [vmem:[%s3883_s11 + $0x100] sm:$0xff] }
  0x20   : > { %228 = vst [vmem:[%s3888_s12 + $0x70] sm:$0xff] %v227_v14  ;;  %v233_v17 = vld [vmem:[%s3883_s11 + $0x108] sm:$0xff]  ;;  %230 = vst [vmem:[%s3888_s12 + $0x78] sm:$0xff] %v229_v15  ;;  %v235_v18 = vld [vmem:[%s3883_s11 + $0x110] sm:$0xff] }
  0x21   : > { %232 = vst [vmem:[%s3888_s12 + $0x80] sm:$0xff] %v231_v16  ;;  %234 = vst [vmem:[%s3888_s12 + $0x88] sm:$0xff] %v233_v17  ;;  %v237_v19 = vld [vmem:[%s3883_s11 + $0x118] sm:$0xff]  ;;  %v239_v20 = vld [vmem:[%s3883_s11 + $0x140] sm:$0xff] }
  0x22   : > { %236 = vst [vmem:[%s3888_s12 + $0x90] sm:$0xff] %v235_v18  ;;  %238 = vst [vmem:[%s3888_s12 + $0x98] sm:$0xff] %v237_v19  ;;  %v241_v21 = vld [vmem:[%s3883_s11 + $0x148] sm:$0xff]  ;;  %v243_v22 = vld [vmem:[%s3883_s11 + $0x150] sm:$0xff] }
  0x23   : > { %240 = vst [vmem:[%s3888_s12 + $0xa0] sm:$0xff] %v239_v20  ;;  %v245_v23 = vld [vmem:[%s3883_s11 + $0x158] sm:$0xff]  ;;  %242 = vst [vmem:[%s3888_s12 + $0xa8] sm:$0xff] %v241_v21  ;;  %v247_v24 = vld [vmem:[%s3883_s11 + $0x180] sm:$0xff] }
  0x24   : > { %244 = vst [vmem:[%s3888_s12 + $0xb0] sm:$0xff] %v243_v22  ;;  %246 = vst [vmem:[%s3888_s12 + $0xb8] sm:$0xff] %v245_v23  ;;  %v249_v25 = vld [vmem:[%s3883_s11 + $0x188] sm:$0xff]  ;;  %v251_v26 = vld [vmem:[%s3883_s11 + $0x190] sm:$0xff] }
  0x25   : > { %248 = vst [vmem:[%s3888_s12 + $0xc0] sm:$0xff] %v247_v24  ;;  %250 = vst [vmem:[%s3888_s12 + $0xc8] sm:$0xff] %v249_v25  ;;  %v253_v27 = vld [vmem:[%s3883_s11 + $0x198] sm:$0xff]  ;;  %v255_v28 = vld [vmem:[%s3883_s11 + $0x1c0] sm:$0xff] }
  0x26   : > { %252 = vst [vmem:[%s3888_s12 + $0xd0] sm:$0xff] %v251_v26  ;;  %v257_v29 = vld [vmem:[%s3883_s11 + $0x1c8] sm:$0xff]  ;;  %254 = vst [vmem:[%s3888_s12 + $0xd8] sm:$0xff] %v253_v27  ;;  %v259_v30 = vld [vmem:[%s3883_s11 + $0x1d0] sm:$0xff] }
  0x27   : > { %256 = vst [vmem:[%s3888_s12 + $0xe0] sm:$0xff] %v255_v28  ;;  %258 = vst [vmem:[%s3888_s12 + $0xe8] sm:$0xff] %v257_v29  ;;  %v261_v31 = vld [vmem:[%s3883_s11 + $0x1d8] sm:$0xff]  ;;  %v263_v32 = vld [vmem:[%s3883_s11 + $0x200] sm:$0xff] }
  0x28   : > { %260 = vst [vmem:[%s3888_s12 + $0xf0] sm:$0xff] %v259_v30  ;;  %262 = vst [vmem:[%s3888_s12 + $0xf8] sm:$0xff] %v261_v31  ;;  %v265_v33 = vld [vmem:[%s3883_s11 + $0x208] sm:$0xff]  ;;  %v267_v34 = vld [vmem:[%s3883_s11 + $0x210] sm:$0xff] }
  0x29   : > { %264 = vst [vmem:[%s3888_s12 + $0x100] sm:$0xff] %v263_v32  ;;  %v269_v35 = vld [vmem:[%s3883_s11 + $0x218] sm:$0xff]  ;;  %266 = vst [vmem:[%s3888_s12 + $0x108] sm:$0xff] %v265_v33  ;;  %v271_v36 = vld [vmem:[%s3883_s11 + $0x240] sm:$0xff] }
  0x2a   : > { %268 = vst [vmem:[%s3888_s12 + $0x110] sm:$0xff] %v267_v34  ;;  %270 = vst [vmem:[%s3888_s12 + $0x118] sm:$0xff] %v269_v35  ;;  %v273_v37 = vld [vmem:[%s3883_s11 + $0x248] sm:$0xff]  ;;  %v275_v38 = vld [vmem:[%s3883_s11 + $0x250] sm:$0xff] }
  0x2b   : > { %272 = vst [vmem:[%s3888_s12 + $0x120] sm:$0xff] %v271_v36  ;;  %274 = vst [vmem:[%s3888_s12 + $0x128] sm:$0xff] %v273_v37  ;;  %v277_v39 = vld [vmem:[%s3883_s11 + $0x258] sm:$0xff]  ;;  %v279_v40 = vld [vmem:[%s3883_s11 + $0x280] sm:$0xff] }
  0x2c   : > { %276 = vst [vmem:[%s3888_s12 + $0x130] sm:$0xff] %v275_v38  ;;  %v281_v41 = vld [vmem:[%s3883_s11 + $0x288] sm:$0xff]  ;;  %278 = vst [vmem:[%s3888_s12 + $0x138] sm:$0xff] %v277_v39  ;;  %v283_v42 = vld [vmem:[%s3883_s11 + $0x290] sm:$0xff] }
  0x2d   : > { %280 = vst [vmem:[%s3888_s12 + $0x140] sm:$0xff] %v279_v40  ;;  %282 = vst [vmem:[%s3888_s12 + $0x148] sm:$0xff] %v281_v41  ;;  %v285_v43 = vld [vmem:[%s3883_s11 + $0x298] sm:$0xff]  ;;  %v287_v44 = vld [vmem:[%s3883_s11 + $0x2c0] sm:$0xff] }
  0x2e   : > { %284 = vst [vmem:[%s3888_s12 + $0x150] sm:$0xff] %v283_v42  ;;  %286 = vst [vmem:[%s3888_s12 + $0x158] sm:$0xff] %v285_v43  ;;  %v289_v45 = vld [vmem:[%s3883_s11 + $0x2c8] sm:$0xff]  ;;  %v291_v46 = vld [vmem:[%s3883_s11 + $0x2d0] sm:$0xff] }
  0x2f   : > { %288 = vst [vmem:[%s3888_s12 + $0x160] sm:$0xff] %v287_v44  ;;  %v293_v47 = vld [vmem:[%s3883_s11 + $0x2d8] sm:$0xff]  ;;  %290 = vst [vmem:[%s3888_s12 + $0x168] sm:$0xff] %v289_v45  ;;  %v295_v48 = vld [vmem:[%s3883_s11 + $0x300] sm:$0xff] }
  0x30   : > { %292 = vst [vmem:[%s3888_s12 + $0x170] sm:$0xff] %v291_v46  ;;  %294 = vst [vmem:[%s3888_s12 + $0x178] sm:$0xff] %v293_v47  ;;  %v297_v49 = vld [vmem:[%s3883_s11 + $0x308] sm:$0xff]  ;;  %v299_v50 = vld [vmem:[%s3883_s11 + $0x310] sm:$0xff] }
  0x31   : > { %296 = vst [vmem:[%s3888_s12 + $0x180] sm:$0xff] %v295_v48  ;;  %298 = vst [vmem:[%s3888_s12 + $0x188] sm:$0xff] %v297_v49  ;;  %v301_v51 = vld [vmem:[%s3883_s11 + $0x318] sm:$0xff]  ;;  %v303_v52 = vld [vmem:[%s3883_s11 + $0x340] sm:$0xff] }
  0x32   : > { %300 = vst [vmem:[%s3888_s12 + $0x190] sm:$0xff] %v299_v50  ;;  %v305_v53 = vld [vmem:[%s3883_s11 + $0x348] sm:$0xff]  ;;  %302 = vst [vmem:[%s3888_s12 + $0x198] sm:$0xff] %v301_v51  ;;  %v307_v54 = vld [vmem:[%s3883_s11 + $0x350] sm:$0xff] }
  0x33   : > { %304 = vst [vmem:[%s3888_s12 + $0x1a0] sm:$0xff] %v303_v52  ;;  %306 = vst [vmem:[%s3888_s12 + $0x1a8] sm:$0xff] %v305_v53  ;;  %v309_v55 = vld [vmem:[%s3883_s11 + $0x358] sm:$0xff]  ;;  %v311_v56 = vld [vmem:[%s3883_s11 + $0x380] sm:$0xff] }
  0x34   : > { %308 = vst [vmem:[%s3888_s12 + $0x1b0] sm:$0xff] %v307_v54  ;;  %310 = vst [vmem:[%s3888_s12 + $0x1b8] sm:$0xff] %v309_v55  ;;  %v313_v57 = vld [vmem:[%s3883_s11 + $0x388] sm:$0xff]  ;;  %v315_v58 = vld [vmem:[%s3883_s11 + $0x390] sm:$0xff] }
  0x35   : > { %312 = vst [vmem:[%s3888_s12 + $0x1c0] sm:$0xff] %v311_v56  ;;  %v317_v59 = vld [vmem:[%s3883_s11 + $0x398] sm:$0xff]  ;;  %314 = vst [vmem:[%s3888_s12 + $0x1c8] sm:$0xff] %v313_v57  ;;  %v319_v60 = vld [vmem:[%s3883_s11 + $0x3c0] sm:$0xff] }
  0x36   : > { %316 = vst [vmem:[%s3888_s12 + $0x1d0] sm:$0xff] %v315_v58  ;;  %318 = vst [vmem:[%s3888_s12 + $0x1d8] sm:$0xff] %v317_v59  ;;  %v321_v61 = vld [vmem:[%s3883_s11 + $0x3c8] sm:$0xff]  ;;  %v323_v62 = vld [vmem:[%s3883_s11 + $0x3d0] sm:$0xff] }
  0x37   : > { %320 = vst [vmem:[%s3888_s12 + $0x1e0] sm:$0xff] %v319_v60  ;;  %322 = vst [vmem:[%s3888_s12 + $0x1e8] sm:$0xff] %v321_v61  ;;  %v325_v63 = vld [vmem:[%s3883_s11 + $0x3d8] sm:$0xff]  ;;  %v327_v0 = vld [vmem:[%s3883_s11 + $0x400] sm:$0xff] }
  0x38   : > { %324 = vst [vmem:[%s3888_s12 + $0x1f0] sm:$0xff] %v323_v62  ;;  %v329_v1 = vld [vmem:[%s3883_s11 + $0x408] sm:$0xff]  ;;  %326 = vst [vmem:[%s3888_s12 + $0x1f8] sm:$0xff] %v325_v63  ;;  %v331_v2 = vld [vmem:[%s3883_s11 + $0x410] sm:$0xff] }
  0x39   : > { %328 = vst [vmem:[%s3888_s12 + $0x200] sm:$0xff] %v327_v0  ;;  %330 = vst [vmem:[%s3888_s12 + $0x208] sm:$0xff] %v329_v1  ;;  %v333_v3 = vld [vmem:[%s3883_s11 + $0x418] sm:$0xff]  ;;  %v335_v4 = vld [vmem:[%s3883_s11 + $0x440] sm:$0xff] }
  0x3a   : > { %332 = vst [vmem:[%s3888_s12 + $0x210] sm:$0xff] %v331_v2  ;;  %334 = vst [vmem:[%s3888_s12 + $0x218] sm:$0xff] %v333_v3  ;;  %v337_v5 = vld [vmem:[%s3883_s11 + $0x448] sm:$0xff]  ;;  %v339_v6 = vld [vmem:[%s3883_s11 + $0x450] sm:$0xff] }
  0x3b   : > { %336 = vst [vmem:[%s3888_s12 + $0x220] sm:$0xff] %v335_v4  ;;  %v341_v7 = vld [vmem:[%s3883_s11 + $0x458] sm:$0xff]  ;;  %338 = vst [vmem:[%s3888_s12 + $0x228] sm:$0xff] %v337_v5  ;;  %v343_v8 = vld [vmem:[%s3883_s11 + $0x480] sm:$0xff] }
  0x3c   : > { %340 = vst [vmem:[%s3888_s12 + $0x230] sm:$0xff] %v339_v6  ;;  %342 = vst [vmem:[%s3888_s12 + $0x238] sm:$0xff] %v341_v7  ;;  %v345_v9 = vld [vmem:[%s3883_s11 + $0x488] sm:$0xff]  ;;  %v347_v10 = vld [vmem:[%s3883_s11 + $0x490] sm:$0xff] }
  0x3d   : > { %344 = vst [vmem:[%s3888_s12 + $0x240] sm:$0xff] %v343_v8  ;;  %346 = vst [vmem:[%s3888_s12 + $0x248] sm:$0xff] %v345_v9  ;;  %v349_v11 = vld [vmem:[%s3883_s11 + $0x498] sm:$0xff]  ;;  %v351_v12 = vld [vmem:[%s3883_s11 + $0x4c0] sm:$0xff] }
  0x3e   : > { %348 = vst [vmem:[%s3888_s12 + $0x250] sm:$0xff] %v347_v10  ;;  %v353_v13 = vld [vmem:[%s3883_s11 + $0x4c8] sm:$0xff]  ;;  %350 = vst [vmem:[%s3888_s12 + $0x258] sm:$0xff] %v349_v11  ;;  %v355_v14 = vld [vmem:[%s3883_s11 + $0x4d0] sm:$0xff] }
  0x3f   : > { %352 = vst [vmem:[%s3888_s12 + $0x260] sm:$0xff] %v351_v12  ;;  %354 = vst [vmem:[%s3888_s12 + $0x268] sm:$0xff] %v353_v13  ;;  %v357_v15 = vld [vmem:[%s3883_s11 + $0x4d8] sm:$0xff]  ;;  %v359_v16 = vld [vmem:[%s3883_s11 + $0x500] sm:$0xff] }
  0x40   : > { %356 = vst [vmem:[%s3888_s12 + $0x270] sm:$0xff] %v355_v14  ;;  %358 = vst [vmem:[%s3888_s12 + $0x278] sm:$0xff] %v357_v15  ;;  %v361_v17 = vld [vmem:[%s3883_s11 + $0x508] sm:$0xff]  ;;  %v363_v18 = vld [vmem:[%s3883_s11 + $0x510] sm:$0xff] }
  0x41   : > { %360 = vst [vmem:[%s3888_s12 + $0x280] sm:$0xff] %v359_v16  ;;  %v365_v19 = vld [vmem:[%s3883_s11 + $0x518] sm:$0xff]  ;;  %362 = vst [vmem:[%s3888_s12 + $0x288] sm:$0xff] %v361_v17  ;;  %v367_v20 = vld [vmem:[%s3883_s11 + $0x540] sm:$0xff] }
  0x42   : > { %364 = vst [vmem:[%s3888_s12 + $0x290] sm:$0xff] %v363_v18  ;;  %366 = vst [vmem:[%s3888_s12 + $0x298] sm:$0xff] %v365_v19  ;;  %v369_v21 = vld [vmem:[%s3883_s11 + $0x548] sm:$0xff]  ;;  %v371_v22 = vld [vmem:[%s3883_s11 + $0x550] sm:$0xff] }
  0x43   : > { %368 = vst [vmem:[%s3888_s12 + $0x2a0] sm:$0xff] %v367_v20  ;;  %370 = vst [vmem:[%s3888_s12 + $0x2a8] sm:$0xff] %v369_v21  ;;  %v373_v23 = vld [vmem:[%s3883_s11 + $0x558] sm:$0xff]  ;;  %v375_v24 = vld [vmem:[%s3883_s11 + $0x580] sm:$0xff] }
  0x44   : > { %372 = vst [vmem:[%s3888_s12 + $0x2b0] sm:$0xff] %v371_v22  ;;  %v377_v25 = vld [vmem:[%s3883_s11 + $0x588] sm:$0xff]  ;;  %374 = vst [vmem:[%s3888_s12 + $0x2b8] sm:$0xff] %v373_v23  ;;  %v379_v26 = vld [vmem:[%s3883_s11 + $0x590] sm:$0xff] }
  0x45   : > { %376 = vst [vmem:[%s3888_s12 + $0x2c0] sm:$0xff] %v375_v24  ;;  %378 = vst [vmem:[%s3888_s12 + $0x2c8] sm:$0xff] %v377_v25  ;;  %v381_v27 = vld [vmem:[%s3883_s11 + $0x598] sm:$0xff]  ;;  %v383_v28 = vld [vmem:[%s3883_s11 + $0x5c0] sm:$0xff] }
  0x46   : > { %380 = vst [vmem:[%s3888_s12 + $0x2d0] sm:$0xff] %v379_v26  ;;  %382 = vst [vmem:[%s3888_s12 + $0x2d8] sm:$0xff] %v381_v27  ;;  %v385_v29 = vld [vmem:[%s3883_s11 + $0x5c8] sm:$0xff]  ;;  %v387_v30 = vld [vmem:[%s3883_s11 + $0x5d0] sm:$0xff] }
  0x47   : > { %384 = vst [vmem:[%s3888_s12 + $0x2e0] sm:$0xff] %v383_v28  ;;  %v389_v31 = vld [vmem:[%s3883_s11 + $0x5d8] sm:$0xff]  ;;  %386 = vst [vmem:[%s3888_s12 + $0x2e8] sm:$0xff] %v385_v29  ;;  %v391_v32 = vld [vmem:[%s3883_s11 + $0x600] sm:$0xff] }
  0x48   : > { %388 = vst [vmem:[%s3888_s12 + $0x2f0] sm:$0xff] %v387_v30  ;;  %390 = vst [vmem:[%s3888_s12 + $0x2f8] sm:$0xff] %v389_v31  ;;  %v393_v33 = vld [vmem:[%s3883_s11 + $0x608] sm:$0xff]  ;;  %v395_v34 = vld [vmem:[%s3883_s11 + $0x610] sm:$0xff] }
  0x49   : > { %392 = vst [vmem:[%s3888_s12 + $0x300] sm:$0xff] %v391_v32  ;;  %394 = vst [vmem:[%s3888_s12 + $0x308] sm:$0xff] %v393_v33  ;;  %v397_v35 = vld [vmem:[%s3883_s11 + $0x618] sm:$0xff]  ;;  %v399_v36 = vld [vmem:[%s3883_s11 + $0x640] sm:$0xff] }
  0x4a   : > { %396 = vst [vmem:[%s3888_s12 + $0x310] sm:$0xff] %v395_v34  ;;  %v401_v37 = vld [vmem:[%s3883_s11 + $0x648] sm:$0xff]  ;;  %398 = vst [vmem:[%s3888_s12 + $0x318] sm:$0xff] %v397_v35  ;;  %v403_v38 = vld [vmem:[%s3883_s11 + $0x650] sm:$0xff] }
  0x4b   : > { %400 = vst [vmem:[%s3888_s12 + $0x320] sm:$0xff] %v399_v36  ;;  %402 = vst [vmem:[%s3888_s12 + $0x328] sm:$0xff] %v401_v37  ;;  %v405_v39 = vld [vmem:[%s3883_s11 + $0x658] sm:$0xff]  ;;  %v407_v40 = vld [vmem:[%s3883_s11 + $0x680] sm:$0xff] }
  0x4c   : > { %404 = vst [vmem:[%s3888_s12 + $0x330] sm:$0xff] %v403_v38  ;;  %406 = vst [vmem:[%s3888_s12 + $0x338] sm:$0xff] %v405_v39  ;;  %v409_v41 = vld [vmem:[%s3883_s11 + $0x688] sm:$0xff]  ;;  %v411_v42 = vld [vmem:[%s3883_s11 + $0x690] sm:$0xff] }
  0x4d   : > { %408 = vst [vmem:[%s3888_s12 + $0x340] sm:$0xff] %v407_v40  ;;  %v413_v43 = vld [vmem:[%s3883_s11 + $0x698] sm:$0xff]  ;;  %410 = vst [vmem:[%s3888_s12 + $0x348] sm:$0xff] %v409_v41  ;;  %v415_v44 = vld [vmem:[%s3883_s11 + $0x6c0] sm:$0xff] }
  0x4e   : > { %412 = vst [vmem:[%s3888_s12 + $0x350] sm:$0xff] %v411_v42  ;;  %414 = vst [vmem:[%s3888_s12 + $0x358] sm:$0xff] %v413_v43  ;;  %v417_v45 = vld [vmem:[%s3883_s11 + $0x6c8] sm:$0xff]  ;;  %v419_v46 = vld [vmem:[%s3883_s11 + $0x6d0] sm:$0xff] }
  0x4f   : > { %416 = vst [vmem:[%s3888_s12 + $0x360] sm:$0xff] %v415_v44  ;;  %418 = vst [vmem:[%s3888_s12 + $0x368] sm:$0xff] %v417_v45  ;;  %v421_v47 = vld [vmem:[%s3883_s11 + $0x6d8] sm:$0xff]  ;;  %v423_v48 = vld [vmem:[%s3883_s11 + $0x700] sm:$0xff] }
  0x50   : > { %420 = vst [vmem:[%s3888_s12 + $0x370] sm:$0xff] %v419_v46  ;;  %v425_v49 = vld [vmem:[%s3883_s11 + $0x708] sm:$0xff]  ;;  %422 = vst [vmem:[%s3888_s12 + $0x378] sm:$0xff] %v421_v47  ;;  %v427_v50 = vld [vmem:[%s3883_s11 + $0x710] sm:$0xff] }
  0x51   : > { %424 = vst [vmem:[%s3888_s12 + $0x380] sm:$0xff] %v423_v48  ;;  %426 = vst [vmem:[%s3888_s12 + $0x388] sm:$0xff] %v425_v49  ;;  %v429_v51 = vld [vmem:[%s3883_s11 + $0x718] sm:$0xff]  ;;  %v431_v52 = vld [vmem:[%s3883_s11 + $0x740] sm:$0xff] }
  0x52   : > { %428 = vst [vmem:[%s3888_s12 + $0x390] sm:$0xff] %v427_v50  ;;  %430 = vst [vmem:[%s3888_s12 + $0x398] sm:$0xff] %v429_v51  ;;  %v433_v53 = vld [vmem:[%s3883_s11 + $0x748] sm:$0xff]  ;;  %v435_v54 = vld [vmem:[%s3883_s11 + $0x750] sm:$0xff] }
  0x53   : > { %432 = vst [vmem:[%s3888_s12 + $0x3a0] sm:$0xff] %v431_v52  ;;  %v437_v55 = vld [vmem:[%s3883_s11 + $0x758] sm:$0xff]  ;;  %434 = vst [vmem:[%s3888_s12 + $0x3a8] sm:$0xff] %v433_v53  ;;  %v439_v56 = vld [vmem:[%s3883_s11 + $0x780] sm:$0xff] }
  0x54   : > { %436 = vst [vmem:[%s3888_s12 + $0x3b0] sm:$0xff] %v435_v54  ;;  %438 = vst [vmem:[%s3888_s12 + $0x3b8] sm:$0xff] %v437_v55  ;;  %v441_v57 = vld [vmem:[%s3883_s11 + $0x788] sm:$0xff]  ;;  %v443_v58 = vld [vmem:[%s3883_s11 + $0x790] sm:$0xff] }
  0x55   : > { %440 = vst [vmem:[%s3888_s12 + $0x3c0] sm:$0xff] %v439_v56  ;;  %442 = vst [vmem:[%s3888_s12 + $0x3c8] sm:$0xff] %v441_v57  ;;  %v445_v59 = vld [vmem:[%s3883_s11 + $0x798] sm:$0xff]  ;;  %v447_v60 = vld [vmem:[%s3883_s11 + $0x7c0] sm:$0xff] }
  0x56   : > { %444 = vst [vmem:[%s3888_s12 + $0x3d0] sm:$0xff] %v443_v58  ;;  %v449_v61 = vld [vmem:[%s3883_s11 + $0x7c8] sm:$0xff]  ;;  %446 = vst [vmem:[%s3888_s12 + $0x3d8] sm:$0xff] %v445_v59  ;;  %v451_v62 = vld [vmem:[%s3883_s11 + $0x7d0] sm:$0xff] }
  0x57   : > { %448 = vst [vmem:[%s3888_s12 + $0x3e0] sm:$0xff] %v447_v60  ;;  %450 = vst [vmem:[%s3888_s12 + $0x3e8] sm:$0xff] %v449_v61  ;;  %v453_v63 = vld [vmem:[%s3883_s11 + $0x7d8] sm:$0xff] }
  0x58   : > { %452 = vst [vmem:[%s3888_s12 + $0x3f0] sm:$0xff] %v451_v62  ;;  %454 = vst [vmem:[%s3888_s12 + $0x3f8] sm:$0xff] %v453_v63 }
  0x59 PF: > { %p2967_p7 = scmp.ge.s32.totalorder %s3795_s21, 1  ;;  %p468_p8 = scmp.lt.s32.totalorder %s3795_s21, 5 }
  0x5b   : > { %p469_p9 = pnand %p2967_p7, %p468_p8 }
  0x5c   : > { %s475_s13 = sand.u32 (!%p469_p9), 1, %s3771_s15   ;;  %s2969_s14 = sshll.u32 (!%p469_p9), %s3779_s17, 7 }
  0x5d   : > { %472 = sbr.rel (%p469_p9) target bundleno = 699 (0x2bb), region = 47  ;;  %s2968_s24 = sshll.u32 (!%p469_p9), %s475_s13, 10 }
  0x5e   : > { %p516_p10 = scmp.lt.s32.totalorder (!%p469_p9), %s2969_s14, 255  ;;  %s2971_s25 = sshll.u32 (!%p469_p9), %s3783_s18, 5 }
  0x5f   : > { %p522_p11 = scmp.lt.s32.totalorder (!%p469_p9), %s2971_s25, 63  ;;  %p527_p12 = scmp.lt.s32.totalorder (!%p469_p9), %s3783_s18, 1 }
  0x60   : > { %p2975_p13 = scmp.ne.s32.totalorder (!%p469_p9), %s3779_s17, 0 }
  0x64   : > { %s4763_s14 = smov (!%p516_p10, %s2969_s14), 255  ;;  %s4765_s25 = smov (!%p522_p11, %s2971_s25), 63 }
  0x65   : > { %s2970_s26 = sshll.u32 %s4763_s14, 2  ;;  %s4767_s18 = smov (!%p527_p12, %s3783_s18), 1  ;;  %vm540_vm0 = vcmask (!%p2975_p13), 523264   ;;  %v3797_v0 = vmov (!%p2975_p13), 0.0  }
  0x66   : > { %s4152_s30 = scalar_lea.vmem %s4746_s1, %s2970_s26  ;;  %s2972_s5 = sshll.u32 %s4765_s25, 3 }
  0x67   : > { %s4158_s15 = scalar_lea.vmem %s4747_s2, %s2972_s5  ;;  %s2973_s8 = sshll.u32 %s4767_s18, 3 }
  0x68   : > { %s4163_s11 = scalar_lea.vmem %s4748_s3, %s2973_s8  ;;  %s4168_s14 = scalar_lea.vmem %s4749_s4, %s2973_s8  ;;  %541 = vst.msk [vmem:[%s4158_s15] sm:$0xff] (!%p2975_p13), %vm540_vm0, %v3797_v0  ;;  %542 = vst.msk [vmem:[%s4158_s15 + $0x8] sm:$0xff] (!%p2975_p13), %vm540_vm0, %v3797_v0 }
  0x69   : > { %s4170_s26 = scalar_lea.vmem [#allocation2], %s2968_s24  ;;  %539 = sbr.rel (%p2975_p13) target bundleno = 120 (0x78), region = 55  ;;  %543 = vst.msk [vmem:[%s4158_s15 + $0x10] sm:$0xff] (!%p2975_p13), %vm540_vm0, %v3797_v0  ;;  %544 = vst.msk [vmem:[%s4158_s15 + $0x18] sm:$0xff] (!%p2975_p13), %vm540_vm0, %v3797_v0 }
  0x6a   : > { %545 = vst.msk [vmem:[%s4158_s15 + $0x20] sm:$0xff] (!%p2975_p13), %vm540_vm0, %v3797_v0  ;;  %546 = vst.msk [vmem:[%s4158_s15 + $0x28] sm:$0xff] (!%p2975_p13), %vm540_vm0, %v3797_v0 }
  0x6b   : > { %547 = vst.msk [vmem:[%s4158_s15 + $0x30] sm:$0xff] (!%p2975_p13), %vm540_vm0, %v3797_v0  ;;  %548 = vst.msk [vmem:[%s4158_s15 + $0x38] sm:$0xff] (!%p2975_p13), %vm540_vm0, %v3797_v0 }
  0x6c   : > { %549 = vst.msk [vmem:[%s4158_s15 + $0x40] sm:$0xff] (!%p2975_p13), %vm540_vm0, %v3797_v0  ;;  %550 = vst.msk [vmem:[%s4158_s15 + $0x48] sm:$0xff] (!%p2975_p13), %vm540_vm0, %v3797_v0 }
  0x6d   : > { %551 = vst.msk [vmem:[%s4158_s15 + $0x50] sm:$0xff] (!%p2975_p13), %vm540_vm0, %v3797_v0  ;;  %552 = vst.msk [vmem:[%s4158_s15 + $0x58] sm:$0xff] (!%p2975_p13), %vm540_vm0, %v3797_v0 }
  0x6e   : > { %553 = vst.msk [vmem:[%s4158_s15 + $0x60] sm:$0xff] (!%p2975_p13), %vm540_vm0, %v3797_v0  ;;  %554 = vst.msk [vmem:[%s4158_s15 + $0x68] sm:$0xff] (!%p2975_p13), %vm540_vm0, %v3797_v0 }
  0x6f   : > { %555 = vst.msk [vmem:[%s4158_s15 + $0x70] sm:$0xff] (!%p2975_p13), %vm540_vm0, %v3797_v0  ;;  %556 = vst.msk [vmem:[%s4158_s15 + $0x78] sm:$0xff] (!%p2975_p13), %vm540_vm0, %v3797_v0 }
  0x70   : > { %557 = vst.msk [vmem:[%s4158_s15 + $0x80] sm:$0xff] %vm540_vm0, %v3797_v0  ;;  %558 = vst.msk [vmem:[%s4158_s15 + $0x88] sm:$0xff] %vm540_vm0, %v3797_v0 }
  0x71   : > { %559 = vst.msk [vmem:[%s4158_s15 + $0x90] sm:$0xff] %vm540_vm0, %v3797_v0  ;;  %560 = vst.msk [vmem:[%s4158_s15 + $0x98] sm:$0xff] %vm540_vm0, %v3797_v0 }
  0x72   : > { %561 = vst.msk [vmem:[%s4158_s15 + $0xa0] sm:$0xff] %vm540_vm0, %v3797_v0  ;;  %562 = vst.msk [vmem:[%s4158_s15 + $0xa8] sm:$0xff] %vm540_vm0, %v3797_v0 }
  0x73   : > { %563 = vst.msk [vmem:[%s4158_s15 + $0xb0] sm:$0xff] %vm540_vm0, %v3797_v0  ;;  %564 = vst.msk [vmem:[%s4158_s15 + $0xb8] sm:$0xff] %vm540_vm0, %v3797_v0 }
  0x74   : > { %565 = vst.msk [vmem:[%s4158_s15 + $0xc0] sm:$0xff] %vm540_vm0, %v3797_v0  ;;  %566 = vst.msk [vmem:[%s4158_s15 + $0xc8] sm:$0xff] %vm540_vm0, %v3797_v0 }
  0x75   : > { %567 = vst.msk [vmem:[%s4158_s15 + $0xd0] sm:$0xff] %vm540_vm0, %v3797_v0  ;;  %568 = vst.msk [vmem:[%s4158_s15 + $0xd8] sm:$0xff] %vm540_vm0, %v3797_v0 }
  0x76   : > { %569 = vst.msk [vmem:[%s4158_s15 + $0xe0] sm:$0xff] %vm540_vm0, %v3797_v0  ;;  %570 = vst.msk [vmem:[%s4158_s15 + $0xe8] sm:$0xff] %vm540_vm0, %v3797_v0 }
  0x77   : > { %571 = vst.msk [vmem:[%s4158_s15 + $0xf0] sm:$0xff] %vm540_vm0, %v3797_v0  ;;  %572 = vst.msk [vmem:[%s4158_s15 + $0xf8] sm:$0xff] %vm540_vm0, %v3797_v0 }
  0x78 PF: > { %v3677_v1 = vld [vmem:[%s4152_s30 + $0x40] sm:$0xff]   ;;  %v3681_v5 = vld [vmem:[%s4152_s30 + $0x48] sm:$0xff]   ;;  %v3685_v9 = vld [vmem:[%s4152_s30 + $0x50] sm:$0xff]   ;;  %vm2561_vm1 = vcmask 523264   ;;  %p3168_p0 = scmp.ne.s32.totalorder %s3779_s17, 1 }
  0x79   : > { %v3678_v2 = vld [vmem:[%s4152_s30 + $0xc0] sm:$0xff]   ;;  %3172 = vmatprep.subr.bf16.mxu0 %v3677_v1  ;;  %v3682_v6 = vld [vmem:[%s4152_s30 + $0xc8] sm:$0xff]   ;;  %v3686_v10 = vld [vmem:[%s4152_s30 + $0xd0] sm:$0xff]  }
  0x7a   : > { %v3679_v3 = vld [vmem:[%s4152_s30] sm:$0xff]   ;;  %3284 = vmatprep.subr.bf16.mxu1 %v3678_v2  ;;  %v3683_v7 = vld [vmem:[%s4152_s30 + $0x8] sm:$0xff]   ;;  %v3687_v11 = vld [vmem:[%s4152_s30 + $0x10] sm:$0xff]  }
  0x7b   : > { %v3680_v4 = vld [vmem:[%s4152_s30 + $0x80] sm:$0xff]   ;;  %3173 = vmatpush3.bf16.msra.mxu0 %v3679_v3  ;;  %v3684_v8 = vld [vmem:[%s4152_s30 + $0x88] sm:$0xff]   ;;  %v3688_v12 = vld [vmem:[%s4152_s30 + $0x90] sm:$0xff]  }
  0x7c   : > { %3285 = vmatpush3.bf16.msra.mxu1 %v3680_v4  ;;  %3174 = vmatprep.subr.bf16.mxu0 %v3681_v5  ;;  %v3689_v13 = vld [vmem:[%s4152_s30 + $0x58] sm:$0xff]   ;;  %v3693_v17 = vld [vmem:[%s4152_s30 + $0x60] sm:$0xff]   ;;  %v3697_v21 = vld [vmem:[%s4152_s30 + $0x68] sm:$0xff]  }
  0x7d   : > { %3286 = vmatprep.subr.bf16.mxu1 %v3682_v6  ;;  %v3690_v14 = vld [vmem:[%s4152_s30 + $0xd8] sm:$0xff]   ;;  %v3694_v18 = vld [vmem:[%s4152_s30 + $0xe0] sm:$0xff]   ;;  %v3698_v22 = vld [vmem:[%s4152_s30 + $0xe8] sm:$0xff]  }
  0x7e   : > { %v3691_v15 = vld [vmem:[%s4152_s30 + $0x18] sm:$0xff]   ;;  %v3695_v19 = vld [vmem:[%s4152_s30 + $0x20] sm:$0xff]   ;;  %v3699_v23 = vld [vmem:[%s4152_s30 + $0x28] sm:$0xff]  }
  0x7f   : > { %3175 = vmatpush3.bf16.msra.mxu0 %v3683_v7  ;;  %v3692_v16 = vld [vmem:[%s4152_s30 + $0x98] sm:$0xff]   ;;  %v3696_v20 = vld [vmem:[%s4152_s30 + $0xa0] sm:$0xff]   ;;  %v3700_v24 = vld [vmem:[%s4152_s30 + $0xa8] sm:$0xff]  }
  0x80   : > { %3287 = vmatpush3.bf16.msra.mxu1 %v3684_v8  ;;  %3176 = vmatprep.subr.bf16.mxu0 %v3685_v9  ;;  %v3701_v25 = vld [vmem:[%s4152_s30 + $0x70] sm:$0xff]   ;;  %v3705_v29 = vld [vmem:[%s4152_s30 + $0x78] sm:$0xff]   ;;  %v605_v33 = vld [vmem:[%s4170_s26] sm:$0xff] }
  0x81   : > { %3288 = vmatprep.subr.bf16.mxu1 %v3686_v10  ;;  %v3702_v26 = vld [vmem:[%s4152_s30 + $0xf0] sm:$0xff]   ;;  %v3706_v30 = vld [vmem:[%s4152_s30 + $0xf8] sm:$0xff]   ;;  %v609_v34 = vld [vmem:[%s4170_s26 + $0x20] sm:$0xff] }
  0x82   : > { %v3703_v27 = vld [vmem:[%s4152_s30 + $0x30] sm:$0xff]   ;;  %v3707_v31 = vld [vmem:[%s4152_s30 + $0x38] sm:$0xff]   ;;  %v606_v35 = vld [vmem:[%s4170_s26 + $0x8] sm:$0xff]  ;;  %v2976_v36 = vcombine.low %v605_v33, %v609_v34  ;;  %v2977_v37 = vcombine.high %v605_v33, %v609_v34 }
  0x83   : > { %3177 = vmatpush3.bf16.msra.mxu0 %v3687_v11  ;;  %v3704_v28 = vld [vmem:[%s4152_s30 + $0xb0] sm:$0xff]   ;;  %v3708_v32 = vld [vmem:[%s4152_s30 + $0xb8] sm:$0xff]   ;;  %v610_v38 = vld [vmem:[%s4170_s26 + $0x28] sm:$0xff] }
  0x84   : > { %3289 = vmatpush3.bf16.msra.mxu1 %v3688_v12  ;;  %3178 = vmatprep.subr.bf16.mxu0 %v3689_v13  ;;  %v2978_v39 = vcombine.low %v606_v35, %v610_v38  ;;  %v2979_v40 = vcombine.high %v606_v35, %v610_v38  ;;  %v3709_v41 = vld [vmem:[%s4152_s30 + $0x140] sm:$0xff]   ;;  %v614_v48 = vld [vmem:[%s4170_s26 + $0x48] sm:$0xff]  ;;  %v3717_v3 = vld [vmem:[%s4152_s30 + $0x150] sm:$0xff]  }
  0x85   : > { %3290 = vmatprep.subr.bf16.mxu1 %v3690_v14  ;;  %1917 = vmatprep.mubr.bf16.mxu0 %v2977_v37  ;;  %v3710_v42 = vld [vmem:[%s4152_s30 + $0x100] sm:$0xff]   ;;  %v618_v49 = vld [vmem:[%s4170_s26 + $0x68] sm:$0xff]  ;;  %v3718_v5 = vld [vmem:[%s4152_s30 + $0x110] sm:$0xff]  }
  0x86   : > { %2078 = vmatprep.mubr.bf16.mxu1 %v2979_v40  ;;  %v3711_v43 = vld [vmem:[%s4152_s30 + $0x1c0] sm:$0xff]   ;;  %v2987_v51 = vcombine.high %v614_v48, %v618_v49  ;;  %v622_v53 = vld [vmem:[%s4170_s26 + $0x88] sm:$0xff]  ;;  %v2986_v57 = vcombine.low %v614_v48, %v618_v49  ;;  %v3719_v8 = vld [vmem:[%s4152_s30 + $0x1d0] sm:$0xff]  }
  0x87   : > { %3179 = vmatpush3.bf16.msra.mxu0 %v3691_v15  ;;  %v3712_v44 = vld [vmem:[%s4152_s30 + $0x180] sm:$0xff]   ;;  %v626_v54 = vld [vmem:[%s4170_s26 + $0xa8] sm:$0xff]  ;;  %v3720_v10 = vld [vmem:[%s4152_s30 + $0x190] sm:$0xff]  }
  0x88   : > { %3291 = vmatpush3.bf16.msra.mxu1 %v3692_v16  ;;  %3180 = vmatprep.subr.bf16.mxu0 %v3693_v17  ;;  %v613_v45 = vld [vmem:[%s4170_s26 + $0x40] sm:$0xff]  ;;  %v3713_v56 = vld [vmem:[%s4152_s30 + $0x148] sm:$0xff]   ;;  %v2995_v60 = vcombine.high %v622_v53, %v626_v54  ;;  %v2994_v6 = vcombine.low %v622_v53, %v626_v54  ;;  %v3721_v15 = vld [vmem:[%s4152_s30 + $0x158] sm:$0xff]  }
  0x89   : > { %3292 = vmatprep.subr.bf16.mxu1 %v3694_v18  ;;  %v617_v46 = vld [vmem:[%s4170_s26 + $0x60] sm:$0xff]  ;;  %v3714_v59 = vld [vmem:[%s4152_s30 + $0x108] sm:$0xff]   ;;  %v3722_v16 = vld [vmem:[%s4152_s30 + $0x118] sm:$0xff]  }
  0x8a   : > { %v2985_v47 = vcombine.high %v613_v45, %v617_v46  ;;  %v621_v50 = vld [vmem:[%s4170_s26 + $0x80] sm:$0xff]  ;;  %v2984_v55 = vcombine.low %v613_v45, %v617_v46  ;;  %v3715_v61 = vld [vmem:[%s4152_s30 + $0x1c8] sm:$0xff]   ;;  %v3723_v18 = vld [vmem:[%s4152_s30 + $0x1d8] sm:$0xff]  }
  0x8b   : > { %3181 = vmatpush3.bf16.msra.mxu0 %v3695_v19  ;;  %v625_v52 = vld [vmem:[%s4170_s26 + $0xa0] sm:$0xff]  ;;  %v3716_v62 = vld [vmem:[%s4152_s30 + $0x188] sm:$0xff]   ;;  %v3734_v48 = vld [vmem:[%s4152_s30 + $0x130] sm:$0xff]  }
  0x8c   : > { %3293 = vmatpush3.bf16.msra.mxu1 %v3696_v20  ;;  %3182 = vmatprep.subr.bf16.mxu0 %v3697_v21  ;;  %v2993_v58 = vcombine.high %v621_v50, %v625_v52  ;;  %v629_v63 = vld [vmem:[%s4170_s26 + $0xc0] sm:$0xff]  ;;  %v630_v1 = vld [vmem:[%s4170_s26 + $0xc8] sm:$0xff]  ;;  %v2992_v4 = vcombine.low %v621_v50, %v625_v52  ;;  %v3724_v21 = vld [vmem:[%s4152_s30 + $0x198] sm:$0xff]  }
  0x8d   : > { %3294 = vmatprep.subr.bf16.mxu1 %v3698_v22  ;;  %v633_v0 = vld [vmem:[%s4170_s26 + $0xe0] sm:$0xff]  ;;  %v634_v2 = vld [vmem:[%s4170_s26 + $0xe8] sm:$0xff]  ;;  %v3735_v49 = vld [vmem:[%s4152_s30 + $0x1f0] sm:$0xff]  }
  0x8e   : > { %v3001_v7 = vcombine.high %v629_v63, %v633_v0  ;;  %v3003_v9 = vcombine.high %v630_v1, %v634_v2  ;;  %v637_v11 = vld [vmem:[%s4170_s26 + $0x100] sm:$0xff]  ;;  %v638_v13 = vld [vmem:[%s4170_s26 + $0x108] sm:$0xff]  ;;  %v3000_v17 = vcombine.low %v629_v63, %v633_v0  ;;  %v3002_v19 = vcombine.low %v630_v1, %v634_v2  ;;  %v3736_v50 = vld [vmem:[%s4152_s30 + $0x1b0] sm:$0xff]  }
  0x8f   : > { %3183 = vmatpush3.bf16.msra.mxu0 %v3699_v23  ;;  %v641_v12 = vld [vmem:[%s4170_s26 + $0x120] sm:$0xff]  ;;  %v642_v14 = vld [vmem:[%s4170_s26 + $0x128] sm:$0xff] }
  0x90   : > { %3295 = vmatpush3.bf16.msra.mxu1 %v3700_v24  ;;  %3184 = vmatprep.subr.bf16.mxu0 %v3701_v25  ;;  %v3009_v20 = vcombine.high %v637_v11, %v641_v12  ;;  %v3011_v22 = vcombine.high %v638_v13, %v642_v14  ;;  %v645_v23 = vld [vmem:[%s4170_s26 + $0x140] sm:$0xff]  ;;  %v3729_v35 = vld [vmem:[%s4152_s30 + $0x168] sm:$0xff]  }
  0x91   : > { %3296 = vmatprep.subr.bf16.mxu1 %v3702_v26  ;;  %v649_v24 = vld [vmem:[%s4170_s26 + $0x160] sm:$0xff]  ;;  %v646_v26 = vld [vmem:[%s4170_s26 + $0x148] sm:$0xff] }
  0x92   : > { %v3725_v25 = vld [vmem:[%s4152_s30 + $0x160] sm:$0xff]   ;;  %v3017_v33 = vcombine.high %v645_v23, %v649_v24  ;;  %v3730_v37 = vld [vmem:[%s4152_s30 + $0x128] sm:$0xff]  }
  0x93   : > { %3185 = vmatpush3.bf16.msra.mxu0 %v3703_v27  ;;  %v650_v27 = vld [vmem:[%s4170_s26 + $0x168] sm:$0xff]  ;;  %v665_v52 = vld [vmem:[%s4170_s26 + $0x1e0] sm:$0xff] }
  0x94   : > { %3297 = vmatpush3.bf16.msra.mxu1 %v3704_v28  ;;  %3186 = vmatprep.subr.bf16.mxu0 %v3705_v29  ;;  %v3726_v28 = vld [vmem:[%s4152_s30 + $0x120] sm:$0xff]   ;;  %v3019_v34 = vcombine.high %v646_v26, %v650_v27  ;;  %v3731_v38 = vld [vmem:[%s4152_s30 + $0x1e8] sm:$0xff]  }
  0x95   : > { %3298 = vmatprep.subr.bf16.mxu1 %v3706_v30  ;;  %v3727_v29 = vld [vmem:[%s4152_s30 + $0x1e0] sm:$0xff]   ;;  %v3732_v40 = vld [vmem:[%s4152_s30 + $0x1a8] sm:$0xff]  }
  0x96   : > { %v3728_v30 = vld [vmem:[%s4152_s30 + $0x1a0] sm:$0xff]   ;;  %v662_v53 = vld [vmem:[%s4170_s26 + $0x1c8] sm:$0xff] }
  0x97   : > { %3187 = vmatpush3.bf16.msra.mxu0 %v3707_v31  ;;  %v3008_v31 = vcombine.low %v637_v11, %v641_v12  ;;  %v666_v54 = vld [vmem:[%s4170_s26 + $0x1e8] sm:$0xff]  ;;  %v669_v63 = vld [vmem:[%s4170_s26 + $0x200] sm:$0xff] }
  0x98   : > { %3299 = vmatpush3.bf16.msra.mxu1 %v3708_v32  ;;  %3396 = vmatprep.subr.bf16.mxu0 %v3709_v41  ;;  %v3010_v32 = vcombine.low %v638_v13, %v642_v14  ;;  %v654_v41 = vld [vmem:[%s4170_s26 + $0x188] sm:$0xff]  ;;  %v673_v0 = vld [vmem:[%s4170_s26 + $0x220] sm:$0xff] }
  0x99   : > { %3508 = vmatprep.subr.bf16.mxu1 %v3711_v43  ;;  %v3016_v43 = vcombine.low %v645_v23, %v649_v24  ;;  %v670_v1 = vld [vmem:[%s4170_s26 + $0x208] sm:$0xff]  ;;  %v3040_v11 = vcombine.low %v669_v63, %v673_v0  ;;  %v693_v23 = vld [vmem:[%s4170_s26 + $0x2c0] sm:$0xff] }
  0x9a   : > { %1918 = vmatmul.mubr.bf16.vlgmr.msra.gmra.mrb[0].mxu0 %v2976_v36  ;;  %v653_v36 = vld [vmem:[%s4170_s26 + $0x180] sm:$0xff]  ;;  %v674_v2 = vld [vmem:[%s4170_s26 + $0x228] sm:$0xff] }
  0x9b   : > { %2079 = vmatmul.mubr.bf16.vlgmr.msra.gmra.mrb[0].mxu1 %v2978_v39  ;;  %3397 = vmatpush3.bf16.msra.mxu0 %v3710_v42  ;;  %v657_v39 = vld [vmem:[%s4170_s26 + $0x1a0] sm:$0xff]  ;;  %v658_v42 = vld [vmem:[%s4170_s26 + $0x1a8] sm:$0xff]  ;;  %v3042_v12 = vcombine.low %v670_v1, %v674_v2 }
  0x9c   : > { %3509 = vmatpush3.bf16.msra.mxu1 %v3712_v44  ;;  %1925 = vmatprep.mubr.bf16.mxu0 %v2985_v47  ;;  %v3018_v44 = vcombine.low %v646_v26, %v650_v27  ;;  %v3025_v45 = vcombine.high %v653_v36, %v657_v39  ;;  %v3027_v46 = vcombine.high %v654_v41, %v658_v42  ;;  %v3733_v47 = vld [vmem:[%s4152_s30 + $0x170] sm:$0xff]   ;;  %v697_v24 = vld [vmem:[%s4170_s26 + $0x2e0] sm:$0xff]  ;;  %v698_v26 = vld [vmem:[%s4170_s26 + $0x2e8] sm:$0xff] }
  0x9d   : > { %2086 = vmatprep.mubr.bf16.mxu1 %v2987_v51  ;;  %3398 = vmatprep.subr.bf16.mxu0 %v3713_v56  ;;  %v661_v51 = vld [vmem:[%s4170_s26 + $0x1c0] sm:$0xff]  ;;  %v3737_v56 = vld [vmem:[%s4152_s30 + $0x178] sm:$0xff]  }
  0x9e   : > { %3510 = vmatprep.subr.bf16.mxu1 %v3715_v61  ;;  %v3739_v61 = vld [vmem:[%s4152_s30 + $0x1f8] sm:$0xff]  }
  0x9f   : > { %3399 = vmatpush3.bf16.msra.mxu0 %v3714_v59  ;;  %v3738_v59 = vld [vmem:[%s4152_s30 + $0x138] sm:$0xff]  }
  0xa0   : > { %3511 = vmatpush3.bf16.msra.mxu1 %v3716_v62  ;;  %3400 = vmatprep.subr.bf16.mxu0 %v3717_v3  ;;  %v3740_v62 = vld [vmem:[%s4152_s30 + $0x1b8] sm:$0xff]   ;;  %v3032_v3 = vcombine.low %v661_v51, %v665_v52 }
  0xa1   : > { %3512 = vmatprep.subr.bf16.mxu1 %v3719_v8  ;;  %v681_v8 = vld [vmem:[%s4170_s26 + $0x260] sm:$0xff] }
  0xa2   : > { %1926 = vmatmul.mubr.bf16.gmra.mrb[4].mxu0 %v2984_v55  ;;  %v3024_v55 = vcombine.low %v653_v36, %v657_v39  ;;  %v709_v39 = vld [vmem:[%s4170_s26 + $0x340] sm:$0xff] }
  0xa3   : > { %2087 = vmatmul.mubr.bf16.gmra.mrb[4].mxu1 %v2986_v57  ;;  %1933 = vmatprep.mubr.bf16.mxu0 %v2993_v58  ;;  %v3026_v57 = vcombine.low %v654_v41, %v658_v42  ;;  %v3033_v58 = vcombine.high %v661_v51, %v665_v52  ;;  %v710_v41 = vld [vmem:[%s4170_s26 + $0x348] sm:$0xff] }
  0xa4   : > { %2094 = vmatprep.mubr.bf16.mxu1 %v2995_v60  ;;  %3401 = vmatpush3.bf16.msra.mxu0 %v3718_v5  ;;  %v3035_v60 = vcombine.high %v662_v53, %v666_v54  ;;  %v3041_v5 = vcombine.high %v669_v63, %v673_v0  ;;  %v714_v42 = vld [vmem:[%s4170_s26 + $0x368] sm:$0xff]  ;;  %v607_v63 = vld [vmem:[%s4170_s26 + $0x10] sm:$0xff] }
  0xa5   : > { %3513 = vmatpush3.bf16.msra.mxu1 %v3720_v10  ;;  %3402 = vmatprep.subr.bf16.mxu0 %v3721_v15  ;;  %v682_v10 = vld [vmem:[%s4170_s26 + $0x268] sm:$0xff]  ;;  %v685_v15 = vld [vmem:[%s4170_s26 + $0x280] sm:$0xff]  ;;  %v3082_v52 = vcombine.low %v710_v41, %v714_v42  ;;  %v611_v0 = vld [vmem:[%s4170_s26 + $0x30] sm:$0xff] }
  0xa6   : > { %3514 = vmatprep.subr.bf16.mxu1 %v3723_v18  ;;  %v690_v18 = vld [vmem:[%s4170_s26 + $0x2a8] sm:$0xff] }
  0xa8   : > { %3403 = vmatpush3.bf16.msra.mxu0 %v3722_v16  ;;  %v689_v16 = vld [vmem:[%s4170_s26 + $0x2a0] sm:$0xff] }
  0xa9   : > { %3515 = vmatpush3.bf16.msra.mxu1 %v3724_v21  ;;  %3404 = vmatprep.subr.bf16.mxu0 %v3725_v25  ;;  %v3057_v21 = vcombine.high %v685_v15, %v689_v16  ;;  %v694_v25 = vld [vmem:[%s4170_s26 + $0x2c8] sm:$0xff]  ;;  %v3056_v27 = vcombine.low %v685_v15, %v689_v16  ;;  %v623_v15 = vld [vmem:[%s4170_s26 + $0x90] sm:$0xff] }
  0xaa   : > { %1934 = vmatmul.mubr.bf16.gmra.mrb[8].mxu0 %v2992_v4  ;;  %3516 = vmatprep.subr.bf16.mxu1 %v3727_v29  ;;  %v3034_v4 = vcombine.low %v662_v53, %v666_v54  ;;  %v3065_v29 = vcombine.high %v693_v23, %v697_v24  ;;  %v3066_v36 = vcombine.low %v694_v25, %v698_v26  ;;  %v627_v16 = vld [vmem:[%s4170_s26 + $0xb0] sm:$0xff] }
  0xab   : > { %2095 = vmatmul.mubr.bf16.gmra.mrb[8].mxu1 %v2994_v6  ;;  %1941 = vmatprep.mubr.bf16.mxu0 %v3001_v7  ;;  %v3043_v6 = vcombine.high %v670_v1, %v674_v2  ;;  %v677_v7 = vld [vmem:[%s4170_s26 + $0x240] sm:$0xff]  ;;  %v608_v1 = vld [vmem:[%s4170_s26 + $0x18] sm:$0xff] }
  0xac   : > { %2102 = vmatprep.mubr.bf16.mxu1 %v3003_v9  ;;  %3405 = vmatpush3.bf16.msra.mxu0 %v3726_v28  ;;  %v678_v9 = vld [vmem:[%s4170_s26 + $0x248] sm:$0xff]  ;;  %v3049_v13 = vcombine.high %v677_v7, %v681_v8  ;;  %v612_v2 = vld [vmem:[%s4170_s26 + $0x38] sm:$0xff] }
  0xad   : > { %3517 = vmatpush3.bf16.msra.mxu1 %v3728_v30  ;;  %3406 = vmatprep.subr.bf16.mxu0 %v3729_v35  ;;  %v3051_v14 = vcombine.high %v678_v9, %v682_v10  ;;  %v3067_v30 = vcombine.high %v694_v25, %v698_v26  ;;  %v3064_v35 = vcombine.low %v693_v23, %v697_v24  ;;  %v631_v23 = vld [vmem:[%s4170_s26 + $0xd0] sm:$0xff]  ;;  %v632_v25 = vld [vmem:[%s4170_s26 + $0xd8] sm:$0xff] }
  0xae   : > { %3518 = vmatprep.subr.bf16.mxu1 %v3731_v38  ;;  %v635_v24 = vld [vmem:[%s4170_s26 + $0xf0] sm:$0xff]  ;;  %v636_v26 = vld [vmem:[%s4170_s26 + $0xf8] sm:$0xff] }
  0xb0   : > { %3407 = vmatpush3.bf16.msra.mxu0 %v3730_v37 }
  0xb1   : > { %3519 = vmatpush3.bf16.msra.mxu1 %v3732_v40  ;;  %3408 = vmatprep.subr.bf16.mxu0 %v3733_v47  ;;  %v713_v40 = vld [vmem:[%s4170_s26 + $0x360] sm:$0xff] }
  0xb2   : > { %1942 = vmatmul.mubr.bf16.gmra.mrb[12].mxu0 %v3000_v17  ;;  %3520 = vmatprep.subr.bf16.mxu1 %v3735_v49  ;;  %v686_v17 = vld [vmem:[%s4170_s26 + $0x288] sm:$0xff]  ;;  %v717_v47 = vld [vmem:[%s4170_s26 + $0x380] sm:$0xff]  ;;  %v3080_v51 = vcombine.low %v709_v39, %v713_v40 }
  0xb3   : > { %2103 = vmatmul.mubr.bf16.gmra.mrb[12].mxu1 %v3002_v19  ;;  %1949 = vmatprep.mubr.bf16.mxu0 %v3009_v20  ;;  %v3048_v19 = vcombine.low %v677_v7, %v681_v8  ;;  %v3050_v20 = vcombine.low %v678_v9, %v682_v10  ;;  %v3058_v28 = vcombine.low %v686_v17, %v690_v18  ;;  %v718_v49 = vld [vmem:[%s4170_s26 + $0x388] sm:$0xff]  ;;  %v615_v7 = vld [vmem:[%s4170_s26 + $0x50] sm:$0xff]  ;;  %v616_v9 = vld [vmem:[%s4170_s26 + $0x58] sm:$0xff] }
  0xb4   : > { %2110 = vmatprep.mubr.bf16.mxu1 %v3011_v22  ;;  %3409 = vmatpush3.bf16.msra.mxu0 %v3734_v48  ;;  %v3059_v22 = vcombine.high %v686_v17, %v690_v18  ;;  %v721_v48 = vld [vmem:[%s4170_s26 + $0x3a0] sm:$0xff]  ;;  %v619_v8 = vld [vmem:[%s4170_s26 + $0x70] sm:$0xff]  ;;  %v620_v10 = vld [vmem:[%s4170_s26 + $0x78] sm:$0xff] }
  0xb5   : > { %3521 = vmatpush3.bf16.msra.mxu1 %v3736_v50  ;;  %3410 = vmatprep.subr.bf16.mxu0 %v3737_v56  ;;  %v722_v50 = vld [vmem:[%s4170_s26 + $0x3a8] sm:$0xff]  ;;  %v3089_v53 = vcombine.high %v717_v47, %v721_v48  ;;  %v729_v56 = vld [vmem:[%s4170_s26 + $0x3e0] sm:$0xff]  ;;  %v624_v17 = vld [vmem:[%s4170_s26 + $0x98] sm:$0xff] }
  0xb6   : > { %3522 = vmatprep.subr.bf16.mxu1 %v3739_v61  ;;  %v3091_v54 = vcombine.high %v718_v49, %v722_v50  ;;  %v628_v18 = vld [vmem:[%s4170_s26 + $0xb8] sm:$0xff] }
  0xb8   : > { %3411 = vmatpush3.bf16.msra.mxu0 %v3738_v59  ;;  %v3088_v59 = vcombine.low %v717_v47, %v721_v48  ;;  %v655_v47 = vld [vmem:[%s4170_s26 + $0x190] sm:$0xff] }
  0xb9   : > { %3523 = vmatpush3.bf16.msra.mxu1 %v3740_v62  ;;  %v659_v48 = vld [vmem:[%s4170_s26 + $0x1b0] sm:$0xff] }
  0xba   : > { %1950 = vmatmul.mubr.bf16.gmra.mrb[16].mxu0 %v3008_v31  ;;  %v701_v31 = vld [vmem:[%s4170_s26 + $0x300] sm:$0xff] }
  0xbb   : > { %2111 = vmatmul.mubr.bf16.gmra.mrb[16].mxu1 %v3010_v32  ;;  %1957 = vmatprep.mubr.bf16.mxu0 %v3017_v33  ;;  %v705_v32 = vld [vmem:[%s4170_s26 + $0x320] sm:$0xff]  ;;  %v702_v33 = vld [vmem:[%s4170_s26 + $0x308] sm:$0xff] }
  0xbc   : > { %2118 = vmatprep.mubr.bf16.mxu1 %v3019_v34  ;;  %v706_v34 = vld [vmem:[%s4170_s26 + $0x328] sm:$0xff]  ;;  %v3073_v37 = vcombine.high %v701_v31, %v705_v32 }
  0xbd   : > { %v3075_v38 = vcombine.high %v702_v33, %v706_v34 }
  0xc2   : > { %1958 = vmatmul.mubr.bf16.gmra.mrb[20].mxu0 %v3016_v43  ;;  %v3072_v43 = vcombine.low %v701_v31, %v705_v32  ;;  %v639_v31 = vld [vmem:[%s4170_s26 + $0x110] sm:$0xff] }
  0xc3   : > { %2119 = vmatmul.mubr.bf16.gmra.mrb[20].mxu1 %v3018_v44  ;;  %1965 = vmatprep.mubr.bf16.mxu0 %v3025_v45  ;;  %v3074_v44 = vcombine.low %v702_v33, %v706_v34  ;;  %v3081_v45 = vcombine.high %v709_v39, %v713_v40  ;;  %v643_v32 = vld [vmem:[%s4170_s26 + $0x130] sm:$0xff]  ;;  %v640_v33 = vld [vmem:[%s4170_s26 + $0x118] sm:$0xff] }
  0xc4   : > { %2126 = vmatprep.mubr.bf16.mxu1 %v3027_v46  ;;  %v3083_v46 = vcombine.high %v710_v41, %v714_v42  ;;  %v644_v34 = vld [vmem:[%s4170_s26 + $0x138] sm:$0xff]  ;;  %v647_v39 = vld [vmem:[%s4170_s26 + $0x150] sm:$0xff] }
  0xc5   : > { %v651_v40 = vld [vmem:[%s4170_s26 + $0x170] sm:$0xff]  ;;  %v648_v41 = vld [vmem:[%s4170_s26 + $0x158] sm:$0xff] }
  0xc6   : > { %v652_v42 = vld [vmem:[%s4170_s26 + $0x178] sm:$0xff] }
  0xca   : > { %1966 = vmatmul.mubr.bf16.gmra.mrb[24].mxu0 %v3024_v55  ;;  %v725_v55 = vld [vmem:[%s4170_s26 + $0x3c0] sm:$0xff] }
  0xcb   : > { %2127 = vmatmul.mubr.bf16.gmra.mrb[24].mxu1 %v3026_v57  ;;  %1973 = vmatprep.mubr.bf16.mxu0 %v3033_v58  ;;  %v726_v57 = vld [vmem:[%s4170_s26 + $0x3c8] sm:$0xff]  ;;  %v3097_v61 = vcombine.high %v725_v55, %v729_v56 }
  0xcc   : > { %2134 = vmatprep.mubr.bf16.mxu1 %v3035_v60  ;;  %v730_v58 = vld [vmem:[%s4170_s26 + $0x3e8] sm:$0xff]  ;;  %v3090_v60 = vcombine.low %v718_v49, %v722_v50  ;;  %v656_v49 = vld [vmem:[%s4170_s26 + $0x198] sm:$0xff] }
  0xcd   : > { %v3099_v62 = vcombine.high %v726_v57, %v730_v58  ;;  %v660_v50 = vld [vmem:[%s4170_s26 + $0x1b8] sm:$0xff] }
  0xd2   : > { %1974 = vmatmul.mubr.bf16.gmra.mrb[28].mxu0 %v3032_v3  ;;  %v3096_v3 = vcombine.low %v725_v55, %v729_v56  ;;  %v663_v55 = vld [vmem:[%s4170_s26 + $0x1d0] sm:$0xff] }
  0xd3   : > { %2135 = vmatmul.mubr.bf16.gmra.mrb[28].mxu1 %v3034_v4  ;;  %1981 = vmatprep.mubr.bf16.mxu0 %v3041_v5  ;;  %v3098_v4 = vcombine.low %v726_v57, %v730_v58  ;;  %v2981_v5 = vcombine.high %v607_v63, %v611_v0  ;;  %v667_v56 = vld [vmem:[%s4170_s26 + $0x1f0] sm:$0xff]  ;;  %v664_v57 = vld [vmem:[%s4170_s26 + $0x1d8] sm:$0xff] }
  0xd4   : > { %2142 = vmatprep.mubr.bf16.mxu1 %v3043_v6  ;;  %v2983_v6 = vcombine.high %v608_v1, %v612_v2  ;;  %v668_v58 = vld [vmem:[%s4170_s26 + $0x1f8] sm:$0xff] }
  0xda   : > { %1982 = vmatmul.mubr.bf16.gmra.mrb[32].mxu0 %v3040_v11  ;;  %v2980_v11 = vcombine.low %v607_v63, %v611_v0  ;;  %v671_v63 = vld [vmem:[%s4170_s26 + $0x210] sm:$0xff] }
  0xdb   : > { %2143 = vmatmul.mubr.bf16.gmra.mrb[32].mxu1 %v3042_v12  ;;  %1989 = vmatprep.mubr.bf16.mxu0 %v3049_v13  ;;  %v2982_v12 = vcombine.low %v608_v1, %v612_v2  ;;  %v2989_v13 = vcombine.high %v615_v7, %v619_v8  ;;  %v675_v0 = vld [vmem:[%s4170_s26 + $0x230] sm:$0xff]  ;;  %v672_v1 = vld [vmem:[%s4170_s26 + $0x218] sm:$0xff] }
  0xdc   : > { %2150 = vmatprep.mubr.bf16.mxu1 %v3051_v14  ;;  %v2991_v14 = vcombine.high %v616_v9, %v620_v10  ;;  %v676_v2 = vld [vmem:[%s4170_s26 + $0x238] sm:$0xff] }
  0xe2   : > { %1990 = vmatmul.mubr.bf16.gmra.mrb[36].mxu0 %v3048_v19  ;;  %v2988_v19 = vcombine.low %v615_v7, %v619_v8  ;;  %v679_v7 = vld [vmem:[%s4170_s26 + $0x250] sm:$0xff] }
  0xe3   : > { %2151 = vmatmul.mubr.bf16.gmra.mrb[36].mxu1 %v3050_v20  ;;  %1997 = vmatprep.mubr.bf16.mxu0 %v3057_v21  ;;  %v2990_v20 = vcombine.low %v616_v9, %v620_v10  ;;  %v2997_v21 = vcombine.high %v623_v15, %v627_v16  ;;  %v683_v8 = vld [vmem:[%s4170_s26 + $0x270] sm:$0xff]  ;;  %v680_v9 = vld [vmem:[%s4170_s26 + $0x258] sm:$0xff] }
  0xe4   : > { %2158 = vmatprep.mubr.bf16.mxu1 %v3059_v22  ;;  %v2999_v22 = vcombine.high %v624_v17, %v628_v18  ;;  %v684_v10 = vld [vmem:[%s4170_s26 + $0x278] sm:$0xff] }
  0xea   : > { %1998 = vmatmul.mubr.bf16.gmra.mrb[40].mxu0 %v3056_v27  ;;  %v2996_v27 = vcombine.low %v623_v15, %v627_v16  ;;  %v687_v15 = vld [vmem:[%s4170_s26 + $0x290] sm:$0xff] }
  0xeb   : > { %2159 = vmatmul.mubr.bf16.gmra.mrb[40].mxu1 %v3058_v28  ;;  %2005 = vmatprep.mubr.bf16.mxu0 %v3065_v29  ;;  %v2998_v28 = vcombine.low %v624_v17, %v628_v18  ;;  %v3005_v29 = vcombine.high %v631_v23, %v635_v24  ;;  %v691_v16 = vld [vmem:[%s4170_s26 + $0x2b0] sm:$0xff]  ;;  %v688_v17 = vld [vmem:[%s4170_s26 + $0x298] sm:$0xff] }
  0xec   : > { %2166 = vmatprep.mubr.bf16.mxu1 %v3067_v30  ;;  %v3007_v30 = vcombine.high %v632_v25, %v636_v26  ;;  %v692_v18 = vld [vmem:[%s4170_s26 + $0x2b8] sm:$0xff] }
  0xf2   : > { %2006 = vmatmul.mubr.bf16.gmra.mrb[44].mxu0 %v3064_v35  ;;  %v3004_v35 = vcombine.low %v631_v23, %v635_v24  ;;  %v695_v23 = vld [vmem:[%s4170_s26 + $0x2d0] sm:$0xff] }
  0xf3   : > { %2167 = vmatmul.mubr.bf16.gmra.mrb[44].mxu1 %v3066_v36  ;;  %2013 = vmatprep.mubr.bf16.mxu0 %v3073_v37  ;;  %v3006_v36 = vcombine.low %v632_v25, %v636_v26  ;;  %v3013_v37 = vcombine.high %v639_v31, %v643_v32  ;;  %v699_v24 = vld [vmem:[%s4170_s26 + $0x2f0] sm:$0xff]  ;;  %v696_v25 = vld [vmem:[%s4170_s26 + $0x2d8] sm:$0xff] }
  0xf4   : > { %2174 = vmatprep.mubr.bf16.mxu1 %v3075_v38  ;;  %v3015_v38 = vcombine.high %v640_v33, %v644_v34  ;;  %v700_v26 = vld [vmem:[%s4170_s26 + $0x2f8] sm:$0xff] }
  0xfa   : > { %2014 = vmatmul.mubr.bf16.gmra.mrb[48].mxu0 %v3072_v43  ;;  %v3012_v43 = vcombine.low %v639_v31, %v643_v32  ;;  %v703_v31 = vld [vmem:[%s4170_s26 + $0x310] sm:$0xff] }
  0xfb   : > { %2175 = vmatmul.mubr.bf16.gmra.mrb[48].mxu1 %v3074_v44  ;;  %2021 = vmatprep.mubr.bf16.mxu0 %v3081_v45  ;;  %v3014_v44 = vcombine.low %v640_v33, %v644_v34  ;;  %v3021_v45 = vcombine.high %v647_v39, %v651_v40  ;;  %v707_v32 = vld [vmem:[%s4170_s26 + $0x330] sm:$0xff]  ;;  %v704_v34 = vld [vmem:[%s4170_s26 + $0x318] sm:$0xff] }
  0xfc   : > { %2182 = vmatprep.mubr.bf16.mxu1 %v3083_v46  ;;  %v3023_v46 = vcombine.high %v648_v41, %v652_v42 }
 0x102   : > { %2022 = vmatmul.mubr.bf16.gmra.mrb[52].mxu0 %v3080_v51  ;;  %v3020_v51 = vcombine.low %v647_v39, %v651_v40 }
 0x103   : > { %2183 = vmatmul.mubr.bf16.gmra.mrb[52].mxu1 %v3082_v52  ;;  %2029 = vmatprep.mubr.bf16.mxu0 %v3089_v53  ;;  %v3022_v52 = vcombine.low %v648_v41, %v652_v42  ;;  %v3029_v53 = vcombine.high %v655_v47, %v659_v48  ;;  %v3070_v42 = vcombine.low %v696_v25, %v700_v26 }
 0x104   : > { %2190 = vmatprep.mubr.bf16.mxu1 %v3091_v54  ;;  %v3031_v54 = vcombine.high %v656_v49, %v660_v50 }
 0x10a   : > { %2030 = vmatmul.mubr.bf16.gmra.mrb[56].mxu0 %v3088_v59  ;;  %v3028_v59 = vcombine.low %v655_v47, %v659_v48 }
 0x10b   : > { %2191 = vmatmul.mubr.bf16.gmra.mrb[56].mxu1 %v3090_v60  ;;  %2037 = vmatprep.mubr.bf16.mxu0 %v3097_v61  ;;  %v3030_v60 = vcombine.low %v656_v49, %v660_v50  ;;  %v3037_v61 = vcombine.high %v663_v55, %v667_v56 }
 0x10c   : > { %2198 = vmatprep.mubr.bf16.mxu1 %v3099_v62  ;;  %v3039_v62 = vcombine.high %v664_v57, %v668_v58 }
 0x112   : > { %2038 = vmatmul.mubr.bf16.gmra.mrb[60].mxu0 %v3096_v3  ;;  %v3036_v3 = vcombine.low %v663_v55, %v667_v56  ;;  %v712_v56 = vld [vmem:[%s4170_s26 + $0x358] sm:$0xff] }
 0x113   : > { %2199 = vmatmul.mubr.bf16.gmra.mrb[60].mxu1 %v3098_v4  ;;  %2239 = vmatprep.mubr.bf16.mxu0 %v2981_v5  ;;  %v3038_v4 = vcombine.low %v664_v57, %v668_v58  ;;  %v3045_v5 = vcombine.high %v671_v63, %v675_v0  ;;  %v716_v57 = vld [vmem:[%s4170_s26 + $0x378] sm:$0xff] }
 0x114   : > { %2400 = vmatprep.mubr.bf16.mxu1 %v2983_v6  ;;  %v3047_v6 = vcombine.high %v672_v1, %v676_v2 }
 0x11a   : > { %2240 = vmatmul.mubr.bf16.vlgmr.msra.gmra.mrb[64].mxu0 %v2980_v11  ;;  %v3044_v11 = vcombine.low %v671_v63, %v675_v0 }
 0x11b   : > { %2401 = vmatmul.mubr.bf16.vlgmr.msra.gmra.mrb[64].mxu1 %v2982_v12  ;;  %2247 = vmatprep.mubr.bf16.mxu0 %v2989_v13  ;;  %v3046_v12 = vcombine.low %v672_v1, %v676_v2  ;;  %v3053_v13 = vcombine.high %v679_v7, %v683_v8 }
 0x11c   : > { %2408 = vmatprep.mubr.bf16.mxu1 %v2991_v14  ;;  %v3055_v14 = vcombine.high %v680_v9, %v684_v10 }
 0x122   : > { %2248 = vmatmul.mubr.bf16.gmra.mrb[68].mxu0 %v2988_v19  ;;  %v3052_v19 = vcombine.low %v679_v7, %v683_v8 }
 0x123   : > { %2409 = vmatmul.mubr.bf16.gmra.mrb[68].mxu1 %v2990_v20  ;;  %2255 = vmatprep.mubr.bf16.mxu0 %v2997_v21  ;;  %v3054_v20 = vcombine.low %v680_v9, %v684_v10  ;;  %v3061_v21 = vcombine.high %v687_v15, %v691_v16 }
 0x124   : > { %2416 = vmatprep.mubr.bf16.mxu1 %v2999_v22  ;;  %v3063_v22 = vcombine.high %v688_v17, %v692_v18 }
 0x12a   : > { %2256 = vmatmul.mubr.bf16.gmra.mrb[72].mxu0 %v2996_v27  ;;  %v3060_v27 = vcombine.low %v687_v15, %v691_v16  ;;  %v724_v15 = vld [vmem:[%s4170_s26 + $0x3b8] sm:$0xff] }
 0x12b   : > { %2417 = vmatmul.mubr.bf16.gmra.mrb[72].mxu1 %v2998_v28  ;;  %2263 = vmatprep.mubr.bf16.mxu0 %v3005_v29  ;;  %v3062_v28 = vcombine.low %v688_v17, %v692_v18  ;;  %v3069_v29 = vcombine.high %v695_v23, %v699_v24 }
 0x12c   : > { %2424 = vmatprep.mubr.bf16.mxu1 %v3007_v30  ;;  %v3071_v30 = vcombine.high %v696_v25, %v700_v26 }
 0x132   : > { %2264 = vmatmul.mubr.bf16.gmra.mrb[76].mxu0 %v3004_v35  ;;  %v708_v35 = vld [vmem:[%s4170_s26 + $0x338] sm:$0xff] }
 0x133   : > { %2425 = vmatmul.mubr.bf16.gmra.mrb[76].mxu1 %v3006_v36  ;;  %2271 = vmatprep.mubr.bf16.mxu0 %v3013_v37  ;;  %v3079_v47 = vcombine.high %v704_v34, %v708_v35  ;;  %v3078_v0 = vcombine.low %v704_v34, %v708_v35  ;;  %v731_v34 = vld [vmem:[%s4170_s26 + $0x3f0] sm:$0xff] }
 0x134   : > { %2432 = vmatprep.mubr.bf16.mxu1 %v3015_v38  ;;  %v3068_v38 = vcombine.low %v695_v23, %v699_v24 }
 0x13a   : > { %2272 = vmatmul.mubr.bf16.gmra.mrb[80].mxu0 %v3012_v43  ;;  %v3077_v43 = vcombine.high %v703_v31, %v707_v32 }
 0x13b   : > { %2433 = vmatmul.mubr.bf16.gmra.mrb[80].mxu1 %v3014_v44  ;;  %2279 = vmatprep.mubr.bf16.mxu0 %v3021_v45 }
 0x13c   : > { %2440 = vmatprep.mubr.bf16.mxu1 %v3023_v46 }
 0x142   : > { %2280 = vmatmul.mubr.bf16.gmra.mrb[84].mxu0 %v3020_v51 }
 0x143   : > { %2441 = vmatmul.mubr.bf16.gmra.mrb[84].mxu1 %v3022_v52  ;;  %2287 = vmatprep.mubr.bf16.mxu0 %v3029_v53  ;;  %v711_v53 = vld [vmem:[%s4170_s26 + $0x350] sm:$0xff] }
 0x144   : > { %2448 = vmatprep.mubr.bf16.mxu1 %v3031_v54  ;;  %v715_v54 = vld [vmem:[%s4170_s26 + $0x370] sm:$0xff] }
 0x145   : > { %v3085_v1 = vcombine.high %v711_v53, %v715_v54  ;;  %v3084_v18 = vcombine.low %v711_v53, %v715_v54 }
 0x14a   : > { %2288 = vmatmul.mubr.bf16.gmra.mrb[88].mxu0 %v3028_v59 }
 0x14b   : > { %2449 = vmatmul.mubr.bf16.gmra.mrb[88].mxu1 %v3030_v60  ;;  %2295 = vmatprep.mubr.bf16.mxu0 %v3037_v61  ;;  %v3076_v60 = vcombine.low %v703_v31, %v707_v32 }
 0x14c   : > { %2456 = vmatprep.mubr.bf16.mxu1 %v3039_v62 }
 0x152   : > { %2296 = vmatmul.mubr.bf16.gmra.mrb[92].mxu0 %v3036_v3 }
 0x153   : > { %2457 = vmatmul.mubr.bf16.gmra.mrb[92].mxu1 %v3038_v4  ;;  %2303 = vmatprep.mubr.bf16.mxu0 %v3045_v5  ;;  %v3087_v5 = vcombine.high %v712_v56, %v716_v57 }
 0x154   : > { %2464 = vmatprep.mubr.bf16.mxu1 %v3047_v6 }
 0x15a   : > { %2304 = vmatmul.mubr.bf16.gmra.mrb[96].mxu0 %v3044_v11  ;;  %v719_v11 = vld [vmem:[%s4170_s26 + $0x390] sm:$0xff] }
 0x15b   : > { %2465 = vmatmul.mubr.bf16.gmra.mrb[96].mxu1 %v3046_v12  ;;  %2311 = vmatprep.mubr.bf16.mxu0 %v3053_v13  ;;  %v723_v12 = vld [vmem:[%s4170_s26 + $0x3b0] sm:$0xff] }
 0x15c   : > { %2472 = vmatprep.mubr.bf16.mxu1 %v3055_v14  ;;  %v720_v14 = vld [vmem:[%s4170_s26 + $0x398] sm:$0xff]  ;;  %v3093_v23 = vcombine.high %v719_v11, %v723_v12 }
 0x162   : > { %2312 = vmatmul.mubr.bf16.gmra.mrb[100].mxu0 %v3052_v19 }
 0x163   : > { %2473 = vmatmul.mubr.bf16.gmra.mrb[100].mxu1 %v3054_v20  ;;  %2319 = vmatprep.mubr.bf16.mxu0 %v3061_v21 }
 0x164   : > { %2480 = vmatprep.mubr.bf16.mxu1 %v3063_v22  ;;  %v3086_v22 = vcombine.low %v712_v56, %v716_v57 }
 0x16a   : > { %2320 = vmatmul.mubr.bf16.gmra.mrb[104].mxu0 %v3060_v27  ;;  %v3095_v27 = vcombine.high %v720_v14, %v724_v15 }
 0x16b   : > { %2481 = vmatmul.mubr.bf16.gmra.mrb[104].mxu1 %v3062_v28  ;;  %2327 = vmatprep.mubr.bf16.mxu0 %v3069_v29 }
 0x16c   : > { %2488 = vmatprep.mubr.bf16.mxu1 %v3071_v30 }
 0x16d   : > { %v3188_v33 = vpop.f32.mrb[0].mxu0 }
 0x16e   : > { %v3300_v36 = vpop.f32.mrb[0].mxu1  ;;  %v3189_v37 = vpop.f32.mrb[1].mxu0 }
 0x16f   : > { %v3190_v39 = vadd.f32 %v3189_v37, %v3188_v33  ;;  %v3301_v40 = vpop.f32.mrb[1].mxu1  ;;  %v3191_v41 = vpop.f32.mrb[2].mxu0  ;;  %v727_v33 = vld [vmem:[%s4170_s26 + $0x3d0] sm:$0xff]  ;;  %v732_v37 = vld [vmem:[%s4170_s26 + $0x3f8] sm:$0xff] }
 0x170   : > { %v3302_v44 = vadd.f32 %v3301_v40, %v3300_v36  ;;  %v3303_v45 = vpop.f32.mrb[2].mxu1  ;;  %v3192_v46 = vpop.f32.mrb[3].mxu0  ;;  %v728_v36 = vld [vmem:[%s4170_s26 + $0x3d8] sm:$0xff]  ;;  %v3092_v40 = vcombine.low %v719_v11, %v723_v12 }
 0x171   : > { %v3193_v48 = vadd.f32 %v3192_v46, %v3191_v41  ;;  %v3304_v49 = vpop.f32.mrb[3].mxu1 }
 0x172   : > { %v4417_v50 = vadd.f32 %v3302_v44, %v3190_v39  ;;  %v3305_v51 = vadd.f32 %v3304_v49, %v3303_v45  ;;  %2328 = vmatmul.mubr.bf16.gmra.mrb[108].mxu0 %v3068_v38  ;;  %v3094_v44 = vcombine.low %v720_v14, %v724_v15  ;;  %v3101_v45 = vcombine.high %v727_v33, %v731_v34 }
 0x173   : > { %2489 = vmatmul.mubr.bf16.gmra.mrb[108].mxu1 %v3070_v42  ;;  %2335 = vmatprep.mubr.bf16.mxu0 %v3077_v43  ;;  %v3103_v49 = vcombine.high %v728_v36, %v732_v37 }
 0x174   : > { %v4419_v52 = vadd.f32 %v3305_v51, %v3193_v48  ;;  %2496 = vmatprep.mubr.bf16.mxu1 %v3079_v47 }
 0x175   : > { %v3194_v55 = vpop.f32.mrb[4].mxu0 }
 0x176   : > { %v3306_v58 = vpop.f32.mrb[4].mxu1  ;;  %v3195_v59 = vpop.f32.mrb[5].mxu0 }
 0x177   : > { %v3196_v61 = vadd.f32 %v3195_v59, %v3194_v55  ;;  %v3307_v62 = vpop.f32.mrb[5].mxu1  ;;  %v3197_v63 = vpop.f32.mrb[6].mxu0 }
 0x178   : > { %v3308_v2 = vadd.f32 %v3307_v62, %v3306_v58  ;;  %v3309_v3 = vpop.f32.mrb[6].mxu1  ;;  %v3198_v4 = vpop.f32.mrb[7].mxu0 }
 0x179   : > { %v3199_v6 = vadd.f32 %v3198_v4, %v3197_v63  ;;  %v3310_v7 = vpop.f32.mrb[7].mxu1 }
 0x17a   : > { %v4425_v8 = vadd.f32 %v3308_v2, %v3196_v61  ;;  %v3311_v9 = vadd.f32 %v3310_v7, %v3309_v3  ;;  %2336 = vmatmul.mubr.bf16.gmra.mrb[112].mxu0 %v3076_v60  ;;  %v3100_v60 = vcombine.low %v727_v33, %v731_v34 }
 0x17b   : > { %2497 = vmatmul.mubr.bf16.gmra.mrb[112].mxu1 %v3078_v0  ;;  %2343 = vmatprep.mubr.bf16.mxu0 %v3085_v1  ;;  %v3102_v0 = vcombine.low %v728_v36, %v732_v37 }
 0x17c   : > { %v4427_v10 = vadd.f32 %v3311_v9, %v3199_v6  ;;  %2504 = vmatprep.mubr.bf16.mxu1 %v3087_v5 }
 0x17d   : > { %v3200_v13 = vpop.f32.mrb[8].mxu0 }
 0x17e   : > { %v3312_v16 = vpop.f32.mrb[8].mxu1  ;;  %v3201_v17 = vpop.f32.mrb[9].mxu0 }
 0x17f   : > { %v3202_v19 = vadd.f32 %v3201_v17, %v3200_v13  ;;  %v3313_v20 = vpop.f32.mrb[9].mxu1  ;;  %v3203_v21 = vpop.f32.mrb[10].mxu0 }
 0x180   : > { %v3314_v24 = vadd.f32 %v3313_v20, %v3312_v16  ;;  %v3315_v25 = vpop.f32.mrb[10].mxu1  ;;  %v3204_v26 = vpop.f32.mrb[11].mxu0 }
 0x181   : > { %v3205_v28 = vadd.f32 %v3204_v26, %v3203_v21  ;;  %v3316_v29 = vpop.f32.mrb[11].mxu1 }
 0x182   : > { %v4433_v30 = vadd.f32 %v3314_v24, %v3202_v19  ;;  %v3317_v31 = vadd.f32 %v3316_v29, %v3315_v25  ;;  %2344 = vmatmul.mubr.bf16.gmra.mrb[116].mxu0 %v3084_v18 }
 0x183   : > { %2505 = vmatmul.mubr.bf16.gmra.mrb[116].mxu1 %v3086_v22  ;;  %2351 = vmatprep.mubr.bf16.mxu0 %v3093_v23 }
 0x184   : > { %v4435_v32 = vadd.f32 %v3317_v31, %v3205_v28  ;;  %2512 = vmatprep.mubr.bf16.mxu1 %v3095_v27 }
 0x185   : > { %v3206_v35 = vpop.f32.mrb[12].mxu0 }
 0x186   : > { %v3318_v38 = vpop.f32.mrb[12].mxu1  ;;  %v3207_v39 = vpop.f32.mrb[13].mxu0 }
 0x187   : > { %v3208_v41 = vadd.f32 %v3207_v39, %v3206_v35  ;;  %v3319_v42 = vpop.f32.mrb[13].mxu1  ;;  %v3209_v43 = vpop.f32.mrb[14].mxu0 }
 0x188   : > { %v3320_v46 = vadd.f32 %v3319_v42, %v3318_v38  ;;  %v3321_v47 = vpop.f32.mrb[14].mxu1  ;;  %v3210_v48 = vpop.f32.mrb[15].mxu0 }
 0x189   : > { %v3211_v51 = vadd.f32 %v3210_v48, %v3209_v43  ;;  %v3322_v53 = vpop.f32.mrb[15].mxu1 }
 0x18a   : > { %v4441_v54 = vadd.f32 %v3320_v46, %v3208_v41  ;;  %v3323_v55 = vadd.f32 %v3322_v53, %v3321_v47  ;;  %2352 = vmatmul.mubr.bf16.gmra.mrb[120].mxu0 %v3092_v40 }
 0x18b   : > { %2513 = vmatmul.mubr.bf16.gmra.mrb[120].mxu1 %v3094_v44  ;;  %2359 = vmatprep.mubr.bf16.mxu0 %v3101_v45 }
 0x18c   : > { %v4443_v56 = vadd.f32 %v3323_v55, %v3211_v51  ;;  %2520 = vmatprep.mubr.bf16.mxu1 %v3103_v49 }
 0x18d   : > { %v3212_v57 = vpop.f32.mrb[16].mxu0 }
 0x18e   : > { %v3324_v58 = vpop.f32.mrb[16].mxu1  ;;  %v3213_v59 = vpop.f32.mrb[17].mxu0 }
 0x18f   : > { %v3214_v61 = vadd.f32 %v3213_v59, %v3212_v57  ;;  %v3325_v62 = vpop.f32.mrb[17].mxu1  ;;  %v3215_v63 = vpop.f32.mrb[18].mxu0 }
 0x190   : > { %v3326_v1 = vadd.f32 %v3325_v62, %v3324_v58  ;;  %v3327_v2 = vpop.f32.mrb[18].mxu1  ;;  %v3216_v3 = vpop.f32.mrb[19].mxu0 }
 0x191   : > { %v3217_v4 = vadd.f32 %v3216_v3, %v3215_v63  ;;  %v3328_v5 = vpop.f32.mrb[19].mxu1 }
 0x192   : > { %v4445_v6 = vadd.f32 %v3326_v1, %v3214_v61  ;;  %v3329_v7 = vadd.f32 %v3328_v5, %v3327_v2  ;;  %2360 = vmatmul.mubr.bf16.gmra.mrb[124].mxu0 %v3100_v60 }
 0x193   : > { %2521 = vmatmul.mubr.bf16.gmra.mrb[124].mxu1 %v3102_v0 }
 0x194   : > { %v4447_v9 = vadd.f32 %v3329_v7, %v3217_v4 }
 0x195   : > { %v3218_v11 = vpop.f32.mrb[20].mxu0 }
 0x196   : > { %v3330_v12 = vpop.f32.mrb[20].mxu1  ;;  %v3219_v13 = vpop.f32.mrb[21].mxu0 }
 0x197   : > { %v3220_v14 = vadd.f32 %v3219_v13, %v3218_v11  ;;  %v3331_v15 = vpop.f32.mrb[21].mxu1  ;;  %v3221_v16 = vpop.f32.mrb[22].mxu0 }
 0x198   : > { %v3332_v17 = vadd.f32 %v3331_v15, %v3330_v12  ;;  %v3333_v18 = vpop.f32.mrb[22].mxu1  ;;  %v3222_v19 = vpop.f32.mrb[23].mxu0 }
 0x199   : > { %v3223_v20 = vadd.f32 %v3222_v19, %v3221_v16  ;;  %v3334_v21 = vpop.f32.mrb[23].mxu1 }
 0x19a   : > { %v4449_v22 = vadd.f32 %v3332_v17, %v3220_v14  ;;  %v3335_v23 = vadd.f32 %v3334_v21, %v3333_v18 }
 0x19c   : > { %v4451_v24 = vadd.f32 %v3335_v23, %v3223_v20 }
 0x19d   : > { %v3224_v25 = vpop.f32.mrb[24].mxu0 }
 0x19e   : > { %v3336_v26 = vpop.f32.mrb[24].mxu1  ;;  %v3225_v27 = vpop.f32.mrb[25].mxu0 }
 0x19f   : > { %v3226_v28 = vadd.f32 %v3225_v27, %v3224_v25  ;;  %v3337_v29 = vpop.f32.mrb[25].mxu1  ;;  %v3227_v31 = vpop.f32.mrb[26].mxu0 }
 0x1a0   : > { %v3338_v33 = vadd.f32 %v3337_v29, %v3336_v26  ;;  %v3339_v34 = vpop.f32.mrb[26].mxu1  ;;  %v3228_v35 = vpop.f32.mrb[27].mxu0 }
 0x1a1   : > { %v3229_v36 = vadd.f32 %v3228_v35, %v3227_v31  ;;  %v3340_v37 = vpop.f32.mrb[27].mxu1 }
 0x1a2   : > { %v4453_v38 = vadd.f32 %v3338_v33, %v3226_v28  ;;  %v3341_v39 = vadd.f32 %v3340_v37, %v3339_v34 }
 0x1a4   : > { %v4455_v40 = vadd.f32 %v3341_v39, %v3229_v36 }
 0x1a5   : > { %v3230_v41 = vpop.f32.mrb[28].mxu0 }
 0x1a6   : > { %v3342_v42 = vpop.f32.mrb[28].mxu1  ;;  %v3231_v43 = vpop.f32.mrb[29].mxu0 }
 0x1a7   : > { %v3232_v44 = vadd.f32 %v3231_v43, %v3230_v41  ;;  %v3343_v45 = vpop.f32.mrb[29].mxu1  ;;  %v3233_v46 = vpop.f32.mrb[30].mxu0 }
 0x1a8   : > { %v3344_v47 = vadd.f32 %v3343_v45, %v3342_v42  ;;  %v3345_v48 = vpop.f32.mrb[30].mxu1  ;;  %v3234_v49 = vpop.f32.mrb[31].mxu0 }
 0x1a9   : > { %v3235_v51 = vadd.f32 %v3234_v49, %v3233_v46  ;;  %v3346_v53 = vpop.f32.mrb[31].mxu1 }
 0x1aa   : > { %v4457_v55 = vadd.f32 %v3344_v47, %v3232_v44  ;;  %v3347_v57 = vadd.f32 %v3346_v53, %v3345_v48 }
 0x1ac   : > { %v4459_v58 = vadd.f32 %v3347_v57, %v3235_v51 }
 0x1ad   : > { %v3236_v59 = vpop.f32.mrb[32].mxu0 }
 0x1ae   : > { %v3348_v60 = vpop.f32.mrb[32].mxu1  ;;  %v3237_v61 = vpop.f32.mrb[33].mxu0 }
 0x1af   : > { %v3238_v62 = vadd.f32 %v3237_v61, %v3236_v59  ;;  %v3349_v63 = vpop.f32.mrb[33].mxu1  ;;  %v3239_v0 = vpop.f32.mrb[34].mxu0 }
 0x1b0   : > { %v3350_v1 = vadd.f32 %v3349_v63, %v3348_v60  ;;  %v3351_v2 = vpop.f32.mrb[34].mxu1  ;;  %v3240_v3 = vpop.f32.mrb[35].mxu0 }
 0x1b1   : > { %v3241_v4 = vadd.f32 %v3240_v3, %v3239_v0  ;;  %v3352_v5 = vpop.f32.mrb[35].mxu1 }
 0x1b2   : > { %v4461_v7 = vadd.f32 %v3350_v1, %v3238_v62  ;;  %v3353_v11 = vadd.f32 %v3352_v5, %v3351_v2 }
 0x1b4   : > { %v4463_v12 = vadd.f32 %v3353_v11, %v3241_v4 }
 0x1b5   : > { %v3242_v13 = vpop.f32.mrb[36].mxu0 }
 0x1b6   : > { %v3354_v14 = vpop.f32.mrb[36].mxu1  ;;  %v3243_v15 = vpop.f32.mrb[37].mxu0 }
 0x1b7   : > { %v3244_v16 = vadd.f32 %v3243_v15, %v3242_v13  ;;  %v3355_v17 = vpop.f32.mrb[37].mxu1  ;;  %v3245_v18 = vpop.f32.mrb[38].mxu0 }
 0x1b8   : > { %v3356_v19 = vadd.f32 %v3355_v17, %v3354_v14  ;;  %v3357_v20 = vpop.f32.mrb[38].mxu1  ;;  %v3246_v21 = vpop.f32.mrb[39].mxu0 }
 0x1b9   : > { %v3247_v23 = vadd.f32 %v3246_v21, %v3245_v18  ;;  %v3358_v25 = vpop.f32.mrb[39].mxu1 }
 0x1ba   : > { %v4465_v26 = vadd.f32 %v3356_v19, %v3244_v16  ;;  %v3359_v27 = vadd.f32 %v3358_v25, %v3357_v20 }
 0x1bc   : > { %v4467_v28 = vadd.f32 %v3359_v27, %v3247_v23 }
 0x1bd   : > { %v3248_v29 = vpop.f32.mrb[40].mxu0 }
 0x1be   : > { %v3360_v31 = vpop.f32.mrb[40].mxu1  ;;  %v3249_v33 = vpop.f32.mrb[41].mxu0 }
 0x1bf   : > { %v3250_v34 = vadd.f32 %v3249_v33, %v3248_v29  ;;  %v3361_v35 = vpop.f32.mrb[41].mxu1  ;;  %v3251_v36 = vpop.f32.mrb[42].mxu0 }
 0x1c0   : > { %v3362_v37 = vadd.f32 %v3361_v35, %v3360_v31  ;;  %v3363_v39 = vpop.f32.mrb[42].mxu1  ;;  %v3252_v41 = vpop.f32.mrb[43].mxu0 }
 0x1c1   : > { %v3253_v42 = vadd.f32 %v3252_v41, %v3251_v36  ;;  %v3364_v43 = vpop.f32.mrb[43].mxu1 }
 0x1c2   : > { %v4469_v44 = vadd.f32 %v3362_v37, %v3250_v34  ;;  %v3365_v45 = vadd.f32 %v3364_v43, %v3363_v39 }
 0x1c4   : > { %v4471_v46 = vadd.f32 %v3365_v45, %v3253_v42 }
 0x1c5   : > { %v3254_v47 = vpop.f32.mrb[44].mxu0 }
 0x1c6   : > { %v3366_v48 = vpop.f32.mrb[44].mxu1  ;;  %v3255_v49 = vpop.f32.mrb[45].mxu0 }
 0x1c7   : > { %v3256_v51 = vadd.f32 %v3255_v49, %v3254_v47  ;;  %v3367_v53 = vpop.f32.mrb[45].mxu1  ;;  %v3257_v57 = vpop.f32.mrb[46].mxu0 }
 0x1c8   : > { %v3368_v59 = vadd.f32 %v3367_v53, %v3366_v48  ;;  %v3369_v60 = vpop.f32.mrb[46].mxu1  ;;  %v3258_v61 = vpop.f32.mrb[47].mxu0 }
 0x1c9   : > { %v3259_v62 = vadd.f32 %v3258_v61, %v3257_v57  ;;  %v3370_v63 = vpop.f32.mrb[47].mxu1 }
 0x1ca   : > { %v4473_v0 = vadd.f32 %v3368_v59, %v3256_v51  ;;  %v3371_v1 = vadd.f32 %v3370_v63, %v3369_v60 }
 0x1cc   : > { %v4475_v2 = vadd.f32 %v3371_v1, %v3259_v62 }
 0x1cd   : > { %v3260_v3 = vpop.f32.mrb[48].mxu0 }
 0x1ce   : > { %v3372_v4 = vpop.f32.mrb[48].mxu1  ;;  %v3261_v5 = vpop.f32.mrb[49].mxu0 }
 0x1cf   : > { %v3262_v11 = vadd.f32 %v3261_v5, %v3260_v3  ;;  %v3373_v13 = vpop.f32.mrb[49].mxu1  ;;  %v3263_v14 = vpop.f32.mrb[50].mxu0 }
 0x1d0   : > { %v3374_v15 = vadd.f32 %v3373_v13, %v3372_v4  ;;  %v3375_v16 = vpop.f32.mrb[50].mxu1  ;;  %v3264_v17 = vpop.f32.mrb[51].mxu0 }
 0x1d1   : > { %v3265_v18 = vadd.f32 %v3264_v17, %v3263_v14  ;;  %v3376_v19 = vpop.f32.mrb[51].mxu1 }
 0x1d2   : > { %v4477_v20 = vadd.f32 %v3374_v15, %v3262_v11  ;;  %v3377_v21 = vadd.f32 %v3376_v19, %v3375_v16 }
 0x1d4   : > { %v4479_v23 = vadd.f32 %v3377_v21, %v3265_v18 }
 0x1d5   : > { %v3266_v25 = vpop.f32.mrb[52].mxu0 }
 0x1d6   : > { %v3378_v27 = vpop.f32.mrb[52].mxu1  ;;  %v3267_v29 = vpop.f32.mrb[53].mxu0 }
 0x1d7   : > { %v3268_v31 = vadd.f32 %v3267_v29, %v3266_v25  ;;  %v3379_v33 = vpop.f32.mrb[53].mxu1  ;;  %v3269_v34 = vpop.f32.mrb[54].mxu0 }
 0x1d8   : > { %v3380_v35 = vadd.f32 %v3379_v33, %v3378_v27  ;;  %v3381_v36 = vpop.f32.mrb[54].mxu1  ;;  %v3270_v37 = vpop.f32.mrb[55].mxu0 }
 0x1d9   : > { %v3271_v39 = vadd.f32 %v3270_v37, %v3269_v34  ;;  %v3382_v41 = vpop.f32.mrb[55].mxu1 }
 0x1da   : > { %v4481_v42 = vadd.f32 %v3380_v35, %v3268_v31  ;;  %v3383_v43 = vadd.f32 %v3382_v41, %v3381_v36 }
 0x1dc   : > { %v4483_v45 = vadd.f32 %v3383_v43, %v3271_v39 }
 0x1dd   : > { %v3272_v47 = vpop.f32.mrb[56].mxu0 }
 0x1de   : > { %v3384_v48 = vpop.f32.mrb[56].mxu1  ;;  %v3273_v49 = vpop.f32.mrb[57].mxu0 }
 0x1df   : > { %v3274_v51 = vadd.f32 %v3273_v49, %v3272_v47  ;;  %v3385_v53 = vpop.f32.mrb[57].mxu1  ;;  %v3275_v57 = vpop.f32.mrb[58].mxu0 }
 0x1e0   : > { %v3386_v59 = vadd.f32 %v3385_v53, %v3384_v48  ;;  %v3387_v60 = vpop.f32.mrb[58].mxu1  ;;  %v3276_v61 = vpop.f32.mrb[59].mxu0  ;;  %v573_v53 = vld [vmem:[%s4158_s15] sm:$0xff] }
 0x1e1   : > { %v3277_v62 = vadd.f32 %v3276_v61, %v3275_v57  ;;  %v3388_v63 = vpop.f32.mrb[59].mxu1  ;;  %v574_v61 = vld [vmem:[%s4158_s15 + $0x8] sm:$0xff] }
 0x1e2   : > { %v4485_v1 = vadd.f32 %v3386_v59, %v3274_v51  ;;  %v3389_v3 = vadd.f32 %v3388_v63, %v3387_v60 }
 0x1e4   : > { %v4487_v4 = vadd.f32 %v3389_v3, %v3277_v62 }
 0x1e5   : > { %v3278_v5 = vpop.f32.mrb[60].mxu0 }
 0x1e6   : > { %v3390_v11 = vpop.f32.mrb[60].mxu1  ;;  %v3279_v13 = vpop.f32.mrb[61].mxu0 }
 0x1e7   : > { %v3280_v14 = vadd.f32 %v3279_v13, %v3278_v5  ;;  %v3391_v15 = vpop.f32.mrb[61].mxu1  ;;  %v3281_v16 = vpop.f32.mrb[62].mxu0 }
 0x1e8   : > { %v3392_v17 = vadd.f32 %v3391_v15, %v3390_v11  ;;  %v3393_v18 = vpop.f32.mrb[62].mxu1  ;;  %v3282_v19 = vpop.f32.mrb[63].mxu0 }
 0x1e9   : > { %v3283_v21 = vadd.f32 %v3282_v19, %v3281_v16  ;;  %v3394_v25 = vpop.f32.mrb[63].mxu1 }
 0x1ea   : > { %v4489_v27 = vadd.f32 %v3392_v17, %v3280_v14  ;;  %v3395_v29 = vadd.f32 %v3394_v25, %v3393_v18  ;;  %v575_v25 = vld [vmem:[%s4158_s15 + $0x10] sm:$0xff] }
 0x1ec   : > { %v4491_v31 = vadd.f32 %v3395_v29, %v3283_v21 }
 0x1ed   : > { %v3412_v33 = vpop.f32.mrb[64].mxu0 }
 0x1ee   : > { %v3524_v34 = vpop.f32.mrb[64].mxu1  ;;  %v3413_v35 = vpop.f32.mrb[65].mxu0 }
 0x1ef   : > { %v3414_v36 = vadd.f32 %v3413_v35, %v3412_v33  ;;  %v3525_v37 = vpop.f32.mrb[65].mxu1  ;;  %v3415_v39 = vpop.f32.mrb[66].mxu0  ;;  %v576_v35 = vld [vmem:[%s4158_s15 + $0x18] sm:$0xff] }
 0x1f0   : > { %v3526_v41 = vadd.f32 %v3525_v37, %v3524_v34  ;;  %v3527_v43 = vpop.f32.mrb[66].mxu1  ;;  %v3416_v47 = vpop.f32.mrb[67].mxu0 }
 0x1f1   : > { %v2242_v48 = vadd.f32 %v3414_v36, %v4417_v50  ;;  %v3417_v49 = vadd.f32 %v3416_v47, %v3415_v39  ;;  %v3528_v51 = vpop.f32.mrb[67].mxu1 }
 0x1f2   : > { %v3529_v57 = vadd.f32 %v3528_v51, %v3527_v43 }
 0x1f3   : > { %v2403_v59 = vadd.f32 %v3526_v41, %v2242_v48  ;;  %v2245_v60 = vadd.f32 %v3417_v49, %v4419_v52 }
 0x1f5   : > { %v2529_v62 = vadd.f32 %v2403_v59, %v573_v53  ;;  %v2406_v63 = vadd.f32 %v3529_v57, %v2245_v60  ;;  %v3418_v3 = vpop.f32.mrb[68].mxu0 }
 0x1f6   : > { %v3530_v5 = vpop.f32.mrb[68].mxu1  ;;  %v3419_v11 = vpop.f32.mrb[69].mxu0 }
 0x1f7   : > { %2562 = vst.msk [vmem:[%s4158_s15] sm:$0xff] %vm2561_vm1, %v2529_v62  ;;  %v2530_v50 = vadd.f32 %v2406_v63, %v574_v61  ;;  %v3420_v13 = vadd.f32 %v3419_v11, %v3418_v3  ;;  %v3531_v14 = vpop.f32.mrb[69].mxu1  ;;  %v3421_v15 = vpop.f32.mrb[70].mxu0  ;;  %v577_v61 = vld [vmem:[%s4158_s15 + $0x20] sm:$0xff] }
 0x1f8   : > { %v3532_v16 = vadd.f32 %v3531_v14, %v3530_v5  ;;  %v3533_v17 = vpop.f32.mrb[70].mxu1  ;;  %v3422_v52 = vpop.f32.mrb[71].mxu0  ;;  %v578_v5 = vld [vmem:[%s4158_s15 + $0x28] sm:$0xff] }
 0x1f9   : > { %2563 = vst.msk [vmem:[%s4158_s15 + $0x8] sm:$0xff] %vm2561_vm1, %v2530_v50  ;;  %v2250_v18 = vadd.f32 %v3420_v13, %v4425_v8  ;;  %v3423_v19 = vadd.f32 %v3422_v52, %v3421_v15  ;;  %v3534_v21 = vpop.f32.mrb[71].mxu1 }
 0x1fa   : > { %v3535_v29 = vadd.f32 %v3534_v21, %v3533_v17 }
 0x1fb   : > { %v2411_v33 = vadd.f32 %v3532_v16, %v2250_v18  ;;  %v2253_v34 = vadd.f32 %v3423_v19, %v4427_v10 }
 0x1fd   : > { %v2531_v36 = vadd.f32 %v2411_v33, %v575_v25  ;;  %v2414_v37 = vadd.f32 %v3535_v29, %v2253_v34  ;;  %v3424_v39 = vpop.f32.mrb[72].mxu0  ;;  %v579_v33 = vld [vmem:[%s4158_s15 + $0x30] sm:$0xff] }
 0x1fe   : > { %v3536_v41 = vpop.f32.mrb[72].mxu1  ;;  %v3425_v43 = vpop.f32.mrb[73].mxu0 }
 0x1ff   : > { %2564 = vst.msk [vmem:[%s4158_s15 + $0x10] sm:$0xff] %vm2561_vm1, %v2531_v36  ;;  %v2532_v47 = vadd.f32 %v2414_v37, %v576_v35  ;;  %v3426_v8 = vadd.f32 %v3425_v43, %v3424_v39  ;;  %v3537_v48 = vpop.f32.mrb[73].mxu1  ;;  %v3427_v49 = vpop.f32.mrb[74].mxu0  ;;  %v580_v37 = vld [vmem:[%s4158_s15 + $0x38] sm:$0xff] }
 0x200   : > { %v3538_v51 = vadd.f32 %v3537_v48, %v3536_v41  ;;  %v3539_v53 = vpop.f32.mrb[74].mxu1  ;;  %v3428_v57 = vpop.f32.mrb[75].mxu0 }
 0x201   : > { %2565 = vst.msk [vmem:[%s4158_s15 + $0x18] sm:$0xff] %vm2561_vm1, %v2532_v47  ;;  %v2258_v10 = vadd.f32 %v3426_v8, %v4433_v30  ;;  %v3429_v59 = vadd.f32 %v3428_v57, %v3427_v49  ;;  %v3540_v60 = vpop.f32.mrb[75].mxu1 }
 0x202   : > { %v3541_v62 = vadd.f32 %v3540_v60, %v3539_v53 }
 0x203   : > { %v2419_v63 = vadd.f32 %v3538_v51, %v2258_v10  ;;  %v2261_v3 = vadd.f32 %v3429_v59, %v4435_v32 }
 0x205   : > { %v2533_v11 = vadd.f32 %v2419_v63, %v577_v61  ;;  %v2422_v50 = vadd.f32 %v3541_v62, %v2261_v3  ;;  %v3430_v13 = vpop.f32.mrb[76].mxu0  ;;  %v581_v61 = vld [vmem:[%s4158_s15 + $0x40] sm:$0xff] }
 0x206   : > { %v3542_v14 = vpop.f32.mrb[76].mxu1  ;;  %v3431_v15 = vpop.f32.mrb[77].mxu0 }
 0x207   : > { %2566 = vst.msk [vmem:[%s4158_s15 + $0x20] sm:$0xff] %vm2561_vm1, %v2533_v11  ;;  %v2534_v16 = vadd.f32 %v2422_v50, %v578_v5  ;;  %v3432_v30 = vadd.f32 %v3431_v15, %v3430_v13  ;;  %v3543_v17 = vpop.f32.mrb[77].mxu1  ;;  %v3433_v52 = vpop.f32.mrb[78].mxu0  ;;  %v582_v5 = vld [vmem:[%s4158_s15 + $0x48] sm:$0xff] }
 0x208   : > { %v3544_v18 = vadd.f32 %v3543_v17, %v3542_v14  ;;  %v3545_v19 = vpop.f32.mrb[78].mxu1  ;;  %v3434_v21 = vpop.f32.mrb[79].mxu0 }
 0x209   : > { %2567 = vst.msk [vmem:[%s4158_s15 + $0x28] sm:$0xff] %vm2561_vm1, %v2534_v16  ;;  %v2266_v32 = vadd.f32 %v3432_v30, %v4441_v54  ;;  %v3435_v25 = vadd.f32 %v3434_v21, %v3433_v52  ;;  %v3546_v29 = vpop.f32.mrb[79].mxu1 }
 0x20a   : > { %v3547_v34 = vadd.f32 %v3546_v29, %v3545_v19 }
 0x20b   : > { %v2427_v35 = vadd.f32 %v3544_v18, %v2266_v32  ;;  %v2269_v36 = vadd.f32 %v3435_v25, %v4443_v56  ;;  %v583_v25 = vld [vmem:[%s4158_s15 + $0x50] sm:$0xff] }
 0x20d   : > { %v2535_v39 = vadd.f32 %v2427_v35, %v579_v33  ;;  %v2430_v41 = vadd.f32 %v3547_v34, %v2269_v36  ;;  %v3436_v43 = vpop.f32.mrb[80].mxu0  ;;  %v584_v35 = vld [vmem:[%s4158_s15 + $0x58] sm:$0xff] }
 0x20e   : > { %v3548_v47 = vpop.f32.mrb[80].mxu1  ;;  %v3437_v8 = vpop.f32.mrb[81].mxu0 }
 0x20f   : > { %2568 = vst.msk [vmem:[%s4158_s15 + $0x30] sm:$0xff] %vm2561_vm1, %v2535_v39  ;;  %v2536_v48 = vadd.f32 %v2430_v41, %v580_v37  ;;  %v3438_v54 = vadd.f32 %v3437_v8, %v3436_v43  ;;  %v3549_v49 = vpop.f32.mrb[81].mxu1  ;;  %v3439_v51 = vpop.f32.mrb[82].mxu0 }
 0x210   : > { %v3550_v53 = vadd.f32 %v3549_v49, %v3548_v47  ;;  %v3551_v57 = vpop.f32.mrb[82].mxu1  ;;  %v3440_v10 = vpop.f32.mrb[83].mxu0 }
 0x211   : > { %2569 = vst.msk [vmem:[%s4158_s15 + $0x38] sm:$0xff] %vm2561_vm1, %v2536_v48  ;;  %v2274_v56 = vadd.f32 %v3438_v54, %v4445_v6  ;;  %v3441_v59 = vadd.f32 %v3440_v10, %v3439_v51  ;;  %v3552_v60 = vpop.f32.mrb[83].mxu1  ;;  %v585_v10 = vld [vmem:[%s4158_s15 + $0x60] sm:$0xff] }
 0x212   : > { %v3553_v62 = vadd.f32 %v3552_v60, %v3551_v57 }
 0x213   : > { %v2435_v63 = vadd.f32 %v3550_v53, %v2274_v56  ;;  %v2277_v3 = vadd.f32 %v3441_v59, %v4447_v9 }
 0x215   : > { %v2537_v11 = vadd.f32 %v2435_v63, %v581_v61  ;;  %v2438_v50 = vadd.f32 %v3553_v62, %v2277_v3  ;;  %v3442_v13 = vpop.f32.mrb[84].mxu0  ;;  %v586_v61 = vld [vmem:[%s4158_s15 + $0x68] sm:$0xff] }
 0x216   : > { %v3554_v14 = vpop.f32.mrb[84].mxu1  ;;  %v3443_v15 = vpop.f32.mrb[85].mxu0 }
 0x217   : > { %2570 = vst.msk [vmem:[%s4158_s15 + $0x40] sm:$0xff] %vm2561_vm1, %v2537_v11  ;;  %v2538_v16 = vadd.f32 %v2438_v50, %v582_v5  ;;  %v3444_v6 = vadd.f32 %v3443_v15, %v3442_v13  ;;  %v3555_v30 = vpop.f32.mrb[85].mxu1  ;;  %v3445_v17 = vpop.f32.mrb[86].mxu0 }
 0x218   : > { %v3556_v52 = vadd.f32 %v3555_v30, %v3554_v14  ;;  %v3557_v18 = vpop.f32.mrb[86].mxu1  ;;  %v3446_v19 = vpop.f32.mrb[87].mxu0 }
 0x219   : > { %2571 = vst.msk [vmem:[%s4158_s15 + $0x48] sm:$0xff] %vm2561_vm1, %v2538_v16  ;;  %v2282_v9 = vadd.f32 %v3444_v6, %v4449_v22  ;;  %v3447_v21 = vadd.f32 %v3446_v19, %v3445_v17  ;;  %v3558_v32 = vpop.f32.mrb[87].mxu1 }
 0x21a   : > { %v3559_v29 = vadd.f32 %v3558_v32, %v3557_v18 }
 0x21b   : > { %v2443_v33 = vadd.f32 %v3556_v52, %v2282_v9  ;;  %v2285_v34 = vadd.f32 %v3447_v21, %v4451_v24  ;;  %v587_v52 = vld [vmem:[%s4158_s15 + $0x70] sm:$0xff]  ;;  %v588_v21 = vld [vmem:[%s4158_s15 + $0x78] sm:$0xff] }
 0x21d   : > { %v2539_v36 = vadd.f32 %v2443_v33, %v583_v25  ;;  %v2446_v37 = vadd.f32 %v3559_v29, %v2285_v34  ;;  %v3448_v39 = vpop.f32.mrb[88].mxu0 }
 0x21e   : > { %v3560_v41 = vpop.f32.mrb[88].mxu1  ;;  %v3449_v43 = vpop.f32.mrb[89].mxu0 }
 0x21f   : > { %2572 = vst.msk [vmem:[%s4158_s15 + $0x50] sm:$0xff] %vm2561_vm1, %v2539_v36  ;;  %v2540_v47 = vadd.f32 %v2446_v37, %v584_v35  ;;  %v3450_v22 = vadd.f32 %v3449_v43, %v3448_v39  ;;  %v3561_v8 = vpop.f32.mrb[89].mxu1  ;;  %v3451_v48 = vpop.f32.mrb[90].mxu0 }
 0x220   : > { %v3562_v54 = vadd.f32 %v3561_v8, %v3560_v41  ;;  %v3563_v49 = vpop.f32.mrb[90].mxu1  ;;  %v3452_v51 = vpop.f32.mrb[91].mxu0  ;;  %v589_v8 = vld [vmem:[%s4158_s15 + $0x80] sm:$0xff] }
 0x221   : > { %2573 = vst.msk [vmem:[%s4158_s15 + $0x58] sm:$0xff] %vm2561_vm1, %v2540_v47  ;;  %v2290_v24 = vadd.f32 %v3450_v22, %v4453_v38  ;;  %v3453_v53 = vadd.f32 %v3452_v51, %v3451_v48  ;;  %v3564_v57 = vpop.f32.mrb[91].mxu1  ;;  %v590_v51 = vld [vmem:[%s4158_s15 + $0x88] sm:$0xff] }
 0x222   : > { %v3565_v56 = vadd.f32 %v3564_v57, %v3563_v49 }
 0x223   : > { %v2451_v59 = vadd.f32 %v3562_v54, %v2290_v24  ;;  %v2293_v60 = vadd.f32 %v3453_v53, %v4455_v40 }
 0x225   : > { %v2541_v62 = vadd.f32 %v2451_v59, %v585_v10  ;;  %v2454_v63 = vadd.f32 %v3565_v56, %v2293_v60  ;;  %v3454_v3 = vpop.f32.mrb[92].mxu0 }
 0x226   : > { %v3566_v5 = vpop.f32.mrb[92].mxu1  ;;  %v3455_v11 = vpop.f32.mrb[93].mxu0 }
 0x227   : > { %2574 = vst.msk [vmem:[%s4158_s15 + $0x60] sm:$0xff] %vm2561_vm1, %v2541_v62  ;;  %v2542_v50 = vadd.f32 %v2454_v63, %v586_v61  ;;  %v3456_v38 = vadd.f32 %v3455_v11, %v3454_v3  ;;  %v3567_v13 = vpop.f32.mrb[93].mxu1  ;;  %v3457_v14 = vpop.f32.mrb[94].mxu0 }
 0x228   : > { %v3568_v15 = vadd.f32 %v3567_v13, %v3566_v5  ;;  %v3569_v16 = vpop.f32.mrb[94].mxu1  ;;  %v3458_v6 = vpop.f32.mrb[95].mxu0 }
 0x229   : > { %2575 = vst.msk [vmem:[%s4158_s15 + $0x68] sm:$0xff] %vm2561_vm1, %v2542_v50  ;;  %v2298_v40 = vadd.f32 %v3456_v38, %v4457_v55  ;;  %v3459_v30 = vadd.f32 %v3458_v6, %v3457_v14  ;;  %v3570_v17 = vpop.f32.mrb[95].mxu1  ;;  %v591_v50 = vld [vmem:[%s4158_s15 + $0x90] sm:$0xff] }
 0x22a   : > { %v3571_v18 = vadd.f32 %v3570_v17, %v3569_v16 }
 0x22b   : > { %v2459_v19 = vadd.f32 %v3568_v15, %v2298_v40  ;;  %v2301_v9 = vadd.f32 %v3459_v30, %v4459_v58  ;;  %v592_v15 = vld [vmem:[%s4158_s15 + $0x98] sm:$0xff] }
 0x22d   : > { %v2543_v32 = vadd.f32 %v2459_v19, %v587_v52  ;;  %v2462_v25 = vadd.f32 %v3571_v18, %v2301_v9  ;;  %v3460_v29 = vpop.f32.mrb[96].mxu0 }
 0x22e   : > { %v3572_v33 = vpop.f32.mrb[96].mxu1  ;;  %v3461_v34 = vpop.f32.mrb[97].mxu0 }
 0x22f   : > { %2576 = vst.msk [vmem:[%s4158_s15 + $0x70] sm:$0xff] %vm2561_vm1, %v2543_v32  ;;  %v2544_v35 = vadd.f32 %v2462_v25, %v588_v21  ;;  %v3462_v55 = vadd.f32 %v3461_v34, %v3460_v29  ;;  %v3573_v36 = vpop.f32.mrb[97].mxu1  ;;  %v3463_v37 = vpop.f32.mrb[98].mxu0 }
 0x230   : > { %v3574_v39 = vadd.f32 %v3573_v36, %v3572_v33  ;;  %v3575_v41 = vpop.f32.mrb[98].mxu1  ;;  %v3464_v43 = vpop.f32.mrb[99].mxu0  ;;  %v593_v33 = vld [vmem:[%s4158_s15 + $0xa0] sm:$0xff]  ;;  %v594_v36 = vld [vmem:[%s4158_s15 + $0xa8] sm:$0xff] }
 0x231   : > { %2577 = vst.msk [vmem:[%s4158_s15 + $0x78] sm:$0xff] %vm2561_vm1, %v2544_v35  ;;  %v2306_v58 = vadd.f32 %v3462_v55, %v4461_v7  ;;  %v3465_v47 = vadd.f32 %v3464_v43, %v3463_v37  ;;  %v3576_v22 = vpop.f32.mrb[99].mxu1 }
 0x232   : > { %v3577_v48 = vadd.f32 %v3576_v22, %v3575_v41 }
 0x233   : > { %v2467_v54 = vadd.f32 %v3574_v39, %v2306_v58  ;;  %v2309_v49 = vadd.f32 %v3465_v47, %v4463_v12 }
 0x235   : > { %v2545_v24 = vadd.f32 %v2467_v54, %v589_v8  ;;  %v2470_v53 = vadd.f32 %v3577_v48, %v2309_v49  ;;  %v3466_v57 = vpop.f32.mrb[100].mxu0 }
 0x236   : > { %v3578_v10 = vpop.f32.mrb[100].mxu1  ;;  %v3467_v56 = vpop.f32.mrb[101].mxu0 }
 0x237   : > { %2578 = vst.msk [vmem:[%s4158_s15 + $0x80] sm:$0xff] %vm2561_vm1, %v2545_v24  ;;  %v2546_v59 = vadd.f32 %v2470_v53, %v590_v51  ;;  %v3468_v7 = vadd.f32 %v3467_v56, %v3466_v57  ;;  %v3579_v60 = vpop.f32.mrb[101].mxu1  ;;  %v3469_v61 = vpop.f32.mrb[102].mxu0  ;;  %v595_v53 = vld [vmem:[%s4158_s15 + $0xb0] sm:$0xff] }
 0x238   : > { %v3580_v62 = vadd.f32 %v3579_v60, %v3578_v10  ;;  %v3581_v63 = vpop.f32.mrb[102].mxu1  ;;  %v3470_v3 = vpop.f32.mrb[103].mxu0 }
 0x239   : > { %2579 = vst.msk [vmem:[%s4158_s15 + $0x88] sm:$0xff] %vm2561_vm1, %v2546_v59  ;;  %v2314_v12 = vadd.f32 %v3468_v7, %v4465_v26  ;;  %v3471_v5 = vadd.f32 %v3470_v3, %v3469_v61  ;;  %v3582_v11 = vpop.f32.mrb[103].mxu1  ;;  %v596_v59 = vld [vmem:[%s4158_s15 + $0xb8] sm:$0xff] }
 0x23a   : > { %v3583_v38 = vadd.f32 %v3582_v11, %v3581_v63 }
 0x23b   : > { %v2475_v13 = vadd.f32 %v3580_v62, %v2314_v12  ;;  %v2317_v14 = vadd.f32 %v3471_v5, %v4467_v28 }
 0x23d   : > { %v2547_v16 = vadd.f32 %v2475_v13, %v591_v50  ;;  %v2478_v6 = vadd.f32 %v3583_v38, %v2317_v14  ;;  %v3472_v40 = vpop.f32.mrb[104].mxu0 }
 0x23e   : > { %v3584_v30 = vpop.f32.mrb[104].mxu1  ;;  %v3473_v17 = vpop.f32.mrb[105].mxu0 }
 0x23f   : > { %2580 = vst.msk [vmem:[%s4158_s15 + $0x90] sm:$0xff] %vm2561_vm1, %v2547_v16  ;;  %v2548_v52 = vadd.f32 %v2478_v6, %v592_v15  ;;  %v3474_v26 = vadd.f32 %v3473_v17, %v3472_v40  ;;  %v3585_v18 = vpop.f32.mrb[105].mxu1  ;;  %v3475_v19 = vpop.f32.mrb[106].mxu0  ;;  %v597_v15 = vld [vmem:[%s4158_s15 + $0xc0] sm:$0xff] }
 0x240   : > { %v3586_v9 = vadd.f32 %v3585_v18, %v3584_v30  ;;  %v3587_v21 = vpop.f32.mrb[106].mxu1  ;;  %v3476_v32 = vpop.f32.mrb[107].mxu0  ;;  %v598_v30 = vld [vmem:[%s4158_s15 + $0xc8] sm:$0xff] }
 0x241   : > { %2581 = vst.msk [vmem:[%s4158_s15 + $0x98] sm:$0xff] %vm2561_vm1, %v2548_v52  ;;  %v2322_v28 = vadd.f32 %v3474_v26, %v4469_v44  ;;  %v3477_v25 = vadd.f32 %v3476_v32, %v3475_v19  ;;  %v3588_v29 = vpop.f32.mrb[107].mxu1 }
 0x242   : > { %v3589_v34 = vadd.f32 %v3588_v29, %v3587_v21 }
 0x243   : > { %v2483_v35 = vadd.f32 %v3586_v9, %v2322_v28  ;;  %v2325_v55 = vadd.f32 %v3477_v25, %v4471_v46 }
 0x245   : > { %v2549_v37 = vadd.f32 %v2483_v35, %v593_v33  ;;  %v2486_v39 = vadd.f32 %v3589_v34, %v2325_v55  ;;  %v3478_v41 = vpop.f32.mrb[108].mxu0  ;;  %v599_v35 = vld [vmem:[%s4158_s15 + $0xd0] sm:$0xff] }
 0x246   : > { %v3590_v43 = vpop.f32.mrb[108].mxu1  ;;  %v3479_v58 = vpop.f32.mrb[109].mxu0 }
 0x247   : > { %2582 = vst.msk [vmem:[%s4158_s15 + $0xa0] sm:$0xff] %vm2561_vm1, %v2549_v37  ;;  %v2550_v47 = vadd.f32 %v2486_v39, %v594_v36  ;;  %v3480_v44 = vadd.f32 %v3479_v58, %v3478_v41  ;;  %v3591_v22 = vpop.f32.mrb[109].mxu1  ;;  %v3481_v8 = vpop.f32.mrb[110].mxu0  ;;  %v600_v39 = vld [vmem:[%s4158_s15 + $0xd8] sm:$0xff] }
 0x248   : > { %v3592_v48 = vadd.f32 %v3591_v22, %v3590_v43  ;;  %v3593_v54 = vpop.f32.mrb[110].mxu1  ;;  %v3482_v49 = vpop.f32.mrb[111].mxu0 }
 0x249   : > { %2583 = vst.msk [vmem:[%s4158_s15 + $0xa8] sm:$0xff] %vm2561_vm1, %v2550_v47  ;;  %v2330_v46 = vadd.f32 %v3480_v44, %v4473_v0  ;;  %v3483_v51 = vadd.f32 %v3482_v49, %v3481_v8  ;;  %v3594_v24 = vpop.f32.mrb[111].mxu1 }
 0x24a   : > { %v3595_v57 = vadd.f32 %v3594_v24, %v3593_v54 }
 0x24b   : > { %v2491_v10 = vadd.f32 %v3592_v48, %v2330_v46  ;;  %v2333_v56 = vadd.f32 %v3483_v51, %v4475_v2 }
 0x24d   : > { %v2551_v7 = vadd.f32 %v2491_v10, %v595_v53  ;;  %v2494_v60 = vadd.f32 %v3595_v57, %v2333_v56  ;;  %v3484_v61 = vpop.f32.mrb[112].mxu0  ;;  %v601_v53 = vld [vmem:[%s4158_s15 + $0xe0] sm:$0xff] }
 0x24e   : > { %v3596_v62 = vpop.f32.mrb[112].mxu1  ;;  %v3485_v63 = vpop.f32.mrb[113].mxu0 }
 0x24f   : > { %2584 = vst.msk [vmem:[%s4158_s15 + $0xb0] sm:$0xff] %vm2561_vm1, %v2551_v7  ;;  %v2552_v3 = vadd.f32 %v2494_v60, %v596_v59  ;;  %v3486_v0 = vadd.f32 %v3485_v63, %v3484_v61  ;;  %v3597_v12 = vpop.f32.mrb[113].mxu1  ;;  %v3487_v5 = vpop.f32.mrb[114].mxu0  ;;  %v602_v59 = vld [vmem:[%s4158_s15 + $0xe8] sm:$0xff] }
 0x250   : > { %v3598_v11 = vadd.f32 %v3597_v12, %v3596_v62  ;;  %v3599_v50 = vpop.f32.mrb[114].mxu1  ;;  %v3488_v38 = vpop.f32.mrb[115].mxu0 }
 0x251   : > { %2585 = vst.msk [vmem:[%s4158_s15 + $0xb8] sm:$0xff] %vm2561_vm1, %v2552_v3  ;;  %v2338_v2 = vadd.f32 %v3486_v0, %v4477_v20  ;;  %v3489_v13 = vadd.f32 %v3488_v38, %v3487_v5  ;;  %v3600_v14 = vpop.f32.mrb[115].mxu1 }
 0x252   : > { %v3601_v16 = vadd.f32 %v3600_v14, %v3599_v50 }
 0x253   : > { %v2499_v6 = vadd.f32 %v3598_v11, %v2338_v2  ;;  %v2341_v40 = vadd.f32 %v3489_v13, %v4479_v23  ;;  %v603_v13 = vld [vmem:[%s4158_s15 + $0xf0] sm:$0xff] }
 0x255   : > { %v2553_v17 = vadd.f32 %v2499_v6, %v597_v15  ;;  %v2502_v52 = vadd.f32 %v3601_v16, %v2341_v40  ;;  %v3490_v26 = vpop.f32.mrb[116].mxu0  ;;  %v604_v6 = vld [vmem:[%s4158_s15 + $0xf8] sm:$0xff] }
 0x256   : > { %v3602_v18 = vpop.f32.mrb[116].mxu1  ;;  %v3491_v19 = vpop.f32.mrb[117].mxu0 }
 0x257   : > { %2586 = vst.msk [vmem:[%s4158_s15 + $0xc0] sm:$0xff] %vm2561_vm1, %v2553_v17  ;;  %v2554_v9 = vadd.f32 %v2502_v52, %v598_v30  ;;  %v3492_v20 = vadd.f32 %v3491_v19, %v3490_v26  ;;  %v3603_v21 = vpop.f32.mrb[117].mxu1  ;;  %v3493_v32 = vpop.f32.mrb[118].mxu0  ;;  %v2600_v52 = vld [vmem:[%s4158_s15 + $0x10] sm:$0xff] (!%p3168_p0) }
 0x258   : > { %v3604_v28 = vadd.f32 %v3603_v21, %v3602_v18  ;;  %v3605_v25 = vpop.f32.mrb[118].mxu1  ;;  %v3494_v29 = vpop.f32.mrb[119].mxu0  ;;  %v2633_v19 = vsel (!%p3168_p0), %vm2561_vm1, %v2600_v52, 0.0 }
 0x259   : > { %2587 = vst.msk [vmem:[%s4158_s15 + $0xc8] sm:$0xff] %vm2561_vm1, %v2554_v9  ;;  %v2346_v23 = vadd.f32 %v3492_v20, %v4481_v42  ;;  %v3495_v33 = vadd.f32 %v3494_v29, %v3493_v32  ;;  %v3606_v34 = vpop.f32.mrb[119].mxu1  ;;  %v2601_v9 = vld [vmem:[%s4158_s15 + $0x18] sm:$0xff] (!%p3168_p0)  ;;  %v2602_v32 = vld [vmem:[%s4158_s15 + $0x20] sm:$0xff] (!%p3168_p0)  ;;  %v2603_v29 = vld [vmem:[%s4158_s15 + $0x28] sm:$0xff] (!%p3168_p0) }
 0x25a   : > { %v3607_v55 = vadd.f32 %v3606_v34, %v3605_v25  ;;  %v2635_v21 = vsel (!%p3168_p0), %vm2561_vm1, %v2601_v9, 0.0  ;;  %v2637_v25 = vsel (!%p3168_p0), %vm2561_vm1, %v2602_v32, 0.0  ;;  %v2604_v34 = vld [vmem:[%s4158_s15 + $0x30] sm:$0xff] (!%p3168_p0) }
 0x25b   : > { %v2507_v36 = vadd.f32 %v3604_v28, %v2346_v23  ;;  %v2349_v37 = vadd.f32 %v3495_v33, %v4483_v45  ;;  %v2639_v33 = vsel (!%p3168_p0), %vm2561_vm1, %v2603_v29, 0.0 }
 0x25d   : > { %v2555_v41 = vadd.f32 %v2507_v36, %v599_v35  ;;  %v2510_v43 = vadd.f32 %v3607_v55, %v2349_v37  ;;  %v3496_v58 = vpop.f32.mrb[120].mxu0  ;;  %v2641_v55 = vsel (!%p3168_p0), %vm2561_vm1, %v2604_v34, 0.0  ;;  %v2605_v36 = vld [vmem:[%s4158_s15 + $0x38] sm:$0xff] (!%p3168_p0) }
 0x25e   : > { %v3608_v47 = vpop.f32.mrb[120].mxu1  ;;  %v3497_v44 = vpop.f32.mrb[121].mxu0 }
 0x25f   : > { %2588 = vst.msk [vmem:[%s4158_s15 + $0xd0] sm:$0xff] %vm2561_vm1, %v2555_v41  ;;  %v2556_v22 = vadd.f32 %v2510_v43, %v600_v39  ;;  %v3498_v42 = vadd.f32 %v3497_v44, %v3496_v58  ;;  %v3609_v8 = vpop.f32.mrb[121].mxu1  ;;  %v3499_v48 = vpop.f32.mrb[122].mxu0  ;;  %v2643_v39 = vsel (!%p3168_p0), %vm2561_vm1, %v2605_v36, 0.0  ;;  %v2606_v41 = vld [vmem:[%s4158_s15 + $0x40] sm:$0xff] (!%p3168_p0) }
 0x260   : > { %v3610_v54 = vadd.f32 %v3609_v8, %v3608_v47  ;;  %v3611_v49 = vpop.f32.mrb[122].mxu1  ;;  %v3500_v46 = vpop.f32.mrb[123].mxu0  ;;  %v2645_v58 = vsel (!%p3168_p0), %vm2561_vm1, %v2606_v41, 0.0  ;;  %v2607_v47 = vld [vmem:[%s4158_s15 + $0x48] sm:$0xff] (!%p3168_p0) }
 0x261   : > { %2589 = vst.msk [vmem:[%s4158_s15 + $0xd8] sm:$0xff] %vm2561_vm1, %v2556_v22  ;;  %v2354_v45 = vadd.f32 %v3498_v42, %v4485_v1  ;;  %v3501_v51 = vadd.f32 %v3500_v46, %v3499_v48  ;;  %v3612_v24 = vpop.f32.mrb[123].mxu1  ;;  %v2647_v22 = vsel (!%p3168_p0), %vm2561_vm1, %v2607_v47, 0.0  ;;  %v2701_v48 = vmul.f32 (!%p3168_p0), %v2600_v52, %v2600_v52  ;;  %v2609_v46 = vld [vmem:[%s4158_s15 + $0x58] sm:$0xff] (!%p3168_p0) }
 0x262   : > { %v3613_v57 = vadd.f32 %v3612_v24, %v3611_v49 }
 0x263   : > { %v2515_v10 = vadd.f32 %v3610_v54, %v2354_v45  ;;  %v2357_v56 = vadd.f32 %v3501_v51, %v4487_v4  ;;  %v2608_v54 = vld [vmem:[%s4158_s15 + $0x50] sm:$0xff] (!%p3168_p0)  ;;  %v2702_v51 = vmul.f32 (!%p3168_p0), %v2601_v9, %v2601_v9 }
 0x264   : > { %v2649_v45 = vsel (!%p3168_p0), %vm2561_vm1, %v2608_v54, 0.0 }
 0x265   : > { %v2557_v7 = vadd.f32 %v2515_v10, %v601_v53  ;;  %v2518_v60 = vadd.f32 %v3613_v57, %v2357_v56  ;;  %v3502_v61 = vpop.f32.mrb[124].mxu0  ;;  %v2651_v53 = vsel (!%p3168_p0), %vm2561_vm1, %v2609_v46, 0.0  ;;  %v2703_v57 = vmul.f32 (!%p3168_p0), %v2602_v32, %v2602_v32 }
 0x266   : > { %v3614_v62 = vpop.f32.mrb[124].mxu1  ;;  %v3503_v63 = vpop.f32.mrb[125].mxu0 }
 0x267   : > { %2590 = vst.msk [vmem:[%s4158_s15 + $0xe0] sm:$0xff] %vm2561_vm1, %v2557_v7  ;;  %v2558_v3 = vadd.f32 %v2518_v60, %v602_v59  ;;  %v3504_v1 = vadd.f32 %v3503_v63, %v3502_v61  ;;  %v3615_v0 = vpop.f32.mrb[125].mxu1  ;;  %v3505_v12 = vpop.f32.mrb[126].mxu0  ;;  %v2734_v59 = vsel (!%p3168_p0), %vm2561_vm1, %v2701_v48, 0.0  ;;  %v2610_v7 = vld [vmem:[%s4158_s15 + $0x60] sm:$0xff] (!%p3168_p0)  ;;  %v2704_v63 = vmul.f32 (!%p3168_p0), %v2603_v29, %v2603_v29 }
 0x268   : > { %v3616_v5 = vadd.f32 %v3615_v0, %v3614_v62  ;;  %v3617_v11 = vpop.f32.mrb[126].mxu1  ;;  %v3506_v50 = vpop.f32.mrb[127].mxu0  ;;  %v2653_v62 = vsel (!%p3168_p0), %vm2561_vm1, %v2610_v7, 0.0 }
 0x269   : > { %2591 = vst.msk [vmem:[%s4158_s15 + $0xe8] sm:$0xff] %vm2561_vm1, %v2558_v3  ;;  %v2362_v4 = vadd.f32 %v3504_v1, %v4489_v27  ;;  %v3507_v38 = vadd.f32 %v3506_v50, %v3505_v12  ;;  %v3618_v2 = vpop.f32.mrb[127].mxu1  ;;  %v2598_v27 = vld [vmem:[%s4158_s15] sm:$0xff] (!%p3168_p0)  ;;  %v2736_v3 = vsel (!%p3168_p0), %vm2561_vm1, %v2702_v51, 0.0  ;;  %v2611_v1 = vld [vmem:[%s4158_s15 + $0x68] sm:$0xff] (!%p3168_p0)  ;;  %v2738_v50 = vsel (!%p3168_p0), %vm2561_vm1, %v2703_v57, 0.0 }
 0x26a   : > { %v3619_v14 = vadd.f32 %v3618_v2, %v3617_v11  ;;  %v2630_v26 = vsel (!%p3168_p0), %vm2561_vm1, %v2598_v27, 0.0  ;;  %v2699_v42 = vmul.f32 (!%p3168_p0), %v2598_v27, %v2598_v27  ;;  %v2705_v11 = vmul.f32 (!%p3168_p0), %v2604_v34, %v2604_v34  ;;  %v2620_v57 = vld [vmem:[%s4158_s15 + $0xb0] sm:$0xff] (!%p3168_p0) }
 0x26b   : > { %v2523_v15 = vadd.f32 %v3616_v5, %v2362_v4  ;;  %v2365_v16 = vadd.f32 %v3507_v38, %v4491_v31  ;;  %2597 = sbr.rel (%p3168_p0) target bundleno = 699 (0x2bb), region = 59  ;;  %v2599_v31 = vld [vmem:[%s4158_s15 + $0x8] sm:$0xff] (!%p3168_p0)  ;;  %v2655_v5 = vsel (!%p3168_p0), %vm2561_vm1, %v2611_v1, 0.0  ;;  %v2612_v4 = vld [vmem:[%s4158_s15 + $0x70] sm:$0xff] (!%p3168_p0)  ;;  %v2712_v48 = vmul.f32 (!%p3168_p0), %v2611_v1, %v2611_v1 }
 0x26c   : > { %v2631_v18 = vsel (!%p3168_p0), %vm2561_vm1, %v2599_v31, 0.0  ;;  %v2700_v8 = vmul.f32 (!%p3168_p0), %v2599_v31, %v2599_v31  ;;  %v2731_v10 = vsel (!%p3168_p0), %vm2561_vm1, %v2699_v42, 0.0  ;;  %v2742_v27 = vsel (!%p3168_p0), %vm2561_vm1, %v2705_v11, 0.0  ;;  %v2614_v31 = vld [vmem:[%s4158_s15 + $0x80] sm:$0xff] (!%p3168_p0) }
 0x26d   : > { %v2559_v40 = vadd.f32 %v2523_v15, %v603_v13  ;;  %v2526_v30 = vadd.f32 %v3619_v14, %v2365_v16  ;;  %v2632_v20 = vadd.f32 (!%p3168_p0), %v2631_v18, %v2630_v26  ;;  %v2657_v13 = vsel (!%p3168_p0), %vm2561_vm1, %v2612_v4, 0.0  ;;  %v2613_v16 = vld [vmem:[%s4158_s15 + $0x78] sm:$0xff] (!%p3168_p0) }
 0x26e   : > { %v2732_v56 = vsel (!%p3168_p0), %vm2561_vm1, %v2700_v8, 0.0  ;;  %v2706_v14 = vmul.f32 (!%p3168_p0), %v2605_v36, %v2605_v36  ;;  %v2740_v15 = vsel (!%p3168_p0), %vm2561_vm1, %v2704_v63, 0.0  ;;  %v2661_v18 = vsel (!%p3168_p0), %vm2561_vm1, %v2614_v31, 0.0 }
 0x26f   : > { %2592 = vst.msk [vmem:[%s4158_s15 + $0xf0] sm:$0xff] %vm2561_vm1, %v2559_v40  ;;  %v2560_v17 = vadd.f32 %v2526_v30, %v604_v6  ;;  %v2634_v28 = vadd.f32 (!%p3168_p0), %v2633_v19, %v2632_v20  ;;  %v2733_v61 = vadd.f32 (!%p3168_p0), %v2732_v56, %v2731_v10  ;;  %v2659_v30 = vsel (!%p3168_p0), %vm2561_vm1, %v2613_v16, 0.0  ;;  %v2615_v20 = vld [vmem:[%s4158_s15 + $0x88] sm:$0xff] (!%p3168_p0) }
 0x270   : > { %v2708_v19 = vmul.f32 (!%p3168_p0), %v2607_v47, %v2607_v47  ;;  %v2744_v9 = vsel (!%p3168_p0), %vm2561_vm1, %v2706_v14, 0.0  ;;  %v2715_v1 = vmul.f32 (!%p3168_p0), %v2614_v31, %v2614_v31 }
 0x271   : > { %2593 = vst.msk [vmem:[%s4158_s15 + $0xf8] sm:$0xff] %vm2561_vm1, %v2560_v17  ;;  %v2636_v23 = vadd.f32 (!%p3168_p0), %v2635_v21, %v2634_v28  ;;  %v2735_v12 = vadd.f32 (!%p3168_p0), %v2734_v59, %v2733_v61  ;;  %v2707_v17 = vmul.f32 (!%p3168_p0), %v2606_v41, %v2606_v41  ;;  %v2663_v28 = vsel (!%p3168_p0), %vm2561_vm1, %v2615_v20, 0.0  ;;  %v2621_v61 = vld [vmem:[%s4158_s15 + $0xb8] sm:$0xff] (!%p3168_p0) }
 0x272   : > { %v2748_v36 = vsel %vm2561_vm1, %v2708_v19, 0.0  ;;  %v2673_v59 = vsel %vm2561_vm1, %v2620_v57, 0.0 }
 0x273   : > { %v2638_v35 = vadd.f32 %v2637_v25, %v2636_v23  ;;  %v2737_v2 = vadd.f32 %v2736_v3, %v2735_v12  ;;  %v2709_v25 = vmul.f32 %v2608_v54, %v2608_v54  ;;  %v2746_v29 = vsel %vm2561_vm1, %v2707_v17, 0.0  ;;  %v2616_v23 = vld [vmem:[%s4158_s15 + $0x90] sm:$0xff]  ;;  %v2622_v12 = vld [vmem:[%s4158_s15 + $0xc0] sm:$0xff] }
 0x274   : > { %v2675_v3 = vsel %vm2561_vm1, %v2621_v61, 0.0 }
 0x275   : > { %v2640_v37 = vadd.f32 %v2639_v33, %v2638_v35  ;;  %v2739_v40 = vadd.f32 %v2738_v50, %v2737_v2  ;;  %v2665_v35 = vsel %vm2561_vm1, %v2616_v23, 0.0  ;;  %v2750_v47 = vsel %vm2561_vm1, %v2709_v25, 0.0  ;;  %v2623_v2 = vld [vmem:[%s4158_s15 + $0xc8] sm:$0xff] }
 0x276   : > { %v2677_v50 = vsel %vm2561_vm1, %v2622_v12, 0.0 }
 0x277   : > { %v2642_v43 = vadd.f32 %v2641_v55, %v2640_v37  ;;  %v2741_v26 = vadd.f32 %v2740_v15, %v2739_v40  ;;  %v2710_v55 = vmul.f32 %v2609_v46, %v2609_v46  ;;  %v2617_v37 = vld [vmem:[%s4158_s15 + $0x98] sm:$0xff]  ;;  %v2679_v15 = vsel %vm2561_vm1, %v2623_v2, 0.0  ;;  %v2624_v40 = vld [vmem:[%s4158_s15 + $0xd0] sm:$0xff] }
 0x278   : > { %v2718_v31 = vmul.f32 %v2617_v37, %v2617_v37 }
 0x279   : > { %v2644_v44 = vadd.f32 %v2643_v39, %v2642_v43  ;;  %v2743_v32 = vadd.f32 %v2742_v27, %v2741_v26  ;;  %v2667_v43 = vsel %vm2561_vm1, %v2617_v37, 0.0  ;;  %v2752_v54 = vsel %vm2561_vm1, %v2710_v55, 0.0  ;;  %v2625_v26 = vld [vmem:[%s4158_s15 + $0xd8] sm:$0xff] }
 0x27a   : > { %v2681_v27 = vsel %vm2561_vm1, %v2624_v40, 0.0  ;;  %v2721_v37 = vmul.f32 %v2620_v57, %v2620_v57 }
 0x27b   : > { %v2646_v49 = vadd.f32 %v2645_v58, %v2644_v44  ;;  %v2745_v34 = vadd.f32 %v2744_v9, %v2743_v32  ;;  %v2711_v58 = vmul.f32 %v2610_v7, %v2610_v7  ;;  %v2618_v44 = vld [vmem:[%s4158_s15 + $0xa0] sm:$0xff]  ;;  %v2714_v7 = vmul.f32 %v2613_v16, %v2613_v16 }
 0x27c   : > { %v2669_v8 = vsel %vm2561_vm1, %v2618_v44, 0.0  ;;  %v2717_v16 = vmul.f32 %v2616_v23, %v2616_v23  ;;  %v2683_v9 = vsel %vm2561_vm1, %v2625_v26, 0.0  ;;  %v2626_v32 = vld [vmem:[%s4158_s15 + $0xe0] sm:$0xff] }
 0x27d   : > { %v2648_v24 = vadd.f32 %v2647_v22, %v2646_v49  ;;  %v2747_v41 = vadd.f32 %v2746_v29, %v2745_v34  ;;  %v2619_v49 = vld [vmem:[%s4158_s15 + $0xa8] sm:$0xff]  ;;  %v2685_v29 = vsel %vm2561_vm1, %v2626_v32, 0.0 }
 0x27e   : > { %v2671_v51 = vsel %vm2561_vm1, %v2619_v49, 0.0  ;;  %v2720_v23 = vmul.f32 %v2619_v49, %v2619_v49  ;;  %v2627_v34 = vld [vmem:[%s4158_s15 + $0xe8] sm:$0xff]  ;;  %v2723_v49 = vmul.f32 %v2622_v12, %v2622_v12 }
 0x27f   : > { %v2650_v60 = vadd.f32 %v2649_v45, %v2648_v24  ;;  %v2749_v42 = vadd.f32 %v2748_v36, %v2747_v41  ;;  %v2713_v24 = vmul.f32 %v2612_v4, %v2612_v4  ;;  %v2716_v4 = vmul.f32 %v2615_v20, %v2615_v20  ;;  %v2628_v41 = vld [vmem:[%s4158_s15 + $0xf0] sm:$0xff] }
 0x280   : > { %v2719_v20 = vmul.f32 %v2618_v44, %v2618_v44  ;;  %v2687_v36 = vsel %vm2561_vm1, %v2627_v34, 0.0  ;;  %v2722_v44 = vmul.f32 %v2621_v61, %v2621_v61  ;;  %v2726_v61 = vmul.f32 %v2625_v26, %v2625_v26 }
 0x281   : > { %v2652_v0 = vadd.f32 %v2651_v53, %v2650_v60  ;;  %v2751_v45 = vadd.f32 %v2750_v47, %v2749_v42  ;;  %v2754_v53 = vsel %vm2561_vm1, %v2711_v58, 0.0  ;;  %v2756_v60 = vsel %vm2561_vm1, %v2712_v48, 0.0  ;;  %v2629_v42 = vld [vmem:[%s4158_s15 + $0xf8] sm:$0xff] }
 0x282   : > { %v2689_v47 = vsel %vm2561_vm1, %v2628_v41, 0.0 }
 0x283   : > { %v2654_v38 = vadd.f32 %v2653_v62, %v2652_v0  ;;  %v2753_v56 = vadd.f32 %v2752_v54, %v2751_v45  ;;  %v2758_v0 = vsel %vm2561_vm1, %v2713_v24, 0.0  ;;  %v2691_v54 = vsel %vm2561_vm1, %v2629_v42, 0.0 }
 0x284   : > { %v2724_v24 = vmul.f32 %v2623_v2, %v2623_v2 }
 0x285   : > { %v2656_v6 = vadd.f32 %v2655_v5, %v2654_v38  ;;  %v2755_v63 = vadd.f32 %v2754_v53, %v2753_v56  ;;  %v2760_v38 = vsel %vm2561_vm1, %v2714_v7, 0.0  ;;  %v2776_v53 = vsel %vm2561_vm1, %v2722_v44, 0.0 }
 0x286   : > { %v2725_v56 = vmul.f32 %v2624_v40, %v2624_v40  ;;  %v2730_v40 = vmul.f32 %v2629_v42, %v2629_v42 }
 0x287   : > { %v2658_v52 = vadd.f32 %v2657_v13, %v2656_v6  ;;  %v2757_v11 = vadd.f32 %v2756_v60, %v2755_v63  ;;  %v2762_v6 = vsel %vm2561_vm1, %v2715_v1, 0.0  ;;  %v2800_v63 = vlaneseq }
 0x288   : > { %v2782_v12 = vsel %vm2561_vm1, %v2725_v56, 0.0 }
 0x289   : > { %v2660_v21 = vadd.f32 %v2659_v30, %v2658_v52  ;;  %v2759_v14 = vadd.f32 %v2758_v0, %v2757_v11  ;;  %v2764_v52 = vsel %vm2561_vm1, %v2716_v4, 0.0  ;;  %v2727_v0 = vmul.f32 %v2626_v32, %v2626_v32 }
 0x28a   : > { %v2784_v4 = vsel %vm2561_vm1, %v2726_v61, 0.0 }
 0x28b   : > { %v2662_v33 = vadd.f32 %v2661_v18, %v2660_v21  ;;  %v2761_v17 = vadd.f32 %v2760_v38, %v2759_v14  ;;  %v2766_v21 = vsel %vm2561_vm1, %v2717_v16, 0.0  ;;  %v2801_v38 = vshrl.u32 %v2800_v63, 7 }
 0x28c   : > { %v2729_v14 = vmul.f32 %v2628_v41, %v2628_v41 }
 0x28d   : > { %v2664_v39 = vadd.f32 %v2663_v28, %v2662_v33  ;;  %v2763_v19 = vadd.f32 %v2762_v6, %v2761_v17  ;;  %v2768_v33 = vsel %vm2561_vm1, %v2718_v31, 0.0  ;;  %vm2802_vm2 = vcmp.eq.s32.totalorder %v2801_v38, 0 }
 0x28e   : > { %v2790_v31 = vsel %vm2561_vm1, %v2729_v14, 0.0 }
 0x28f   : > { %v2666_v22 = vadd.f32 %v2665_v35, %v2664_v39  ;;  %v2765_v25 = vadd.f32 %v2764_v52, %v2763_v19  ;;  %v2770_v39 = vsel %vm2561_vm1, %v2719_v20, 0.0 }
 0x291   : > { %v2668_v46 = vadd.f32 %v2667_v43, %v2666_v22  ;;  %v2767_v55 = vadd.f32 %v2766_v21, %v2765_v25  ;;  %v2772_v22 = vsel %vm2561_vm1, %v2720_v23, 0.0 }
 0x293   : > { %v2670_v10 = vadd.f32 %v2669_v8, %v2668_v46  ;;  %v2769_v58 = vadd.f32 %v2768_v33, %v2767_v55  ;;  %v2774_v46 = vsel %vm2561_vm1, %v2721_v37, 0.0 }
 0x295   : > { %v2672_v62 = vadd.f32 %v2671_v51, %v2670_v10  ;;  %v2771_v48 = vadd.f32 %v2770_v39, %v2769_v58 }
 0x297   : > { %v2674_v5 = vadd.f32 %v2673_v59, %v2672_v62  ;;  %v2773_v51 = vadd.f32 %v2772_v22, %v2771_v48  ;;  %v2778_v59 = vsel %vm2561_vm1, %v2723_v49, 0.0  ;;  %v2780_v62 = vsel %vm2561_vm1, %v2724_v24, 0.0 }
 0x299   : > { %v2676_v13 = vadd.f32 %v2675_v3, %v2674_v5  ;;  %v2775_v10 = vadd.f32 %v2774_v46, %v2773_v51 }
 0x29b   : > { %v2678_v30 = vadd.f32 %v2677_v50, %v2676_v13  ;;  %v2777_v60 = vadd.f32 %v2776_v53, %v2775_v10  ;;  %v2728_v50 = vmul.f32 %v2627_v34, %v2627_v34 }
 0x29d   : > { %v2680_v18 = vadd.f32 %v2679_v15, %v2678_v30  ;;  %v2779_v1 = vadd.f32 %v2778_v59, %v2777_v60  ;;  %v2786_v15 = vsel %vm2561_vm1, %v2727_v0, 0.0  ;;  %v2788_v30 = vsel %vm2561_vm1, %v2728_v50, 0.0 }
 0x29f   : > { %v2682_v28 = vadd.f32 %v2681_v27, %v2680_v18  ;;  %v2781_v11 = vadd.f32 %v2780_v62, %v2779_v1  ;;  %v2792_v18 = vsel %vm2561_vm1, %v2730_v40, 0.0 }
 0x2a1   : > { %v2684_v35 = vadd.f32 %v2683_v9, %v2682_v28  ;;  %v2783_v13 = vadd.f32 %v2782_v12, %v2781_v11 }
 0x2a3   : > { %v2686_v43 = vadd.f32 %v2685_v29, %v2684_v35  ;;  %v2785_v6 = vadd.f32 %v2784_v4, %v2783_v13 }
 0x2a5   : > { %v2688_v8 = vadd.f32 %v2687_v36, %v2686_v43  ;;  %v2787_v27 = vadd.f32 %v2786_v15, %v2785_v6 }
 0x2a7   : > { %v2690_v45 = vadd.f32 %v2689_v47, %v2688_v8  ;;  %v2789_v52 = vadd.f32 %v2788_v30, %v2787_v27 }
 0x2a9   : > { %v2692_v57 = vadd.f32 %v2691_v54, %v2690_v45  ;;  %v2791_v19 = vadd.f32 %v2790_v31, %v2789_v52 }
 0x2ab   : > { %v2693_v7 = vrot.slane %v2692_v57, 4  ;;  %v2793_v9 = vadd.f32 %v2792_v18, %v2791_v19 }
 0x2ad   : > { %v2694_v3 = vadd.f32 %v2693_v7, %v2692_v57  ;;  %v2794_v20 = vrot.slane %v2793_v9, 4 }
 0x2af   : > { %v2695_v5 = vrot.slane %v2694_v3, 2  ;;  %v2795_v21 = vadd.f32 %v2794_v20, %v2793_v9 }
 0x2b1   : > { %v2696_v2 = vadd.f32 %v2695_v5, %v2694_v3  ;;  %v2796_v32 = vrot.slane %v2795_v21, 2 }
 0x2b3   : > { %v2697_v16 = vrot.slane %v2696_v2, 1  ;;  %v2797_v28 = vadd.f32 %v2796_v32, %v2795_v21 }
 0x2b5   : > { %v2698_v17 = vadd.f32 %v2697_v16, %v2696_v2  ;;  %v2798_v25 = vrot.slane %v2797_v28, 1 }
 0x2b7   : > { %v2803_v26 = vsel %vm2802_vm2, %v2698_v17, 0.0  ;;  %v2799_v29 = vadd.f32 %v2798_v25, %v2797_v28 }
 0x2b8   : > { %2804 = vst.msk [vmem:[%s4163_s11] sm:$0xff] %vm2561_vm1, %v2803_v26 }
 0x2b9   : > { %v2805_v23 = vsel %vm2802_vm2, %v2799_v29, 0.0 }
 0x2ba   : > { %2806 = vst.msk [vmem:[%s4168_s14] sm:$0xff] %vm2561_vm1, %v2805_v23 }
 0x2bb PF: > { %s15_s21 = sadd.s32 1, %s3795_s21   ;;  %s4750_s15 = smov %s3775_s16 }
 0x2bc   : > { %p12_p1 = scmp.ge.s32.totalorder %s15_s21, 6   ;;  %s4751_s16 = smov %s3874_s28 }
 0x2bd   : > { %s4752_s17 = smov %s3787_s19  ;;  %s4753_s18 = smov %s3791_s20 }
 0x2be   : > { %s4754_s19 = smov %s4757_s22  ;;  %s4755_s20 = smov %s4761_s23 }
 0x2bf   :  { %14 = sbr.rel (!%p12_p1) target bundleno = 4 (0x4), region = 121 }

// kernel: tile.33
= control target key start
LH: loop header
LB: loop body
LE: loop exit
PB: predicated region body
PF: predicated region fallthrough
CT: control target
= control target key end

     0   :  { %s22_s0 = inlined_call_operand.vmem [shape: f32[32], index: 0, kind: input, shape index: {}]   ;;  %s23_s1 = inlined_call_operand.vmem [shape: f32[4,32], index: 1, kind: output, shape index: {}]  }
   0x1   :  { %v4_v0 = vld [vmem:[%s22_s0] ss:$0 sm:$0xff] }
   0x2   :  { %5 = vst [vmem:[%s23_s1] sm:$0xf] %v4_v0 }

// kernel: tile.38
= control target key start
LH: loop header
LB: loop body
LE: loop exit
PB: predicated region body
PF: predicated region fallthrough
CT: control target
= control target key end

     0   :  { %vm7_vm0 = vcmask 261120   ;;  %s37_s8 = smov 32   ;;  %s38_s9 = smov 64   ;;  %vm13_vm1 = vcmask 1048320   ;;  %vm19_vm2 = vcmask 785920   ;;  %vm25_vm3 = vcmask 523520   ;;  %s55_s0 = inlined_call_operand.vmem [shape: f32[4,32], index: 0, kind: input, shape index: {}]   ;;  %s56_s1 = inlined_call_operand.vmem [shape: f32[1,128], index: 1, kind: output, shape index: {}]  }
   0x1   :  { %v4_v0 = vld [vmem:[%s55_s0] sm:$0xf]  ;;  %s36_s0 = smov 96  }
   0x2   :  { %5 = vst [vmem:[#allocation1] sm:$0xf] %v4_v0 }
   0x9   :  { %v10_v1 = vld [vmem:[#allocation1 + $0x3] sm:$0x1]   ;;  %v22_v2 = vld [vmem:[#allocation1 + $0x1] sm:$0x1]   ;;  %v6_v3 = vld [vmem:[#allocation1] sm:$0x1]  }
   0xa   :  { %11 = vrot.lane.b32.xlu0 %v10_v1, %s36_s0  ;;  %23 = vrot.lane.b32.xlu1 %v22_v2, %s37_s8  ;;  %v16_v4 = vld [vmem:[#allocation1 + $0x2] sm:$0x1]   ;;  %8 = vst.msk [vmem:[#allocation0] sm:$0x1] %vm7_vm0, %v6_v3  }
   0xe   :  { %17 = vrot.lane.b32.xlu0 %v16_v4, %s38_s9 }
  0x7c   :  { %v12_v5 = vpop.permute.xlu0 %11   ;;  %v24_v6 = vpop.permute.xlu1 %23  }
  0x7d   :  { %14 = vst.msk [vmem:[#allocation0] sm:$0x1] %vm13_vm1, %v12_v5  }
  0x80   :  { %v18_v7 = vpop.permute.xlu0 %17  }
  0x81   :  { %20 = vst.msk [vmem:[#allocation0] sm:$0x1] %vm19_vm2, %v18_v7  }
  0x82   :  { %26 = vst.msk [vmem:[#allocation0] sm:$0x1] %vm25_vm3, %v24_v6  }
  0x89   :  { %v30_v8 = vld [vmem:[#allocation0] sm:$0x1] }
  0x8a   :  { %32 = vst [vmem:[%s56_s1] sm:$0x1] %v30_v8 }

// kernel: generator_forward.15
= control target key start
LH: loop header
LB: loop body
LE: loop exit
PB: predicated region body
PF: predicated region fallthrough
CT: control target
= control target key end

     0   :  { %s3489_s15 = smov 0   ;;  %s3491_s16 = smov 0   ;;  %s4247_s0 = inlined_call_operand.vmem [shape: bf16[2048,1024], index: 0, kind: input, shape index: {}]   ;;  %s4248_s1 = inlined_call_operand.vmem [shape: bf16[1024,32], index: 1, kind: input, shape index: {}]   ;;  %s4249_s2 = inlined_call_operand.vmem [shape: f32[2048,32], index: 2, kind: output, shape index: {0}]   ;;  %s4250_s3 = inlined_call_operand.vmem [shape: f32[64,32], index: 3, kind: output, shape index: {1}]   ;;  %s4251_s4 = inlined_call_operand.vmem [shape: f32[64,32], index: 4, kind: output, shape index: {2}]  }
   0x1   :  { %s3493_s17 = smov 0  }
   0x2 LB: > { %s27_s18 = sadd.s32 1, %s3457_s16  ;;  %p2699_p0 = scmp.ge.s32.totalorder %s3461_s17, 1  ;;  %s3461_s17 = sphi %s3493_s17, %s15_s17   ;;  %s3457_s16 = sphi %s3491_s16, %s4253_s16   ;;  %s3453_s15 = sphi %s3489_s15, %s4252_s15  }
   0x3   : > { %p29_p1 = scmp.ge.s32.totalorder %s27_s18, 8  ;;  %p199_p2 = scmp.lt.s32.totalorder %s3461_s17, 9 }
   0x5   : > { %s4255_s18 = smov (%p29_p1, %s27_s18), 0  ;;  %p200_p3 = pnand %p2699_p0, %p199_p2 }
   0x6   : > { %v3375_v0 = vld [vmem:[%s4248_s1 + $0x40] sm:$0xff] (!%p200_p3)   ;;  %v3379_v4 = vld [vmem:[%s4248_s1 + $0x48] sm:$0xff] (!%p200_p3)   ;;  %v3383_v8 = vld [vmem:[%s4248_s1 + $0x50] sm:$0xff] (!%p200_p3)   ;;  %s2700_s29 = sshll.u32 (!%p200_p3), %s3453_s15, 5  ;;  %vm280_vm0 = vcmask (!%p200_p3), 261120   ;;  %p267_p5 = scmp.lt.s32.totalorder (!%p200_p3), %s3453_s15, 7 }
   0x7   : > { %203 = sbr.rel (%p200_p3) target bundleno = 538 (0x21a), region = 28  ;;  %v3376_v1 = vld [vmem:[%s4248_s1 + $0xc0] sm:$0xff] (!%p200_p3)   ;;  %2902 = vmatprep.subr.bf16.mxu0 (!%p200_p3), %v3375_v0  ;;  %v3380_v5 = vld [vmem:[%s4248_s1 + $0xc8] sm:$0xff] (!%p200_p3)   ;;  %v3384_v9 = vld [vmem:[%s4248_s1 + $0xd0] sm:$0xff] (!%p200_p3)   ;;  %p245_p4 = scmp.lt.s32.totalorder (!%p200_p3), %s2700_s29, 255 }
   0x8   : > { %v3377_v2 = vld [vmem:[%s4248_s1] sm:$0xff] (!%p200_p3)   ;;  %3014 = vmatprep.subr.bf16.mxu1 (!%p200_p3), %v3376_v1  ;;  %v3381_v6 = vld [vmem:[%s4248_s1 + $0x8] sm:$0xff] (!%p200_p3)   ;;  %v3385_v10 = vld [vmem:[%s4248_s1 + $0x10] sm:$0xff] (!%p200_p3)  }
   0x9   : > { %v3378_v3 = vld [vmem:[%s4248_s1 + $0x80] sm:$0xff] (!%p200_p3)   ;;  %2903 = vmatpush3.bf16.msra.mxu0 (!%p200_p3), %v3377_v2  ;;  %v3382_v7 = vld [vmem:[%s4248_s1 + $0x88] sm:$0xff] (!%p200_p3)   ;;  %v3386_v11 = vld [vmem:[%s4248_s1 + $0x90] sm:$0xff] (!%p200_p3)  }
   0xa   : > { %3015 = vmatpush3.bf16.msra.mxu1 (!%p200_p3), %v3378_v3  ;;  %2904 = vmatprep.subr.bf16.mxu0 (!%p200_p3), %v3379_v4  ;;  %v3387_v12 = vld [vmem:[%s4248_s1 + $0x58] sm:$0xff] (!%p200_p3)   ;;  %v3391_v16 = vld [vmem:[%s4248_s1 + $0x60] sm:$0xff] (!%p200_p3)   ;;  %v3395_v20 = vld [vmem:[%s4248_s1 + $0x68] sm:$0xff] (!%p200_p3)  }
   0xb   : > { %3016 = vmatprep.subr.bf16.mxu1 (!%p200_p3), %v3380_v5  ;;  %v3388_v13 = vld [vmem:[%s4248_s1 + $0xd8] sm:$0xff] (!%p200_p3)   ;;  %v3392_v17 = vld [vmem:[%s4248_s1 + $0xe0] sm:$0xff] (!%p200_p3)   ;;  %v3396_v21 = vld [vmem:[%s4248_s1 + $0xe8] sm:$0xff] (!%p200_p3)  }
   0xc   : > { %v3389_v14 = vld [vmem:[%s4248_s1 + $0x18] sm:$0xff] (!%p200_p3)   ;;  %v3393_v18 = vld [vmem:[%s4248_s1 + $0x20] sm:$0xff] (!%p200_p3)   ;;  %v3397_v22 = vld [vmem:[%s4248_s1 + $0x28] sm:$0xff] (!%p200_p3)  }
   0xd   : > { %2905 = vmatpush3.bf16.msra.mxu0 (!%p200_p3), %v3381_v6  ;;  %v3390_v15 = vld [vmem:[%s4248_s1 + $0x98] sm:$0xff] (!%p200_p3)   ;;  %v3394_v19 = vld [vmem:[%s4248_s1 + $0xa0] sm:$0xff] (!%p200_p3)   ;;  %v3398_v23 = vld [vmem:[%s4248_s1 + $0xa8] sm:$0xff] (!%p200_p3)  }
   0xe   : > { %3017 = vmatpush3.bf16.msra.mxu1 %v3382_v7  ;;  %2906 = vmatprep.subr.bf16.mxu0 %v3383_v8  ;;  %s4257_s29 = smov (!%p245_p4, %s2700_s29), 255  ;;  %v3399_v24 = vld [vmem:[%s4248_s1 + $0x70] sm:$0xff]   ;;  %v3403_v28 = vld [vmem:[%s4248_s1 + $0x78] sm:$0xff]   ;;  %v3407_v40 = vld [vmem:[%s4248_s1 + $0x140] sm:$0xff]   ;;  %s4259_s15 = smov (!%p267_p5, %s3453_s15), 7 }
   0xf   : > { %3018 = vmatprep.subr.bf16.mxu1 %v3384_v9  ;;  %v3400_v25 = vld [vmem:[%s4248_s1 + $0xf0] sm:$0xff]   ;;  %s2901_s5 = sshll.u32 %s4257_s29, 5  ;;  %v3404_v29 = vld [vmem:[%s4248_s1 + $0xf8] sm:$0xff]   ;;  %v3408_v41 = vld [vmem:[%s4248_s1 + $0x100] sm:$0xff]   ;;  %s2704_s27 = sshll.u32 %s4257_s29, 3 }
  0x10   : > { %v3401_v26 = vld [vmem:[%s4248_s1 + $0x30] sm:$0xff]   ;;  %s3606_s14 = scalar_lea.vmem %s4247_s0, %s2901_s5  ;;  %v3405_v30 = vld [vmem:[%s4248_s1 + $0x38] sm:$0xff]   ;;  %v3409_v42 = vld [vmem:[%s4248_s1 + $0x1c0] sm:$0xff]   ;;  %s3850_s5 = scalar_lea.vmem %s4249_s2, %s2704_s27 }
  0x11   : > { %2907 = vmatpush3.bf16.msra.mxu0 %v3385_v10  ;;  %v3402_v27 = vld [vmem:[%s4248_s1 + $0xb0] sm:$0xff]   ;;  %v3406_v31 = vld [vmem:[%s4248_s1 + $0xb8] sm:$0xff]   ;;  %v345_v32 = vld [vmem:[%s3606_s14] sm:$0xff]  ;;  %s2705_s29 = sshll.u32 %s4259_s15, 3 }
  0x12   : > { %3019 = vmatpush3.bf16.msra.mxu1 %v3386_v11  ;;  %2908 = vmatprep.subr.bf16.mxu0 %v3387_v12  ;;  %v349_v33 = vld [vmem:[%s3606_s14 + $0x20] sm:$0xff]  ;;  %v346_v34 = vld [vmem:[%s3606_s14 + $0x8] sm:$0xff]  ;;  %v3415_v2 = vld [vmem:[%s4248_s1 + $0x150] sm:$0xff]   ;;  %s270_s7 = scalar_lea.vmem %s4250_s3, %s2705_s29  ;;  %s274_s10 = scalar_lea.vmem %s4251_s4, %s2705_s29 }
  0x13   : > { %3020 = vmatprep.subr.bf16.mxu1 %v3388_v13  ;;  %v2707_v35 = vcombine.low %v345_v32, %v349_v33  ;;  %v2708_v36 = vcombine.high %v345_v32, %v349_v33  ;;  %v350_v37 = vld [vmem:[%s3606_s14 + $0x28] sm:$0xff]  ;;  %v3410_v43 = vld [vmem:[%s4248_s1 + $0x180] sm:$0xff]   ;;  %v3416_v4 = vld [vmem:[%s4248_s1 + $0x110] sm:$0xff]  }
  0x14   : > { %v2709_v38 = vcombine.low %v346_v34, %v350_v37  ;;  %v2710_v39 = vcombine.high %v346_v34, %v350_v37  ;;  %v353_v44 = vld [vmem:[%s3606_s14 + $0x40] sm:$0xff]  ;;  %v354_v47 = vld [vmem:[%s3606_s14 + $0x48] sm:$0xff]  ;;  %v3417_v7 = vld [vmem:[%s4248_s1 + $0x1d0] sm:$0xff]  }
  0x15   : > { %2909 = vmatpush3.bf16.msra.mxu0 %v3389_v14  ;;  %1657 = vmatprep.mubr.bf16.mxu0 %v2708_v36  ;;  %v357_v45 = vld [vmem:[%s3606_s14 + $0x60] sm:$0xff]  ;;  %v358_v48 = vld [vmem:[%s3606_s14 + $0x68] sm:$0xff]  ;;  %v3418_v9 = vld [vmem:[%s4248_s1 + $0x190] sm:$0xff]  }
  0x16   : > { %3021 = vmatpush3.bf16.msra.mxu1 %v3390_v15  ;;  %2910 = vmatprep.subr.bf16.mxu0 %v3391_v16  ;;  %v2716_v46 = vcombine.high %v353_v44, %v357_v45  ;;  %v361_v49 = vld [vmem:[%s3606_s14 + $0x80] sm:$0xff]  ;;  %v2718_v50 = vcombine.high %v354_v47, %v358_v48  ;;  %v362_v52 = vld [vmem:[%s3606_s14 + $0x88] sm:$0xff]  ;;  %v2715_v54 = vcombine.low %v353_v44, %v357_v45  ;;  %v3419_v14 = vld [vmem:[%s4248_s1 + $0x158] sm:$0xff]  }
  0x17   : > { %3022 = vmatprep.subr.bf16.mxu1 %v3392_v17  ;;  %1818 = vmatprep.mubr.bf16.mxu1 %v2710_v39  ;;  %v365_v51 = vld [vmem:[%s3606_s14 + $0xa0] sm:$0xff]  ;;  %v366_v53 = vld [vmem:[%s3606_s14 + $0xa8] sm:$0xff]  ;;  %v2717_v56 = vcombine.low %v354_v47, %v358_v48  ;;  %v3420_v15 = vld [vmem:[%s4248_s1 + $0x118] sm:$0xff]  }
  0x18   : > { %v3411_v55 = vld [vmem:[%s4248_s1 + $0x148] sm:$0xff]   ;;  %v2724_v57 = vcombine.high %v361_v49, %v365_v51  ;;  %v2726_v59 = vcombine.high %v362_v52, %v366_v53  ;;  %v369_v62 = vld [vmem:[%s3606_s14 + $0xc0] sm:$0xff]  ;;  %v2723_v3 = vcombine.low %v361_v49, %v365_v51  ;;  %v2725_v5 = vcombine.low %v362_v52, %v366_v53  ;;  %v3421_v17 = vld [vmem:[%s4248_s1 + $0x1d8] sm:$0xff]  }
  0x19   : > { %2911 = vmatpush3.bf16.msra.mxu0 %v3393_v18  ;;  %v3412_v58 = vld [vmem:[%s4248_s1 + $0x108] sm:$0xff]   ;;  %v373_v63 = vld [vmem:[%s3606_s14 + $0xe0] sm:$0xff]  ;;  %v3432_v47 = vld [vmem:[%s4248_s1 + $0x130] sm:$0xff]  }
  0x1a   : > { %3023 = vmatpush3.bf16.msra.mxu1 %v3394_v19  ;;  %2912 = vmatprep.subr.bf16.mxu0 %v3395_v20  ;;  %v3413_v60 = vld [vmem:[%s4248_s1 + $0x1c8] sm:$0xff]   ;;  %v2732_v6 = vcombine.high %v369_v62, %v373_v63  ;;  %v377_v10 = vld [vmem:[%s3606_s14 + $0x100] sm:$0xff]  ;;  %v2731_v16 = vcombine.low %v369_v62, %v373_v63  ;;  %v3422_v20 = vld [vmem:[%s4248_s1 + $0x198] sm:$0xff]  }
  0x1b   : > { %3024 = vmatprep.subr.bf16.mxu1 %v3396_v21  ;;  %v3414_v61 = vld [vmem:[%s4248_s1 + $0x188] sm:$0xff]   ;;  %v381_v11 = vld [vmem:[%s3606_s14 + $0x120] sm:$0xff]  ;;  %v3433_v48 = vld [vmem:[%s4248_s1 + $0x1f0] sm:$0xff]  }
  0x1c   : > { %v370_v0 = vld [vmem:[%s3606_s14 + $0xc8] sm:$0xff]  ;;  %v2740_v19 = vcombine.high %v377_v10, %v381_v11  ;;  %v3434_v49 = vld [vmem:[%s4248_s1 + $0x1b0] sm:$0xff]   ;;  %v405_v51 = vld [vmem:[%s3606_s14 + $0x1e0] sm:$0xff] }
  0x1d   : > { %2913 = vmatpush3.bf16.msra.mxu0 %v3397_v22  ;;  %v374_v1 = vld [vmem:[%s3606_s14 + $0xe8] sm:$0xff]  ;;  %v385_v22 = vld [vmem:[%s3606_s14 + $0x140] sm:$0xff] }
  0x1e   : > { %3025 = vmatpush3.bf16.msra.mxu1 %v3398_v23  ;;  %2914 = vmatprep.subr.bf16.mxu0 %v3399_v24  ;;  %v2734_v8 = vcombine.high %v370_v0, %v374_v1  ;;  %v378_v12 = vld [vmem:[%s3606_s14 + $0x108] sm:$0xff]  ;;  %v2733_v18 = vcombine.low %v370_v0, %v374_v1  ;;  %v389_v23 = vld [vmem:[%s3606_s14 + $0x160] sm:$0xff] }
  0x1f   : > { %3026 = vmatprep.subr.bf16.mxu1 %v3400_v25  ;;  %v382_v13 = vld [vmem:[%s3606_s14 + $0x128] sm:$0xff]  ;;  %v3423_v24 = vld [vmem:[%s4248_s1 + $0x160] sm:$0xff]   ;;  %v2748_v32 = vcombine.high %v385_v22, %v389_v23 }
  0x20   : > { %v2742_v21 = vcombine.high %v378_v12, %v382_v13  ;;  %v386_v25 = vld [vmem:[%s3606_s14 + $0x148] sm:$0xff]  ;;  %v409_v62 = vld [vmem:[%s3606_s14 + $0x200] sm:$0xff] }
  0x21   : > { %2915 = vmatpush3.bf16.msra.mxu0 %v3401_v26  ;;  %v390_v26 = vld [vmem:[%s3606_s14 + $0x168] sm:$0xff]  ;;  %v413_v63 = vld [vmem:[%s3606_s14 + $0x220] sm:$0xff] }
  0x22   : > { %3027 = vmatpush3.bf16.msra.mxu1 %v3402_v27  ;;  %2916 = vmatprep.subr.bf16.mxu0 %v3403_v28  ;;  %v3424_v27 = vld [vmem:[%s4248_s1 + $0x120] sm:$0xff]   ;;  %v2750_v33 = vcombine.high %v386_v25, %v390_v26  ;;  %v3427_v34 = vld [vmem:[%s4248_s1 + $0x168] sm:$0xff]  }
  0x23   : > { %3028 = vmatprep.subr.bf16.mxu1 %v3404_v29  ;;  %v3425_v28 = vld [vmem:[%s4248_s1 + $0x1e0] sm:$0xff]   ;;  %v3428_v36 = vld [vmem:[%s4248_s1 + $0x128] sm:$0xff]  }
  0x24   : > { %v3426_v29 = vld [vmem:[%s4248_s1 + $0x1a0] sm:$0xff]   ;;  %v3429_v37 = vld [vmem:[%s4248_s1 + $0x1e8] sm:$0xff]  }
  0x25   : > { %2917 = vmatpush3.bf16.msra.mxu0 %v3405_v30  ;;  %v2739_v30 = vcombine.low %v377_v10, %v381_v11  ;;  %v3430_v39 = vld [vmem:[%s4248_s1 + $0x1a8] sm:$0xff]   ;;  %v2771_v10 = vcombine.low %v409_v62, %v413_v63 }
  0x26   : > { %3029 = vmatpush3.bf16.msra.mxu1 %v3406_v31  ;;  %3126 = vmatprep.subr.bf16.mxu0 %v3407_v40  ;;  %v2741_v31 = vcombine.low %v378_v12, %v382_v13  ;;  %v394_v40 = vld [vmem:[%s3606_s14 + $0x188] sm:$0xff] }
  0x27   : > { %3238 = vmatprep.subr.bf16.mxu1 %v3409_v42  ;;  %v2747_v42 = vcombine.low %v385_v22, %v389_v23  ;;  %v402_v52 = vld [vmem:[%s3606_s14 + $0x1c8] sm:$0xff]  ;;  %v433_v22 = vld [vmem:[%s3606_s14 + $0x2c0] sm:$0xff] }
  0x28   : > { %1658 = vmatmul.mubr.bf16.vlgmr.msra.gmra.mrb[0].mxu0 %v2707_v35  ;;  %v393_v35 = vld [vmem:[%s3606_s14 + $0x180] sm:$0xff]  ;;  %v406_v53 = vld [vmem:[%s3606_s14 + $0x1e8] sm:$0xff] }
  0x29   : > { %1819 = vmatmul.mubr.bf16.vlgmr.msra.gmra.mrb[0].mxu1 %v2709_v38  ;;  %3127 = vmatpush3.bf16.msra.mxu0 %v3408_v41  ;;  %v397_v38 = vld [vmem:[%s3606_s14 + $0x1a0] sm:$0xff]  ;;  %v398_v41 = vld [vmem:[%s3606_s14 + $0x1a8] sm:$0xff] }
  0x2a   : > { %3239 = vmatpush3.bf16.msra.mxu1 %v3410_v43  ;;  %1665 = vmatprep.mubr.bf16.mxu0 %v2716_v46  ;;  %v2749_v43 = vcombine.low %v386_v25, %v390_v26  ;;  %v2756_v44 = vcombine.high %v393_v35, %v397_v38  ;;  %v2758_v45 = vcombine.high %v394_v40, %v398_v41  ;;  %v3431_v46 = vld [vmem:[%s4248_s1 + $0x170] sm:$0xff]   ;;  %v410_v0 = vld [vmem:[%s3606_s14 + $0x208] sm:$0xff]  ;;  %v437_v23 = vld [vmem:[%s3606_s14 + $0x2e0] sm:$0xff] }
  0x2b   : > { %1826 = vmatprep.mubr.bf16.mxu1 %v2718_v50  ;;  %3128 = vmatprep.subr.bf16.mxu0 %v3411_v55  ;;  %v401_v50 = vld [vmem:[%s3606_s14 + $0x1c0] sm:$0xff]  ;;  %v3435_v55 = vld [vmem:[%s4248_s1 + $0x178] sm:$0xff]   ;;  %v414_v1 = vld [vmem:[%s3606_s14 + $0x228] sm:$0xff] }
  0x2c   : > { %3240 = vmatprep.subr.bf16.mxu1 %v3413_v60  ;;  %v3437_v60 = vld [vmem:[%s4248_s1 + $0x1f8] sm:$0xff]   ;;  %v2773_v11 = vcombine.low %v410_v0, %v414_v1  ;;  %v438_v25 = vld [vmem:[%s3606_s14 + $0x2e8] sm:$0xff] }
  0x2d   : > { %3129 = vmatpush3.bf16.msra.mxu0 %v3412_v58  ;;  %v3436_v58 = vld [vmem:[%s4248_s1 + $0x138] sm:$0xff]  }
  0x2e   : > { %3241 = vmatpush3.bf16.msra.mxu1 %v3414_v61  ;;  %3130 = vmatprep.subr.bf16.mxu0 %v3415_v2  ;;  %v3438_v61 = vld [vmem:[%s4248_s1 + $0x1b8] sm:$0xff]   ;;  %v2763_v2 = vcombine.low %v401_v50, %v405_v51 }
  0x2f   : > { %3242 = vmatprep.subr.bf16.mxu1 %v3417_v7  ;;  %v421_v7 = vld [vmem:[%s3606_s14 + $0x260] sm:$0xff] }
  0x30   : > { %1666 = vmatmul.mubr.bf16.gmra.mrb[4].mxu0 %v2715_v54  ;;  %v2755_v54 = vcombine.low %v393_v35, %v397_v38  ;;  %v449_v38 = vld [vmem:[%s3606_s14 + $0x340] sm:$0xff] }
  0x31   : > { %1827 = vmatmul.mubr.bf16.gmra.mrb[4].mxu1 %v2717_v56  ;;  %1673 = vmatprep.mubr.bf16.mxu0 %v2724_v57  ;;  %v2757_v56 = vcombine.low %v394_v40, %v398_v41  ;;  %v2764_v57 = vcombine.high %v401_v50, %v405_v51  ;;  %v450_v40 = vld [vmem:[%s3606_s14 + $0x348] sm:$0xff] }
  0x32   : > { %1834 = vmatprep.mubr.bf16.mxu1 %v2726_v59  ;;  %3131 = vmatpush3.bf16.msra.mxu0 %v3416_v4  ;;  %v2766_v59 = vcombine.high %v402_v52, %v406_v53  ;;  %v2772_v4 = vcombine.high %v409_v62, %v413_v63  ;;  %v454_v41 = vld [vmem:[%s3606_s14 + $0x368] sm:$0xff]  ;;  %v347_v62 = vld [vmem:[%s3606_s14 + $0x10] sm:$0xff] }
  0x33   : > { %3243 = vmatpush3.bf16.msra.mxu1 %v3418_v9  ;;  %3132 = vmatprep.subr.bf16.mxu0 %v3419_v14  ;;  %v422_v9 = vld [vmem:[%s3606_s14 + $0x268] sm:$0xff]  ;;  %v425_v14 = vld [vmem:[%s3606_s14 + $0x280] sm:$0xff]  ;;  %v2813_v51 = vcombine.low %v450_v40, %v454_v41  ;;  %v351_v63 = vld [vmem:[%s3606_s14 + $0x30] sm:$0xff] }
  0x34   : > { %3244 = vmatprep.subr.bf16.mxu1 %v3421_v17  ;;  %v430_v17 = vld [vmem:[%s3606_s14 + $0x2a8] sm:$0xff] }
  0x36   : > { %3133 = vmatpush3.bf16.msra.mxu0 %v3420_v15  ;;  %v429_v15 = vld [vmem:[%s3606_s14 + $0x2a0] sm:$0xff] }
  0x37   : > { %3245 = vmatpush3.bf16.msra.mxu1 %v3422_v20  ;;  %3134 = vmatprep.subr.bf16.mxu0 %v3423_v24  ;;  %v2788_v20 = vcombine.high %v425_v14, %v429_v15  ;;  %v434_v24 = vld [vmem:[%s3606_s14 + $0x2c8] sm:$0xff]  ;;  %v2787_v26 = vcombine.low %v425_v14, %v429_v15  ;;  %v363_v14 = vld [vmem:[%s3606_s14 + $0x90] sm:$0xff] }
  0x38   : > { %1674 = vmatmul.mubr.bf16.gmra.mrb[8].mxu0 %v2723_v3  ;;  %3246 = vmatprep.subr.bf16.mxu1 %v3425_v28  ;;  %v2765_v3 = vcombine.low %v402_v52, %v406_v53  ;;  %v2796_v28 = vcombine.high %v433_v22, %v437_v23  ;;  %v2797_v35 = vcombine.low %v434_v24, %v438_v25  ;;  %v367_v15 = vld [vmem:[%s3606_s14 + $0xb0] sm:$0xff] }
  0x39   : > { %1835 = vmatmul.mubr.bf16.gmra.mrb[8].mxu1 %v2725_v5  ;;  %1681 = vmatprep.mubr.bf16.mxu0 %v2732_v6  ;;  %v2774_v5 = vcombine.high %v410_v0, %v414_v1  ;;  %v417_v6 = vld [vmem:[%s3606_s14 + $0x240] sm:$0xff]  ;;  %v348_v0 = vld [vmem:[%s3606_s14 + $0x18] sm:$0xff] }
  0x3a   : > { %1842 = vmatprep.mubr.bf16.mxu1 %v2734_v8  ;;  %3135 = vmatpush3.bf16.msra.mxu0 %v3424_v27  ;;  %v418_v8 = vld [vmem:[%s3606_s14 + $0x248] sm:$0xff]  ;;  %v2780_v12 = vcombine.high %v417_v6, %v421_v7  ;;  %v352_v1 = vld [vmem:[%s3606_s14 + $0x38] sm:$0xff] }
  0x3b   : > { %3247 = vmatpush3.bf16.msra.mxu1 %v3426_v29  ;;  %3136 = vmatprep.subr.bf16.mxu0 %v3427_v34  ;;  %v2782_v13 = vcombine.high %v418_v8, %v422_v9  ;;  %v2798_v29 = vcombine.high %v434_v24, %v438_v25  ;;  %v2795_v34 = vcombine.low %v433_v22, %v437_v23  ;;  %v371_v22 = vld [vmem:[%s3606_s14 + $0xd0] sm:$0xff]  ;;  %v372_v24 = vld [vmem:[%s3606_s14 + $0xd8] sm:$0xff] }
  0x3c   : > { %3248 = vmatprep.subr.bf16.mxu1 %v3429_v37  ;;  %v375_v23 = vld [vmem:[%s3606_s14 + $0xf0] sm:$0xff]  ;;  %v376_v25 = vld [vmem:[%s3606_s14 + $0xf8] sm:$0xff] }
  0x3e   : > { %3137 = vmatpush3.bf16.msra.mxu0 %v3428_v36 }
  0x3f   : > { %3249 = vmatpush3.bf16.msra.mxu1 %v3430_v39  ;;  %3138 = vmatprep.subr.bf16.mxu0 %v3431_v46  ;;  %v453_v39 = vld [vmem:[%s3606_s14 + $0x360] sm:$0xff] }
  0x40   : > { %1682 = vmatmul.mubr.bf16.gmra.mrb[12].mxu0 %v2731_v16  ;;  %3250 = vmatprep.subr.bf16.mxu1 %v3433_v48  ;;  %v426_v16 = vld [vmem:[%s3606_s14 + $0x288] sm:$0xff]  ;;  %v457_v46 = vld [vmem:[%s3606_s14 + $0x380] sm:$0xff]  ;;  %v2811_v50 = vcombine.low %v449_v38, %v453_v39 }
  0x41   : > { %1843 = vmatmul.mubr.bf16.gmra.mrb[12].mxu1 %v2733_v18  ;;  %1689 = vmatprep.mubr.bf16.mxu0 %v2740_v19  ;;  %v2779_v18 = vcombine.low %v417_v6, %v421_v7  ;;  %v2781_v19 = vcombine.low %v418_v8, %v422_v9  ;;  %v2789_v27 = vcombine.low %v426_v16, %v430_v17  ;;  %v458_v48 = vld [vmem:[%s3606_s14 + $0x388] sm:$0xff]  ;;  %v355_v6 = vld [vmem:[%s3606_s14 + $0x50] sm:$0xff]  ;;  %v356_v8 = vld [vmem:[%s3606_s14 + $0x58] sm:$0xff] }
  0x42   : > { %1850 = vmatprep.mubr.bf16.mxu1 %v2742_v21  ;;  %3139 = vmatpush3.bf16.msra.mxu0 %v3432_v47  ;;  %v2790_v21 = vcombine.high %v426_v16, %v430_v17  ;;  %v461_v47 = vld [vmem:[%s3606_s14 + $0x3a0] sm:$0xff]  ;;  %v359_v7 = vld [vmem:[%s3606_s14 + $0x70] sm:$0xff]  ;;  %v360_v9 = vld [vmem:[%s3606_s14 + $0x78] sm:$0xff] }
  0x43   : > { %3251 = vmatpush3.bf16.msra.mxu1 %v3434_v49  ;;  %3140 = vmatprep.subr.bf16.mxu0 %v3435_v55  ;;  %v462_v49 = vld [vmem:[%s3606_s14 + $0x3a8] sm:$0xff]  ;;  %v2820_v52 = vcombine.high %v457_v46, %v461_v47  ;;  %v469_v55 = vld [vmem:[%s3606_s14 + $0x3e0] sm:$0xff]  ;;  %v364_v16 = vld [vmem:[%s3606_s14 + $0x98] sm:$0xff] }
  0x44   : > { %3252 = vmatprep.subr.bf16.mxu1 %v3437_v60  ;;  %v2822_v53 = vcombine.high %v458_v48, %v462_v49  ;;  %v368_v17 = vld [vmem:[%s3606_s14 + $0xb8] sm:$0xff] }
  0x46   : > { %3141 = vmatpush3.bf16.msra.mxu0 %v3436_v58  ;;  %v2819_v58 = vcombine.low %v457_v46, %v461_v47  ;;  %v395_v46 = vld [vmem:[%s3606_s14 + $0x190] sm:$0xff] }
  0x47   : > { %3253 = vmatpush3.bf16.msra.mxu1 %v3438_v61  ;;  %v399_v47 = vld [vmem:[%s3606_s14 + $0x1b0] sm:$0xff] }
  0x48   : > { %1690 = vmatmul.mubr.bf16.gmra.mrb[16].mxu0 %v2739_v30  ;;  %v441_v30 = vld [vmem:[%s3606_s14 + $0x300] sm:$0xff] }
  0x49   : > { %1851 = vmatmul.mubr.bf16.gmra.mrb[16].mxu1 %v2741_v31  ;;  %1697 = vmatprep.mubr.bf16.mxu0 %v2748_v32  ;;  %v445_v31 = vld [vmem:[%s3606_s14 + $0x320] sm:$0xff]  ;;  %v442_v32 = vld [vmem:[%s3606_s14 + $0x308] sm:$0xff] }
  0x4a   : > { %1858 = vmatprep.mubr.bf16.mxu1 %v2750_v33  ;;  %v446_v33 = vld [vmem:[%s3606_s14 + $0x328] sm:$0xff]  ;;  %v2804_v36 = vcombine.high %v441_v30, %v445_v31 }
  0x4b   : > { %v2806_v37 = vcombine.high %v442_v32, %v446_v33 }
  0x50   : > { %1698 = vmatmul.mubr.bf16.gmra.mrb[20].mxu0 %v2747_v42  ;;  %v2803_v42 = vcombine.low %v441_v30, %v445_v31  ;;  %v379_v30 = vld [vmem:[%s3606_s14 + $0x110] sm:$0xff] }
  0x51   : > { %1859 = vmatmul.mubr.bf16.gmra.mrb[20].mxu1 %v2749_v43  ;;  %1705 = vmatprep.mubr.bf16.mxu0 %v2756_v44  ;;  %v2805_v43 = vcombine.low %v442_v32, %v446_v33  ;;  %v2812_v44 = vcombine.high %v449_v38, %v453_v39  ;;  %v383_v31 = vld [vmem:[%s3606_s14 + $0x130] sm:$0xff]  ;;  %v380_v32 = vld [vmem:[%s3606_s14 + $0x118] sm:$0xff] }
  0x52   : > { %1866 = vmatprep.mubr.bf16.mxu1 %v2758_v45  ;;  %v2814_v45 = vcombine.high %v450_v40, %v454_v41  ;;  %v384_v33 = vld [vmem:[%s3606_s14 + $0x138] sm:$0xff]  ;;  %v387_v38 = vld [vmem:[%s3606_s14 + $0x150] sm:$0xff] }
  0x53   : > { %v391_v39 = vld [vmem:[%s3606_s14 + $0x170] sm:$0xff]  ;;  %v388_v40 = vld [vmem:[%s3606_s14 + $0x158] sm:$0xff] }
  0x54   : > { %v392_v41 = vld [vmem:[%s3606_s14 + $0x178] sm:$0xff] }
  0x58   : > { %1706 = vmatmul.mubr.bf16.gmra.mrb[24].mxu0 %v2755_v54  ;;  %v465_v54 = vld [vmem:[%s3606_s14 + $0x3c0] sm:$0xff] }
  0x59   : > { %1867 = vmatmul.mubr.bf16.gmra.mrb[24].mxu1 %v2757_v56  ;;  %1713 = vmatprep.mubr.bf16.mxu0 %v2764_v57  ;;  %v466_v56 = vld [vmem:[%s3606_s14 + $0x3c8] sm:$0xff]  ;;  %v2828_v60 = vcombine.high %v465_v54, %v469_v55 }
  0x5a   : > { %1874 = vmatprep.mubr.bf16.mxu1 %v2766_v59  ;;  %v470_v57 = vld [vmem:[%s3606_s14 + $0x3e8] sm:$0xff]  ;;  %v2821_v59 = vcombine.low %v458_v48, %v462_v49  ;;  %v396_v48 = vld [vmem:[%s3606_s14 + $0x198] sm:$0xff] }
  0x5b   : > { %v2830_v61 = vcombine.high %v466_v56, %v470_v57  ;;  %v400_v49 = vld [vmem:[%s3606_s14 + $0x1b8] sm:$0xff] }
  0x60   : > { %1714 = vmatmul.mubr.bf16.gmra.mrb[28].mxu0 %v2763_v2  ;;  %v2827_v2 = vcombine.low %v465_v54, %v469_v55  ;;  %v403_v54 = vld [vmem:[%s3606_s14 + $0x1d0] sm:$0xff] }
  0x61   : > { %1875 = vmatmul.mubr.bf16.gmra.mrb[28].mxu1 %v2765_v3  ;;  %1721 = vmatprep.mubr.bf16.mxu0 %v2772_v4  ;;  %v2829_v3 = vcombine.low %v466_v56, %v470_v57  ;;  %v2712_v4 = vcombine.high %v347_v62, %v351_v63  ;;  %v407_v55 = vld [vmem:[%s3606_s14 + $0x1f0] sm:$0xff]  ;;  %v404_v56 = vld [vmem:[%s3606_s14 + $0x1d8] sm:$0xff] }
  0x62   : > { %1882 = vmatprep.mubr.bf16.mxu1 %v2774_v5  ;;  %v2714_v5 = vcombine.high %v348_v0, %v352_v1  ;;  %v408_v57 = vld [vmem:[%s3606_s14 + $0x1f8] sm:$0xff] }
  0x68   : > { %1722 = vmatmul.mubr.bf16.gmra.mrb[32].mxu0 %v2771_v10  ;;  %v2711_v10 = vcombine.low %v347_v62, %v351_v63  ;;  %v411_v62 = vld [vmem:[%s3606_s14 + $0x210] sm:$0xff] }
  0x69   : > { %1883 = vmatmul.mubr.bf16.gmra.mrb[32].mxu1 %v2773_v11  ;;  %1729 = vmatprep.mubr.bf16.mxu0 %v2780_v12  ;;  %v2713_v11 = vcombine.low %v348_v0, %v352_v1  ;;  %v2720_v12 = vcombine.high %v355_v6, %v359_v7  ;;  %v415_v63 = vld [vmem:[%s3606_s14 + $0x230] sm:$0xff]  ;;  %v412_v0 = vld [vmem:[%s3606_s14 + $0x218] sm:$0xff] }
  0x6a   : > { %1890 = vmatprep.mubr.bf16.mxu1 %v2782_v13  ;;  %v2722_v13 = vcombine.high %v356_v8, %v360_v9  ;;  %v416_v1 = vld [vmem:[%s3606_s14 + $0x238] sm:$0xff] }
  0x70   : > { %1730 = vmatmul.mubr.bf16.gmra.mrb[36].mxu0 %v2779_v18  ;;  %v2719_v18 = vcombine.low %v355_v6, %v359_v7  ;;  %v419_v6 = vld [vmem:[%s3606_s14 + $0x250] sm:$0xff] }
  0x71   : > { %1891 = vmatmul.mubr.bf16.gmra.mrb[36].mxu1 %v2781_v19  ;;  %1737 = vmatprep.mubr.bf16.mxu0 %v2788_v20  ;;  %v2721_v19 = vcombine.low %v356_v8, %v360_v9  ;;  %v2728_v20 = vcombine.high %v363_v14, %v367_v15  ;;  %v423_v7 = vld [vmem:[%s3606_s14 + $0x270] sm:$0xff]  ;;  %v420_v8 = vld [vmem:[%s3606_s14 + $0x258] sm:$0xff] }
  0x72   : > { %1898 = vmatprep.mubr.bf16.mxu1 %v2790_v21  ;;  %v2730_v21 = vcombine.high %v364_v16, %v368_v17  ;;  %v424_v9 = vld [vmem:[%s3606_s14 + $0x278] sm:$0xff] }
  0x78   : > { %1738 = vmatmul.mubr.bf16.gmra.mrb[40].mxu0 %v2787_v26  ;;  %v2727_v26 = vcombine.low %v363_v14, %v367_v15  ;;  %v427_v14 = vld [vmem:[%s3606_s14 + $0x290] sm:$0xff] }
  0x79   : > { %1899 = vmatmul.mubr.bf16.gmra.mrb[40].mxu1 %v2789_v27  ;;  %1745 = vmatprep.mubr.bf16.mxu0 %v2796_v28  ;;  %v2729_v27 = vcombine.low %v364_v16, %v368_v17  ;;  %v2736_v28 = vcombine.high %v371_v22, %v375_v23  ;;  %v431_v15 = vld [vmem:[%s3606_s14 + $0x2b0] sm:$0xff]  ;;  %v428_v16 = vld [vmem:[%s3606_s14 + $0x298] sm:$0xff] }
  0x7a   : > { %1906 = vmatprep.mubr.bf16.mxu1 %v2798_v29  ;;  %v2738_v29 = vcombine.high %v372_v24, %v376_v25  ;;  %v432_v17 = vld [vmem:[%s3606_s14 + $0x2b8] sm:$0xff] }
  0x80   : > { %1746 = vmatmul.mubr.bf16.gmra.mrb[44].mxu0 %v2795_v34  ;;  %v2735_v34 = vcombine.low %v371_v22, %v375_v23  ;;  %v3819_v22 = vld [vmem:[%s3606_s14 + $0x2d0] sm:$0xff] }
  0x81   : > { %1907 = vmatmul.mubr.bf16.gmra.mrb[44].mxu1 %v2797_v35  ;;  %1753 = vmatprep.mubr.bf16.mxu0 %v2804_v36  ;;  %v2737_v35 = vcombine.low %v372_v24, %v376_v25  ;;  %v2744_v36 = vcombine.high %v379_v30, %v383_v31  ;;  %v3822_v23 = vld [vmem:[%s3606_s14 + $0x2f0] sm:$0xff]  ;;  %v3825_v24 = vld [vmem:[%s3606_s14 + $0x2d8] sm:$0xff] }
  0x82   : > { %1914 = vmatprep.mubr.bf16.mxu1 %v2806_v37  ;;  %v2746_v37 = vcombine.high %v380_v32, %v384_v33  ;;  %v3828_v25 = vld [vmem:[%s3606_s14 + $0x2f8] sm:$0xff] }
  0x88   : > { %1754 = vmatmul.mubr.bf16.gmra.mrb[48].mxu0 %v2803_v42  ;;  %v2743_v42 = vcombine.low %v379_v30, %v383_v31  ;;  %v3836_v30 = vld [vmem:[%s3606_s14 + $0x310] sm:$0xff] }
  0x89   : > { %1915 = vmatmul.mubr.bf16.gmra.mrb[48].mxu1 %v2805_v43  ;;  %1761 = vmatprep.mubr.bf16.mxu0 %v2812_v44  ;;  %v2745_v43 = vcombine.low %v380_v32, %v384_v33  ;;  %v2752_v44 = vcombine.high %v387_v38, %v391_v39  ;;  %v3839_v31 = vld [vmem:[%s3606_s14 + $0x330] sm:$0xff]  ;;  %v3842_v33 = vld [vmem:[%s3606_s14 + $0x318] sm:$0xff] }
  0x8a   : > { %1922 = vmatprep.mubr.bf16.mxu1 %v2814_v45  ;;  %v2754_v45 = vcombine.high %v388_v40, %v392_v41 }
  0x90   : > { %1762 = vmatmul.mubr.bf16.gmra.mrb[52].mxu0 %v2811_v50  ;;  %v2751_v50 = vcombine.low %v387_v38, %v391_v39  ;;  %v3463_v38 = vmov 0.0  }
  0x91   : > { %1923 = vmatmul.mubr.bf16.gmra.mrb[52].mxu1 %v2813_v51  ;;  %1769 = vmatprep.mubr.bf16.mxu0 %v2820_v52  ;;  %v2753_v51 = vcombine.low %v388_v40, %v392_v41  ;;  %v2760_v52 = vcombine.high %v395_v46, %v399_v47  ;;  %281 = vst.msk [vmem:[%s3850_s5] sm:$0xff] %vm280_vm0, %v3463_v38  ;;  %282 = vst.msk [vmem:[%s3850_s5 + $0x8] sm:$0xff] %vm280_vm0, %v3463_v38 }
  0x92   : > { %1930 = vmatprep.mubr.bf16.mxu1 %v2822_v53  ;;  %v2762_v53 = vcombine.high %v396_v48, %v400_v49  ;;  %283 = vst.msk [vmem:[%s3850_s5 + $0x10] sm:$0xff] %vm280_vm0, %v3463_v38  ;;  %284 = vst.msk [vmem:[%s3850_s5 + $0x18] sm:$0xff] %vm280_vm0, %v3463_v38 }
  0x93   : > { %285 = vst.msk [vmem:[%s3850_s5 + $0x20] sm:$0xff] %vm280_vm0, %v3463_v38  ;;  %286 = vst.msk [vmem:[%s3850_s5 + $0x28] sm:$0xff] %vm280_vm0, %v3463_v38 }
  0x94   : > { %287 = vst.msk [vmem:[%s3850_s5 + $0x30] sm:$0xff] %vm280_vm0, %v3463_v38  ;;  %288 = vst.msk [vmem:[%s3850_s5 + $0x38] sm:$0xff] %vm280_vm0, %v3463_v38 }
  0x95   : > { %289 = vst.msk [vmem:[%s3850_s5 + $0x40] sm:$0xff] %vm280_vm0, %v3463_v38  ;;  %290 = vst.msk [vmem:[%s3850_s5 + $0x48] sm:$0xff] %vm280_vm0, %v3463_v38 }
  0x96   : > { %291 = vst.msk [vmem:[%s3850_s5 + $0x50] sm:$0xff] %vm280_vm0, %v3463_v38  ;;  %292 = vst.msk [vmem:[%s3850_s5 + $0x58] sm:$0xff] %vm280_vm0, %v3463_v38 }
  0x97   : > { %293 = vst.msk [vmem:[%s3850_s5 + $0x60] sm:$0xff] %vm280_vm0, %v3463_v38  ;;  %294 = vst.msk [vmem:[%s3850_s5 + $0x68] sm:$0xff] %vm280_vm0, %v3463_v38 }
  0x98   : > { %1770 = vmatmul.mubr.bf16.gmra.mrb[56].mxu0 %v2819_v58  ;;  %v2759_v58 = vcombine.low %v395_v46, %v399_v47  ;;  %295 = vst.msk [vmem:[%s3850_s5 + $0x70] sm:$0xff] %vm280_vm0, %v3463_v38  ;;  %296 = vst.msk [vmem:[%s3850_s5 + $0x78] sm:$0xff] %vm280_vm0, %v3463_v38 }
  0x99   : > { %1931 = vmatmul.mubr.bf16.gmra.mrb[56].mxu1 %v2821_v59  ;;  %1777 = vmatprep.mubr.bf16.mxu0 %v2828_v60  ;;  %v2761_v59 = vcombine.low %v396_v48, %v400_v49  ;;  %v2768_v60 = vcombine.high %v403_v54, %v407_v55  ;;  %297 = vst.msk [vmem:[%s3850_s5 + $0x80] sm:$0xff] %vm280_vm0, %v3463_v38  ;;  %298 = vst.msk [vmem:[%s3850_s5 + $0x88] sm:$0xff] %vm280_vm0, %v3463_v38 }
  0x9a   : > { %1938 = vmatprep.mubr.bf16.mxu1 %v2830_v61  ;;  %v2770_v61 = vcombine.high %v404_v56, %v408_v57  ;;  %299 = vst.msk [vmem:[%s3850_s5 + $0x90] sm:$0xff] %vm280_vm0, %v3463_v38  ;;  %300 = vst.msk [vmem:[%s3850_s5 + $0x98] sm:$0xff] %vm280_vm0, %v3463_v38 }
  0x9b   : > { %301 = vst.msk [vmem:[%s3850_s5 + $0xa0] sm:$0xff] %vm280_vm0, %v3463_v38  ;;  %302 = vst.msk [vmem:[%s3850_s5 + $0xa8] sm:$0xff] %vm280_vm0, %v3463_v38 }
  0x9c   : > { %303 = vst.msk [vmem:[%s3850_s5 + $0xb0] sm:$0xff] %vm280_vm0, %v3463_v38  ;;  %304 = vst.msk [vmem:[%s3850_s5 + $0xb8] sm:$0xff] %vm280_vm0, %v3463_v38 }
  0x9d   : > { %305 = vst.msk [vmem:[%s3850_s5 + $0xc0] sm:$0xff] %vm280_vm0, %v3463_v38  ;;  %306 = vst.msk [vmem:[%s3850_s5 + $0xc8] sm:$0xff] %vm280_vm0, %v3463_v38 }
  0x9e   : > { %307 = vst.msk [vmem:[%s3850_s5 + $0xd0] sm:$0xff] %vm280_vm0, %v3463_v38  ;;  %308 = vst.msk [vmem:[%s3850_s5 + $0xd8] sm:$0xff] %vm280_vm0, %v3463_v38 }
  0x9f   : > { %309 = vst.msk [vmem:[%s3850_s5 + $0xe0] sm:$0xff] %vm280_vm0, %v3463_v38  ;;  %310 = vst.msk [vmem:[%s3850_s5 + $0xe8] sm:$0xff] %vm280_vm0, %v3463_v38 }
  0xa0   : > { %1778 = vmatmul.mubr.bf16.gmra.mrb[60].mxu0 %v2827_v2  ;;  %v2767_v2 = vcombine.low %v403_v54, %v407_v55  ;;  %311 = vst.msk [vmem:[%s3850_s5 + $0xf0] sm:$0xff] %vm280_vm0, %v3463_v38  ;;  %312 = vst.msk [vmem:[%s3850_s5 + $0xf8] sm:$0xff] %vm280_vm0, %v3463_v38  ;;  %v455_v54 = vld [vmem:[%s3606_s14 + $0x370] sm:$0xff] }
  0xa1   : > { %1939 = vmatmul.mubr.bf16.gmra.mrb[60].mxu1 %v2829_v3  ;;  %1979 = vmatprep.mubr.bf16.mxu0 %v2712_v4  ;;  %v2769_v3 = vcombine.low %v404_v56, %v408_v57  ;;  %v2776_v4 = vcombine.high %v411_v62, %v415_v63  ;;  %v452_v56 = vld [vmem:[%s3606_s14 + $0x358] sm:$0xff] }
  0xa2   : > { %2140 = vmatprep.mubr.bf16.mxu1 %v2714_v5  ;;  %v2778_v5 = vcombine.high %v412_v0, %v416_v1  ;;  %v456_v57 = vld [vmem:[%s3606_s14 + $0x378] sm:$0xff] }
  0xa8   : > { %1980 = vmatmul.mubr.bf16.vlgmr.msra.gmra.mrb[64].mxu0 %v2711_v10  ;;  %v2775_v10 = vcombine.low %v411_v62, %v415_v63 }
  0xa9   : > { %2141 = vmatmul.mubr.bf16.vlgmr.msra.gmra.mrb[64].mxu1 %v2713_v11  ;;  %1987 = vmatprep.mubr.bf16.mxu0 %v2720_v12  ;;  %v2777_v11 = vcombine.low %v412_v0, %v416_v1  ;;  %v2784_v12 = vcombine.high %v419_v6, %v423_v7 }
  0xaa   : > { %2148 = vmatprep.mubr.bf16.mxu1 %v2722_v13  ;;  %v2786_v13 = vcombine.high %v420_v8, %v424_v9 }
  0xb0   : > { %1988 = vmatmul.mubr.bf16.gmra.mrb[68].mxu0 %v2719_v18  ;;  %v2783_v18 = vcombine.low %v419_v6, %v423_v7 }
  0xb1   : > { %2149 = vmatmul.mubr.bf16.gmra.mrb[68].mxu1 %v2721_v19  ;;  %1995 = vmatprep.mubr.bf16.mxu0 %v2728_v20  ;;  %v2785_v19 = vcombine.low %v420_v8, %v424_v9  ;;  %v2792_v20 = vcombine.high %v427_v14, %v431_v15 }
  0xb2   : > { %2156 = vmatprep.mubr.bf16.mxu1 %v2730_v21  ;;  %v2794_v21 = vcombine.high %v428_v16, %v432_v17 }
  0xb8   : > { %1996 = vmatmul.mubr.bf16.gmra.mrb[72].mxu0 %v2727_v26  ;;  %v2791_v26 = vcombine.low %v427_v14, %v431_v15  ;;  %v460_v14 = vld [vmem:[%s3606_s14 + $0x398] sm:$0xff] }
  0xb9   : > { %2157 = vmatmul.mubr.bf16.gmra.mrb[72].mxu1 %v2729_v27  ;;  %2003 = vmatprep.mubr.bf16.mxu0 %v2736_v28  ;;  %v2793_v27 = vcombine.low %v428_v16, %v432_v17  ;;  %v2800_v28 = vcombine.high %v3819_v22, %v3822_v23  ;;  %v464_v15 = vld [vmem:[%s3606_s14 + $0x3b8] sm:$0xff] }
  0xba   : > { %2164 = vmatprep.mubr.bf16.mxu1 %v2738_v29  ;;  %v2802_v29 = vcombine.high %v3825_v24, %v3828_v25 }
  0xc0   : > { %2004 = vmatmul.mubr.bf16.gmra.mrb[76].mxu0 %v2735_v34  ;;  %v3845_v34 = vld [vmem:[%s3606_s14 + $0x338] sm:$0xff] }
  0xc1   : > { %2165 = vmatmul.mubr.bf16.gmra.mrb[76].mxu1 %v2737_v35  ;;  %2011 = vmatprep.mubr.bf16.mxu0 %v2744_v36  ;;  %v2810_v47 = vcombine.high %v3842_v33, %v3845_v34  ;;  %v2809_v0 = vcombine.low %v3842_v33, %v3845_v34  ;;  %v467_v33 = vld [vmem:[%s3606_s14 + $0x3d0] sm:$0xff] }
  0xc2   : > { %2172 = vmatprep.mubr.bf16.mxu1 %v2746_v37  ;;  %v2799_v37 = vcombine.low %v3819_v22, %v3822_v23  ;;  %v2817_v22 = vcombine.low %v452_v56, %v456_v57  ;;  %v471_v34 = vld [vmem:[%s3606_s14 + $0x3f0] sm:$0xff] }
  0xc8   : > { %2012 = vmatmul.mubr.bf16.gmra.mrb[80].mxu0 %v2743_v42  ;;  %v2801_v42 = vcombine.low %v3825_v24, %v3828_v25 }
  0xc9   : > { %2173 = vmatmul.mubr.bf16.gmra.mrb[80].mxu1 %v2745_v43  ;;  %2019 = vmatprep.mubr.bf16.mxu0 %v2752_v44  ;;  %v2808_v43 = vcombine.high %v3836_v30, %v3839_v31 }
  0xca   : > { %2180 = vmatprep.mubr.bf16.mxu1 %v2754_v45 }
  0xd0   : > { %2020 = vmatmul.mubr.bf16.gmra.mrb[84].mxu0 %v2751_v50 }
  0xd1   : > { %2181 = vmatmul.mubr.bf16.gmra.mrb[84].mxu1 %v2753_v51  ;;  %2027 = vmatprep.mubr.bf16.mxu0 %v2760_v52 }
  0xd2   : > { %2188 = vmatprep.mubr.bf16.mxu1 %v2762_v53  ;;  %v451_v53 = vld [vmem:[%s3606_s14 + $0x350] sm:$0xff] }
  0xd3   : > { %v2816_v1 = vcombine.high %v451_v53, %v455_v54 }
  0xd8   : > { %2028 = vmatmul.mubr.bf16.gmra.mrb[88].mxu0 %v2759_v58 }
  0xd9   : > { %2189 = vmatmul.mubr.bf16.gmra.mrb[88].mxu1 %v2761_v59  ;;  %2035 = vmatprep.mubr.bf16.mxu0 %v2768_v60  ;;  %v2807_v60 = vcombine.low %v3836_v30, %v3839_v31 }
  0xda   : > { %2196 = vmatprep.mubr.bf16.mxu1 %v2770_v61 }
  0xe0   : > { %2036 = vmatmul.mubr.bf16.gmra.mrb[92].mxu0 %v2767_v2 }
  0xe1   : > { %2197 = vmatmul.mubr.bf16.gmra.mrb[92].mxu1 %v2769_v3  ;;  %2043 = vmatprep.mubr.bf16.mxu0 %v2776_v4 }
  0xe2   : > { %2204 = vmatprep.mubr.bf16.mxu1 %v2778_v5  ;;  %v2818_v5 = vcombine.high %v452_v56, %v456_v57 }
  0xe8   : > { %2044 = vmatmul.mubr.bf16.gmra.mrb[96].mxu0 %v2775_v10 }
  0xe9   : > { %2205 = vmatmul.mubr.bf16.gmra.mrb[96].mxu1 %v2777_v11  ;;  %2051 = vmatprep.mubr.bf16.mxu0 %v2784_v12  ;;  %v459_v11 = vld [vmem:[%s3606_s14 + $0x390] sm:$0xff] }
  0xea   : > { %2212 = vmatprep.mubr.bf16.mxu1 %v2786_v13  ;;  %v463_v12 = vld [vmem:[%s3606_s14 + $0x3b0] sm:$0xff] }
  0xeb   : > { %v2824_v23 = vcombine.high %v459_v11, %v463_v12 }
  0xf0   : > { %2052 = vmatmul.mubr.bf16.gmra.mrb[100].mxu0 %v2783_v18  ;;  %v2815_v18 = vcombine.low %v451_v53, %v455_v54 }
  0xf1   : > { %2213 = vmatmul.mubr.bf16.gmra.mrb[100].mxu1 %v2785_v19  ;;  %2059 = vmatprep.mubr.bf16.mxu0 %v2792_v20 }
  0xf2   : > { %2220 = vmatprep.mubr.bf16.mxu1 %v2794_v21 }
  0xf8   : > { %2060 = vmatmul.mubr.bf16.gmra.mrb[104].mxu0 %v2791_v26 }
  0xf9   : > { %2221 = vmatmul.mubr.bf16.gmra.mrb[104].mxu1 %v2793_v27  ;;  %2067 = vmatprep.mubr.bf16.mxu0 %v2800_v28  ;;  %v2826_v27 = vcombine.high %v460_v14, %v464_v15 }
  0xfa   : > { %2228 = vmatprep.mubr.bf16.mxu1 %v2802_v29 }
  0xfb   : > { %v2918_v32 = vpop.f32.mrb[0].mxu0 }
  0xfc   : > { %v3030_v35 = vpop.f32.mrb[0].mxu1  ;;  %v2919_v36 = vpop.f32.mrb[1].mxu0 }
  0xfd   : > { %v2920_v39 = vadd.f32 %v2919_v36, %v2918_v32  ;;  %v3031_v40 = vpop.f32.mrb[1].mxu1  ;;  %v2921_v41 = vpop.f32.mrb[2].mxu0  ;;  %v468_v36 = vld [vmem:[%s3606_s14 + $0x3d8] sm:$0xff] }
  0xfe   : > { %v3032_v44 = vadd.f32 %v3031_v40, %v3030_v35  ;;  %v3033_v45 = vpop.f32.mrb[2].mxu1  ;;  %v2922_v46 = vpop.f32.mrb[3].mxu0  ;;  %v2823_v40 = vcombine.low %v459_v11, %v463_v12 }
  0xff   : > { %v2923_v48 = vadd.f32 %v2922_v46, %v2921_v41  ;;  %v3034_v49 = vpop.f32.mrb[3].mxu1 }
 0x100   : > { %v3924_v50 = vadd.f32 %v3032_v44, %v2920_v39  ;;  %v3035_v51 = vadd.f32 %v3034_v49, %v3033_v45  ;;  %2068 = vmatmul.mubr.bf16.gmra.mrb[108].mxu0 %v2799_v37  ;;  %v472_v37 = vld [vmem:[%s3606_s14 + $0x3f8] sm:$0xff]  ;;  %v2825_v44 = vcombine.low %v460_v14, %v464_v15  ;;  %v2832_v45 = vcombine.high %v467_v33, %v471_v34 }
 0x101   : > { %2229 = vmatmul.mubr.bf16.gmra.mrb[108].mxu1 %v2801_v42  ;;  %2075 = vmatprep.mubr.bf16.mxu0 %v2808_v43  ;;  %v2834_v49 = vcombine.high %v468_v36, %v472_v37 }
 0x102   : > { %v3926_v52 = vadd.f32 %v3035_v51, %v2923_v48  ;;  %2236 = vmatprep.mubr.bf16.mxu1 %v2810_v47 }
 0x103   : > { %v2924_v55 = vpop.f32.mrb[4].mxu0 }
 0x104   : > { %v3036_v58 = vpop.f32.mrb[4].mxu1  ;;  %v2925_v59 = vpop.f32.mrb[5].mxu0 }
 0x105   : > { %v2926_v61 = vadd.f32 %v2925_v59, %v2924_v55  ;;  %v3037_v62 = vpop.f32.mrb[5].mxu1  ;;  %v2927_v63 = vpop.f32.mrb[6].mxu0 }
 0x106   : > { %v3038_v2 = vadd.f32 %v3037_v62, %v3036_v58  ;;  %v3039_v3 = vpop.f32.mrb[6].mxu1  ;;  %v2928_v4 = vpop.f32.mrb[7].mxu0 }
 0x107   : > { %v2929_v6 = vadd.f32 %v2928_v4, %v2927_v63  ;;  %v3040_v7 = vpop.f32.mrb[7].mxu1 }
 0x108   : > { %v3936_v8 = vadd.f32 %v3038_v2, %v2926_v61  ;;  %v3041_v9 = vadd.f32 %v3040_v7, %v3039_v3  ;;  %2076 = vmatmul.mubr.bf16.gmra.mrb[112].mxu0 %v2807_v60  ;;  %v2831_v60 = vcombine.low %v467_v33, %v471_v34 }
 0x109   : > { %2237 = vmatmul.mubr.bf16.gmra.mrb[112].mxu1 %v2809_v0  ;;  %2083 = vmatprep.mubr.bf16.mxu0 %v2816_v1  ;;  %v2833_v0 = vcombine.low %v468_v36, %v472_v37 }
 0x10a   : > { %v3938_v10 = vadd.f32 %v3041_v9, %v2929_v6  ;;  %2244 = vmatprep.mubr.bf16.mxu1 %v2818_v5 }
 0x10b   : > { %v2930_v13 = vpop.f32.mrb[8].mxu0 }
 0x10c   : > { %v3042_v16 = vpop.f32.mrb[8].mxu1  ;;  %v2931_v17 = vpop.f32.mrb[9].mxu0 }
 0x10d   : > { %v2932_v19 = vadd.f32 %v2931_v17, %v2930_v13  ;;  %v3043_v20 = vpop.f32.mrb[9].mxu1  ;;  %v2933_v21 = vpop.f32.mrb[10].mxu0 }
 0x10e   : > { %v3044_v24 = vadd.f32 %v3043_v20, %v3042_v16  ;;  %v3045_v25 = vpop.f32.mrb[10].mxu1  ;;  %v2934_v26 = vpop.f32.mrb[11].mxu0 }
 0x10f   : > { %v2935_v28 = vadd.f32 %v2934_v26, %v2933_v21  ;;  %v3046_v29 = vpop.f32.mrb[11].mxu1 }
 0x110   : > { %v3944_v30 = vadd.f32 %v3044_v24, %v2932_v19  ;;  %v3047_v31 = vadd.f32 %v3046_v29, %v3045_v25  ;;  %2084 = vmatmul.mubr.bf16.gmra.mrb[116].mxu0 %v2815_v18 }
 0x111   : > { %2245 = vmatmul.mubr.bf16.gmra.mrb[116].mxu1 %v2817_v22  ;;  %2091 = vmatprep.mubr.bf16.mxu0 %v2824_v23 }
 0x112   : > { %v3946_v32 = vadd.f32 %v3047_v31, %v2935_v28  ;;  %2252 = vmatprep.mubr.bf16.mxu1 %v2826_v27 }
 0x113   : > { %v2936_v35 = vpop.f32.mrb[12].mxu0 }
 0x114   : > { %v3048_v38 = vpop.f32.mrb[12].mxu1  ;;  %v2937_v39 = vpop.f32.mrb[13].mxu0 }
 0x115   : > { %v2938_v41 = vadd.f32 %v2937_v39, %v2936_v35  ;;  %v3049_v42 = vpop.f32.mrb[13].mxu1  ;;  %v2939_v43 = vpop.f32.mrb[14].mxu0 }
 0x116   : > { %v3050_v46 = vadd.f32 %v3049_v42, %v3048_v38  ;;  %v3051_v47 = vpop.f32.mrb[14].mxu1  ;;  %v2940_v48 = vpop.f32.mrb[15].mxu0 }
 0x117   : > { %v2941_v51 = vadd.f32 %v2940_v48, %v2939_v43  ;;  %v3052_v53 = vpop.f32.mrb[15].mxu1 }
 0x118   : > { %v3952_v54 = vadd.f32 %v3050_v46, %v2938_v41  ;;  %v3053_v55 = vadd.f32 %v3052_v53, %v3051_v47  ;;  %2092 = vmatmul.mubr.bf16.gmra.mrb[120].mxu0 %v2823_v40 }
 0x119   : > { %2253 = vmatmul.mubr.bf16.gmra.mrb[120].mxu1 %v2825_v44  ;;  %2099 = vmatprep.mubr.bf16.mxu0 %v2832_v45 }
 0x11a   : > { %v3954_v56 = vadd.f32 %v3053_v55, %v2941_v51  ;;  %2260 = vmatprep.mubr.bf16.mxu1 %v2834_v49 }
 0x11b   : > { %v2942_v57 = vpop.f32.mrb[16].mxu0 }
 0x11c   : > { %v3054_v58 = vpop.f32.mrb[16].mxu1  ;;  %v2943_v59 = vpop.f32.mrb[17].mxu0 }
 0x11d   : > { %v2944_v61 = vadd.f32 %v2943_v59, %v2942_v57  ;;  %v3055_v62 = vpop.f32.mrb[17].mxu1  ;;  %v2945_v63 = vpop.f32.mrb[18].mxu0 }
 0x11e   : > { %v3056_v1 = vadd.f32 %v3055_v62, %v3054_v58  ;;  %v3057_v2 = vpop.f32.mrb[18].mxu1  ;;  %v2946_v3 = vpop.f32.mrb[19].mxu0 }
 0x11f   : > { %v2947_v4 = vadd.f32 %v2946_v3, %v2945_v63  ;;  %v3058_v5 = vpop.f32.mrb[19].mxu1 }
 0x120   : > { %v3956_v6 = vadd.f32 %v3056_v1, %v2944_v61  ;;  %v3059_v7 = vadd.f32 %v3058_v5, %v3057_v2  ;;  %2100 = vmatmul.mubr.bf16.gmra.mrb[124].mxu0 %v2831_v60 }
 0x121   : > { %2261 = vmatmul.mubr.bf16.gmra.mrb[124].mxu1 %v2833_v0 }
 0x122   : > { %v3958_v9 = vadd.f32 %v3059_v7, %v2947_v4 }
 0x123   : > { %v2948_v11 = vpop.f32.mrb[20].mxu0 }
 0x124   : > { %v3060_v12 = vpop.f32.mrb[20].mxu1  ;;  %v2949_v13 = vpop.f32.mrb[21].mxu0 }
 0x125   : > { %v2950_v14 = vadd.f32 %v2949_v13, %v2948_v11  ;;  %v3061_v15 = vpop.f32.mrb[21].mxu1  ;;  %v2951_v16 = vpop.f32.mrb[22].mxu0 }
 0x126   : > { %v3062_v17 = vadd.f32 %v3061_v15, %v3060_v12  ;;  %v3063_v18 = vpop.f32.mrb[22].mxu1  ;;  %v2952_v19 = vpop.f32.mrb[23].mxu0 }
 0x127   : > { %v2953_v20 = vadd.f32 %v2952_v19, %v2951_v16  ;;  %v3064_v21 = vpop.f32.mrb[23].mxu1 }
 0x128   : > { %v3960_v22 = vadd.f32 %v3062_v17, %v2950_v14  ;;  %v3065_v23 = vadd.f32 %v3064_v21, %v3063_v18 }
 0x12a   : > { %v3962_v24 = vadd.f32 %v3065_v23, %v2953_v20 }
 0x12b   : > { %v2954_v25 = vpop.f32.mrb[24].mxu0 }
 0x12c   : > { %v3066_v26 = vpop.f32.mrb[24].mxu1  ;;  %v2955_v27 = vpop.f32.mrb[25].mxu0 }
 0x12d   : > { %v2956_v28 = vadd.f32 %v2955_v27, %v2954_v25  ;;  %v3067_v29 = vpop.f32.mrb[25].mxu1  ;;  %v2957_v31 = vpop.f32.mrb[26].mxu0 }
 0x12e   : > { %v3068_v33 = vadd.f32 %v3067_v29, %v3066_v26  ;;  %v3069_v34 = vpop.f32.mrb[26].mxu1  ;;  %v2958_v35 = vpop.f32.mrb[27].mxu0 }
 0x12f   : > { %v2959_v36 = vadd.f32 %v2958_v35, %v2957_v31  ;;  %v3070_v37 = vpop.f32.mrb[27].mxu1 }
 0x130   : > { %v3964_v38 = vadd.f32 %v3068_v33, %v2956_v28  ;;  %v3071_v39 = vadd.f32 %v3070_v37, %v3069_v34 }
 0x132   : > { %v3966_v40 = vadd.f32 %v3071_v39, %v2959_v36 }
 0x133   : > { %v2960_v41 = vpop.f32.mrb[28].mxu0 }
 0x134   : > { %v3072_v42 = vpop.f32.mrb[28].mxu1  ;;  %v2961_v43 = vpop.f32.mrb[29].mxu0 }
 0x135   : > { %v2962_v44 = vadd.f32 %v2961_v43, %v2960_v41  ;;  %v3073_v45 = vpop.f32.mrb[29].mxu1  ;;  %v2963_v46 = vpop.f32.mrb[30].mxu0 }
 0x136   : > { %v3074_v47 = vadd.f32 %v3073_v45, %v3072_v42  ;;  %v3075_v48 = vpop.f32.mrb[30].mxu1  ;;  %v2964_v49 = vpop.f32.mrb[31].mxu0 }
 0x137   : > { %v2965_v51 = vadd.f32 %v2964_v49, %v2963_v46  ;;  %v3076_v53 = vpop.f32.mrb[31].mxu1 }
 0x138   : > { %v3968_v55 = vadd.f32 %v3074_v47, %v2962_v44  ;;  %v3077_v57 = vadd.f32 %v3076_v53, %v3075_v48 }
 0x13a   : > { %v3970_v58 = vadd.f32 %v3077_v57, %v2965_v51 }
 0x13b   : > { %v2966_v59 = vpop.f32.mrb[32].mxu0 }
 0x13c   : > { %v3078_v60 = vpop.f32.mrb[32].mxu1  ;;  %v2967_v61 = vpop.f32.mrb[33].mxu0 }
 0x13d   : > { %v2968_v62 = vadd.f32 %v2967_v61, %v2966_v59  ;;  %v3079_v63 = vpop.f32.mrb[33].mxu1  ;;  %v2969_v0 = vpop.f32.mrb[34].mxu0 }
 0x13e   : > { %v3080_v1 = vadd.f32 %v3079_v63, %v3078_v60  ;;  %v3081_v2 = vpop.f32.mrb[34].mxu1  ;;  %v2970_v3 = vpop.f32.mrb[35].mxu0 }
 0x13f   : > { %v2971_v4 = vadd.f32 %v2970_v3, %v2969_v0  ;;  %v3082_v5 = vpop.f32.mrb[35].mxu1 }
 0x140   : > { %v3972_v7 = vadd.f32 %v3080_v1, %v2968_v62  ;;  %v3083_v11 = vadd.f32 %v3082_v5, %v3081_v2 }
 0x142   : > { %v3974_v12 = vadd.f32 %v3083_v11, %v2971_v4 }
 0x143   : > { %v2972_v13 = vpop.f32.mrb[36].mxu0 }
 0x144   : > { %v3084_v14 = vpop.f32.mrb[36].mxu1  ;;  %v2973_v15 = vpop.f32.mrb[37].mxu0 }
 0x145   : > { %v2974_v16 = vadd.f32 %v2973_v15, %v2972_v13  ;;  %v3085_v17 = vpop.f32.mrb[37].mxu1  ;;  %v2975_v18 = vpop.f32.mrb[38].mxu0 }
 0x146   : > { %v3086_v19 = vadd.f32 %v3085_v17, %v3084_v14  ;;  %v3087_v20 = vpop.f32.mrb[38].mxu1  ;;  %v2976_v21 = vpop.f32.mrb[39].mxu0 }
 0x147   : > { %v2977_v23 = vadd.f32 %v2976_v21, %v2975_v18  ;;  %v3088_v25 = vpop.f32.mrb[39].mxu1 }
 0x148   : > { %v3976_v26 = vadd.f32 %v3086_v19, %v2974_v16  ;;  %v3089_v27 = vadd.f32 %v3088_v25, %v3087_v20 }
 0x14a   : > { %v3978_v28 = vadd.f32 %v3089_v27, %v2977_v23 }
 0x14b   : > { %v2978_v29 = vpop.f32.mrb[40].mxu0 }
 0x14c   : > { %v3090_v31 = vpop.f32.mrb[40].mxu1  ;;  %v2979_v33 = vpop.f32.mrb[41].mxu0 }
 0x14d   : > { %v2980_v34 = vadd.f32 %v2979_v33, %v2978_v29  ;;  %v3091_v35 = vpop.f32.mrb[41].mxu1  ;;  %v2981_v36 = vpop.f32.mrb[42].mxu0 }
 0x14e   : > { %v3092_v37 = vadd.f32 %v3091_v35, %v3090_v31  ;;  %v3093_v39 = vpop.f32.mrb[42].mxu1  ;;  %v2982_v41 = vpop.f32.mrb[43].mxu0 }
 0x14f   : > { %v2983_v42 = vadd.f32 %v2982_v41, %v2981_v36  ;;  %v3094_v43 = vpop.f32.mrb[43].mxu1 }
 0x150   : > { %v3980_v44 = vadd.f32 %v3092_v37, %v2980_v34  ;;  %v3095_v45 = vadd.f32 %v3094_v43, %v3093_v39 }
 0x152   : > { %v3982_v46 = vadd.f32 %v3095_v45, %v2983_v42 }
 0x153   : > { %v2984_v47 = vpop.f32.mrb[44].mxu0 }
 0x154   : > { %v3096_v48 = vpop.f32.mrb[44].mxu1  ;;  %v2985_v49 = vpop.f32.mrb[45].mxu0 }
 0x155   : > { %v2986_v51 = vadd.f32 %v2985_v49, %v2984_v47  ;;  %v3097_v53 = vpop.f32.mrb[45].mxu1  ;;  %v2987_v57 = vpop.f32.mrb[46].mxu0 }
 0x156   : > { %v3098_v59 = vadd.f32 %v3097_v53, %v3096_v48  ;;  %v3099_v60 = vpop.f32.mrb[46].mxu1  ;;  %v2988_v61 = vpop.f32.mrb[47].mxu0 }
 0x157   : > { %v2989_v62 = vadd.f32 %v2988_v61, %v2987_v57  ;;  %v3100_v63 = vpop.f32.mrb[47].mxu1 }
 0x158   : > { %v3984_v0 = vadd.f32 %v3098_v59, %v2986_v51  ;;  %v3101_v1 = vadd.f32 %v3100_v63, %v3099_v60 }
 0x15a   : > { %v3986_v2 = vadd.f32 %v3101_v1, %v2989_v62 }
 0x15b   : > { %v2990_v3 = vpop.f32.mrb[48].mxu0 }
 0x15c   : > { %v3102_v4 = vpop.f32.mrb[48].mxu1  ;;  %v2991_v5 = vpop.f32.mrb[49].mxu0 }
 0x15d   : > { %v2992_v11 = vadd.f32 %v2991_v5, %v2990_v3  ;;  %v3103_v13 = vpop.f32.mrb[49].mxu1  ;;  %v2993_v14 = vpop.f32.mrb[50].mxu0 }
 0x15e   : > { %v3104_v15 = vadd.f32 %v3103_v13, %v3102_v4  ;;  %v3105_v16 = vpop.f32.mrb[50].mxu1  ;;  %v2994_v17 = vpop.f32.mrb[51].mxu0 }
 0x15f   : > { %v2995_v18 = vadd.f32 %v2994_v17, %v2993_v14  ;;  %v3106_v19 = vpop.f32.mrb[51].mxu1 }
 0x160   : > { %v3988_v20 = vadd.f32 %v3104_v15, %v2992_v11  ;;  %v3107_v21 = vadd.f32 %v3106_v19, %v3105_v16 }
 0x162   : > { %v3990_v23 = vadd.f32 %v3107_v21, %v2995_v18 }
 0x163   : > { %v2996_v25 = vpop.f32.mrb[52].mxu0 }
 0x164   : > { %v3108_v27 = vpop.f32.mrb[52].mxu1  ;;  %v2997_v29 = vpop.f32.mrb[53].mxu0 }
 0x165   : > { %v2998_v31 = vadd.f32 %v2997_v29, %v2996_v25  ;;  %v3109_v33 = vpop.f32.mrb[53].mxu1  ;;  %v2999_v34 = vpop.f32.mrb[54].mxu0 }
 0x166   : > { %v3110_v35 = vadd.f32 %v3109_v33, %v3108_v27  ;;  %v3111_v36 = vpop.f32.mrb[54].mxu1  ;;  %v3000_v37 = vpop.f32.mrb[55].mxu0 }
 0x167   : > { %v3001_v39 = vadd.f32 %v3000_v37, %v2999_v34  ;;  %v3112_v41 = vpop.f32.mrb[55].mxu1 }
 0x168   : > { %v3992_v42 = vadd.f32 %v3110_v35, %v2998_v31  ;;  %v3113_v43 = vadd.f32 %v3112_v41, %v3111_v36 }
 0x16a   : > { %v3994_v45 = vadd.f32 %v3113_v43, %v3001_v39 }
 0x16b   : > { %v3002_v47 = vpop.f32.mrb[56].mxu0 }
 0x16c   : > { %v3114_v48 = vpop.f32.mrb[56].mxu1  ;;  %v3003_v49 = vpop.f32.mrb[57].mxu0 }
 0x16d   : > { %v3004_v51 = vadd.f32 %v3003_v49, %v3002_v47  ;;  %v3115_v53 = vpop.f32.mrb[57].mxu1  ;;  %v3005_v57 = vpop.f32.mrb[58].mxu0 }
 0x16e   : > { %v3116_v59 = vadd.f32 %v3115_v53, %v3114_v48  ;;  %v3117_v60 = vpop.f32.mrb[58].mxu1  ;;  %v3006_v61 = vpop.f32.mrb[59].mxu0  ;;  %v313_v53 = vld [vmem:[%s3850_s5] sm:$0xff] }
 0x16f   : > { %v3007_v62 = vadd.f32 %v3006_v61, %v3005_v57  ;;  %v3118_v63 = vpop.f32.mrb[59].mxu1  ;;  %v314_v61 = vld [vmem:[%s3850_s5 + $0x8] sm:$0xff] }
 0x170   : > { %v3996_v1 = vadd.f32 %v3116_v59, %v3004_v51  ;;  %v3119_v3 = vadd.f32 %v3118_v63, %v3117_v60 }
 0x172   : > { %v3998_v4 = vadd.f32 %v3119_v3, %v3007_v62 }
 0x173   : > { %v3008_v5 = vpop.f32.mrb[60].mxu0 }
 0x174   : > { %v3120_v11 = vpop.f32.mrb[60].mxu1  ;;  %v3009_v13 = vpop.f32.mrb[61].mxu0 }
 0x175   : > { %v3010_v14 = vadd.f32 %v3009_v13, %v3008_v5  ;;  %v3121_v15 = vpop.f32.mrb[61].mxu1  ;;  %v3011_v16 = vpop.f32.mrb[62].mxu0 }
 0x176   : > { %v3122_v17 = vadd.f32 %v3121_v15, %v3120_v11  ;;  %v3123_v18 = vpop.f32.mrb[62].mxu1  ;;  %v3012_v19 = vpop.f32.mrb[63].mxu0 }
 0x177   : > { %v3013_v21 = vadd.f32 %v3012_v19, %v3011_v16  ;;  %v3124_v25 = vpop.f32.mrb[63].mxu1 }
 0x178   : > { %v4000_v27 = vadd.f32 %v3122_v17, %v3010_v14  ;;  %v3125_v29 = vadd.f32 %v3124_v25, %v3123_v18  ;;  %v315_v25 = vld [vmem:[%s3850_s5 + $0x10] sm:$0xff] }
 0x17a   : > { %v4002_v31 = vadd.f32 %v3125_v29, %v3013_v21 }
 0x17b   : > { %v3142_v33 = vpop.f32.mrb[64].mxu0 }
 0x17c   : > { %v3254_v34 = vpop.f32.mrb[64].mxu1  ;;  %v3143_v35 = vpop.f32.mrb[65].mxu0 }
 0x17d   : > { %v3144_v36 = vadd.f32 %v3143_v35, %v3142_v33  ;;  %v3255_v37 = vpop.f32.mrb[65].mxu1  ;;  %v3145_v39 = vpop.f32.mrb[66].mxu0  ;;  %v316_v35 = vld [vmem:[%s3850_s5 + $0x18] sm:$0xff] }
 0x17e   : > { %v3256_v41 = vadd.f32 %v3255_v37, %v3254_v34  ;;  %v3257_v43 = vpop.f32.mrb[66].mxu1  ;;  %v3146_v47 = vpop.f32.mrb[67].mxu0 }
 0x17f   : > { %v1982_v48 = vadd.f32 %v3144_v36, %v3924_v50  ;;  %v3147_v49 = vadd.f32 %v3146_v47, %v3145_v39  ;;  %v3258_v51 = vpop.f32.mrb[67].mxu1 }
 0x180   : > { %v3259_v57 = vadd.f32 %v3258_v51, %v3257_v43 }
 0x181   : > { %v2143_v59 = vadd.f32 %v3256_v41, %v1982_v48  ;;  %v1985_v60 = vadd.f32 %v3147_v49, %v3926_v52 }
 0x183   : > { %v2269_v62 = vadd.f32 %v2143_v59, %v313_v53  ;;  %v2146_v63 = vadd.f32 %v3259_v57, %v1985_v60  ;;  %v3148_v3 = vpop.f32.mrb[68].mxu0  ;;  %v317_v60 = vld [vmem:[%s3850_s5 + $0x20] sm:$0xff] }
 0x184   : > { %v3260_v5 = vpop.f32.mrb[68].mxu1  ;;  %v3149_v11 = vpop.f32.mrb[69].mxu0 }
 0x185   : > { %2302 = vst.msk [vmem:[%s3850_s5] sm:$0xff] %vm280_vm0, %v2269_v62  ;;  %v2270_v13 = vadd.f32 %v2146_v63, %v314_v61  ;;  %v3150_v50 = vadd.f32 %v3149_v11, %v3148_v3  ;;  %v3261_v14 = vpop.f32.mrb[69].mxu1  ;;  %v3151_v15 = vpop.f32.mrb[70].mxu0  ;;  %v318_v11 = vld [vmem:[%s3850_s5 + $0x28] sm:$0xff] }
 0x186   : > { %v3262_v16 = vadd.f32 %v3261_v14, %v3260_v5  ;;  %v3263_v17 = vpop.f32.mrb[70].mxu1  ;;  %v3152_v18 = vpop.f32.mrb[71].mxu0 }
 0x187   : > { %2303 = vst.msk [vmem:[%s3850_s5 + $0x8] sm:$0xff] %vm280_vm0, %v2270_v13  ;;  %v1990_v52 = vadd.f32 %v3150_v50, %v3936_v8  ;;  %v3153_v19 = vadd.f32 %v3152_v18, %v3151_v15  ;;  %v3264_v21 = vpop.f32.mrb[71].mxu1 }
 0x188   : > { %v3265_v29 = vadd.f32 %v3264_v21, %v3263_v17 }
 0x189   : > { %v2151_v33 = vadd.f32 %v3262_v16, %v1990_v52  ;;  %v1993_v34 = vadd.f32 %v3153_v19, %v3938_v10 }
 0x18b   : > { %v2271_v36 = vadd.f32 %v2151_v33, %v315_v25  ;;  %v2154_v37 = vadd.f32 %v3265_v29, %v1993_v34  ;;  %v3154_v39 = vpop.f32.mrb[72].mxu0  ;;  %v319_v29 = vld [vmem:[%s3850_s5 + $0x30] sm:$0xff] }
 0x18c   : > { %v3266_v41 = vpop.f32.mrb[72].mxu1  ;;  %v3155_v43 = vpop.f32.mrb[73].mxu0 }
 0x18d   : > { %2304 = vst.msk [vmem:[%s3850_s5 + $0x10] sm:$0xff] %vm280_vm0, %v2271_v36  ;;  %v2272_v47 = vadd.f32 %v2154_v37, %v316_v35  ;;  %v3156_v8 = vadd.f32 %v3155_v43, %v3154_v39  ;;  %v3267_v48 = vpop.f32.mrb[73].mxu1  ;;  %v3157_v49 = vpop.f32.mrb[74].mxu0  ;;  %v320_v39 = vld [vmem:[%s3850_s5 + $0x38] sm:$0xff] }
 0x18e   : > { %v3268_v51 = vadd.f32 %v3267_v48, %v3266_v41  ;;  %v3269_v53 = vpop.f32.mrb[74].mxu1  ;;  %v3158_v57 = vpop.f32.mrb[75].mxu0 }
 0x18f   : > { %2305 = vst.msk [vmem:[%s3850_s5 + $0x18] sm:$0xff] %vm280_vm0, %v2272_v47  ;;  %v1998_v10 = vadd.f32 %v3156_v8, %v3944_v30  ;;  %v3270_v59 = vpop.f32.mrb[75].mxu1  ;;  %v3159_v61 = vadd.f32 %v3158_v57, %v3157_v49 }
 0x190   : > { %v3271_v62 = vadd.f32 %v3270_v59, %v3269_v53 }
 0x191   : > { %v2159_v63 = vadd.f32 %v3268_v51, %v1998_v10  ;;  %v2001_v3 = vadd.f32 %v3159_v61, %v3946_v32  ;;  %v321_v61 = vld [vmem:[%s3850_s5 + $0x40] sm:$0xff] }
 0x193   : > { %v2273_v5 = vadd.f32 %v2159_v63, %v317_v60  ;;  %v3160_v13 = vpop.f32.mrb[76].mxu0  ;;  %v2162_v50 = vadd.f32 %v3271_v62, %v2001_v3 }
 0x194   : > { %v3272_v14 = vpop.f32.mrb[76].mxu1  ;;  %v3161_v15 = vpop.f32.mrb[77].mxu0 }
 0x195   : > { %2306 = vst.msk [vmem:[%s3850_s5 + $0x20] sm:$0xff] %vm280_vm0, %v2273_v5  ;;  %v3162_v16 = vadd.f32 %v3161_v15, %v3160_v13  ;;  %v3273_v30 = vpop.f32.mrb[77].mxu1  ;;  %v3163_v17 = vpop.f32.mrb[78].mxu0  ;;  %v2274_v18 = vadd.f32 %v2162_v50, %v318_v11  ;;  %v322_v5 = vld [vmem:[%s3850_s5 + $0x48] sm:$0xff] }
 0x196   : > { %v3274_v52 = vadd.f32 %v3273_v30, %v3272_v14  ;;  %v3275_v19 = vpop.f32.mrb[78].mxu1  ;;  %v3164_v21 = vpop.f32.mrb[79].mxu0 }
 0x197   : > { %v2006_v32 = vadd.f32 %v3162_v16, %v3952_v54  ;;  %v3276_v25 = vpop.f32.mrb[79].mxu1  ;;  %2307 = vst.msk [vmem:[%s3850_s5 + $0x28] sm:$0xff] %vm280_vm0, %v2274_v18  ;;  %v3165_v33 = vadd.f32 %v3164_v21, %v3163_v17 }
 0x198   : > { %v3277_v34 = vadd.f32 %v3276_v25, %v3275_v19  ;;  %v2338_v25 = vld [vmem:[%s3850_s5 + $0x8] sm:$0xff] }
 0x199   : > { %v2167_v35 = vadd.f32 %v3274_v52, %v2006_v32  ;;  %v2009_v36 = vadd.f32 %v3165_v33, %v3954_v56 }
 0x19b   : > { %v2275_v37 = vadd.f32 %v2167_v35, %v319_v29  ;;  %v3166_v41 = vpop.f32.mrb[80].mxu0  ;;  %v2170_v43 = vadd.f32 %v3277_v34, %v2009_v36  ;;  %v323_v29 = vld [vmem:[%s3850_s5 + $0x50] sm:$0xff]  ;;  %v2337_v34 = vld [vmem:[%s3850_s5] sm:$0xff] }
 0x19c   : > { %v3278_v47 = vpop.f32.mrb[80].mxu1  ;;  %v3167_v8 = vpop.f32.mrb[81].mxu0 }
 0x19d   : > { %2308 = vst.msk [vmem:[%s3850_s5 + $0x30] sm:$0xff] %vm280_vm0, %v2275_v37  ;;  %v3168_v54 = vadd.f32 %v3167_v8, %v3166_v41  ;;  %v3279_v48 = vpop.f32.mrb[81].mxu1  ;;  %v3169_v49 = vpop.f32.mrb[82].mxu0  ;;  %v2276_v51 = vadd.f32 %v2170_v43, %v320_v39  ;;  %v2339_v37 = vld [vmem:[%s3850_s5 + $0x10] sm:$0xff]  ;;  %v324_v39 = vld [vmem:[%s3850_s5 + $0x58] sm:$0xff]  ;;  %v2439_v41 = vmul.f32 %v2338_v25, %v2338_v25 }
 0x19e   : > { %v3280_v53 = vadd.f32 %v3279_v48, %v3278_v47  ;;  %v3281_v57 = vpop.f32.mrb[82].mxu1  ;;  %v3170_v10 = vpop.f32.mrb[83].mxu0 }
 0x19f   : > { %v2014_v56 = vadd.f32 %v3168_v54, %v3956_v6  ;;  %v3171_v59 = vadd.f32 %v3170_v10, %v3169_v49  ;;  %v3282_v60 = vpop.f32.mrb[83].mxu1  ;;  %2309 = vst.msk [vmem:[%s3850_s5 + $0x38] sm:$0xff] %vm280_vm0, %v2276_v51  ;;  %v2438_v54 = vmul.f32 %v2337_v34, %v2337_v34  ;;  %v2370_v49 = vsel %vm280_vm0, %v2338_v25, 0.0  ;;  %v326_v25 = vld [vmem:[%s3850_s5 + $0x68] sm:$0xff] }
 0x1a0   : > { %v3283_v62 = vadd.f32 %v3282_v60, %v3281_v57  ;;  %v2440_v51 = vmul.f32 %v2339_v37, %v2339_v37 }
 0x1a1   : > { %v2175_v63 = vadd.f32 %v3280_v53, %v2014_v56  ;;  %v2017_v3 = vadd.f32 %v3171_v59, %v3958_v9  ;;  %v2340_v56 = vld [vmem:[%s3850_s5 + $0x18] sm:$0xff] }
 0x1a3   : > { %v2277_v11 = vadd.f32 %v2175_v63, %v321_v61  ;;  %v2178_v13 = vadd.f32 %v3283_v62, %v2017_v3  ;;  %v3172_v50 = vpop.f32.mrb[84].mxu0  ;;  %v2369_v62 = vsel %vm280_vm0, %v2337_v34, 0.0  ;;  %v2471_v63 = vsel %vm280_vm0, %v2439_v41, 0.0  ;;  %v2342_v34 = vld [vmem:[%s3850_s5 + $0x28] sm:$0xff] }
 0x1a4   : > { %v3284_v14 = vpop.f32.mrb[84].mxu1  ;;  %v3173_v15 = vpop.f32.mrb[85].mxu0  ;;  %v2372_v3 = vsel %vm280_vm0, %v2339_v37, 0.0 }
 0x1a5   : > { %2310 = vst.msk [vmem:[%s3850_s5 + $0x40] sm:$0xff] %vm280_vm0, %v2277_v11  ;;  %v2278_v6 = vadd.f32 %v2178_v13, %v322_v5  ;;  %v3174_v16 = vadd.f32 %v3173_v15, %v3172_v50  ;;  %v3285_v30 = vpop.f32.mrb[85].mxu1  ;;  %v3175_v17 = vpop.f32.mrb[86].mxu0  ;;  %v2371_v13 = vadd.f32 %v2370_v49, %v2369_v62  ;;  %v2341_v50 = vld [vmem:[%s3850_s5 + $0x20] sm:$0xff] }
 0x1a6   : > { %v3286_v18 = vadd.f32 %v3285_v30, %v3284_v14  ;;  %v3287_v52 = vpop.f32.mrb[86].mxu1  ;;  %v3176_v9 = vpop.f32.mrb[87].mxu0  ;;  %v325_v14 = vld [vmem:[%s3850_s5 + $0x60] sm:$0xff]  ;;  %v2473_v30 = vsel %vm280_vm0, %v2440_v51, 0.0  ;;  %v2376_v41 = vsel %vm280_vm0, %v2341_v50, 0.0 }
 0x1a7   : > { %2311 = vst.msk [vmem:[%s3850_s5 + $0x48] sm:$0xff] %vm280_vm0, %v2278_v6  ;;  %v2022_v19 = vadd.f32 %v3174_v16, %v3960_v22  ;;  %v3177_v21 = vadd.f32 %v3176_v9, %v3175_v17  ;;  %v3288_v32 = vpop.f32.mrb[87].mxu1  ;;  %v2470_v16 = vsel %vm280_vm0, %v2438_v54, 0.0  ;;  %v2441_v17 = vmul.f32 %v2340_v56, %v2340_v56  ;;  %v2343_v54 = vld [vmem:[%s3850_s5 + $0x30] sm:$0xff] }
 0x1a8   : > { %v3289_v33 = vadd.f32 %v3288_v32, %v3287_v52  ;;  %v2472_v52 = vadd.f32 %v2471_v63, %v2470_v16  ;;  %v2373_v9 = vadd.f32 %v2372_v3, %v2371_v13  ;;  %v2378_v63 = vsel %vm280_vm0, %v2342_v34, 0.0  ;;  %v2344_v13 = vld [vmem:[%s3850_s5 + $0x38] sm:$0xff] }
 0x1a9   : > { %v2183_v35 = vadd.f32 %v3286_v18, %v2022_v19  ;;  %v2025_v36 = vadd.f32 %v3177_v21, %v3962_v24  ;;  %v2442_v21 = vmul.f32 %v2341_v50, %v2341_v50  ;;  %v2444_v3 = vmul.f32 %v2343_v54, %v2343_v54 }
 0x1ab   : > { %v2279_v43 = vadd.f32 %v2183_v35, %v323_v29  ;;  %v2186_v47 = vadd.f32 %v3289_v33, %v2025_v36  ;;  %v3178_v8 = vpop.f32.mrb[88].mxu0  ;;  %v2474_v33 = vadd.f32 %v2473_v30, %v2472_v52 }
 0x1ac   : > { %v3290_v48 = vpop.f32.mrb[88].mxu1  ;;  %v3179_v22 = vpop.f32.mrb[89].mxu0 }
 0x1ad   : > { %2312 = vst.msk [vmem:[%s3850_s5 + $0x50] sm:$0xff] %vm280_vm0, %v2279_v43  ;;  %v2280_v53 = vadd.f32 %v2186_v47, %v324_v39  ;;  %v3180_v24 = vadd.f32 %v3179_v22, %v3178_v8  ;;  %v3291_v57 = vpop.f32.mrb[89].mxu1  ;;  %v3181_v10 = vpop.f32.mrb[90].mxu0  ;;  %v2475_v39 = vsel %vm280_vm0, %v2441_v17, 0.0  ;;  %v2345_v17 = vld [vmem:[%s3850_s5 + $0x40] sm:$0xff] }
 0x1ae   : > { %v3292_v59 = vadd.f32 %v3291_v57, %v3290_v48  ;;  %v3293_v60 = vpop.f32.mrb[90].mxu1  ;;  %v3182_v61 = vpop.f32.mrb[91].mxu0 }
 0x1af   : > { %2313 = vst.msk [vmem:[%s3850_s5 + $0x58] sm:$0xff] %vm280_vm0, %v2280_v53  ;;  %v2030_v5 = vadd.f32 %v3180_v24, %v3964_v38  ;;  %v3294_v11 = vpop.f32.mrb[91].mxu1  ;;  %v3183_v15 = vadd.f32 %v3182_v61, %v3181_v10  ;;  %v2374_v38 = vsel %vm280_vm0, %v2340_v56, 0.0  ;;  %v2477_v53 = vsel %vm280_vm0, %v2442_v21, 0.0 }
 0x1b0   : > { %v3295_v6 = vadd.f32 %v3294_v11, %v3293_v60  ;;  %v2375_v8 = vadd.f32 %v2374_v38, %v2373_v9  ;;  %v2443_v24 = vmul.f32 %v2342_v34, %v2342_v34  ;;  %v2476_v56 = vadd.f32 %v2475_v39, %v2474_v33  ;;  %v327_v60 = vld [vmem:[%s3850_s5 + $0x70] sm:$0xff] }
 0x1b1   : > { %v2191_v18 = vadd.f32 %v3292_v59, %v2030_v5  ;;  %v2033_v19 = vadd.f32 %v3183_v15, %v3966_v40  ;;  %v2445_v38 = vmul.f32 %v2344_v13, %v2344_v13  ;;  %v2446_v39 = vmul.f32 %v2345_v17, %v2345_v17 }
 0x1b2   : > { %v2377_v59 = vadd.f32 %v2376_v41, %v2375_v8  ;;  %v2478_v11 = vadd.f32 %v2477_v53, %v2476_v56  ;;  %v2346_v8 = vld [vmem:[%s3850_s5 + $0x48] sm:$0xff] }
 0x1b3   : > { %v2281_v32 = vadd.f32 %v2191_v18, %v325_v14  ;;  %v3184_v29 = vpop.f32.mrb[92].mxu0  ;;  %v2194_v35 = vadd.f32 %v3295_v6, %v2033_v19  ;;  %v2380_v14 = vsel %vm280_vm0, %v2343_v54, 0.0  ;;  %v328_v6 = vld [vmem:[%s3850_s5 + $0x78] sm:$0xff]  ;;  %v2481_v19 = vsel %vm280_vm0, %v2444_v3, 0.0  ;;  %v329_v54 = vld [vmem:[%s3850_s5 + $0x80] sm:$0xff] }
 0x1b4   : > { %v3296_v36 = vpop.f32.mrb[92].mxu1  ;;  %v3185_v37 = vpop.f32.mrb[93].mxu0  ;;  %v2379_v30 = vadd.f32 %v2378_v63, %v2377_v59  ;;  %v2447_v56 = vmul.f32 %v2346_v8, %v2346_v8 }
 0x1b5   : > { %2314 = vst.msk [vmem:[%s3850_s5 + $0x60] sm:$0xff] %vm280_vm0, %v2281_v32  ;;  %v3186_v40 = vadd.f32 %v3185_v37, %v3184_v29  ;;  %v3297_v43 = vpop.f32.mrb[93].mxu1  ;;  %v3187_v47 = vpop.f32.mrb[94].mxu0  ;;  %v2282_v48 = vadd.f32 %v2194_v35, %v326_v25  ;;  %v2382_v37 = vsel %vm280_vm0, %v2344_v13, 0.0 }
 0x1b6   : > { %v3298_v22 = vadd.f32 %v3297_v43, %v3296_v36  ;;  %v3299_v49 = vpop.f32.mrb[94].mxu1  ;;  %v3188_v51 = vpop.f32.mrb[95].mxu0  ;;  %v2381_v29 = vadd.f32 %v2380_v14, %v2379_v30 }
 0x1b7   : > { %v2038_v57 = vadd.f32 %v3186_v40, %v3968_v55  ;;  %v3300_v10 = vpop.f32.mrb[95].mxu1  ;;  %2315 = vst.msk [vmem:[%s3850_s5 + $0x68] sm:$0xff] %vm280_vm0, %v2282_v48  ;;  %v3189_v61 = vadd.f32 %v3188_v51, %v3187_v47  ;;  %v2479_v55 = vsel %vm280_vm0, %v2443_v24, 0.0 }
 0x1b8   : > { %v3301_v62 = vadd.f32 %v3300_v10, %v3299_v49  ;;  %v2480_v25 = vadd.f32 %v2479_v55, %v2478_v11  ;;  %v2384_v49 = vsel %vm280_vm0, %v2345_v17, 0.0  ;;  %v2383_v24 = vadd.f32 %v2382_v37, %v2381_v29  ;;  %v330_v10 = vld [vmem:[%s3850_s5 + $0x88] sm:$0xff] }
 0x1b9   : > { %v2199_v5 = vadd.f32 %v3298_v22, %v2038_v57  ;;  %v2041_v50 = vadd.f32 %v3189_v61, %v3970_v58  ;;  %v2483_v22 = vsel %vm280_vm0, %v2445_v38, 0.0  ;;  %v2347_v57 = vld [vmem:[%s3850_s5 + $0x50] sm:$0xff]  ;;  %v2386_v11 = vsel %vm280_vm0, %v2346_v8, 0.0 }
 0x1ba   : > { %v2482_v47 = vadd.f32 %v2481_v19, %v2480_v25  ;;  %v2385_v63 = vadd.f32 %v2384_v49, %v2383_v24  ;;  %v2448_v13 = vmul.f32 %v2347_v57, %v2347_v57 }
 0x1bb   : > { %v2283_v15 = vadd.f32 %v2199_v5, %v327_v60  ;;  %v3190_v16 = vpop.f32.mrb[96].mxu0  ;;  %v2202_v18 = vadd.f32 %v3301_v62, %v2041_v50 }
 0x1bc   : > { %v3302_v52 = vpop.f32.mrb[96].mxu1  ;;  %v3191_v9 = vpop.f32.mrb[97].mxu0  ;;  %v2484_v62 = vadd.f32 %v2483_v22, %v2482_v47  ;;  %v2489_v29 = vsel %vm280_vm0, %v2448_v13, 0.0  ;;  %v333_v13 = vld [vmem:[%s3850_s5 + $0xa0] sm:$0xff] }
 0x1bd   : > { %2316 = vst.msk [vmem:[%s3850_s5 + $0x70] sm:$0xff] %vm280_vm0, %v2283_v15  ;;  %v3192_v21 = vadd.f32 %v3191_v9, %v3190_v16  ;;  %v3303_v58 = vpop.f32.mrb[97].mxu1  ;;  %v3193_v32 = vpop.f32.mrb[98].mxu0  ;;  %v2284_v33 = vadd.f32 %v2202_v18, %v328_v6  ;;  %v2348_v6 = vld [vmem:[%s3850_s5 + $0x58] sm:$0xff]  ;;  %v2487_v18 = vsel %vm280_vm0, %v2447_v56, 0.0 }
 0x1be   : > { %v3304_v34 = vadd.f32 %v3303_v58, %v3302_v52  ;;  %v3305_v35 = vpop.f32.mrb[98].mxu1  ;;  %v3194_v36 = vpop.f32.mrb[99].mxu0  ;;  %v2388_v52 = vsel %vm280_vm0, %v2347_v57, 0.0  ;;  %v2349_v58 = vld [vmem:[%s3850_s5 + $0x60] sm:$0xff] }
 0x1bf   : > { %v2046_v41 = vadd.f32 %v3192_v21, %v3972_v7  ;;  %v3195_v40 = vadd.f32 %v3194_v36, %v3193_v32  ;;  %v3306_v43 = vpop.f32.mrb[99].mxu1  ;;  %2317 = vst.msk [vmem:[%s3850_s5 + $0x78] sm:$0xff] %vm280_vm0, %v2284_v33  ;;  %v2485_v7 = vsel %vm280_vm0, %v2446_v39, 0.0  ;;  %v2387_v21 = vadd.f32 %v2386_v11, %v2385_v63  ;;  %v331_v32 = vld [vmem:[%s3850_s5 + $0x90] sm:$0xff]  ;;  %v332_v39 = vld [vmem:[%s3850_s5 + $0x98] sm:$0xff] }
 0x1c0   : > { %v3307_v48 = vadd.f32 %v3306_v43, %v3305_v35  ;;  %v2486_v15 = vadd.f32 %v2485_v7, %v2484_v62  ;;  %v2449_v33 = vmul.f32 %v2348_v6, %v2348_v6 }
 0x1c1   : > { %v2207_v51 = vadd.f32 %v3304_v34, %v2046_v41  ;;  %v2049_v53 = vadd.f32 %v3195_v40, %v3974_v12  ;;  %v2389_v37 = vadd.f32 %v2388_v52, %v2387_v21  ;;  %v2390_v41 = vsel %vm280_vm0, %v2348_v6, 0.0  ;;  %v334_v52 = vld [vmem:[%s3850_s5 + $0xa8] sm:$0xff] }
 0x1c2   : > { %v2488_v36 = vadd.f32 %v2487_v18, %v2486_v15  ;;  %v2491_v49 = vsel %vm280_vm0, %v2449_v33, 0.0 }
 0x1c3   : > { %v2285_v59 = vadd.f32 %v2207_v51, %v329_v54  ;;  %v2210_v60 = vadd.f32 %v3307_v48, %v2049_v53  ;;  %v3196_v61 = vpop.f32.mrb[100].mxu0  ;;  %v2350_v54 = vld [vmem:[%s3850_s5 + $0x68] sm:$0xff]  ;;  %v2392_v51 = vsel %vm280_vm0, %v2349_v58, 0.0 }
 0x1c4   : > { %v3308_v3 = vpop.f32.mrb[100].mxu1  ;;  %v3197_v5 = vpop.f32.mrb[101].mxu0  ;;  %v2490_v8 = vadd.f32 %v2489_v29, %v2488_v36  ;;  %v2351_v7 = vld [vmem:[%s3850_s5 + $0x70] sm:$0xff]  ;;  %v2451_v62 = vmul.f32 %v2350_v54, %v2350_v54 }
 0x1c5   : > { %2318 = vst.msk [vmem:[%s3850_s5 + $0x80] sm:$0xff] %vm280_vm0, %v2285_v59  ;;  %v2286_v12 = vadd.f32 %v2210_v60, %v330_v10  ;;  %v3198_v50 = vadd.f32 %v3197_v5, %v3196_v61  ;;  %v3309_v55 = vpop.f32.mrb[101].mxu1  ;;  %v3199_v14 = vpop.f32.mrb[102].mxu0  ;;  %v2391_v10 = vadd.f32 %v2390_v41, %v2389_v37 }
 0x1c6   : > { %v3310_v16 = vadd.f32 %v3309_v55, %v3308_v3  ;;  %v3311_v30 = vpop.f32.mrb[102].mxu1  ;;  %v3200_v17 = vpop.f32.mrb[103].mxu0  ;;  %v2492_v5 = vadd.f32 %v2491_v49, %v2490_v8  ;;  %v2394_v55 = vsel %vm280_vm0, %v2350_v54, 0.0 }
 0x1c7   : > { %2319 = vst.msk [vmem:[%s3850_s5 + $0x88] sm:$0xff] %vm280_vm0, %v2286_v12  ;;  %v2054_v9 = vadd.f32 %v3198_v50, %v3976_v26  ;;  %v3201_v19 = vadd.f32 %v3200_v17, %v3199_v14  ;;  %v3312_v38 = vpop.f32.mrb[103].mxu1  ;;  %v2450_v26 = vmul.f32 %v2349_v58, %v2349_v58  ;;  %v2393_v11 = vadd.f32 %v2392_v51, %v2391_v10 }
 0x1c8   : > { %v3313_v25 = vadd.f32 %v3312_v38, %v3311_v30  ;;  %v2452_v14 = vmul.f32 %v2351_v7, %v2351_v7  ;;  %v2495_v17 = vsel %vm280_vm0, %v2451_v62, 0.0 }
 0x1c9   : > { %v2215_v34 = vadd.f32 %v3310_v16, %v2054_v9  ;;  %v2057_v35 = vadd.f32 %v3201_v19, %v3978_v28  ;;  %v2493_v61 = vsel %vm280_vm0, %v2450_v26, 0.0  ;;  %v2352_v16 = vld [vmem:[%s3850_s5 + $0x78] sm:$0xff]  ;;  %v2395_v19 = vadd.f32 %v2394_v55, %v2393_v11 }
 0x1ca   : > { %v2494_v6 = vadd.f32 %v2493_v61, %v2492_v5  ;;  %v2453_v29 = vmul.f32 %v2352_v16, %v2352_v16 }
 0x1cb   : > { %v2287_v40 = vadd.f32 %v2215_v34, %v331_v32  ;;  %v2218_v43 = vadd.f32 %v3313_v25, %v2057_v35  ;;  %v3202_v47 = vpop.f32.mrb[104].mxu0  ;;  %v2497_v25 = vsel %vm280_vm0, %v2452_v14, 0.0 }
 0x1cc   : > { %v3314_v48 = vpop.f32.mrb[104].mxu1  ;;  %v3203_v22 = vpop.f32.mrb[105].mxu0  ;;  %v2353_v38 = vld [vmem:[%s3850_s5 + $0x80] sm:$0xff]  ;;  %v2496_v35 = vadd.f32 %v2495_v17, %v2494_v6 }
 0x1cd   : > { %2320 = vst.msk [vmem:[%s3850_s5 + $0x90] sm:$0xff] %vm280_vm0, %v2287_v40  ;;  %v2288_v28 = vadd.f32 %v2218_v43, %v332_v39  ;;  %v3204_v53 = vadd.f32 %v3203_v22, %v3202_v47  ;;  %v3315_v24 = vpop.f32.mrb[105].mxu1  ;;  %v3205_v57 = vpop.f32.mrb[106].mxu0  ;;  %v2398_v40 = vsel %vm280_vm0, %v2352_v16, 0.0  ;;  %v2454_v43 = vmul.f32 %v2353_v38, %v2353_v38  ;;  %v335_v22 = vld [vmem:[%s3850_s5 + $0xb0] sm:$0xff] }
 0x1ce   : > { %v3316_v56 = vadd.f32 %v3315_v24, %v3314_v48  ;;  %v3317_v59 = vpop.f32.mrb[106].mxu1  ;;  %v3206_v60 = vpop.f32.mrb[107].mxu0  ;;  %v2498_v54 = vadd.f32 %v2497_v25, %v2496_v35  ;;  %v2354_v48 = vld [vmem:[%s3850_s5 + $0x88] sm:$0xff] }
 0x1cf   : > { %2321 = vst.msk [vmem:[%s3850_s5 + $0x98] sm:$0xff] %vm280_vm0, %v2288_v28  ;;  %v2062_v63 = vadd.f32 %v3204_v53, %v3980_v44  ;;  %v3318_v3 = vpop.f32.mrb[107].mxu1  ;;  %v3207_v12 = vadd.f32 %v3206_v60, %v3205_v57  ;;  %v2396_v44 = vsel %vm280_vm0, %v2351_v7, 0.0  ;;  %v2499_v28 = vsel %vm280_vm0, %v2453_v29, 0.0  ;;  %v336_v60 = vld [vmem:[%s3850_s5 + $0xb8] sm:$0xff] }
 0x1d0   : > { %v3319_v50 = vadd.f32 %v3318_v3, %v3317_v59  ;;  %v2397_v36 = vadd.f32 %v2396_v44, %v2395_v19  ;;  %v2400_v53 = vsel %vm280_vm0, %v2353_v38, 0.0  ;;  %v2500_v62 = vadd.f32 %v2499_v28, %v2498_v54 }
 0x1d1   : > { %v2223_v15 = vadd.f32 %v3316_v56, %v2062_v63  ;;  %v2065_v30 = vadd.f32 %v3207_v12, %v3982_v46  ;;  %v2455_v56 = vmul.f32 %v2354_v48, %v2354_v48 }
 0x1d2   : > { %v2399_v57 = vadd.f32 %v2398_v40, %v2397_v36  ;;  %v338_v36 = vld [vmem:[%s3850_s5 + $0xc8] sm:$0xff] }
 0x1d3   : > { %v2289_v18 = vadd.f32 %v2223_v15, %v333_v13  ;;  %v3208_v9 = vpop.f32.mrb[108].mxu0  ;;  %v2226_v21 = vadd.f32 %v3319_v50, %v2065_v30  ;;  %v2402_v13 = vsel %vm280_vm0, %v2354_v48, 0.0  ;;  %v2503_v44 = vsel %vm280_vm0, %v2455_v56, 0.0 }
 0x1d4   : > { %v3320_v58 = vpop.f32.mrb[108].mxu1  ;;  %v3209_v32 = vpop.f32.mrb[109].mxu0  ;;  %v2355_v10 = vld [vmem:[%s3850_s5 + $0x90] sm:$0xff]  ;;  %v2401_v63 = vadd.f32 %v2400_v53, %v2399_v57 }
 0x1d5   : > { %2322 = vst.msk [vmem:[%s3850_s5 + $0xa0] sm:$0xff] %vm280_vm0, %v2289_v18  ;;  %v3210_v46 = vadd.f32 %v3209_v32, %v3208_v9  ;;  %v3321_v33 = vpop.f32.mrb[109].mxu1  ;;  %v3211_v34 = vpop.f32.mrb[110].mxu0  ;;  %v2290_v37 = vadd.f32 %v2226_v21, %v334_v52  ;;  %v2456_v12 = vmul.f32 %v2355_v10, %v2355_v10  ;;  %v2404_v18 = vsel %vm280_vm0, %v2355_v10, 0.0 }
 0x1d6   : > { %v3322_v39 = vadd.f32 %v3321_v33, %v3320_v58  ;;  %v3323_v41 = vpop.f32.mrb[110].mxu1  ;;  %v3212_v26 = vpop.f32.mrb[111].mxu0  ;;  %v2356_v15 = vld [vmem:[%s3850_s5 + $0x98] sm:$0xff]  ;;  %v2403_v38 = vadd.f32 %v2402_v13, %v2401_v63  ;;  %v337_v58 = vld [vmem:[%s3850_s5 + $0xc0] sm:$0xff]  ;;  %v339_v63 = vld [vmem:[%s3850_s5 + $0xd0] sm:$0xff] }
 0x1d7   : > { %v2070_v47 = vadd.f32 %v3210_v46, %v3984_v0  ;;  %v3324_v8 = vpop.f32.mrb[111].mxu1  ;;  %2323 = vst.msk [vmem:[%s3850_s5 + $0xa8] sm:$0xff] %vm280_vm0, %v2290_v37  ;;  %v3213_v49 = vadd.f32 %v3212_v26, %v3211_v34  ;;  %v2501_v0 = vsel %vm280_vm0, %v2454_v43, 0.0  ;;  %v2505_v25 = vsel %vm280_vm0, %v2456_v12, 0.0 }
 0x1d8   : > { %v3325_v51 = vadd.f32 %v3324_v8, %v3323_v41  ;;  %v2502_v14 = vadd.f32 %v2501_v0, %v2500_v62  ;;  %v2457_v29 = vmul.f32 %v2356_v15, %v2356_v15  ;;  %v2405_v35 = vadd.f32 %v2404_v18, %v2403_v38 }
 0x1d9   : > { %v2231_v24 = vadd.f32 %v3322_v39, %v2070_v47  ;;  %v2073_v7 = vadd.f32 %v3213_v49, %v3986_v2 }
 0x1da   : > { %v2504_v34 = vadd.f32 %v2503_v44, %v2502_v14  ;;  %v2507_v54 = vsel %vm280_vm0, %v2457_v29, 0.0 }
 0x1db   : > { %v2291_v59 = vadd.f32 %v2231_v24, %v335_v22  ;;  %v3214_v61 = vpop.f32.mrb[112].mxu0  ;;  %v2234_v3 = vadd.f32 %v3325_v51, %v2073_v7 }
 0x1dc   : > { %v3326_v5 = vpop.f32.mrb[112].mxu1  ;;  %v3215_v11 = vpop.f32.mrb[113].mxu0  ;;  %v2357_v21 = vld [vmem:[%s3850_s5 + $0xa0] sm:$0xff]  ;;  %v2506_v40 = vadd.f32 %v2505_v25, %v2504_v34 }
 0x1dd   : > { %2324 = vst.msk [vmem:[%s3850_s5 + $0xb0] sm:$0xff] %vm280_vm0, %v2291_v59  ;;  %v3216_v50 = vadd.f32 %v3215_v11, %v3214_v61  ;;  %v3327_v2 = vpop.f32.mrb[113].mxu1  ;;  %v3217_v55 = vpop.f32.mrb[114].mxu0  ;;  %v2292_v6 = vadd.f32 %v2234_v3, %v336_v60  ;;  %v2458_v37 = vmul.f32 %v2357_v21, %v2357_v21  ;;  %v2408_v48 = vsel %vm280_vm0, %v2357_v21, 0.0 }
 0x1de   : > { %v3328_v16 = vadd.f32 %v3327_v2, %v3326_v5  ;;  %v3329_v30 = vpop.f32.mrb[114].mxu1  ;;  %v3218_v17 = vpop.f32.mrb[115].mxu0  ;;  %v2358_v43 = vld [vmem:[%s3850_s5 + $0xa8] sm:$0xff]  ;;  %v2508_v61 = vadd.f32 %v2507_v54, %v2506_v40 }
 0x1df   : > { %v2078_v52 = vadd.f32 %v3216_v50, %v3988_v20  ;;  %v3219_v9 = vadd.f32 %v3218_v17, %v3217_v55  ;;  %v3330_v19 = vpop.f32.mrb[115].mxu1  ;;  %2325 = vst.msk [vmem:[%s3850_s5 + $0xb8] sm:$0xff] %vm280_vm0, %v2292_v6  ;;  %v2406_v20 = vsel %vm280_vm0, %v2356_v15, 0.0  ;;  %v2509_v7 = vsel %vm280_vm0, %v2458_v37, 0.0  ;;  %v340_v55 = vld [vmem:[%s3850_s5 + $0xd8] sm:$0xff] }
 0x1e0   : > { %v3331_v32 = vadd.f32 %v3330_v19, %v3329_v30  ;;  %v2407_v28 = vadd.f32 %v2406_v20, %v2405_v35  ;;  %v2459_v0 = vmul.f32 %v2358_v43, %v2358_v43  ;;  %v2410_v5 = vsel %vm280_vm0, %v2358_v43, 0.0 }
 0x1e1   : > { %v2239_v46 = vadd.f32 %v3328_v16, %v2078_v52  ;;  %v2081_v33 = vadd.f32 %v3219_v9, %v3990_v23  ;;  %v2510_v50 = vadd.f32 %v2509_v7, %v2508_v61 }
 0x1e2   : > { %v2409_v62 = vadd.f32 %v2408_v48, %v2407_v28  ;;  %v2511_v14 = vsel %vm280_vm0, %v2459_v0, 0.0 }
 0x1e3   : > { %v2293_v39 = vadd.f32 %v2239_v46, %v337_v58  ;;  %v2242_v41 = vadd.f32 %v3331_v32, %v2081_v33  ;;  %v3220_v26 = vpop.f32.mrb[116].mxu0  ;;  %v2512_v58 = vadd.f32 %v2511_v14, %v2510_v50 }
 0x1e4   : > { %v3332_v47 = vpop.f32.mrb[116].mxu1  ;;  %v3221_v8 = vpop.f32.mrb[117].mxu0  ;;  %v2359_v53 = vld [vmem:[%s3850_s5 + $0xb0] sm:$0xff]  ;;  %v2411_v30 = vadd.f32 %v2410_v5, %v2409_v62 }
 0x1e5   : > { %2326 = vst.msk [vmem:[%s3850_s5 + $0xc0] sm:$0xff] %vm280_vm0, %v2293_v39  ;;  %v2294_v23 = vadd.f32 %v2242_v41, %v338_v36  ;;  %v3222_v22 = vadd.f32 %v3221_v8, %v3220_v26  ;;  %v3333_v49 = vpop.f32.mrb[117].mxu1  ;;  %v3223_v51 = vpop.f32.mrb[118].mxu0  ;;  %v2460_v11 = vmul.f32 %v2359_v53, %v2359_v53  ;;  %v341_v39 = vld [vmem:[%s3850_s5 + $0xe0] sm:$0xff] }
 0x1e6   : > { %v3334_v24 = vadd.f32 %v3333_v49, %v3332_v47  ;;  %v3335_v57 = vpop.f32.mrb[118].mxu1  ;;  %v3224_v10 = vpop.f32.mrb[119].mxu0  ;;  %v2360_v2 = vld [vmem:[%s3850_s5 + $0xb8] sm:$0xff] }
 0x1e7   : > { %2327 = vst.msk [vmem:[%s3850_s5 + $0xc8] sm:$0xff] %vm280_vm0, %v2294_v23  ;;  %v2086_v56 = vadd.f32 %v3222_v22, %v3992_v42  ;;  %v3225_v59 = vadd.f32 %v3224_v10, %v3223_v51  ;;  %v3336_v60 = vpop.f32.mrb[119].mxu1  ;;  %v2412_v42 = vsel %vm280_vm0, %v2359_v53, 0.0  ;;  %v2513_v52 = vsel %vm280_vm0, %v2460_v11, 0.0  ;;  %v342_v22 = vld [vmem:[%s3850_s5 + $0xe8] sm:$0xff] }
 0x1e8   : > { %v3337_v3 = vadd.f32 %v3336_v60, %v3335_v57  ;;  %v2461_v9 = vmul.f32 %v2360_v2, %v2360_v2  ;;  %v2413_v32 = vadd.f32 %v2412_v42, %v2411_v30  ;;  %v2414_v33 = vsel %vm280_vm0, %v2360_v2, 0.0 }
 0x1e9   : > { %v2247_v13 = vadd.f32 %v3334_v24, %v2086_v56  ;;  %v2089_v12 = vadd.f32 %v3225_v59, %v3994_v45  ;;  %v2514_v20 = vadd.f32 %v2513_v52, %v2512_v58  ;;  %v344_v52 = vld [vmem:[%s3850_s5 + $0xf8] sm:$0xff] }
 0x1ea   : > { %v2515_v40 = vsel %vm280_vm0, %v2461_v9, 0.0  ;;  %v2415_v8 = vadd.f32 %v2414_v33, %v2413_v32 }
 0x1eb   : > { %v2295_v15 = vadd.f32 %v2247_v13, %v339_v63  ;;  %v2250_v6 = vadd.f32 %v3337_v3, %v2089_v12  ;;  %v3226_v16 = vpop.f32.mrb[120].mxu0  ;;  %v2516_v51 = vadd.f32 %v2515_v40, %v2514_v20 }
 0x1ec   : > { %v2361_v17 = vld [vmem:[%s3850_s5 + $0xc0] sm:$0xff]  ;;  %v3338_v44 = vpop.f32.mrb[120].mxu1  ;;  %v3227_v18 = vpop.f32.mrb[121].mxu0 }
 0x1ed   : > { %2328 = vst.msk [vmem:[%s3850_s5 + $0xd0] sm:$0xff] %vm280_vm0, %v2295_v15  ;;  %v2296_v45 = vadd.f32 %v2250_v6, %v340_v55  ;;  %v3228_v19 = vadd.f32 %v3227_v18, %v3226_v16  ;;  %v3339_v38 = vpop.f32.mrb[121].mxu1  ;;  %v3229_v21 = vpop.f32.mrb[122].mxu0  ;;  %v2462_v34 = vmul.f32 %v2361_v17, %v2361_v17  ;;  %v2416_v43 = vsel %vm280_vm0, %v2361_v17, 0.0  ;;  %v343_v55 = vld [vmem:[%s3850_s5 + $0xf0] sm:$0xff] }
 0x1ee   : > { %v3340_v25 = vadd.f32 %v3339_v38, %v3338_v44  ;;  %v3341_v29 = vpop.f32.mrb[122].mxu1  ;;  %v3230_v46 = vpop.f32.mrb[123].mxu0  ;;  %v2362_v37 = vld [vmem:[%s3850_s5 + $0xc8] sm:$0xff]  ;;  %v2417_v28 = vadd.f32 %v2416_v43, %v2415_v8 }
 0x1ef   : > { %2329 = vst.msk [vmem:[%s3850_s5 + $0xd8] sm:$0xff] %vm280_vm0, %v2296_v45  ;;  %v2094_v35 = vadd.f32 %v3228_v19, %v3996_v1  ;;  %v3342_v36 = vpop.f32.mrb[123].mxu1  ;;  %v3231_v41 = vadd.f32 %v3230_v46, %v3229_v21  ;;  %v2517_v48 = vsel %vm280_vm0, %v2462_v34, 0.0  ;;  %v2463_v23 = vmul.f32 %v2362_v37, %v2362_v37 }
 0x1f0   : > { %v3343_v26 = vadd.f32 %v3342_v36, %v3341_v29  ;;  %v2418_v7 = vsel %vm280_vm0, %v2362_v37, 0.0  ;;  %v2518_v60 = vadd.f32 %v2517_v48, %v2516_v51 }
 0x1f1   : > { %v2255_v47 = vadd.f32 %v3340_v25, %v2094_v35  ;;  %v2097_v54 = vadd.f32 %v3231_v41, %v3998_v4  ;;  %v2519_v11 = vsel %vm280_vm0, %v2463_v23, 0.0  ;;  %v2419_v2 = vadd.f32 %v2418_v7, %v2417_v28 }
 0x1f2   : > { %v2520_v30 = vadd.f32 %v2519_v11, %v2518_v60  ;;  %v2539_v28 = vlaneseq }
 0x1f3   : > { %v2297_v1 = vadd.f32 %v2255_v47, %v341_v39  ;;  %v3232_v49 = vpop.f32.mrb[124].mxu0  ;;  %v2258_v24 = vadd.f32 %v3343_v26, %v2097_v54 }
 0x1f4   : > { %v2363_v53 = vld [vmem:[%s3850_s5 + $0xd0] sm:$0xff]  ;;  %v3344_v57 = vpop.f32.mrb[124].mxu1  ;;  %v3233_v10 = vpop.f32.mrb[125].mxu0  ;;  %v2540_v7 = vshrl.u32 %v2539_v28, 7 }
 0x1f5   : > { %v2464_v0 = vmul.f32 %v2363_v53, %v2363_v53  ;;  %2330 = vst.msk [vmem:[%s3850_s5 + $0xe0] sm:$0xff] %vm280_vm0, %v2297_v1  ;;  %v3234_v4 = vadd.f32 %v3233_v10, %v3232_v49  ;;  %v3345_v56 = vpop.f32.mrb[125].mxu1  ;;  %v3235_v59 = vpop.f32.mrb[126].mxu0  ;;  %v2298_v62 = vadd.f32 %v2258_v24, %v342_v22  ;;  %v2420_v13 = vsel %vm280_vm0, %v2363_v53, 0.0 }
 0x1f6   : > { %v2364_v61 = vld [vmem:[%s3850_s5 + $0xd8] sm:$0xff]  ;;  %v3346_v63 = vadd.f32 %v3345_v56, %v3344_v57  ;;  %v3347_v3 = vpop.f32.mrb[126].mxu1  ;;  %v3236_v5 = vpop.f32.mrb[127].mxu0  ;;  %v2421_v17 = vadd.f32 %v2420_v13, %v2419_v2  ;;  %vm2541_vm1 = vcmp.eq.s32.totalorder %v2540_v7, 0 }
 0x1f7   : > { %v2102_v12 = vadd.f32 %v3234_v4, %v4000_v27  ;;  %v3348_v50 = vpop.f32.mrb[127].mxu1  ;;  %2331 = vst.msk [vmem:[%s3850_s5 + $0xe8] sm:$0xff] %vm280_vm0, %v2298_v62  ;;  %v3237_v14 = vadd.f32 %v3236_v5, %v3235_v59  ;;  %v2521_v15 = vsel %vm280_vm0, %v2464_v0, 0.0  ;;  %v2465_v6 = vmul.f32 %v2364_v61, %v2364_v61 }
 0x1f8   : > { %v3349_v42 = vadd.f32 %v3348_v50, %v3347_v3  ;;  %v2422_v27 = vsel %vm280_vm0, %v2364_v61, 0.0  ;;  %v2522_v9 = vadd.f32 %v2521_v15, %v2520_v30 }
 0x1f9   : > { %v2263_v16 = vadd.f32 %v3346_v63, %v2102_v12  ;;  %v2105_v44 = vadd.f32 %v3237_v14, %v4002_v31  ;;  %v2523_v38 = vsel %vm280_vm0, %v2465_v6, 0.0  ;;  %v2423_v32 = vadd.f32 %v2422_v27, %v2421_v17 }
 0x1fa   : > { %v2524_v46 = vadd.f32 %v2523_v38, %v2522_v9 }
 0x1fb   : > { %v2299_v18 = vadd.f32 %v2263_v16, %v343_v55  ;;  %v2266_v19 = vadd.f32 %v3349_v42, %v2105_v44 }
 0x1fc   : > { %v2365_v45 = vld [vmem:[%s3850_s5 + $0xe0] sm:$0xff] }
 0x1fd   : > { %v2424_v21 = vsel %vm280_vm0, %v2365_v45, 0.0  ;;  %v2466_v58 = vmul.f32 %v2365_v45, %v2365_v45  ;;  %2332 = vst.msk [vmem:[%s3850_s5 + $0xf0] sm:$0xff] %vm280_vm0, %v2299_v18  ;;  %v2300_v25 = vadd.f32 %v2266_v19, %v344_v52 }
 0x1fe   : > { %v2366_v29 = vld [vmem:[%s3850_s5 + $0xe8] sm:$0xff]  ;;  %v2425_v33 = vadd.f32 %v2424_v21, %v2423_v32 }
 0x1ff   : > { %v2525_v31 = vsel %vm280_vm0, %v2466_v58, 0.0  ;;  %v2467_v34 = vmul.f32 %v2366_v29, %v2366_v29  ;;  %2333 = vst.msk [vmem:[%s3850_s5 + $0xf8] sm:$0xff] %vm280_vm0, %v2300_v25  ;;  %v2426_v35 = vsel %vm280_vm0, %v2366_v29, 0.0 }
 0x200   : > { %v2526_v36 = vadd.f32 %v2525_v31, %v2524_v46  ;;  %v2427_v37 = vadd.f32 %v2426_v35, %v2425_v33 }
 0x201   : > { %v2527_v20 = vsel %vm280_vm0, %v2467_v34, 0.0 }
 0x202   : > { %v2528_v40 = vadd.f32 %v2527_v20, %v2526_v36 }
 0x204   : > { %v2367_v39 = vld [vmem:[%s3850_s5 + $0xf0] sm:$0xff] }
 0x205   : > { %v2428_v41 = vsel %vm280_vm0, %v2367_v39, 0.0  ;;  %v2468_v26 = vmul.f32 %v2367_v39, %v2367_v39 }
 0x206   : > { %v2429_v43 = vadd.f32 %v2428_v41, %v2427_v37  ;;  %v2368_v8 = vld [vmem:[%s3850_s5 + $0xf8] sm:$0xff] }
 0x207   : > { %v2529_v47 = vsel %vm280_vm0, %v2468_v26, 0.0  ;;  %v2430_v48 = vsel %vm280_vm0, %v2368_v8, 0.0  ;;  %v2469_v23 = vmul.f32 %v2368_v8, %v2368_v8 }
 0x208   : > { %v2530_v54 = vadd.f32 %v2529_v47, %v2528_v40  ;;  %v2431_v1 = vadd.f32 %v2430_v48, %v2429_v43 }
 0x209   : > { %v2531_v22 = vsel %vm280_vm0, %v2469_v23, 0.0 }
 0x20a   : > { %v2432_v49 = vrot.slane %v2431_v1, 4  ;;  %v2532_v51 = vadd.f32 %v2531_v22, %v2530_v54 }
 0x20c   : > { %v2433_v53 = vadd.f32 %v2432_v49, %v2431_v1  ;;  %v2533_v24 = vrot.slane %v2532_v51, 4 }
 0x20e   : > { %v2434_v57 = vrot.slane %v2433_v53, 2  ;;  %v2534_v10 = vadd.f32 %v2533_v24, %v2532_v51 }
 0x210   : > { %v2435_v0 = vadd.f32 %v2434_v57, %v2433_v53  ;;  %v2535_v4 = vrot.slane %v2534_v10, 2 }
 0x212   : > { %v2436_v56 = vrot.slane %v2435_v0, 1  ;;  %v2536_v59 = vadd.f32 %v2535_v4, %v2534_v10 }
 0x214   : > { %v2437_v60 = vadd.f32 %v2436_v56, %v2435_v0  ;;  %v2537_v61 = vrot.slane %v2536_v59, 1 }
 0x216   : > { %v2538_v62 = vadd.f32 %v2537_v61, %v2536_v59  ;;  %v2542_v63 = vsel %vm2541_vm1, %v2437_v60, 0.0 }
 0x217   : > { %2543 = vst.msk [vmem:[%s270_s7] sm:$0xff] %vm280_vm0, %v2542_v63 }
 0x218   : > { %v2544_v3 = vsel %vm2541_vm1, %v2538_v62, 0.0 }
 0x219   : > { %2545 = vst.msk [vmem:[%s274_s10] sm:$0xff] %vm280_vm0, %v2544_v3 }
 0x21a PF: > { %s15_s17 = sadd.s32 1, %s3461_s17   ;;  %s4252_s15 = smov %s3457_s16 }
 0x21b   : > { %p12_p6 = scmp.ge.s32.totalorder %s15_s17, 10   ;;  %s4253_s16 = smov %s4255_s18 }
 0x21d   :  { %14 = sbr.rel (!%p12_p6) target bundleno = 2 (0x2), region = 93 }

// kernel: generator_forward.16
= control target key start
LH: loop header
LB: loop body
LE: loop exit
PB: predicated region body
PF: predicated region fallthrough
CT: control target
= control target key end

     0   :  { %s1375_s0 = inlined_call_operand.vmem [shape: f32[512,128], index: 0, kind: input, shape index: {}]   ;;  %s1376_s1 = inlined_call_operand.vmem [shape: f32[1,128], index: 1, kind: input, shape index: {}]   ;;  %s1377_s2 = inlined_call_operand.vmem [shape: f32[1,128], index: 2, kind: input, shape index: {}]   ;;  %s1378_s3 = inlined_call_operand.vmem [shape: bf16[512,128], index: 3, kind: output, shape index: {}]  }
   0x1   :  { %v14_v0 = vld [vmem:[%s1375_s0] sm:$0xff]  ;;  %v15_v1 = vld [vmem:[%s1375_s0 + $0x8] sm:$0xff]  ;;  %v16_v6 = vld [vmem:[%s1375_s0 + $0x10] sm:$0xff] }
   0x2   :  { %v958_v2 = vld [vmem:[%s1376_s1] ss:$0 sm:$0xff]  ;;  %v17_v7 = vld [vmem:[%s1375_s0 + $0x18] sm:$0xff]  ;;  %v19_v11 = vld [vmem:[%s1375_s0 + $0x28] sm:$0xff] }
   0x3   :  { %v85_v3 = vmul.f32 %v958_v2, %v14_v0  ;;  %v86_v4 = vmul.f32 %v958_v2, %v15_v1  ;;  %v965_v5 = vld [vmem:[%s1377_s2] ss:$0 sm:$0xff]  ;;  %v87_v8 = vmul.f32 %v958_v2, %v16_v6  ;;  %v88_v9 = vmul.f32 %v958_v2, %v17_v7  ;;  %v20_v12 = vld [vmem:[%s1375_s0 + $0x30] sm:$0xff]  ;;  %v21_v17 = vld [vmem:[%s1375_s0 + $0x38] sm:$0xff] }
   0x4   :  { %v18_v10 = vld [vmem:[%s1375_s0 + $0x20] sm:$0xff]  ;;  %v90_v16 = vmul.f32 %v958_v2, %v19_v11  ;;  %v91_v20 = vmul.f32 %v958_v2, %v20_v12  ;;  %v92_v21 = vmul.f32 %v958_v2, %v21_v17  ;;  %v23_v27 = vld [vmem:[%s1375_s0 + $0x48] sm:$0xff]  ;;  %v24_v32 = vld [vmem:[%s1375_s0 + $0x50] sm:$0xff] }
   0x5   :  { %v156_v13 = vadd.f32 %v965_v5, %v85_v3  ;;  %v157_v14 = vadd.f32 %v965_v5, %v86_v4  ;;  %v89_v15 = vmul.f32 %v958_v2, %v18_v10  ;;  %v158_v18 = vadd.f32 %v965_v5, %v87_v8  ;;  %v22_v22 = vld [vmem:[%s1375_s0 + $0x40] sm:$0xff]  ;;  %v25_v33 = vld [vmem:[%s1375_s0 + $0x58] sm:$0xff]  ;;  %v27_v39 = vld [vmem:[%s1375_s0 + $0x68] sm:$0xff] }
   0x6   :  { %v159_v19 = vadd.f32 %v965_v5, %v88_v9  ;;  %v161_v26 = vadd.f32 %v965_v5, %v90_v16  ;;  %v162_v30 = vadd.f32 %v965_v5, %v91_v20  ;;  %v163_v31 = vadd.f32 %v965_v5, %v92_v21  ;;  %v26_v38 = vld [vmem:[%s1375_s0 + $0x60] sm:$0xff]  ;;  %v28_v44 = vld [vmem:[%s1375_s0 + $0x70] sm:$0xff]  ;;  %v29_v49 = vld [vmem:[%s1375_s0 + $0x78] sm:$0xff] }
   0x7   :  { %v220_v23 = vmax.f32 %v156_v13, 0.0  ;;  %v221_v24 = vmax.f32 %v157_v14, 0.0  ;;  %v160_v25 = vadd.f32 %v965_v5, %v89_v15  ;;  %v222_v28 = vmax.f32 %v158_v18, 0.0  ;;  %v30_v54 = vld [vmem:[%s1375_s0 + $0x80] sm:$0xff]  ;;  %v31_v63 = vld [vmem:[%s1375_s0 + $0x88] sm:$0xff]  ;;  %v32_v6 = vld [vmem:[%s1375_s0 + $0x90] sm:$0xff] }
   0x8   :  { %v223_v29 = vmax.f32 %v159_v19, 0.0  ;;  %v225_v36 = vmax.f32 %v161_v26, 0.0  ;;  %v93_v37 = vmul.f32 %v958_v2, %v22_v22  ;;  %v226_v41 = vmax.f32 %v162_v30, 0.0  ;;  %v33_v7 = vld [vmem:[%s1375_s0 + $0x98] sm:$0xff]  ;;  %v34_v12 = vld [vmem:[%s1375_s0 + $0xa0] sm:$0xff]  ;;  %v35_v13 = vld [vmem:[%s1375_s0 + $0xa8] sm:$0xff] }
   0x9   :  { %v741_v34 = vpack.c.bf16 %v221_v24, %v220_v23  ;;  %v224_v35 = vmax.f32 %v160_v25, 0.0  ;;  %v227_v42 = vmax.f32 %v163_v31, 0.0  ;;  %v94_v43 = vmul.f32 %v958_v2, %v23_v27  ;;  %v36_v18 = vld [vmem:[%s1375_s0 + $0xb0] sm:$0xff]  ;;  %v37_v23 = vld [vmem:[%s1375_s0 + $0xb8] sm:$0xff] }
   0xa   :  { %v746_v40 = vpack.c.bf16 %v223_v29, %v222_v28  ;;  %v164_v46 = vadd.f32 %v965_v5, %v93_v37  ;;  %v95_v47 = vmul.f32 %v958_v2, %v24_v32  ;;  %v96_v48 = vmul.f32 %v958_v2, %v25_v33  ;;  %v38_v28 = vld [vmem:[%s1375_s0 + $0xc0] sm:$0xff]  ;;  %v39_v37 = vld [vmem:[%s1375_s0 + $0xc8] sm:$0xff] }
   0xb   :  { %742 = vst [vmem:[%s1378_s3] sm:$0xff] %v741_v34   ;;  %v751_v45 = vpack.c.bf16 %v225_v36, %v224_v35  ;;  %v756_v50 = vpack.c.bf16 %v227_v42, %v226_v41  ;;  %v165_v51 = vadd.f32 %v965_v5, %v94_v43  ;;  %v97_v52 = vmul.f32 %v958_v2, %v26_v38  ;;  %v40_v42 = vld [vmem:[%s1375_s0 + $0xd0] sm:$0xff]  ;;  %v41_v43 = vld [vmem:[%s1375_s0 + $0xd8] sm:$0xff] }
   0xc   :  { %898 = vst [vmem:[%s1378_s3 + $0x8] sm:$0xff] %v746_v40   ;;  %v98_v53 = vmul.f32 %v958_v2, %v27_v39  ;;  %v228_v55 = vmax.f32 %v164_v46, 0.0  ;;  %v166_v56 = vadd.f32 %v965_v5, %v95_v47  ;;  %v167_v57 = vadd.f32 %v965_v5, %v96_v48  ;;  %v42_v48 = vld [vmem:[%s1375_s0 + $0xe0] sm:$0xff] }
   0xd   :  { %899 = vst [vmem:[%s1378_s3 + $0x10] sm:$0xff] %v751_v45   ;;  %v99_v58 = vmul.f32 %v958_v2, %v28_v44  ;;  %900 = vst [vmem:[%s1378_s3 + $0x18] sm:$0xff] %v756_v50   ;;  %v229_v59 = vmax.f32 %v165_v51, 0.0  ;;  %v168_v60 = vadd.f32 %v965_v5, %v97_v52  ;;  %v100_v62 = vmul.f32 %v958_v2, %v29_v49  ;;  %v43_v49 = vld [vmem:[%s1375_s0 + $0xe8] sm:$0xff] }
   0xe   :  { %v169_v61 = vadd.f32 %v965_v5, %v98_v53  ;;  %v230_v0 = vmax.f32 %v166_v56, 0.0  ;;  %v231_v1 = vmax.f32 %v167_v57, 0.0  ;;  %v101_v4 = vmul.f32 %v958_v2, %v30_v54  ;;  %v44_v54 = vld [vmem:[%s1375_s0 + $0xf0] sm:$0xff] }
   0xf   :  { %v170_v3 = vadd.f32 %v965_v5, %v99_v58  ;;  %v761_v8 = vpack.c.bf16 %v229_v59, %v228_v55  ;;  %v232_v9 = vmax.f32 %v168_v60, 0.0  ;;  %v171_v11 = vadd.f32 %v965_v5, %v100_v62  ;;  %v45_v59 = vld [vmem:[%s1375_s0 + $0xf8] sm:$0xff] }
  0x10   :  { %v233_v10 = vmax.f32 %v169_v61, 0.0  ;;  %v766_v14 = vpack.c.bf16 %v231_v1, %v230_v0  ;;  %v102_v16 = vmul.f32 %v958_v2, %v31_v63  ;;  %v172_v17 = vadd.f32 %v965_v5, %v101_v4  ;;  %v46_v0 = vld [vmem:[%s1375_s0 + $0x100] sm:$0xff] }
  0x11   :  { %v234_v15 = vmax.f32 %v170_v3, 0.0  ;;  %901 = vst [vmem:[%s1378_s3 + $0x20] sm:$0xff] %v761_v8   ;;  %v235_v20 = vmax.f32 %v171_v11, 0.0  ;;  %v103_v21 = vmul.f32 %v958_v2, %v32_v6  ;;  %v104_v22 = vmul.f32 %v958_v2, %v33_v7  ;;  %v47_v11 = vld [vmem:[%s1375_s0 + $0x108] sm:$0xff] }
  0x12   :  { %v771_v19 = vpack.c.bf16 %v233_v10, %v232_v9  ;;  %902 = vst [vmem:[%s1378_s3 + $0x28] sm:$0xff] %v766_v14   ;;  %v173_v24 = vadd.f32 %v965_v5, %v102_v16  ;;  %v236_v25 = vmax.f32 %v172_v17, 0.0  ;;  %v105_v26 = vmul.f32 %v958_v2, %v34_v12  ;;  %v48_v16 = vld [vmem:[%s1375_s0 + $0x110] sm:$0xff]  ;;  %v49_v17 = vld [vmem:[%s1375_s0 + $0x118] sm:$0xff] }
  0x13   :  { %v106_v27 = vmul.f32 %v958_v2, %v35_v13  ;;  %v776_v29 = vpack.c.bf16 %v235_v20, %v234_v15  ;;  %v174_v30 = vadd.f32 %v965_v5, %v103_v21  ;;  %v175_v31 = vadd.f32 %v965_v5, %v104_v22  ;;  %v50_v22 = vld [vmem:[%s1375_s0 + $0x120] sm:$0xff] }
  0x14   :  { %903 = vst [vmem:[%s1378_s3 + $0x30] sm:$0xff] %v771_v19   ;;  %v107_v32 = vmul.f32 %v958_v2, %v36_v18  ;;  %v237_v33 = vmax.f32 %v173_v24, 0.0  ;;  %v176_v34 = vadd.f32 %v965_v5, %v105_v26  ;;  %v108_v36 = vmul.f32 %v958_v2, %v37_v23  ;;  %v51_v23 = vld [vmem:[%s1375_s0 + $0x128] sm:$0xff] }
  0x15   :  { %v177_v35 = vadd.f32 %v965_v5, %v106_v27  ;;  %904 = vst [vmem:[%s1378_s3 + $0x38] sm:$0xff] %v776_v29   ;;  %v238_v38 = vmax.f32 %v174_v30, 0.0  ;;  %v239_v39 = vmax.f32 %v175_v31, 0.0  ;;  %v109_v41 = vmul.f32 %v958_v2, %v38_v28  ;;  %v52_v28 = vld [vmem:[%s1375_s0 + $0x130] sm:$0xff] }
  0x16   :  { %v178_v40 = vadd.f32 %v965_v5, %v107_v32  ;;  %v781_v44 = vpack.c.bf16 %v237_v33, %v236_v25  ;;  %v240_v45 = vmax.f32 %v176_v34, 0.0  ;;  %v179_v47 = vadd.f32 %v965_v5, %v108_v36  ;;  %v53_v33 = vld [vmem:[%s1375_s0 + $0x138] sm:$0xff] }
  0x17   :  { %v241_v46 = vmax.f32 %v177_v35, 0.0  ;;  %v786_v50 = vpack.c.bf16 %v239_v39, %v238_v38  ;;  %v110_v52 = vmul.f32 %v958_v2, %v39_v37  ;;  %v180_v53 = vadd.f32 %v965_v5, %v109_v41  ;;  %v54_v38 = vld [vmem:[%s1375_s0 + $0x140] sm:$0xff] }
  0x18   :  { %v242_v51 = vmax.f32 %v178_v40, 0.0  ;;  %905 = vst [vmem:[%s1378_s3 + $0x40] sm:$0xff] %v781_v44   ;;  %v243_v56 = vmax.f32 %v179_v47, 0.0  ;;  %v111_v57 = vmul.f32 %v958_v2, %v40_v42  ;;  %v112_v58 = vmul.f32 %v958_v2, %v41_v43  ;;  %v55_v47 = vld [vmem:[%s1375_s0 + $0x148] sm:$0xff] }
  0x19   :  { %v791_v55 = vpack.c.bf16 %v241_v46, %v240_v45  ;;  %906 = vst [vmem:[%s1378_s3 + $0x48] sm:$0xff] %v786_v50   ;;  %v181_v60 = vadd.f32 %v965_v5, %v110_v52  ;;  %v244_v61 = vmax.f32 %v180_v53, 0.0  ;;  %v113_v62 = vmul.f32 %v958_v2, %v42_v48  ;;  %v56_v52 = vld [vmem:[%s1375_s0 + $0x150] sm:$0xff]  ;;  %v57_v53 = vld [vmem:[%s1375_s0 + $0x158] sm:$0xff] }
  0x1a   :  { %v114_v63 = vmul.f32 %v958_v2, %v43_v49  ;;  %v796_v1 = vpack.c.bf16 %v243_v56, %v242_v51  ;;  %v182_v3 = vadd.f32 %v965_v5, %v111_v57  ;;  %v183_v4 = vadd.f32 %v965_v5, %v112_v58  ;;  %v58_v58 = vld [vmem:[%s1375_s0 + $0x160] sm:$0xff] }
  0x1b   :  { %907 = vst [vmem:[%s1378_s3 + $0x50] sm:$0xff] %v791_v55   ;;  %v115_v6 = vmul.f32 %v958_v2, %v44_v54  ;;  %v245_v7 = vmax.f32 %v181_v60, 0.0  ;;  %v184_v8 = vadd.f32 %v965_v5, %v113_v62  ;;  %v116_v10 = vmul.f32 %v958_v2, %v45_v59  ;;  %v59_v59 = vld [vmem:[%s1375_s0 + $0x168] sm:$0xff] }
  0x1c   :  { %v185_v9 = vadd.f32 %v965_v5, %v114_v63  ;;  %908 = vst [vmem:[%s1378_s3 + $0x58] sm:$0xff] %v796_v1   ;;  %v246_v12 = vmax.f32 %v182_v3, 0.0  ;;  %v247_v13 = vmax.f32 %v183_v4, 0.0  ;;  %v117_v15 = vmul.f32 %v958_v2, %v46_v0  ;;  %v60_v0 = vld [vmem:[%s1375_s0 + $0x170] sm:$0xff] }
  0x1d   :  { %v186_v14 = vadd.f32 %v965_v5, %v115_v6  ;;  %v801_v18 = vpack.c.bf16 %v245_v7, %v244_v61  ;;  %v248_v19 = vmax.f32 %v184_v8, 0.0  ;;  %v187_v21 = vadd.f32 %v965_v5, %v116_v10  ;;  %v61_v7 = vld [vmem:[%s1375_s0 + $0x178] sm:$0xff] }
  0x1e   :  { %v249_v20 = vmax.f32 %v185_v9, 0.0  ;;  %v806_v24 = vpack.c.bf16 %v247_v13, %v246_v12  ;;  %v118_v26 = vmul.f32 %v958_v2, %v47_v11  ;;  %v188_v27 = vadd.f32 %v965_v5, %v117_v15  ;;  %v62_v12 = vld [vmem:[%s1375_s0 + $0x180] sm:$0xff] }
  0x1f   :  { %v250_v25 = vmax.f32 %v186_v14, 0.0  ;;  %909 = vst [vmem:[%s1378_s3 + $0x60] sm:$0xff] %v801_v18   ;;  %v251_v30 = vmax.f32 %v187_v21, 0.0  ;;  %v119_v31 = vmul.f32 %v958_v2, %v48_v16  ;;  %v120_v32 = vmul.f32 %v958_v2, %v49_v17  ;;  %v63_v21 = vld [vmem:[%s1375_s0 + $0x188] sm:$0xff] }
  0x20   :  { %v811_v29 = vpack.c.bf16 %v249_v20, %v248_v19  ;;  %910 = vst [vmem:[%s1378_s3 + $0x68] sm:$0xff] %v806_v24   ;;  %v189_v34 = vadd.f32 %v965_v5, %v118_v26  ;;  %v252_v35 = vmax.f32 %v188_v27, 0.0  ;;  %v121_v36 = vmul.f32 %v958_v2, %v50_v22  ;;  %v64_v26 = vld [vmem:[%s1375_s0 + $0x190] sm:$0xff]  ;;  %v65_v27 = vld [vmem:[%s1375_s0 + $0x198] sm:$0xff] }
  0x21   :  { %v122_v37 = vmul.f32 %v958_v2, %v51_v23  ;;  %v816_v39 = vpack.c.bf16 %v251_v30, %v250_v25  ;;  %v190_v40 = vadd.f32 %v965_v5, %v119_v31  ;;  %v191_v41 = vadd.f32 %v965_v5, %v120_v32  ;;  %v66_v32 = vld [vmem:[%s1375_s0 + $0x1a0] sm:$0xff] }
  0x22   :  { %911 = vst [vmem:[%s1378_s3 + $0x70] sm:$0xff] %v811_v29   ;;  %v123_v42 = vmul.f32 %v958_v2, %v52_v28  ;;  %v253_v43 = vmax.f32 %v189_v34, 0.0  ;;  %v192_v44 = vadd.f32 %v965_v5, %v121_v36  ;;  %v124_v46 = vmul.f32 %v958_v2, %v53_v33  ;;  %v67_v33 = vld [vmem:[%s1375_s0 + $0x1a8] sm:$0xff] }
  0x23   :  { %v193_v45 = vadd.f32 %v965_v5, %v122_v37  ;;  %912 = vst [vmem:[%s1378_s3 + $0x78] sm:$0xff] %v816_v39   ;;  %v254_v48 = vmax.f32 %v190_v40, 0.0  ;;  %v255_v49 = vmax.f32 %v191_v41, 0.0  ;;  %v125_v51 = vmul.f32 %v958_v2, %v54_v38  ;;  %v68_v38 = vld [vmem:[%s1375_s0 + $0x1b0] sm:$0xff] }
  0x24   :  { %v194_v50 = vadd.f32 %v965_v5, %v123_v42  ;;  %v821_v54 = vpack.c.bf16 %v253_v43, %v252_v35  ;;  %v256_v55 = vmax.f32 %v192_v44, 0.0  ;;  %v195_v57 = vadd.f32 %v965_v5, %v124_v46  ;;  %v69_v43 = vld [vmem:[%s1375_s0 + $0x1b8] sm:$0xff] }
  0x25   :  { %v257_v56 = vmax.f32 %v193_v45, 0.0  ;;  %v826_v60 = vpack.c.bf16 %v255_v49, %v254_v48  ;;  %v126_v62 = vmul.f32 %v958_v2, %v55_v47  ;;  %v196_v63 = vadd.f32 %v965_v5, %v125_v51  ;;  %v70_v48 = vld [vmem:[%s1375_s0 + $0x1c0] sm:$0xff] }
  0x26   :  { %v258_v61 = vmax.f32 %v194_v50, 0.0  ;;  %913 = vst [vmem:[%s1378_s3 + $0x80] sm:$0xff] %v821_v54   ;;  %v259_v3 = vmax.f32 %v195_v57, 0.0  ;;  %v127_v4 = vmul.f32 %v958_v2, %v56_v52  ;;  %v128_v6 = vmul.f32 %v958_v2, %v57_v53  ;;  %v71_v57 = vld [vmem:[%s1375_s0 + $0x1c8] sm:$0xff] }
  0x27   :  { %v831_v1 = vpack.c.bf16 %v257_v56, %v256_v55  ;;  %914 = vst [vmem:[%s1378_s3 + $0x88] sm:$0xff] %v826_v60   ;;  %v197_v8 = vadd.f32 %v965_v5, %v126_v62  ;;  %v260_v9 = vmax.f32 %v196_v63, 0.0  ;;  %v129_v10 = vmul.f32 %v958_v2, %v58_v58  ;;  %v72_v62 = vld [vmem:[%s1375_s0 + $0x1d0] sm:$0xff]  ;;  %v73_v63 = vld [vmem:[%s1375_s0 + $0x1d8] sm:$0xff] }
  0x28   :  { %v130_v11 = vmul.f32 %v958_v2, %v59_v59  ;;  %v836_v13 = vpack.c.bf16 %v259_v3, %v258_v61  ;;  %v198_v14 = vadd.f32 %v965_v5, %v127_v4  ;;  %v199_v15 = vadd.f32 %v965_v5, %v128_v6  ;;  %v74_v6 = vld [vmem:[%s1375_s0 + $0x1e0] sm:$0xff] }
  0x29   :  { %915 = vst [vmem:[%s1378_s3 + $0x90] sm:$0xff] %v831_v1   ;;  %v131_v16 = vmul.f32 %v958_v2, %v60_v0  ;;  %v261_v17 = vmax.f32 %v197_v8, 0.0  ;;  %v200_v18 = vadd.f32 %v965_v5, %v129_v10  ;;  %v132_v20 = vmul.f32 %v958_v2, %v61_v7  ;;  %v75_v7 = vld [vmem:[%s1375_s0 + $0x1e8] sm:$0xff] }
  0x2a   :  { %v201_v19 = vadd.f32 %v965_v5, %v130_v11  ;;  %916 = vst [vmem:[%s1378_s3 + $0x98] sm:$0xff] %v836_v13   ;;  %v262_v22 = vmax.f32 %v198_v14, 0.0  ;;  %v263_v23 = vmax.f32 %v199_v15, 0.0  ;;  %v133_v25 = vmul.f32 %v958_v2, %v62_v12  ;;  %v76_v12 = vld [vmem:[%s1375_s0 + $0x1f0] sm:$0xff] }
  0x2b   :  { %v202_v24 = vadd.f32 %v965_v5, %v131_v16  ;;  %v841_v28 = vpack.c.bf16 %v261_v17, %v260_v9  ;;  %v264_v29 = vmax.f32 %v200_v18, 0.0  ;;  %v203_v31 = vadd.f32 %v965_v5, %v132_v20  ;;  %v77_v17 = vld [vmem:[%s1375_s0 + $0x1f8] sm:$0xff] }
  0x2c   :  { %v265_v30 = vmax.f32 %v201_v19, 0.0  ;;  %v846_v34 = vpack.c.bf16 %v263_v23, %v262_v22  ;;  %v134_v36 = vmul.f32 %v958_v2, %v63_v21  ;;  %v204_v37 = vadd.f32 %v965_v5, %v133_v25 }
  0x2d   :  { %v266_v35 = vmax.f32 %v202_v24, 0.0  ;;  %917 = vst [vmem:[%s1378_s3 + $0xa0] sm:$0xff] %v841_v28   ;;  %v267_v40 = vmax.f32 %v203_v31, 0.0  ;;  %v135_v41 = vmul.f32 %v958_v2, %v64_v26  ;;  %v136_v42 = vmul.f32 %v958_v2, %v65_v27 }
  0x2e   :  { %v851_v39 = vpack.c.bf16 %v265_v30, %v264_v29  ;;  %918 = vst [vmem:[%s1378_s3 + $0xa8] sm:$0xff] %v846_v34   ;;  %v205_v44 = vadd.f32 %v965_v5, %v134_v36  ;;  %v268_v45 = vmax.f32 %v204_v37, 0.0  ;;  %v137_v46 = vmul.f32 %v958_v2, %v66_v32 }
  0x2f   :  { %v138_v47 = vmul.f32 %v958_v2, %v67_v33  ;;  %v856_v49 = vpack.c.bf16 %v267_v40, %v266_v35  ;;  %v206_v50 = vadd.f32 %v965_v5, %v135_v41  ;;  %v207_v51 = vadd.f32 %v965_v5, %v136_v42 }
  0x30   :  { %919 = vst [vmem:[%s1378_s3 + $0xb0] sm:$0xff] %v851_v39   ;;  %v139_v52 = vmul.f32 %v958_v2, %v68_v38  ;;  %v269_v53 = vmax.f32 %v205_v44, 0.0  ;;  %v208_v54 = vadd.f32 %v965_v5, %v137_v46  ;;  %v140_v56 = vmul.f32 %v958_v2, %v69_v43 }
  0x31   :  { %v209_v55 = vadd.f32 %v965_v5, %v138_v47  ;;  %920 = vst [vmem:[%s1378_s3 + $0xb8] sm:$0xff] %v856_v49   ;;  %v270_v58 = vmax.f32 %v206_v50, 0.0  ;;  %v271_v59 = vmax.f32 %v207_v51, 0.0  ;;  %v141_v61 = vmul.f32 %v958_v2, %v70_v48 }
  0x32   :  { %v210_v60 = vadd.f32 %v965_v5, %v139_v52  ;;  %v861_v0 = vpack.c.bf16 %v269_v53, %v268_v45  ;;  %v272_v1 = vmax.f32 %v208_v54, 0.0  ;;  %v211_v4 = vadd.f32 %v965_v5, %v140_v56 }
  0x33   :  { %v273_v3 = vmax.f32 %v209_v55, 0.0  ;;  %v866_v8 = vpack.c.bf16 %v271_v59, %v270_v58  ;;  %v142_v10 = vmul.f32 %v958_v2, %v71_v57  ;;  %v212_v11 = vadd.f32 %v965_v5, %v141_v61 }
  0x34   :  { %v274_v9 = vmax.f32 %v210_v60, 0.0  ;;  %921 = vst [vmem:[%s1378_s3 + $0xc0] sm:$0xff] %v861_v0   ;;  %v275_v14 = vmax.f32 %v211_v4, 0.0  ;;  %v143_v15 = vmul.f32 %v958_v2, %v72_v62  ;;  %v144_v16 = vmul.f32 %v958_v2, %v73_v63 }
  0x35   :  { %v871_v13 = vpack.c.bf16 %v273_v3, %v272_v1  ;;  %922 = vst [vmem:[%s1378_s3 + $0xc8] sm:$0xff] %v866_v8   ;;  %v213_v18 = vadd.f32 %v965_v5, %v142_v10  ;;  %v276_v19 = vmax.f32 %v212_v11, 0.0  ;;  %v145_v20 = vmul.f32 %v958_v2, %v74_v6 }
  0x36   :  { %v146_v21 = vmul.f32 %v958_v2, %v75_v7  ;;  %v876_v22 = vpack.c.bf16 %v275_v14, %v274_v9  ;;  %v214_v23 = vadd.f32 %v965_v5, %v143_v15  ;;  %v215_v24 = vadd.f32 %v965_v5, %v144_v16 }
  0x37   :  { %923 = vst [vmem:[%s1378_s3 + $0xd0] sm:$0xff] %v871_v13   ;;  %v147_v25 = vmul.f32 %v958_v2, %v76_v12  ;;  %v277_v26 = vmax.f32 %v213_v18, 0.0  ;;  %v216_v27 = vadd.f32 %v965_v5, %v145_v20  ;;  %v148_v29 = vmul.f32 %v958_v2, %v77_v17 }
  0x38   :  { %v217_v28 = vadd.f32 %v965_v5, %v146_v21  ;;  %924 = vst [vmem:[%s1378_s3 + $0xd8] sm:$0xff] %v876_v22   ;;  %v278_v30 = vmax.f32 %v214_v23, 0.0  ;;  %v279_v31 = vmax.f32 %v215_v24, 0.0 }
  0x39   :  { %v218_v32 = vadd.f32 %v965_v5, %v147_v25  ;;  %v881_v33 = vpack.c.bf16 %v277_v26, %v276_v19  ;;  %v280_v34 = vmax.f32 %v216_v27, 0.0  ;;  %v219_v36 = vadd.f32 %v965_v5, %v148_v29 }
  0x3a   :  { %v281_v35 = vmax.f32 %v217_v28, 0.0  ;;  %v886_v37 = vpack.c.bf16 %v279_v31, %v278_v30 }
  0x3b   :  { %v282_v38 = vmax.f32 %v218_v32, 0.0  ;;  %925 = vst [vmem:[%s1378_s3 + $0xe0] sm:$0xff] %v881_v33   ;;  %v283_v39 = vmax.f32 %v219_v36, 0.0 }
  0x3c   :  { %v891_v2 = vpack.c.bf16 %v281_v35, %v280_v34  ;;  %926 = vst [vmem:[%s1378_s3 + $0xe8] sm:$0xff] %v886_v37  }
  0x3d   :  { %v896_v40 = vpack.c.bf16 %v283_v39, %v282_v38 }
  0x3e   :  { %927 = vst [vmem:[%s1378_s3 + $0xf0] sm:$0xff] %v891_v2  }
  0x3f   :  { %928 = vst [vmem:[%s1378_s3 + $0xf8] sm:$0xff] %v896_v40  }

// kernel: generator_forward.17
= control target key start
LH: loop header
LB: loop body
LE: loop exit
PB: predicated region body
PF: predicated region fallthrough
CT: control target
= control target key end

     0   :  { %10 = vsyncpa [#allocation3], 0  ;;  %s3324_s0 = inlined_call_operand.vmem [shape: bf16[8192,512], index: 0, kind: input, shape index: {}]   ;;  %s3325_s1 = inlined_call_operand.vmem [shape: bf16[512,3], index: 1, kind: input, shape index: {}]   ;;  %s3326_s2 = inlined_call_operand.vmem [shape: f32[8192,3], index: 2, kind: output, shape index: {0}]   ;;  %s3327_s3 = inlined_call_operand.hbm [shape: f32[256,3], index: 3, kind: output, shape index: {1}]   ;;  %s3328_s4 = inlined_call_operand.hbm [shape: f32[256,3], index: 4, kind: output, shape index: {2}]  }
   0x1   :  { %12 = vsyncpa [#allocation3 + $0x1], 0 }
   0x2   :  { %13 = vsyncpa [#allocation5], 0 }
   0x3   :  { %15 = vsyncpa [#allocation5 + $0x1], 0  ;;  %s2567_s15 = smov 0   ;;  %s2569_s16 = smov 0  }
   0x4   :  { %s2571_s17 = smov 0   ;;  %s2573_s18 = smov 0  }
   0x5   :  { %s2575_s19 = smov 0   ;;  %s2577_s20 = smov 0  }
   0x6 LB: > { %s1834_s21 = sadd.s32 4294967295, %s2537_s20   ;;  %s1835_s22 = sadd.s32 4294967294, %s2537_s20   ;;  %s2537_s20 = sphi %s2577_s20, %s21_s20   ;;  %s2533_s19 = sphi %s2575_s19, %s3335_s19   ;;  %s2529_s18 = sphi %s2573_s18, %s3334_s18   ;;  %s2525_s17 = sphi %s2571_s17, %s3333_s17   ;;  %s2521_s16 = sphi %s2569_s16, %s3332_s16   ;;  %s2517_s15 = sphi %s2567_s15, %s3331_s15  }
   0x7   : > { %s33_s23 = sadd.s32 1, %s2533_s19  ;;  %s120_s24 = sadd.s32 1, %s2525_s17 }
   0x8   : > { %p35_p0 = scmp.ge.s32.totalorder %s33_s23, 32  ;;  %p130_p1 = scmp.ne.s32.totalorder %s2525_s17, %s2521_s16 }
   0x9   : > { %p131_p2 = scmp.eq.s32.totalorder %s1834_s21, 31  ;;  %p136_p3 = scmp.ne.s32.totalorder %s2521_s16, %s2517_s15 }
   0xa   : > { %s3337_s23 = smov (%p35_p0, %s33_s23), 0  ;;  %p137_p5 = scmp.eq.s32.totalorder %s1835_s22, 31 }
   0xb   : > { %p2607_p4 = por %p131_p2, %p130_p1  ;;  %s117_s26 = ssub.s32 %s2533_s19, %s3337_s23 }
   0xc   : > { %p1839_p6 = scmp.ge.s32.totalorder %s2537_s20, 1  ;;  %p118_p7 = scmp.eq.s32.totalorder %s117_s26, 0 }
   0xd   : > { %p2614_p8 = por %p137_p5, %p136_p3  ;;  %p205_p9 = scmp.lt.s32.totalorder %s2537_s20, 33 }
   0xe   : > { %s2620_s28 = scalar_select %p118_p7, %s2525_s17, %s120_s24  }
   0xf   : > { %p206_p10 = pnand %p1839_p6, %p205_p9 }
  0x10   : > { %v2235_v0 = vld [vmem:[%s3325_s1 + $0x40] sm:$0xff] (!%p206_p10)   ;;  %v2239_v4 = vld [vmem:[%s3325_s1 + $0x48] sm:$0xff] (!%p206_p10)   ;;  %v2243_v8 = vld [vmem:[%s3325_s1 + $0x50] sm:$0xff] (!%p206_p10)   ;;  %s1842_s29 = sshll.u32 (!%p206_p10), %s2529_s18, 5  ;;  %vm280_vm0 = vcmask (!%p206_p10), 23552   ;;  %s1945_s21 = sshll.u32 (!%p206_p10), %s2529_s18, 7 }
  0x11   : > { %209 = sbr.rel (%p206_p10) target bundleno = 455 (0x1c7), region = 28  ;;  %v2236_v1 = vld [vmem:[%s3325_s1 + $0xc0] sm:$0xff] (!%p206_p10)   ;;  %1950 = vmatprep.subr.bf16.mxu0 (!%p206_p10), %v2235_v0  ;;  %v2240_v5 = vld [vmem:[%s3325_s1 + $0xc8] sm:$0xff] (!%p206_p10)   ;;  %v2244_v9 = vld [vmem:[%s3325_s1 + $0xd0] sm:$0xff] (!%p206_p10)   ;;  %p253_p11 = scmp.lt.s32.totalorder (!%p206_p10), %s1842_s29, 1023 }
  0x12   : > { %v2237_v2 = vld [vmem:[%s3325_s1] sm:$0xff] (!%p206_p10)   ;;  %2062 = vmatprep.subr.bf16.mxu1 (!%p206_p10), %v2236_v1  ;;  %v2241_v6 = vld [vmem:[%s3325_s1 + $0x8] sm:$0xff] (!%p206_p10)   ;;  %v2245_v10 = vld [vmem:[%s3325_s1 + $0x10] sm:$0xff] (!%p206_p10)   ;;  %s3242_s7 = scalar_lea.hbm (!%p206_p10), %s3327_s3, %s1945_s21  ;;  %s3251_s9 = scalar_lea.hbm (!%p206_p10), %s3328_s4, %s1945_s21 }
  0x13   : > { %v2238_v3 = vld [vmem:[%s3325_s1 + $0x80] sm:$0xff] (!%p206_p10)   ;;  %1951 = vmatpush3.bf16.msra.mxu0 (!%p206_p10), %v2237_v2  ;;  %v2242_v7 = vld [vmem:[%s3325_s1 + $0x88] sm:$0xff] (!%p206_p10)   ;;  %v2246_v11 = vld [vmem:[%s3325_s1 + $0x90] sm:$0xff] (!%p206_p10)   ;;  %s2540_s12 = smov (!%p206_p10), [#allocation2]  }
  0x14   : > { %2063 = vmatpush3.bf16.msra.mxu1 (!%p206_p10), %v2238_v3  ;;  %1952 = vmatprep.subr.bf16.mxu0 (!%p206_p10), %v2239_v4  ;;  %v2247_v12 = vld [vmem:[%s3325_s1 + $0x58] sm:$0xff] (!%p206_p10)   ;;  %v2251_v16 = vld [vmem:[%s3325_s1 + $0x60] sm:$0xff] (!%p206_p10)   ;;  %v2255_v20 = vld [vmem:[%s3325_s1 + $0x68] sm:$0xff] (!%p206_p10)  }
  0x15   : > { %2064 = vmatprep.subr.bf16.mxu1 (!%p206_p10), %v2240_v5  ;;  %v2248_v13 = vld [vmem:[%s3325_s1 + $0xd8] sm:$0xff] (!%p206_p10)   ;;  %v2252_v17 = vld [vmem:[%s3325_s1 + $0xe0] sm:$0xff] (!%p206_p10)   ;;  %v2256_v21 = vld [vmem:[%s3325_s1 + $0xe8] sm:$0xff] (!%p206_p10)  }
  0x16   : > { %v2249_v14 = vld [vmem:[%s3325_s1 + $0x18] sm:$0xff] (!%p206_p10)   ;;  %v2253_v18 = vld [vmem:[%s3325_s1 + $0x20] sm:$0xff] (!%p206_p10)   ;;  %v2257_v22 = vld [vmem:[%s3325_s1 + $0x28] sm:$0xff] (!%p206_p10)  }
  0x17   : > { %1953 = vmatpush3.bf16.msra.mxu0 (!%p206_p10), %v2241_v6  ;;  %v2250_v15 = vld [vmem:[%s3325_s1 + $0x98] sm:$0xff] (!%p206_p10)   ;;  %v2254_v19 = vld [vmem:[%s3325_s1 + $0xa0] sm:$0xff] (!%p206_p10)   ;;  %v2258_v23 = vld [vmem:[%s3325_s1 + $0xa8] sm:$0xff] (!%p206_p10)  }
  0x18   : > { %2065 = vmatpush3.bf16.msra.mxu1 %v2242_v7  ;;  %1954 = vmatprep.subr.bf16.mxu0 %v2243_v8  ;;  %s3339_s29 = smov (!%p253_p11, %s1842_s29), 1023  ;;  %v2259_v24 = vld [vmem:[%s3325_s1 + $0x70] sm:$0xff]   ;;  %v2263_v28 = vld [vmem:[%s3325_s1 + $0x78] sm:$0xff]  }
  0x19   : > { %2066 = vmatprep.subr.bf16.mxu1 %v2244_v9  ;;  %v2260_v25 = vld [vmem:[%s3325_s1 + $0xf0] sm:$0xff]   ;;  %s1949_s11 = sshll.u32 %s3339_s29, 4  ;;  %v2264_v29 = vld [vmem:[%s3325_s1 + $0xf8] sm:$0xff]   ;;  %s1846_s10 = sshll.u32 %s3339_s29, 3 }
  0x1a   : > { %v2261_v26 = vld [vmem:[%s3325_s1 + $0x30] sm:$0xff]   ;;  %s2719_s5 = scalar_lea.vmem %s3324_s0, %s1949_s11  ;;  %v2265_v30 = vld [vmem:[%s3325_s1 + $0x38] sm:$0xff]   ;;  %s2777_s13 = scalar_lea.vmem %s3326_s2, %s1846_s10 }
  0x1b   : > { %1955 = vmatpush3.bf16.msra.mxu0 %v2245_v10  ;;  %v2262_v27 = vld [vmem:[%s3325_s1 + $0xb0] sm:$0xff]   ;;  %v2266_v31 = vld [vmem:[%s3325_s1 + $0xb8] sm:$0xff]   ;;  %s3225_s29 = sand.u32 1, %s2521_s16  }
  0x1c   : > { %2067 = vmatpush3.bf16.msra.mxu1 %v2246_v11  ;;  %1956 = vmatprep.subr.bf16.mxu0 %v2247_v12  ;;  %v2267_v32 = vld [vmem:[%s2719_s5] ss:$16 sps:$4 sm:$0xff]   ;;  %v2269_v33 = vld [vmem:[%s2719_s5 + $0x4] ss:$16 sps:$4 sm:$0xff]   ;;  %v2270_v34 = vld [vmem:[%s2719_s5 + $0x8] ss:$16 sps:$4 sm:$0xff]  }
  0x1d   : > { %2068 = vmatprep.subr.bf16.mxu1 %v2248_v13  ;;  %v2272_v35 = vld [vmem:[%s2719_s5 + $0xc] ss:$16 sps:$4 sm:$0xff]   ;;  %1017 = vmatprep.mubr.bf16.mxu0 %v2269_v33  ;;  %v2273_v36 = vld [vmem:[%s2719_s5 + $0x24] ss:$16 sps:$4 sm:$0xff]   ;;  %v2277_v38 = vld [vmem:[%s2719_s5 + $0x20] ss:$16 sps:$4 sm:$0xff]  }
  0x1e   : > { %1178 = vmatprep.mubr.bf16.mxu1 %v2272_v35  ;;  %v2275_v37 = vld [vmem:[%s2719_s5 + $0x2c] ss:$16 sps:$4 sm:$0xff]   ;;  %v2278_v39 = vld [vmem:[%s2719_s5 + $0x28] ss:$16 sps:$4 sm:$0xff]   ;;  %v2279_v40 = vld [vmem:[%s2719_s5 + $0x44] ss:$16 sps:$4 sm:$0xff]  }
  0x1f   : > { %1957 = vmatpush3.bf16.msra.mxu0 %v2249_v14  ;;  %v2281_v41 = vld [vmem:[%s2719_s5 + $0x4c] ss:$16 sps:$4 sm:$0xff]   ;;  %v2283_v42 = vld [vmem:[%s2719_s5 + $0x40] ss:$16 sps:$4 sm:$0xff]   ;;  %v2284_v43 = vld [vmem:[%s2719_s5 + $0x48] ss:$16 sps:$4 sm:$0xff]  }
  0x20   : > { %2069 = vmatpush3.bf16.msra.mxu1 %v2250_v15  ;;  %1958 = vmatprep.subr.bf16.mxu0 %v2251_v16  ;;  %v2285_v44 = vld [vmem:[%s2719_s5 + $0x64] ss:$16 sps:$4 sm:$0xff]   ;;  %v2287_v45 = vld [vmem:[%s2719_s5 + $0x6c] ss:$16 sps:$4 sm:$0xff]   ;;  %v2289_v46 = vld [vmem:[%s2719_s5 + $0x60] ss:$16 sps:$4 sm:$0xff]  }
  0x21   : > { %2070 = vmatprep.subr.bf16.mxu1 %v2252_v17  ;;  %v2290_v47 = vld [vmem:[%s2719_s5 + $0x68] ss:$16 sps:$4 sm:$0xff]   ;;  %v2291_v48 = vld [vmem:[%s2719_s5 + $0x84] ss:$16 sps:$4 sm:$0xff]   ;;  %v2293_v49 = vld [vmem:[%s2719_s5 + $0x8c] ss:$16 sps:$4 sm:$0xff]  }
  0x22   : > { %v2295_v50 = vld [vmem:[%s2719_s5 + $0x80] ss:$16 sps:$4 sm:$0xff]   ;;  %v2296_v51 = vld [vmem:[%s2719_s5 + $0x88] ss:$16 sps:$4 sm:$0xff]   ;;  %v2297_v52 = vld [vmem:[%s2719_s5 + $0xa4] ss:$16 sps:$4 sm:$0xff]  }
  0x23   : > { %1959 = vmatpush3.bf16.msra.mxu0 %v2253_v18  ;;  %v2299_v53 = vld [vmem:[%s2719_s5 + $0xac] ss:$16 sps:$4 sm:$0xff]   ;;  %v2301_v54 = vld [vmem:[%s2719_s5 + $0xa0] ss:$16 sps:$4 sm:$0xff]   ;;  %v2302_v55 = vld [vmem:[%s2719_s5 + $0xa8] ss:$16 sps:$4 sm:$0xff]  }
  0x24   : > { %2071 = vmatpush3.bf16.msra.mxu1 %v2254_v19  ;;  %1960 = vmatprep.subr.bf16.mxu0 %v2255_v20  ;;  %v2303_v56 = vld [vmem:[%s2719_s5 + $0xc4] ss:$16 sps:$4 sm:$0xff]   ;;  %v2305_v57 = vld [vmem:[%s2719_s5 + $0xcc] ss:$16 sps:$4 sm:$0xff]   ;;  %v2307_v58 = vld [vmem:[%s2719_s5 + $0xc0] ss:$16 sps:$4 sm:$0xff]  }
  0x25   : > { %2072 = vmatprep.subr.bf16.mxu1 %v2256_v21  ;;  %v2308_v59 = vld [vmem:[%s2719_s5 + $0xc8] ss:$16 sps:$4 sm:$0xff]   ;;  %v2309_v60 = vld [vmem:[%s2719_s5 + $0xe4] ss:$16 sps:$4 sm:$0xff]   ;;  %v2311_v61 = vld [vmem:[%s2719_s5 + $0xec] ss:$16 sps:$4 sm:$0xff]  }
  0x26   : > { %v2313_v62 = vld [vmem:[%s2719_s5 + $0xe0] ss:$16 sps:$4 sm:$0xff]   ;;  %v2314_v63 = vld [vmem:[%s2719_s5 + $0xe8] ss:$16 sps:$4 sm:$0xff]   ;;  %v2315_v0 = vld [vmem:[%s2719_s5 + $0x104] ss:$16 sps:$4 sm:$0xff]  }
  0x27   : > { %1961 = vmatpush3.bf16.msra.mxu0 %v2257_v22  ;;  %v2317_v1 = vld [vmem:[%s2719_s5 + $0x10c] ss:$16 sps:$4 sm:$0xff]   ;;  %v2319_v2 = vld [vmem:[%s2719_s5 + $0x100] ss:$16 sps:$4 sm:$0xff]   ;;  %v2320_v3 = vld [vmem:[%s2719_s5 + $0x108] ss:$16 sps:$4 sm:$0xff]  }
  0x28   : > { %2073 = vmatpush3.bf16.msra.mxu1 %v2258_v23  ;;  %1962 = vmatprep.subr.bf16.mxu0 %v2259_v24  ;;  %v2321_v4 = vld [vmem:[%s2719_s5 + $0x124] ss:$16 sps:$4 sm:$0xff]   ;;  %v2323_v5 = vld [vmem:[%s2719_s5 + $0x12c] ss:$16 sps:$4 sm:$0xff]   ;;  %v2325_v6 = vld [vmem:[%s2719_s5 + $0x120] ss:$16 sps:$4 sm:$0xff]  }
  0x29   : > { %2074 = vmatprep.subr.bf16.mxu1 %v2260_v25  ;;  %v2326_v7 = vld [vmem:[%s2719_s5 + $0x128] ss:$16 sps:$4 sm:$0xff]   ;;  %v2327_v8 = vld [vmem:[%s2719_s5 + $0x144] ss:$16 sps:$4 sm:$0xff]   ;;  %v2329_v9 = vld [vmem:[%s2719_s5 + $0x14c] ss:$16 sps:$4 sm:$0xff]  }
  0x2a   : > { %v2331_v10 = vld [vmem:[%s2719_s5 + $0x140] ss:$16 sps:$4 sm:$0xff]   ;;  %v2332_v11 = vld [vmem:[%s2719_s5 + $0x148] ss:$16 sps:$4 sm:$0xff]   ;;  %v2333_v12 = vld [vmem:[%s2719_s5 + $0x164] ss:$16 sps:$4 sm:$0xff]  }
  0x2b   : > { %1963 = vmatpush3.bf16.msra.mxu0 %v2261_v26  ;;  %v2335_v13 = vld [vmem:[%s2719_s5 + $0x16c] ss:$16 sps:$4 sm:$0xff]   ;;  %v2539_v14 = vmov 0.0   ;;  %v2337_v15 = vld [vmem:[%s2719_s5 + $0x160] ss:$16 sps:$4 sm:$0xff]   ;;  %s1840_s14 = sshll.u32 %s3225_s29, 3 }
  0x2c   : > { %2075 = vmatpush3.bf16.msra.mxu1 %v2262_v27  ;;  %1964 = vmatprep.subr.bf16.mxu0 %v2263_v28  ;;  %281 = vst.msk [vmem:[%s2777_s13] sm:$0xff] %vm280_vm0, %v2539_v14  ;;  %282 = vst.msk [vmem:[%s2777_s13 + $0x8] sm:$0xff] %vm280_vm0, %v2539_v14  ;;  %v2338_v16 = vld [vmem:[%s2719_s5 + $0x168] ss:$16 sps:$4 sm:$0xff]   ;;  %v2339_v17 = vld [vmem:[%s2719_s5 + $0x184] ss:$16 sps:$4 sm:$0xff]  }
  0x2d   : > { %2076 = vmatprep.subr.bf16.mxu1 %v2264_v29  ;;  %283 = vst.msk [vmem:[%s2777_s13 + $0x10] sm:$0xff] %vm280_vm0, %v2539_v14  ;;  %284 = vst.msk [vmem:[%s2777_s13 + $0x18] sm:$0xff] %vm280_vm0, %v2539_v14  ;;  %v2341_v18 = vld [vmem:[%s2719_s5 + $0x18c] ss:$16 sps:$4 sm:$0xff]   ;;  %v2343_v19 = vld [vmem:[%s2719_s5 + $0x180] ss:$16 sps:$4 sm:$0xff]  }
  0x2e   : > { %285 = vst.msk [vmem:[%s2777_s13 + $0x20] sm:$0xff] %vm280_vm0, %v2539_v14  ;;  %286 = vst.msk [vmem:[%s2777_s13 + $0x28] sm:$0xff] %vm280_vm0, %v2539_v14  ;;  %v2344_v20 = vld [vmem:[%s2719_s5 + $0x188] ss:$16 sps:$4 sm:$0xff]   ;;  %v2345_v21 = vld [vmem:[%s2719_s5 + $0x1a4] ss:$16 sps:$4 sm:$0xff]  }
  0x2f   : > { %1965 = vmatpush3.bf16.msra.mxu0 %v2265_v30  ;;  %287 = vst.msk [vmem:[%s2777_s13 + $0x30] sm:$0xff] %vm280_vm0, %v2539_v14  ;;  %288 = vst.msk [vmem:[%s2777_s13 + $0x38] sm:$0xff] %vm280_vm0, %v2539_v14  ;;  %v2347_v22 = vld [vmem:[%s2719_s5 + $0x1ac] ss:$16 sps:$4 sm:$0xff]   ;;  %v2349_v23 = vld [vmem:[%s2719_s5 + $0x1a0] ss:$16 sps:$4 sm:$0xff]  }
  0x30   : > { %2077 = vmatpush3.bf16.msra.mxu1 %v2266_v31  ;;  %289 = vst.msk [vmem:[%s2777_s13 + $0x40] sm:$0xff] %vm280_vm0, %v2539_v14  ;;  %290 = vst.msk [vmem:[%s2777_s13 + $0x48] sm:$0xff] %vm280_vm0, %v2539_v14  ;;  %v2350_v24 = vld [vmem:[%s2719_s5 + $0x1a8] ss:$16 sps:$4 sm:$0xff]   ;;  %v2351_v25 = vld [vmem:[%s2719_s5 + $0x1c4] ss:$16 sps:$4 sm:$0xff]  }
  0x31   : > { %291 = vst.msk [vmem:[%s2777_s13 + $0x50] sm:$0xff] %vm280_vm0, %v2539_v14  ;;  %292 = vst.msk [vmem:[%s2777_s13 + $0x58] sm:$0xff] %vm280_vm0, %v2539_v14  ;;  %v2353_v26 = vld [vmem:[%s2719_s5 + $0x1cc] ss:$16 sps:$4 sm:$0xff]   ;;  %v2355_v27 = vld [vmem:[%s2719_s5 + $0x1c0] ss:$16 sps:$4 sm:$0xff]  }
  0x32   : > { %1018 = vmatmul.mubr.bf16.vlgmr.msra.gmra.mrb[0].mxu0 %v2267_v32  ;;  %293 = vst.msk [vmem:[%s2777_s13 + $0x60] sm:$0xff] %vm280_vm0, %v2539_v14  ;;  %294 = vst.msk [vmem:[%s2777_s13 + $0x68] sm:$0xff] %vm280_vm0, %v2539_v14  ;;  %v2356_v28 = vld [vmem:[%s2719_s5 + $0x1c8] ss:$16 sps:$4 sm:$0xff]   ;;  %v2357_v29 = vld [vmem:[%s2719_s5 + $0x1e4] ss:$16 sps:$4 sm:$0xff]  }
  0x33   : > { %1179 = vmatmul.mubr.bf16.vlgmr.msra.gmra.mrb[0].mxu1 %v2270_v34  ;;  %1025 = vmatprep.mubr.bf16.mxu0 %v2273_v36  ;;  %295 = vst.msk [vmem:[%s2777_s13 + $0x70] sm:$0xff] %vm280_vm0, %v2539_v14  ;;  %296 = vst.msk [vmem:[%s2777_s13 + $0x78] sm:$0xff] %vm280_vm0, %v2539_v14  ;;  %v2359_v30 = vld [vmem:[%s2719_s5 + $0x1ec] ss:$16 sps:$4 sm:$0xff]   ;;  %v2361_v31 = vld [vmem:[%s2719_s5 + $0x1e0] ss:$16 sps:$4 sm:$0xff]  }
  0x34   : > { %1186 = vmatprep.mubr.bf16.mxu1 %v2275_v37  ;;  %297 = vst.msk [vmem:[%s2777_s13 + $0x80] sm:$0xff] %vm280_vm0, %v2539_v14  ;;  %298 = vst.msk [vmem:[%s2777_s13 + $0x88] sm:$0xff] %vm280_vm0, %v2539_v14  ;;  %v2362_v32 = vld [vmem:[%s2719_s5 + $0x1e8] ss:$16 sps:$4 sm:$0xff]   ;;  %s243_s22 = scalar_lea.vmem [#allocation2], %s1840_s14  ;;  %s3236_s26 = scalar_lea.vmem [#allocation4], %s1840_s14 }
  0x35   : > { %299 = vst.msk [vmem:[%s2777_s13 + $0x90] sm:$0xff] %vm280_vm0, %v2539_v14  ;;  %300 = vst.msk [vmem:[%s2777_s13 + $0x98] sm:$0xff] %vm280_vm0, %v2539_v14  ;;  %s1676_s24 = sshll.u32 %s243_s22, 4  ;;  %s1689_s30 = sshll.u32 %s3236_s26, 4  ;;  %s3244_s24 = int_to_ptr.vmem [resolvable:$true] %s1676_s24  ;;  %s3253_s30 = int_to_ptr.vmem [resolvable:$true] %s1689_s30 }
  0x36   : > { %301 = vst.msk [vmem:[%s2777_s13 + $0xa0] sm:$0xff] %vm280_vm0, %v2539_v14  ;;  %302 = vst.msk [vmem:[%s2777_s13 + $0xa8] sm:$0xff] %vm280_vm0, %v2539_v14  ;;  %s1654_s10 = scalar_lea.sflag [#allocation3], %s3225_s29  ;;  %s2427_s11 = scalar_lea.vmem %s3244_s24, 128 }
  0x37   : > { %303 = vst.msk [vmem:[%s2777_s13 + $0xb0] sm:$0xff] %vm280_vm0, %v2539_v14  ;;  %304 = vst.msk [vmem:[%s2777_s13 + $0xb8] sm:$0xff] %vm280_vm0, %v2539_v14  ;;  %p2428_p12 = scmp.ne.s32.totalorder %s3244_s24, %s2427_s11 }
  0x38   : > { %305 = vst.msk [vmem:[%s2777_s13 + $0xc0] sm:$0xff] %vm280_vm0, %v2539_v14  ;;  %306 = vst.msk [vmem:[%s2777_s13 + $0xc8] sm:$0xff] %vm280_vm0, %v2539_v14 }
  0x39   : > { %307 = vst.msk [vmem:[%s2777_s13 + $0xd0] sm:$0xff] %vm280_vm0, %v2539_v14  ;;  %308 = vst.msk [vmem:[%s2777_s13 + $0xd8] sm:$0xff] %vm280_vm0, %v2539_v14  ;;  %p2429_p13 = pnand %p2428_p12, %p2607_p4 }
  0x3a   : > { %1026 = vmatmul.mubr.bf16.gmra.mrb[4].mxu0 %v2277_v38  ;;  %309 = vst.msk [vmem:[%s2777_s13 + $0xe0] sm:$0xff] %vm280_vm0, %v2539_v14  ;;  %310 = vst.msk [vmem:[%s2777_s13 + $0xe8] sm:$0xff] %vm280_vm0, %v2539_v14 }
  0x3b   : > { %1187 = vmatmul.mubr.bf16.gmra.mrb[4].mxu1 %v2278_v39  ;;  %1033 = vmatprep.mubr.bf16.mxu0 %v2279_v40  ;;  %311 = vst.msk [vmem:[%s2777_s13 + $0xf0] sm:$0xff] %vm280_vm0, %v2539_v14  ;;  %312 = vst.msk [vmem:[%s2777_s13 + $0xf8] sm:$0xff] %vm280_vm0, %v2539_v14  ;;  %p2430_p0 = pneg %p2429_p13 }
  0x3c   : > { %1194 = vmatprep.mubr.bf16.mxu1 %v2281_v41 }
  0x42   : > { %1034 = vmatmul.mubr.bf16.gmra.mrb[8].mxu0 %v2283_v42  ;;  %v313_v42 = vld [vmem:[%s2777_s13] sm:$0xff] }
  0x43   : > { %1195 = vmatmul.mubr.bf16.gmra.mrb[8].mxu1 %v2284_v43  ;;  %1041 = vmatprep.mubr.bf16.mxu0 %v2285_v44 }
  0x44   : > { %1202 = vmatprep.mubr.bf16.mxu1 %v2287_v45 }
  0x4a   : > { %1042 = vmatmul.mubr.bf16.gmra.mrb[12].mxu0 %v2289_v46 }
  0x4b   : > { %1203 = vmatmul.mubr.bf16.gmra.mrb[12].mxu1 %v2290_v47  ;;  %1049 = vmatprep.mubr.bf16.mxu0 %v2291_v48  ;;  %v314_v47 = vld [vmem:[%s2777_s13 + $0x8] sm:$0xff] }
  0x4c   : > { %1210 = vmatprep.mubr.bf16.mxu1 %v2293_v49 }
  0x52   : > { %1050 = vmatmul.mubr.bf16.gmra.mrb[16].mxu0 %v2295_v50 }
  0x53   : > { %1211 = vmatmul.mubr.bf16.gmra.mrb[16].mxu1 %v2296_v51  ;;  %1057 = vmatprep.mubr.bf16.mxu0 %v2297_v52 }
  0x54   : > { %1218 = vmatprep.mubr.bf16.mxu1 %v2299_v53 }
  0x5a   : > { %1058 = vmatmul.mubr.bf16.gmra.mrb[20].mxu0 %v2301_v54 }
  0x5b   : > { %1219 = vmatmul.mubr.bf16.gmra.mrb[20].mxu1 %v2302_v55  ;;  %1065 = vmatprep.mubr.bf16.mxu0 %v2303_v56 }
  0x5c   : > { %1226 = vmatprep.mubr.bf16.mxu1 %v2305_v57 }
  0x62   : > { %1066 = vmatmul.mubr.bf16.gmra.mrb[24].mxu0 %v2307_v58 }
  0x63   : > { %1227 = vmatmul.mubr.bf16.gmra.mrb[24].mxu1 %v2308_v59  ;;  %1073 = vmatprep.mubr.bf16.mxu0 %v2309_v60  ;;  %v315_v60 = vld [vmem:[%s2777_s13 + $0x10] sm:$0xff] }
  0x64   : > { %1234 = vmatprep.mubr.bf16.mxu1 %v2311_v61 }
  0x6a   : > { %1074 = vmatmul.mubr.bf16.gmra.mrb[28].mxu0 %v2313_v62 }
  0x6b   : > { %1235 = vmatmul.mubr.bf16.gmra.mrb[28].mxu1 %v2314_v63  ;;  %1081 = vmatprep.mubr.bf16.mxu0 %v2315_v0 }
  0x6c   : > { %1242 = vmatprep.mubr.bf16.mxu1 %v2317_v1  ;;  %v316_v1 = vld [vmem:[%s2777_s13 + $0x18] sm:$0xff] }
  0x72   : > { %1082 = vmatmul.mubr.bf16.gmra.mrb[32].mxu0 %v2319_v2 }
  0x73   : > { %1243 = vmatmul.mubr.bf16.gmra.mrb[32].mxu1 %v2320_v3  ;;  %1089 = vmatprep.mubr.bf16.mxu0 %v2321_v4 }
  0x74   : > { %1250 = vmatprep.mubr.bf16.mxu1 %v2323_v5 }
  0x7a   : > { %1090 = vmatmul.mubr.bf16.gmra.mrb[36].mxu0 %v2325_v6 }
  0x7b   : > { %1251 = vmatmul.mubr.bf16.gmra.mrb[36].mxu1 %v2326_v7  ;;  %1097 = vmatprep.mubr.bf16.mxu0 %v2327_v8 }
  0x7c   : > { %1258 = vmatprep.mubr.bf16.mxu1 %v2329_v9 }
  0x82   : > { %1098 = vmatmul.mubr.bf16.gmra.mrb[40].mxu0 %v2331_v10 }
  0x83   : > { %1259 = vmatmul.mubr.bf16.gmra.mrb[40].mxu1 %v2332_v11  ;;  %1105 = vmatprep.mubr.bf16.mxu0 %v2333_v12 }
  0x84   : > { %1266 = vmatprep.mubr.bf16.mxu1 %v2335_v13 }
  0x8a   : > { %1106 = vmatmul.mubr.bf16.gmra.mrb[44].mxu0 %v2337_v15 }
  0x8b   : > { %1267 = vmatmul.mubr.bf16.gmra.mrb[44].mxu1 %v2338_v16  ;;  %1113 = vmatprep.mubr.bf16.mxu0 %v2339_v17 }
  0x8c   : > { %1274 = vmatprep.mubr.bf16.mxu1 %v2341_v18  ;;  %v317_v18 = vld [vmem:[%s2777_s13 + $0x20] sm:$0xff] }
  0x92   : > { %1114 = vmatmul.mubr.bf16.gmra.mrb[48].mxu0 %v2343_v19 }
  0x93   : > { %1275 = vmatmul.mubr.bf16.gmra.mrb[48].mxu1 %v2344_v20  ;;  %1121 = vmatprep.mubr.bf16.mxu0 %v2345_v21  ;;  %v318_v21 = vld [vmem:[%s2777_s13 + $0x28] sm:$0xff] }
  0x94   : > { %1282 = vmatprep.mubr.bf16.mxu1 %v2347_v22 }
  0x9a   : > { %1122 = vmatmul.mubr.bf16.gmra.mrb[52].mxu0 %v2349_v23 }
  0x9b   : > { %1283 = vmatmul.mubr.bf16.gmra.mrb[52].mxu1 %v2350_v24  ;;  %1129 = vmatprep.mubr.bf16.mxu0 %v2351_v25 }
  0x9c   : > { %1290 = vmatprep.mubr.bf16.mxu1 %v2353_v26 }
  0xa2   : > { %1130 = vmatmul.mubr.bf16.gmra.mrb[56].mxu0 %v2355_v27 }
  0xa3   : > { %1291 = vmatmul.mubr.bf16.gmra.mrb[56].mxu1 %v2356_v28  ;;  %1137 = vmatprep.mubr.bf16.mxu0 %v2357_v29 }
  0xa4   : > { %1298 = vmatprep.mubr.bf16.mxu1 %v2359_v30 }
  0xaa   : > { %1138 = vmatmul.mubr.bf16.gmra.mrb[60].mxu0 %v2361_v31 }
  0xab   : > { %1299 = vmatmul.mubr.bf16.gmra.mrb[60].mxu1 %v2362_v32 }
 0x105   : > { %v1966_v33 = vpop.f32.mrb[0].mxu0 }
 0x106   : > { %v2078_v34 = vpop.f32.mrb[0].mxu1  ;;  %v1967_v35 = vpop.f32.mrb[1].mxu0 }
 0x107   : > { %v1968_v36 = vadd.f32 %v1967_v35, %v1966_v33  ;;  %v2079_v37 = vpop.f32.mrb[1].mxu1  ;;  %v1969_v38 = vpop.f32.mrb[2].mxu0 }
 0x108   : > { %v2080_v39 = vadd.f32 %v2079_v37, %v2078_v34  ;;  %v2081_v40 = vpop.f32.mrb[2].mxu1  ;;  %v1970_v41 = vpop.f32.mrb[3].mxu0 }
 0x109   : > { %v1971_v43 = vadd.f32 %v1970_v41, %v1969_v38  ;;  %v2082_v44 = vpop.f32.mrb[3].mxu1 }
 0x10a   : > { %v1181_v45 = vadd.f32 %v2080_v39, %v1968_v36  ;;  %v2083_v46 = vadd.f32 %v2082_v44, %v2081_v40  ;;  %v319_v40 = vld [vmem:[%s2777_s13 + $0x30] sm:$0xff] }
 0x10c   : > { %v1307_v48 = vadd.f32 %v1181_v45, %v313_v42  ;;  %v1184_v49 = vadd.f32 %v2083_v46, %v1971_v43  ;;  %v320_v43 = vld [vmem:[%s2777_s13 + $0x38] sm:$0xff] }
 0x10d   : > { %v1972_v50 = vpop.f32.mrb[4].mxu0 }
 0x10e   : > { %1340 = vst.msk [vmem:[%s2777_s13] sm:$0xff] %vm280_vm0, %v1307_v48  ;;  %v1308_v51 = vadd.f32 %v1184_v49, %v314_v47  ;;  %v2084_v52 = vpop.f32.mrb[4].mxu1  ;;  %v1973_v53 = vpop.f32.mrb[5].mxu0 }
 0x10f   : > { %v1974_v54 = vadd.f32 %v1973_v53, %v1972_v50  ;;  %v2085_v55 = vpop.f32.mrb[5].mxu1  ;;  %v1975_v56 = vpop.f32.mrb[6].mxu0 }
 0x110   : > { %1341 = vst.msk [vmem:[%s2777_s13 + $0x8] sm:$0xff] %vm280_vm0, %v1308_v51  ;;  %v2086_v57 = vadd.f32 %v2085_v55, %v2084_v52  ;;  %v2087_v58 = vpop.f32.mrb[6].mxu1  ;;  %v1976_v59 = vpop.f32.mrb[7].mxu0 }
 0x111   : > { %v1977_v61 = vadd.f32 %v1976_v59, %v1975_v56  ;;  %v2088_v62 = vpop.f32.mrb[7].mxu1 }
 0x112   : > { %v1189_v63 = vadd.f32 %v2086_v57, %v1974_v54  ;;  %v2089_v0 = vadd.f32 %v2088_v62, %v2087_v58  ;;  %v321_v62 = vld [vmem:[%s2777_s13 + $0x40] sm:$0xff] }
 0x114   : > { %v1309_v2 = vadd.f32 %v1189_v63, %v315_v60  ;;  %v1192_v3 = vadd.f32 %v2089_v0, %v1977_v61 }
 0x115   : > { %v2870_v4 = vld [vmem:[%s2777_s13] sm:$0xff]  ;;  %v1978_v5 = vpop.f32.mrb[8].mxu0 }
 0x116   : > { %2363 = vtanh.f32 %v2870_v4  ;;  %1342 = vst.msk [vmem:[%s2777_s13 + $0x10] sm:$0xff] %vm280_vm0, %v1309_v2  ;;  %v1310_v6 = vadd.f32 %v1192_v3, %v316_v1  ;;  %v2090_v7 = vpop.f32.mrb[8].mxu1  ;;  %v1979_v8 = vpop.f32.mrb[9].mxu0  ;;  %v322_v1 = vld [vmem:[%s2777_s13 + $0x48] sm:$0xff] }
 0x117   : > { %v2876_v9 = vld [vmem:[%s2777_s13 + $0x8] sm:$0xff]  ;;  %v1980_v10 = vadd.f32 %v1979_v8, %v1978_v5  ;;  %v2091_v11 = vpop.f32.mrb[9].mxu1  ;;  %v1981_v12 = vpop.f32.mrb[10].mxu0 }
 0x118   : > { %2365 = vtanh.f32 %v2876_v9  ;;  %1343 = vst.msk [vmem:[%s2777_s13 + $0x18] sm:$0xff] %vm280_vm0, %v1310_v6  ;;  %v2093_v13 = vpop.f32.mrb[10].mxu1  ;;  %v1982_v14 = vpop.f32.mrb[11].mxu0  ;;  %v2092_v15 = vadd.f32 %v2091_v11, %v2090_v7 }
 0x119   : > { %v1983_v16 = vadd.f32 %v1982_v14, %v1981_v12  ;;  %v2094_v17 = vpop.f32.mrb[11].mxu1 }
 0x11a   : > { %v2095_v19 = vadd.f32 %v2094_v17, %v2093_v13  ;;  %v1197_v20 = vadd.f32 %v2092_v15, %v1980_v10 }
 0x11c   : > { %v1200_v22 = vadd.f32 %v2095_v19, %v1983_v16  ;;  %v1311_v24 = vadd.f32 %v1197_v20, %v317_v18 }
 0x11d   : > { %v2884_v23 = vld [vmem:[%s2777_s13 + $0x10] sm:$0xff]  ;;  %v1984_v25 = vpop.f32.mrb[12].mxu0 }
 0x11e   : > { %2367 = vtanh.f32 %v2884_v23  ;;  %v1312_v26 = vadd.f32 %v1200_v22, %v318_v21  ;;  %v2096_v27 = vpop.f32.mrb[12].mxu1  ;;  %v1985_v28 = vpop.f32.mrb[13].mxu0  ;;  %1344 = vst.msk [vmem:[%s2777_s13 + $0x20] sm:$0xff] %vm280_vm0, %v1311_v24  ;;  %v323_v22 = vld [vmem:[%s2777_s13 + $0x50] sm:$0xff] }
 0x11f   : > { %v2888_v29 = vld [vmem:[%s2777_s13 + $0x18] sm:$0xff]  ;;  %v1986_v30 = vadd.f32 %v1985_v28, %v1984_v25  ;;  %v2097_v31 = vpop.f32.mrb[13].mxu1  ;;  %v1987_v32 = vpop.f32.mrb[14].mxu0 }
 0x120   : > { %v2364_v33 = vpop.eup %2363  ;;  %2369 = vtanh.f32 %v2888_v29  ;;  %1345 = vst.msk [vmem:[%s2777_s13 + $0x28] sm:$0xff] %vm280_vm0, %v1312_v26  ;;  %v2099_v34 = vpop.f32.mrb[14].mxu1  ;;  %v2098_v36 = vadd.f32 %v2097_v31, %v2096_v27  ;;  %v324_v26 = vld [vmem:[%s2777_s13 + $0x58] sm:$0xff]  ;;  %v1477_v27 = vmul.f32 %v2876_v9, %v2876_v9 }
 0x121   : > { %v1988_v35 = vpop.f32.mrb[15].mxu0  ;;  %1616 = vst.msk [vmem:[%s2777_s13] sm:$0xff] %vm280_vm0, %v2364_v33  ;;  %v2100_v38 = vpop.f32.mrb[15].mxu1  ;;  %v1408_v33 = vsel %vm280_vm0, %v2876_v9, 0.0  ;;  %v1407_v9 = vsel %vm280_vm0, %v2870_v4, 0.0 }
 0x122   : > { %v1989_v37 = vadd.f32 %v1988_v35, %v1987_v32  ;;  %v2366_v39 = vpop.eup %2365  ;;  %v2101_v41 = vadd.f32 %v2100_v38, %v2099_v34  ;;  %v1205_v42 = vadd.f32 %v2098_v36, %v1986_v30  ;;  %v1476_v32 = vmul.f32 %v2870_v4, %v2870_v4 }
 0x123   : > { %1617 = vst.msk [vmem:[%s2777_s13 + $0x8] sm:$0xff] %vm280_vm0, %v2366_v39  ;;  %v1478_v34 = vmul.f32 %v2884_v23, %v2884_v23 }
 0x124   : > { %v1208_v44 = vadd.f32 %v2101_v41, %v1989_v37  ;;  %v1313_v45 = vadd.f32 %v1205_v42, %v319_v40 }
 0x125   : > { %v1990_v46 = vpop.f32.mrb[16].mxu0  ;;  %v2902_v47 = vld [vmem:[%s2777_s13 + $0x20] sm:$0xff] }
 0x126   : > { %v1314_v48 = vadd.f32 %v1208_v44, %v320_v43  ;;  %v2102_v49 = vpop.f32.mrb[16].mxu1  ;;  %v1991_v50 = vpop.f32.mrb[17].mxu0  ;;  %2371 = vtanh.f32 %v2902_v47  ;;  %1346 = vst.msk [vmem:[%s2777_s13 + $0x30] sm:$0xff] %vm280_vm0, %v1313_v45  ;;  %v1509_v43 = vsel %vm280_vm0, %v1477_v27, 0.0  ;;  %v1410_v44 = vsel %vm280_vm0, %v2884_v23, 0.0 }
 0x127   : > { %v2906_v51 = vld [vmem:[%s2777_s13 + $0x28] sm:$0xff]  ;;  %v1992_v52 = vadd.f32 %v1991_v50, %v1990_v46  ;;  %v2103_v53 = vpop.f32.mrb[17].mxu1  ;;  %v1993_v54 = vpop.f32.mrb[18].mxu0  ;;  %v1479_v23 = vmul.f32 %v2888_v29, %v2888_v29 }
 0x128   : > { %v2368_v55 = vpop.eup %2367  ;;  %2373 = vtanh.f32 %v2906_v51  ;;  %1347 = vst.msk [vmem:[%s2777_s13 + $0x38] sm:$0xff] %vm280_vm0, %v1314_v48  ;;  %v2105_v56 = vpop.f32.mrb[18].mxu1  ;;  %v2104_v58 = vadd.f32 %v2103_v53, %v2102_v49  ;;  %v1409_v49 = vadd.f32 %v1408_v33, %v1407_v9 }
 0x129   : > { %v1994_v57 = vpop.f32.mrb[19].mxu0  ;;  %1618 = vst.msk [vmem:[%s2777_s13 + $0x10] sm:$0xff] %vm280_vm0, %v2368_v55  ;;  %v2106_v60 = vpop.f32.mrb[19].mxu1  ;;  %v1511_v55 = vsel %vm280_vm0, %v1478_v34, 0.0 }
 0x12a   : > { %v1995_v59 = vadd.f32 %v1994_v57, %v1993_v54  ;;  %v2370_v61 = vpop.eup %2369  ;;  %v2107_v63 = vadd.f32 %v2106_v60, %v2105_v56  ;;  %v1213_v0 = vadd.f32 %v2104_v58, %v1992_v52  ;;  %v1508_v54 = vsel %vm280_vm0, %v1476_v32, 0.0  ;;  %v325_v56 = vld [vmem:[%s2777_s13 + $0x60] sm:$0xff]  ;;  %v327_v32 = vld [vmem:[%s2777_s13 + $0x70] sm:$0xff] }
 0x12b   : > { %1619 = vst.msk [vmem:[%s2777_s13 + $0x18] sm:$0xff] %vm280_vm0, %v2370_v61  ;;  %v1510_v58 = vadd.f32 %v1509_v43, %v1508_v54  ;;  %v326_v61 = vld [vmem:[%s2777_s13 + $0x68] sm:$0xff] }
 0x12c   : > { %v1216_v2 = vadd.f32 %v2107_v63, %v1995_v59  ;;  %v1315_v3 = vadd.f32 %v1213_v0, %v321_v62  ;;  %v1411_v59 = vadd.f32 %v1410_v44, %v1409_v49  ;;  %v1412_v62 = vsel %vm280_vm0, %v2888_v29, 0.0 }
 0x12d   : > { %v1996_v5 = vpop.f32.mrb[20].mxu0  ;;  %v2920_v6 = vld [vmem:[%s2777_s13 + $0x30] sm:$0xff]  ;;  %v1480_v63 = vmul.f32 %v2902_v47, %v2902_v47 }
 0x12e   : > { %v1316_v7 = vadd.f32 %v1216_v2, %v322_v1  ;;  %v2108_v8 = vpop.f32.mrb[20].mxu1  ;;  %v1997_v10 = vpop.f32.mrb[21].mxu0  ;;  %2375 = vtanh.f32 %v2920_v6  ;;  %1348 = vst.msk [vmem:[%s2777_s13 + $0x40] sm:$0xff] %vm280_vm0, %v1315_v3  ;;  %v1512_v1 = vadd.f32 %v1511_v55, %v1510_v58 }
 0x12f   : > { %v2924_v11 = vld [vmem:[%s2777_s13 + $0x38] sm:$0xff]  ;;  %v1998_v12 = vadd.f32 %v1997_v10, %v1996_v5  ;;  %v2109_v13 = vpop.f32.mrb[21].mxu1  ;;  %v1999_v14 = vpop.f32.mrb[22].mxu0  ;;  %v1513_v5 = vsel %vm280_vm0, %v1479_v23, 0.0 }
 0x130   : > { %2377 = vtanh.f32 %v2924_v11  ;;  %1349 = vst.msk [vmem:[%s2777_s13 + $0x48] sm:$0xff] %vm280_vm0, %v1316_v7  ;;  %v2111_v15 = vpop.f32.mrb[22].mxu1  ;;  %v2000_v16 = vpop.f32.mrb[23].mxu0  ;;  %v2110_v18 = vadd.f32 %v2109_v13, %v2108_v8  ;;  %v1414_v7 = vsel %vm280_vm0, %v2902_v47, 0.0  ;;  %v1481_v47 = vmul.f32 %v2906_v51, %v2906_v51 }
 0x131   : > { %v2372_v17 = vpop.eup %2371  ;;  %v2001_v19 = vadd.f32 %v2000_v16, %v1999_v14  ;;  %v2112_v20 = vpop.f32.mrb[23].mxu1  ;;  %v1413_v14 = vadd.f32 %v1412_v62, %v1411_v59  ;;  %v1483_v44 = vmul.f32 %v2924_v11, %v2924_v11  ;;  %v1420_v55 = vsel %vm280_vm0, %v2924_v11, 0.0 }
 0x132   : > { %v2374_v21 = vpop.eup %2373  ;;  %1620 = vst.msk [vmem:[%s2777_s13 + $0x20] sm:$0xff] %vm280_vm0, %v2372_v17  ;;  %v2113_v24 = vadd.f32 %v2112_v20, %v2111_v15  ;;  %v1221_v25 = vadd.f32 %v2110_v18, %v1998_v12  ;;  %v1515_v18 = vsel %vm280_vm0, %v1480_v63, 0.0 }
 0x133   : > { %1621 = vst.msk [vmem:[%s2777_s13 + $0x28] sm:$0xff] %vm280_vm0, %v2374_v21 }
 0x134   : > { %v1224_v28 = vadd.f32 %v2113_v24, %v2001_v19  ;;  %v1317_v30 = vadd.f32 %v1221_v25, %v323_v22  ;;  %v1514_v22 = vadd.f32 %v1513_v5, %v1512_v1  ;;  %v1415_v24 = vadd.f32 %v1414_v7, %v1413_v14  ;;  %v329_v1 = vld [vmem:[%s2777_s13 + $0x80] sm:$0xff]  ;;  %v330_v7 = vld [vmem:[%s2777_s13 + $0x88] sm:$0xff] }
 0x135   : > { %v2002_v31 = vpop.f32.mrb[24].mxu0  ;;  %v2946_v35 = vld [vmem:[%s2777_s13 + $0x40] sm:$0xff] }
 0x136   : > { %v1318_v36 = vadd.f32 %v1224_v28, %v324_v26  ;;  %v2114_v37 = vpop.f32.mrb[24].mxu1  ;;  %v2003_v38 = vpop.f32.mrb[25].mxu0  ;;  %2379 = vtanh.f32 %v2946_v35  ;;  %1350 = vst.msk [vmem:[%s2777_s13 + $0x50] sm:$0xff] %vm280_vm0, %v1317_v30  ;;  %v1416_v30 = vsel %vm280_vm0, %v2906_v51, 0.0  ;;  %v1516_v34 = vadd.f32 %v1515_v18, %v1514_v22 }
 0x137   : > { %v2950_v39 = vld [vmem:[%s2777_s13 + $0x48] sm:$0xff]  ;;  %v2004_v40 = vadd.f32 %v2003_v38, %v2002_v31  ;;  %v2115_v41 = vpop.f32.mrb[25].mxu1  ;;  %v2005_v42 = vpop.f32.mrb[26].mxu0  ;;  %v1482_v31 = vmul.f32 %v2920_v6, %v2920_v6  ;;  %v1517_v38 = vsel %vm280_vm0, %v1481_v47, 0.0  ;;  %v1418_v51 = vsel %vm280_vm0, %v2920_v6, 0.0 }
 0x138   : > { %2381 = vtanh.f32 %v2950_v39  ;;  %1351 = vst.msk [vmem:[%s2777_s13 + $0x58] sm:$0xff] %vm280_vm0, %v1318_v36  ;;  %v2117_v45 = vpop.f32.mrb[26].mxu1  ;;  %v2006_v46 = vpop.f32.mrb[27].mxu0  ;;  %v2116_v50 = vadd.f32 %v2115_v41, %v2114_v37  ;;  %v328_v37 = vld [vmem:[%s2777_s13 + $0x78] sm:$0xff]  ;;  %v1417_v41 = vadd.f32 %v1416_v30, %v1415_v24  ;;  %v1484_v23 = vmul.f32 %v2946_v35, %v2946_v35 }
 0x139   : > { %v2376_v48 = vpop.eup %2375  ;;  %v2007_v52 = vadd.f32 %v2006_v46, %v2005_v42  ;;  %v2118_v4 = vpop.f32.mrb[27].mxu1  ;;  %v1519_v43 = vsel %vm280_vm0, %v1482_v31, 0.0  ;;  %v1422_v11 = vsel %vm280_vm0, %v2946_v35, 0.0 }
 0x13a   : > { %v2378_v53 = vpop.eup %2377  ;;  %1622 = vst.msk [vmem:[%s2777_s13 + $0x30] sm:$0xff] %vm280_vm0, %v2376_v48  ;;  %v2119_v57 = vadd.f32 %v2118_v4, %v2117_v45  ;;  %v1229_v60 = vadd.f32 %v2116_v50, %v2004_v40  ;;  %v1518_v50 = vadd.f32 %v1517_v38, %v1516_v34 }
 0x13b   : > { %1623 = vst.msk [vmem:[%s2777_s13 + $0x38] sm:$0xff] %vm280_vm0, %v2378_v53 }
 0x13c   : > { %v1232_v0 = vadd.f32 %v2119_v57, %v2007_v52  ;;  %v1319_v2 = vadd.f32 %v1229_v60, %v325_v56  ;;  %v1419_v52 = vadd.f32 %v1418_v51, %v1417_v41  ;;  %v1520_v59 = vadd.f32 %v1519_v43, %v1518_v50 }
 0x13d   : > { %v2008_v3 = vpop.f32.mrb[28].mxu0  ;;  %v2980_v8 = vld [vmem:[%s2777_s13 + $0x50] sm:$0xff] }
 0x13e   : > { %v1320_v10 = vadd.f32 %v1232_v0, %v326_v61  ;;  %v2120_v12 = vpop.f32.mrb[28].mxu1  ;;  %v2009_v13 = vpop.f32.mrb[29].mxu0  ;;  %2383 = vtanh.f32 %v2980_v8  ;;  %1352 = vst.msk [vmem:[%s2777_s13 + $0x60] sm:$0xff] %vm280_vm0, %v1319_v2  ;;  %v1521_v0 = vsel %vm280_vm0, %v1483_v44, 0.0  ;;  %v1486_v18 = vmul.f32 %v2980_v8, %v2980_v8  ;;  %v332_v44 = vld [vmem:[%s2777_s13 + $0x98] sm:$0xff] }
 0x13f   : > { %v2984_v29 = vld [vmem:[%s2777_s13 + $0x58] sm:$0xff]  ;;  %v2010_v15 = vadd.f32 %v2009_v13, %v2008_v3  ;;  %v2121_v16 = vpop.f32.mrb[29].mxu1  ;;  %v2011_v17 = vpop.f32.mrb[30].mxu0  ;;  %v1421_v3 = vadd.f32 %v1420_v55, %v1419_v52  ;;  %v1522_v14 = vadd.f32 %v1521_v0, %v1520_v59 }
 0x140   : > { %2385 = vtanh.f32 %v2984_v29  ;;  %1353 = vst.msk [vmem:[%s2777_s13 + $0x68] sm:$0xff] %vm280_vm0, %v1320_v10  ;;  %v2123_v19 = vpop.f32.mrb[30].mxu1  ;;  %v2012_v20 = vpop.f32.mrb[31].mxu0  ;;  %v2122_v25 = vadd.f32 %v2121_v16, %v2120_v12  ;;  %v1523_v10 = vsel %vm280_vm0, %v1484_v23, 0.0  ;;  %v1485_v12 = vmul.f32 %v2950_v39, %v2950_v39 }
 0x141   : > { %v2380_v21 = vpop.eup %2379  ;;  %v2013_v26 = vadd.f32 %v2012_v20, %v2011_v17  ;;  %v2124_v27 = vpop.f32.mrb[31].mxu1  ;;  %v1423_v35 = vadd.f32 %v1422_v11, %v1421_v3  ;;  %v1424_v17 = vsel %vm280_vm0, %v2950_v39, 0.0  ;;  %v1524_v22 = vadd.f32 %v1523_v10, %v1522_v14  ;;  %v333_v14 = vld [vmem:[%s2777_s13 + $0xa0] sm:$0xff] }
 0x142   : > { %v2382_v28 = vpop.eup %2381  ;;  %1624 = vst.msk [vmem:[%s2777_s13 + $0x40] sm:$0xff] %vm280_vm0, %v2380_v21  ;;  %v2125_v33 = vadd.f32 %v2124_v27, %v2123_v19  ;;  %v1237_v36 = vadd.f32 %v2122_v25, %v2010_v15  ;;  %v1525_v27 = vsel %vm280_vm0, %v1485_v12, 0.0  ;;  %v1527_v51 = vsel %vm280_vm0, %v1486_v18, 0.0 }
 0x143   : > { %1625 = vst.msk [vmem:[%s2777_s13 + $0x48] sm:$0xff] %vm280_vm0, %v2382_v28  ;;  %v1426_v28 = vsel %vm280_vm0, %v2980_v8, 0.0  ;;  %v331_v8 = vld [vmem:[%s2777_s13 + $0x90] sm:$0xff] }
 0x144   : > { %v1240_v40 = vadd.f32 %v2125_v33, %v2013_v26  ;;  %v1321_v42 = vadd.f32 %v1237_v36, %v327_v32  ;;  %v1425_v33 = vadd.f32 %v1424_v17, %v1423_v35  ;;  %v334_v17 = vld [vmem:[%s2777_s13 + $0xa8] sm:$0xff] }
 0x145   : > { %v2014_v9 = vpop.f32.mrb[32].mxu0  ;;  %v3011_v45 = vld [vmem:[%s2777_s13 + $0x60] sm:$0xff] }
 0x146   : > { %v1322_v46 = vadd.f32 %v1240_v40, %v328_v37  ;;  %v2126_v48 = vpop.f32.mrb[32].mxu1  ;;  %v2015_v49 = vpop.f32.mrb[33].mxu0  ;;  %2387 = vtanh.f32 %v3011_v45  ;;  %1354 = vst.msk [vmem:[%s2777_s13 + $0x70] sm:$0xff] %vm280_vm0, %v1321_v42  ;;  %v1487_v40 = vmul.f32 %v2984_v29, %v2984_v29  ;;  %v1526_v42 = vadd.f32 %v1525_v27, %v1524_v22 }
 0x147   : > { %v3015_v6 = vld [vmem:[%s2777_s13 + $0x68] sm:$0xff]  ;;  %v2016_v4 = vadd.f32 %v2015_v49, %v2014_v9  ;;  %v2127_v53 = vpop.f32.mrb[33].mxu1  ;;  %v2017_v54 = vpop.f32.mrb[34].mxu0  ;;  %v1427_v9 = vadd.f32 %v1426_v28, %v1425_v33 }
 0x148   : > { %2389 = vtanh.f32 %v3015_v6  ;;  %1355 = vst.msk [vmem:[%s2777_s13 + $0x78] sm:$0xff] %vm280_vm0, %v1322_v46  ;;  %v2129_v56 = vpop.f32.mrb[34].mxu1  ;;  %v2018_v57 = vpop.f32.mrb[35].mxu0  ;;  %v2128_v60 = vadd.f32 %v2127_v53, %v2126_v48  ;;  %v1428_v46 = vsel %vm280_vm0, %v2984_v29, 0.0  ;;  %v1488_v48 = vmul.f32 %v3011_v45, %v3011_v45 }
 0x149   : > { %v2384_v58 = vpop.eup %2383  ;;  %v2019_v61 = vadd.f32 %v2018_v57, %v2017_v54  ;;  %v2130_v62 = vpop.f32.mrb[35].mxu1  ;;  %v1528_v50 = vadd.f32 %v1527_v51, %v1526_v42  ;;  %v1529_v53 = vsel %vm280_vm0, %v1487_v40, 0.0  ;;  %v1430_v54 = vsel %vm280_vm0, %v3011_v45, 0.0 }
 0x14a   : > { %v2386_v63 = vpop.eup %2385  ;;  %1626 = vst.msk [vmem:[%s2777_s13 + $0x50] sm:$0xff] %vm280_vm0, %v2384_v58  ;;  %v2131_v2 = vadd.f32 %v2130_v62, %v2129_v56  ;;  %v1245_v5 = vadd.f32 %v2128_v60, %v2016_v4  ;;  %v1429_v58 = vadd.f32 %v1428_v46, %v1427_v9  ;;  %v1531_v62 = vsel %vm280_vm0, %v1488_v48, 0.0  ;;  %v335_v48 = vld [vmem:[%s2777_s13 + $0xb0] sm:$0xff] }
 0x14b   : > { %1627 = vst.msk [vmem:[%s2777_s13 + $0x58] sm:$0xff] %vm280_vm0, %v2386_v63  ;;  %v1489_v45 = vmul.f32 %v3015_v6, %v3015_v6  ;;  %v1432_v12 = vsel %vm280_vm0, %v3015_v6, 0.0 }
 0x14c   : > { %v1248_v13 = vadd.f32 %v2131_v2, %v2019_v61  ;;  %v1323_v15 = vadd.f32 %v1245_v5, %v329_v1  ;;  %v1530_v1 = vadd.f32 %v1529_v53, %v1528_v50  ;;  %v1431_v2 = vadd.f32 %v1430_v54, %v1429_v58 }
 0x14d   : > { %v2020_v16 = vpop.f32.mrb[36].mxu0  ;;  %v3043_v47 = vld [vmem:[%s2777_s13 + $0x70] sm:$0xff]  ;;  %v1533_v18 = vsel %vm280_vm0, %v1489_v45, 0.0 }
 0x14e   : > { %v1324_v19 = vadd.f32 %v1248_v13, %v330_v7  ;;  %v2132_v20 = vpop.f32.mrb[36].mxu1  ;;  %v2021_v21 = vpop.f32.mrb[37].mxu0  ;;  %2391 = vtanh.f32 %v3043_v47  ;;  %1356 = vst.msk [vmem:[%s2777_s13 + $0x80] sm:$0xff] %vm280_vm0, %v1323_v15  ;;  %v1490_v13 = vmul.f32 %v3043_v47, %v3043_v47  ;;  %v1532_v15 = vadd.f32 %v1531_v62, %v1530_v1 }
 0x14f   : > { %v3047_v24 = vld [vmem:[%s2777_s13 + $0x78] sm:$0xff]  ;;  %v2022_v25 = vadd.f32 %v2021_v21, %v2020_v16  ;;  %v2133_v26 = vpop.f32.mrb[37].mxu1  ;;  %v2023_v39 = vpop.f32.mrb[38].mxu0  ;;  %v1434_v6 = vsel %vm280_vm0, %v3043_v47, 0.0 }
 0x150   : > { %2393 = vtanh.f32 %v3047_v24  ;;  %1357 = vst.msk [vmem:[%s2777_s13 + $0x88] sm:$0xff] %vm280_vm0, %v1324_v19  ;;  %v2135_v30 = vpop.f32.mrb[38].mxu1  ;;  %v2024_v31 = vpop.f32.mrb[39].mxu0  ;;  %v2134_v34 = vadd.f32 %v2133_v26, %v2132_v20  ;;  %v1433_v20 = vadd.f32 %v1432_v12, %v1431_v2  ;;  %v1491_v26 = vmul.f32 %v3047_v24, %v3047_v24 }
 0x151   : > { %v2388_v32 = vpop.eup %2387  ;;  %v2025_v36 = vadd.f32 %v2024_v31, %v2023_v39  ;;  %v2136_v37 = vpop.f32.mrb[39].mxu1  ;;  %v1534_v31 = vadd.f32 %v1533_v18, %v1532_v15 }
 0x152   : > { %v2390_v38 = vpop.eup %2389  ;;  %1628 = vst.msk [vmem:[%s2777_s13 + $0x60] sm:$0xff] %vm280_vm0, %v2388_v32  ;;  %v2137_v41 = vadd.f32 %v2136_v37, %v2135_v30  ;;  %v1253_v43 = vadd.f32 %v2134_v34, %v2022_v25  ;;  %v1535_v25 = vsel %vm280_vm0, %v1490_v13, 0.0  ;;  %v1435_v32 = vadd.f32 %v1434_v6, %v1433_v20  ;;  %v337_v6 = vld [vmem:[%s2777_s13 + $0xc0] sm:$0xff] }
 0x153   : > { %1629 = vst.msk [vmem:[%s2777_s13 + $0x68] sm:$0xff] %vm280_vm0, %v2390_v38  ;;  %v1436_v37 = vsel %vm280_vm0, %v3047_v24, 0.0  ;;  %v1537_v46 = vsel %vm280_vm0, %v1491_v26, 0.0 }
 0x154   : > { %v1256_v49 = vadd.f32 %v2137_v41, %v2025_v36  ;;  %v1325_v52 = vadd.f32 %v1253_v43, %v331_v8  ;;  %v1536_v41 = vadd.f32 %v1535_v25, %v1534_v31  ;;  %v1437_v50 = vadd.f32 %v1436_v37, %v1435_v32  ;;  %v338_v25 = vld [vmem:[%s2777_s13 + $0xc8] sm:$0xff] }
 0x155   : > { %v2026_v4 = vpop.f32.mrb[40].mxu0  ;;  %v3074_v55 = vld [vmem:[%s2777_s13 + $0x80] sm:$0xff] }
 0x156   : > { %v1326_v23 = vadd.f32 %v1256_v49, %v332_v44  ;;  %v2138_v56 = vpop.f32.mrb[40].mxu1  ;;  %v2027_v57 = vpop.f32.mrb[41].mxu0  ;;  %2395 = vtanh.f32 %v3074_v55  ;;  %1358 = vst.msk [vmem:[%s2777_s13 + $0x90] sm:$0xff] %vm280_vm0, %v1325_v52  ;;  %v1492_v38 = vmul.f32 %v3074_v55, %v3074_v55  ;;  %v1438_v24 = vsel %vm280_vm0, %v3074_v55, 0.0 }
 0x157   : > { %v3078_v29 = vld [vmem:[%s2777_s13 + $0x88] sm:$0xff]  ;;  %v2028_v59 = vadd.f32 %v2027_v57, %v2026_v4  ;;  %v2139_v60 = vpop.f32.mrb[41].mxu1  ;;  %v2029_v61 = vpop.f32.mrb[42].mxu0  ;;  %v336_v4 = vld [vmem:[%s2777_s13 + $0xb8] sm:$0xff]  ;;  %v1439_v55 = vadd.f32 %v1438_v24, %v1437_v50 }
 0x158   : > { %2397 = vtanh.f32 %v3078_v29  ;;  %1359 = vst.msk [vmem:[%s2777_s13 + $0x98] sm:$0xff] %vm280_vm0, %v1326_v23  ;;  %v2141_v63 = vpop.f32.mrb[42].mxu1  ;;  %v2030_v0 = vpop.f32.mrb[43].mxu0  ;;  %v2140_v3 = vadd.f32 %v2139_v60, %v2138_v56  ;;  %v1539_v53 = vsel %vm280_vm0, %v1492_v38, 0.0  ;;  %v1493_v54 = vmul.f32 %v3078_v29, %v3078_v29 }
 0x159   : > { %v2392_v11 = vpop.eup %2391  ;;  %v2031_v5 = vadd.f32 %v2030_v0, %v2029_v61  ;;  %v2142_v7 = vpop.f32.mrb[43].mxu1  ;;  %v1538_v56 = vadd.f32 %v1537_v46, %v1536_v41 }
 0x15a   : > { %v2394_v10 = vpop.eup %2393  ;;  %1630 = vst.msk [vmem:[%s2777_s13 + $0x70] sm:$0xff] %vm280_vm0, %v2392_v11  ;;  %v2143_v35 = vadd.f32 %v2142_v7, %v2141_v63  ;;  %v1261_v16 = vadd.f32 %v2140_v3, %v2028_v59  ;;  %v1440_v59 = vsel %vm280_vm0, %v3078_v29, 0.0 }
 0x15b   : > { %1631 = vst.msk [vmem:[%s2777_s13 + $0x78] sm:$0xff] %vm280_vm0, %v2394_v10  ;;  %v1540_v0 = vadd.f32 %v1539_v53, %v1538_v56  ;;  %v1441_v13 = vadd.f32 %v1440_v59, %v1439_v55 }
 0x15c   : > { %v1264_v19 = vadd.f32 %v2143_v35, %v2031_v5  ;;  %v1327_v21 = vadd.f32 %v1261_v16, %v333_v14  ;;  %v1541_v5 = vsel %vm280_vm0, %v1493_v54, 0.0 }
 0x15d   : > { %v2032_v22 = vpop.f32.mrb[44].mxu0  ;;  %v1393_v39 = vld [vmem:[%s2777_s13 + $0x90] sm:$0xff]  ;;  %v1542_v20 = vadd.f32 %v1541_v5, %v1540_v0 }
 0x15e   : > { %v1328_v27 = vadd.f32 %v1264_v19, %v334_v17  ;;  %v2144_v28 = vpop.f32.mrb[44].mxu1  ;;  %v2033_v30 = vpop.f32.mrb[45].mxu0  ;;  %2399 = vtanh.f32 %v1393_v39  ;;  %1360 = vst.msk [vmem:[%s2777_s13 + $0xa0] sm:$0xff] %vm280_vm0, %v1327_v21  ;;  %v1494_v60 = vmul.f32 %v1393_v39, %v1393_v39  ;;  %v1442_v29 = vsel %vm280_vm0, %v1393_v39, 0.0 }
 0x15f   : > { %v3106_v33 = vld [vmem:[%s2777_s13 + $0x98] sm:$0xff]  ;;  %v2034_v47 = vadd.f32 %v2033_v30, %v2032_v22  ;;  %v2145_v34 = vpop.f32.mrb[45].mxu1  ;;  %v2035_v36 = vpop.f32.mrb[46].mxu0  ;;  %v1443_v21 = vadd.f32 %v1442_v29, %v1441_v13 }
 0x160   : > { %2401 = vtanh.f32 %v3106_v33  ;;  %1361 = vst.msk [vmem:[%s2777_s13 + $0xa8] sm:$0xff] %vm280_vm0, %v1328_v27  ;;  %v2147_v51 = vpop.f32.mrb[46].mxu1  ;;  %v2036_v40 = vpop.f32.mrb[47].mxu0  ;;  %v2146_v42 = vadd.f32 %v2145_v34, %v2144_v28  ;;  %v1543_v17 = vsel %vm280_vm0, %v1494_v60, 0.0  ;;  %v1495_v18 = vmul.f32 %v3106_v33, %v3106_v33 }
 0x161   : > { %v2396_v8 = vpop.eup %2395  ;;  %v2037_v9 = vadd.f32 %v2036_v40, %v2035_v36  ;;  %v2148_v43 = vpop.f32.mrb[47].mxu1  ;;  %v1444_v26 = vsel %vm280_vm0, %v3106_v33, 0.0  ;;  %v1544_v28 = vadd.f32 %v1543_v17, %v1542_v20  ;;  %v341_v20 = vld [vmem:[%s2777_s13 + $0xe0] sm:$0xff] }
 0x162   : > { %v2398_v44 = vpop.eup %2397  ;;  %1632 = vst.msk [vmem:[%s2777_s13 + $0x80] sm:$0xff] %vm280_vm0, %v2396_v8  ;;  %v2149_v49 = vadd.f32 %v2148_v43, %v2147_v51  ;;  %v1269_v52 = vadd.f32 %v2146_v42, %v2034_v47  ;;  %v1545_v32 = vsel %vm280_vm0, %v1495_v18, 0.0  ;;  %v1445_v51 = vadd.f32 %v1444_v26, %v1443_v21 }
 0x163   : > { %1633 = vst.msk [vmem:[%s2777_s13 + $0x88] sm:$0xff] %vm280_vm0, %v2398_v44  ;;  %v1546_v24 = vadd.f32 %v1545_v32, %v1544_v28 }
 0x164   : > { %v1272_v23 = vadd.f32 %v2149_v49, %v2037_v9  ;;  %v1329_v57 = vadd.f32 %v1269_v52, %v335_v48 }
 0x165   : > { %v2038_v58 = vpop.f32.mrb[48].mxu0  ;;  %v1395_v61 = vld [vmem:[%s2777_s13 + $0xa0] sm:$0xff] }
 0x166   : > { %v1330_v62 = vadd.f32 %v1272_v23, %v336_v4  ;;  %v2150_v45 = vpop.f32.mrb[48].mxu1  ;;  %v2039_v63 = vpop.f32.mrb[49].mxu0  ;;  %2403 = vtanh.f32 %v1395_v61  ;;  %1362 = vst.msk [vmem:[%s2777_s13 + $0xb0] sm:$0xff] %vm280_vm0, %v1329_v57  ;;  %v1496_v39 = vmul.f32 %v1395_v61, %v1395_v61  ;;  %v1446_v47 = vsel %vm280_vm0, %v1395_v61, 0.0  ;;  %v339_v23 = vld [vmem:[%s2777_s13 + $0xd0] sm:$0xff] }
 0x167   : > { %v1396_v11 = vld [vmem:[%s2777_s13 + $0xa8] sm:$0xff]  ;;  %v2040_v1 = vadd.f32 %v2039_v63, %v2038_v58  ;;  %v2151_v2 = vpop.f32.mrb[49].mxu1  ;;  %v2041_v3 = vpop.f32.mrb[50].mxu0  ;;  %v1447_v48 = vadd.f32 %v1446_v47, %v1445_v51  ;;  %v340_v58 = vld [vmem:[%s2777_s13 + $0xd8] sm:$0xff] }
 0x168   : > { %2405 = vtanh.f32 %v1396_v11  ;;  %1363 = vst.msk [vmem:[%s2777_s13 + $0xb8] sm:$0xff] %vm280_vm0, %v1330_v62  ;;  %v2153_v7 = vpop.f32.mrb[50].mxu1  ;;  %v2042_v10 = vpop.f32.mrb[51].mxu0  ;;  %v2152_v14 = vadd.f32 %v2151_v2, %v2150_v45  ;;  %v1547_v42 = vsel %vm280_vm0, %v1496_v39, 0.0  ;;  %v1497_v9 = vmul.f32 %v1396_v11, %v1396_v11 }
 0x169   : > { %v2400_v12 = vpop.eup %2399  ;;  %v2043_v35 = vadd.f32 %v2042_v10, %v2041_v3  ;;  %v2154_v15 = vpop.f32.mrb[51].mxu1  ;;  %v1448_v53 = vsel %vm280_vm0, %v1396_v11, 0.0  ;;  %v1548_v55 = vadd.f32 %v1547_v42, %v1546_v24 }
 0x16a   : > { %v2402_v16 = vpop.eup %2401  ;;  %1634 = vst.msk [vmem:[%s2777_s13 + $0x90] sm:$0xff] %vm280_vm0, %v2400_v12  ;;  %v2155_v19 = vadd.f32 %v2154_v15, %v2153_v7  ;;  %v1277_v22 = vadd.f32 %v2152_v14, %v2040_v1  ;;  %v1549_v59 = vsel %vm280_vm0, %v1497_v9, 0.0  ;;  %v1449_v62 = vadd.f32 %v1448_v53, %v1447_v48 }
 0x16b   : > { %1635 = vst.msk [vmem:[%s2777_s13 + $0x98] sm:$0xff] %vm280_vm0, %v2402_v16  ;;  %v1550_v29 = vadd.f32 %v1549_v59, %v1548_v55 }
 0x16c   : > { %v1280_v27 = vadd.f32 %v2155_v19, %v2043_v35  ;;  %v1331_v30 = vadd.f32 %v1277_v22, %v337_v6 }
 0x16d   : > { %v2044_v31 = vpop.f32.mrb[52].mxu0  ;;  %v1397_v34 = vld [vmem:[%s2777_s13 + $0xb0] sm:$0xff] }
 0x16e   : > { %v1332_v36 = vadd.f32 %v1280_v27, %v338_v25  ;;  %v2156_v37 = vpop.f32.mrb[52].mxu1  ;;  %v2045_v38 = vpop.f32.mrb[53].mxu0  ;;  %2407 = vtanh.f32 %v1397_v34  ;;  %1364 = vst.msk [vmem:[%s2777_s13 + $0xc0] sm:$0xff] %vm280_vm0, %v1331_v30  ;;  %v1498_v54 = vmul.f32 %v1397_v34, %v1397_v34  ;;  %v1450_v60 = vsel %vm280_vm0, %v1397_v34, 0.0 }
 0x16f   : > { %v1398_v40 = vld [vmem:[%s2777_s13 + $0xb8] sm:$0xff]  ;;  %v2046_v33 = vadd.f32 %v2045_v38, %v2044_v31  ;;  %v2157_v8 = vpop.f32.mrb[53].mxu1  ;;  %v2047_v41 = vpop.f32.mrb[54].mxu0  ;;  %v1451_v7 = vadd.f32 %v1450_v60, %v1449_v62  ;;  %v342_v31 = vld [vmem:[%s2777_s13 + $0xe8] sm:$0xff] }
 0x170   : > { %2409 = vtanh.f32 %v1398_v40  ;;  %1365 = vst.msk [vmem:[%s2777_s13 + $0xc8] sm:$0xff] %vm280_vm0, %v1332_v36  ;;  %v2159_v43 = vpop.f32.mrb[54].mxu1  ;;  %v2048_v44 = vpop.f32.mrb[55].mxu0  ;;  %v2158_v49 = vadd.f32 %v2157_v8, %v2156_v37  ;;  %v1551_v0 = vsel %vm280_vm0, %v1498_v54, 0.0  ;;  %v1499_v11 = vmul.f32 %v1398_v40, %v1398_v40 }
 0x171   : > { %v2404_v46 = vpop.eup %2403  ;;  %v2049_v50 = vadd.f32 %v2048_v44, %v2047_v41  ;;  %v2160_v52 = vpop.f32.mrb[55].mxu1  ;;  %v1452_v35 = vsel %vm280_vm0, %v1398_v40, 0.0  ;;  %v1552_v19 = vadd.f32 %v1551_v0, %v1550_v29 }
 0x172   : > { %v2406_v4 = vpop.eup %2405  ;;  %1636 = vst.msk [vmem:[%s2777_s13 + $0xa0] sm:$0xff] %vm280_vm0, %v2404_v46  ;;  %v2161_v56 = vadd.f32 %v2160_v52, %v2159_v43  ;;  %v1285_v57 = vadd.f32 %v2158_v49, %v2046_v33  ;;  %v1553_v26 = vsel %vm280_vm0, %v1499_v11, 0.0  ;;  %v1453_v30 = vadd.f32 %v1452_v35, %v1451_v7 }
 0x173   : > { %1637 = vst.msk [vmem:[%s2777_s13 + $0xa8] sm:$0xff] %vm280_vm0, %v2406_v4  ;;  %v1554_v51 = vadd.f32 %v1553_v26, %v1552_v19 }
 0x174   : > { %v1288_v61 = vadd.f32 %v2161_v56, %v2049_v50  ;;  %v1333_v45 = vadd.f32 %v1285_v57, %v339_v23  ;;  %v343_v23 = vld [vmem:[%s2777_s13 + $0xf0] sm:$0xff] }
 0x175   : > { %v2050_v63 = vpop.f32.mrb[56].mxu0  ;;  %v1399_v1 = vld [vmem:[%s2777_s13 + $0xc0] sm:$0xff] }
 0x176   : > { %v1334_v2 = vadd.f32 %v1288_v61, %v340_v58  ;;  %v2162_v3 = vpop.f32.mrb[56].mxu1  ;;  %v2051_v5 = vpop.f32.mrb[57].mxu0  ;;  %2411 = vtanh.f32 %v1399_v1  ;;  %1366 = vst.msk [vmem:[%s2777_s13 + $0xd0] sm:$0xff] %vm280_vm0, %v1333_v45  ;;  %v1500_v15 = vmul.f32 %v1399_v1, %v1399_v1  ;;  %v1454_v39 = vsel %vm280_vm0, %v1399_v1, 0.0  ;;  %v344_v45 = vld [vmem:[%s2777_s13 + $0xf8] sm:$0xff] }
 0x177   : > { %v1400_v10 = vld [vmem:[%s2777_s13 + $0xc8] sm:$0xff]  ;;  %v2052_v12 = vadd.f32 %v2051_v5, %v2050_v63  ;;  %v2163_v13 = vpop.f32.mrb[57].mxu1  ;;  %v2053_v14 = vpop.f32.mrb[58].mxu0  ;;  %v1455_v38 = vadd.f32 %v1454_v39, %v1453_v30 }
 0x178   : > { %2413 = vtanh.f32 %v1400_v10  ;;  %1367 = vst.msk [vmem:[%s2777_s13 + $0xd8] sm:$0xff] %vm280_vm0, %v1334_v2  ;;  %v2164_v16 = vadd.f32 %v2163_v13, %v2162_v3  ;;  %v2165_v17 = vpop.f32.mrb[58].mxu1  ;;  %v2054_v18 = vpop.f32.mrb[59].mxu0  ;;  %v1501_v32 = vmul.f32 %v1400_v10, %v1400_v10  ;;  %v1555_v36 = vsel %vm280_vm0, %v1500_v15, 0.0 }
 0x179   : > { %v2408_v6 = vpop.eup %2407  ;;  %v2055_v21 = vadd.f32 %v2054_v18, %v2053_v14  ;;  %v2166_v22 = vpop.f32.mrb[59].mxu1  ;;  %v1456_v42 = vsel %vm280_vm0, %v1400_v10, 0.0  ;;  %v1556_v48 = vadd.f32 %v1555_v36, %v1554_v51 }
 0x17a   : > { %v2410_v25 = vpop.eup %2409  ;;  %1638 = vst.msk [vmem:[%s2777_s13 + $0xb0] sm:$0xff] %vm280_vm0, %v2408_v6  ;;  %v1293_v27 = vadd.f32 %v2164_v16, %v2052_v12  ;;  %v2167_v28 = vadd.f32 %v2166_v22, %v2165_v17  ;;  %v1557_v53 = vsel %vm280_vm0, %v1501_v32, 0.0  ;;  %v1457_v57 = vadd.f32 %v1456_v42, %v1455_v38 }
 0x17b   : > { %1639 = vst.msk [vmem:[%s2777_s13 + $0xb8] sm:$0xff] %vm280_vm0, %v2410_v25  ;;  %v1558_v0 = vadd.f32 %v1557_v53, %v1556_v48 }
 0x17c   : > { %v1335_v47 = vadd.f32 %v1293_v27, %v341_v20  ;;  %v1296_v34 = vadd.f32 %v2167_v28, %v2055_v21 }
 0x17d   : > { %v2056_v37 = vpop.f32.mrb[60].mxu0  ;;  %v1401_v40 = vld [vmem:[%s2777_s13 + $0xd0] sm:$0xff] }
 0x17e   : > { %1368 = vst.msk [vmem:[%s2777_s13 + $0xe0] sm:$0xff] %vm280_vm0, %v1335_v47  ;;  %v1336_v33 = vadd.f32 %v1296_v34, %v342_v31  ;;  %v2168_v8 = vpop.f32.mrb[60].mxu1  ;;  %v2057_v41 = vpop.f32.mrb[61].mxu0  ;;  %2415 = vtanh.f32 %v1401_v40  ;;  %v1502_v24 = vmul.f32 %v1401_v40, %v1401_v40  ;;  %v1458_v4 = vsel %vm280_vm0, %v1401_v40, 0.0 }
 0x17f   : > { %v1402_v9 = vld [vmem:[%s2777_s13 + $0xd8] sm:$0xff]  ;;  %v2058_v43 = vadd.f32 %v2057_v41, %v2056_v37  ;;  %v2169_v44 = vpop.f32.mrb[61].mxu1  ;;  %v2059_v46 = vpop.f32.mrb[62].mxu0  ;;  %v1459_v63 = vadd.f32 %v1458_v4, %v1457_v57 }
 0x180   : > { %2417 = vtanh.f32 %v1402_v9  ;;  %1369 = vst.msk [vmem:[%s2777_s13 + $0xe8] sm:$0xff] %vm280_vm0, %v1336_v33  ;;  %v2170_v49 = vadd.f32 %v2169_v44, %v2168_v8  ;;  %v2171_v50 = vpop.f32.mrb[62].mxu1  ;;  %v2060_v52 = vpop.f32.mrb[63].mxu0  ;;  %v1503_v58 = vmul.f32 %v1402_v9, %v1402_v9  ;;  %v1559_v62 = vsel %vm280_vm0, %v1502_v24, 0.0 }
 0x181   : > { %v2412_v54 = vpop.eup %2411  ;;  %v2061_v56 = vadd.f32 %v2060_v52, %v2059_v46  ;;  %v2172_v55 = vpop.f32.mrb[63].mxu1  ;;  %v1460_v2 = vsel %vm280_vm0, %v1402_v9, 0.0  ;;  %v1560_v5 = vadd.f32 %v1559_v62, %v1558_v0  ;;  %v1577_v8 = vlaneseq }
 0x182   : > { %v2414_v59 = vpop.eup %2413  ;;  %1640 = vst.msk [vmem:[%s2777_s13 + $0xc0] sm:$0xff] %vm280_vm0, %v2412_v54  ;;  %v1301_v60 = vadd.f32 %v2170_v49, %v2058_v43  ;;  %v2173_v61 = vadd.f32 %v2172_v55, %v2171_v50  ;;  %v1561_v29 = vsel %vm280_vm0, %v1503_v58, 0.0  ;;  %v1461_v14 = vadd.f32 %v1460_v2, %v1459_v63 }
 0x183   : > { %1641 = vst.msk [vmem:[%s2777_s13 + $0xc8] sm:$0xff] %vm280_vm0, %v2414_v59  ;;  %v1562_v18 = vadd.f32 %v1561_v29, %v1560_v5  ;;  %v1578_v46 = vshrl.u32 %v1577_v8, 7 }
 0x184   : > { %v1337_v11 = vadd.f32 %v1301_v60, %v343_v23  ;;  %v1304_v1 = vadd.f32 %v2173_v61, %v2061_v56 }
 0x185   : > { %v1403_v3 = vld [vmem:[%s2777_s13 + $0xe0] sm:$0xff]  ;;  %vm1579_vm1 = vcmp.eq.s32.totalorder %v1578_v46, 0 }
 0x186   : > { %2419 = vtanh.f32 %v1403_v3  ;;  %1370 = vst.msk [vmem:[%s2777_s13 + $0xf0] sm:$0xff] %vm280_vm0, %v1337_v11  ;;  %v1338_v7 = vadd.f32 %v1304_v1, %v344_v45  ;;  %v1462_v10 = vsel %vm280_vm0, %v1403_v3, 0.0  ;;  %v1504_v12 = vmul.f32 %v1403_v3, %v1403_v3 }
 0x187   : > { %v1404_v13 = vld [vmem:[%s2777_s13 + $0xe8] sm:$0xff]  ;;  %v1463_v17 = vadd.f32 %v1462_v10, %v1461_v14 }
 0x188   : > { %2421 = vtanh.f32 %v1404_v13  ;;  %1371 = vst.msk [vmem:[%s2777_s13 + $0xf8] sm:$0xff] %vm280_vm0, %v1338_v7  ;;  %v1505_v35 = vmul.f32 %v1404_v13, %v1404_v13  ;;  %v1563_v15 = vsel %vm280_vm0, %v1504_v12, 0.0  ;;  %v2416_v16 = vpop.eup %2415  ;;  %v1464_v19 = vsel %vm280_vm0, %v1404_v13, 0.0 }
 0x189   : > { %1642 = vst.msk [vmem:[%s2777_s13 + $0xd0] sm:$0xff] %vm280_vm0, %v2416_v16  ;;  %v1564_v20 = vadd.f32 %v1563_v15, %v1562_v18  ;;  %v1465_v25 = vadd.f32 %v1464_v19, %v1463_v17 }
 0x18a   : > { %v2418_v6 = vpop.eup %2417  ;;  %v1565_v21 = vsel %vm280_vm0, %v1505_v35, 0.0 }
 0x18b   : > { %1643 = vst.msk [vmem:[%s2777_s13 + $0xd8] sm:$0xff] %vm280_vm0, %v2418_v6  ;;  %v1566_v30 = vadd.f32 %v1565_v21, %v1564_v20 }
 0x18d   : > { %v1405_v22 = vld [vmem:[%s2777_s13 + $0xf0] sm:$0xff] }
 0x18e   : > { %2423 = vtanh.f32 %v1405_v22  ;;  %v1466_v26 = vsel %vm280_vm0, %v1405_v22, 0.0  ;;  %v1506_v39 = vmul.f32 %v1405_v22, %v1405_v22 }
 0x18f   : > { %v1406_v27 = vld [vmem:[%s2777_s13 + $0xf8] sm:$0xff]  ;;  %v1467_v28 = vadd.f32 %v1466_v26, %v1465_v25 }
 0x190   : > { %v2420_v31 = vpop.eup %2419  ;;  %2425 = vtanh.f32 %v1406_v27  ;;  %v1468_v32 = vsel %vm280_vm0, %v1406_v27, 0.0  ;;  %v1507_v47 = vmul.f32 %v1406_v27, %v1406_v27  ;;  %v1567_v34 = vsel %vm280_vm0, %v1506_v39, 0.0 }
 0x191   : > { %1644 = vst.msk [vmem:[%s2777_s13 + $0xe0] sm:$0xff] %vm280_vm0, %v2420_v31  ;;  %v1469_v36 = vadd.f32 %v1468_v32, %v1467_v28  ;;  %v1568_v37 = vadd.f32 %v1567_v34, %v1566_v30 }
 0x192   : > { %v2422_v38 = vpop.eup %2421  ;;  %v1569_v51 = vsel %vm280_vm0, %v1507_v47, 0.0 }
 0x193   : > { %1645 = vst.msk [vmem:[%s2777_s13 + $0xe8] sm:$0xff] %vm280_vm0, %v2422_v38  ;;  %v1470_v40 = vrot.slane %v1469_v36, 4  ;;  %v1570_v33 = vadd.f32 %v1569_v51, %v1568_v37 }
 0x195   : > { %v1471_v41 = vadd.f32 %v1470_v40, %v1469_v36  ;;  %v1571_v42 = vrot.slane %v1570_v33, 4 }
 0x197   : > { %v1472_v9 = vrot.slane %v1471_v41, 2  ;;  %v1572_v43 = vadd.f32 %v1571_v42, %v1570_v33 }
 0x198   : > { %v2424_v44 = vpop.eup %2423 }
 0x199   : > { %1646 = vst.msk [vmem:[%s2777_s13 + $0xf0] sm:$0xff] %vm280_vm0, %v2424_v44  ;;  %v1473_v24 = vadd.f32 %v1472_v9, %v1471_v41  ;;  %v1573_v48 = vrot.slane %v1572_v43, 2 }
 0x19a   : > { %v2426_v49 = vpop.eup %2425 }
 0x19b   : > { %1647 = vst.msk [vmem:[%s2777_s13 + $0xf8] sm:$0xff] %vm280_vm0, %v2426_v49  ;;  %v1474_v50 = vrot.slane %v1473_v24, 1  ;;  %v1574_v52 = vadd.f32 %v1573_v48, %v1572_v43  ;;  %s2431_s13 = sshll.u32 %s2540_s12, 4  ;;  %s2432_s13 = int_to_ptr.vmem [resolvable:$false] %s2431_s13 }
 0x19c   : > { %s2433_s14 = scalar_lea.vmem %s2432_s13, 256  ;;  %p2434_p1 = scmp.lt.s32.totalorder %s3244_s24, %s2432_s13 }
 0x19d   : > { %v1475_v4 = vadd.f32 %v1474_v50, %v1473_v24  ;;  %v1575_v53 = vrot.slane %v1574_v52, 1  ;;  %p2435_p2 = scmp.lt.s32.totalorder %s2433_s14, %s2427_s11 }
 0x19f   : > { %v1580_v54 = vsel %vm1579_vm1, %v1475_v4, 0.0  ;;  %v1576_v23 = vadd.f32 %v1575_v53, %v1574_v52  ;;  %p2436_p3 = por %p2435_p2, %p2434_p1 }
 0x1a0   : > { %1581 = vst.msk [vmem:[%s243_s22] sm:$0xff] %vm280_vm0, %v1580_v54 }
 0x1a1   : > { %p2437_p5 = pnand %p2436_p3, %p2430_p0 }
 0x1a3   : > { %2440 = shalt.err (!%p2437_p5)
}
 0x1a4   : > { %s2441_s21 = scalar_lea.hbm %s3242_s7, 128  ;;  %s2445_s6 = scalar_lea.hbm %s3327_s3, 4096 }
 0x1a5   : > { %p2442_p6 = scmp.ne.s32.totalorder %s3242_s7, %s2441_s21  ;;  %p2446_p10 = scmp.lt.u32.totalorder %s3242_s7, %s3327_s3 }
 0x1a6   : > { %p2447_p11 = scmp.lt.u32.totalorder %s2445_s6, %s2441_s21  ;;  %p2449_p13 = scmp.lt.u32.totalorder %s2441_s21, %s3242_s7 }
 0x1a7   : > { %p2443_p7 = pnand %p2442_p6, %p2607_p4 }
 0x1a8   : > { %p2448_p12 = por %p2447_p11, %p2446_p10 }
 0x1a9   : > { %p2444_p9 = pneg %p2443_p7 }
 0x1aa   : > { %p2450_p0 = por %p2449_p13, %p2448_p12 }
 0x1ac   : > { %p2451_p1 = pnand %p2450_p0, %p2444_p9 }
 0x1ae   : > { %2454 = shalt.err (!%p2451_p1)
}
 0x1af   : > { %2174 = dma.vmem_to_hbm [thread:$0]  (%p2607_p4), %s3244_s24, 128, %s3242_s7, %s1654_s10   ;;  %v1582_v56 = vsel %vm1579_vm1, %v1576_v23, 0.0 }
 0x1b0   : > { %1583 = vst.msk [vmem:[%s3236_s26] sm:$0xff] %vm280_vm0, %v1582_v56  ;;  %s1659_s11 = scalar_lea.sflag [#allocation5], %s3225_s29  ;;  %s2455_s12 = scalar_lea.vmem %s3253_s30, 128 }
 0x1b1   : > { %p2456_p2 = scmp.ne.s32.totalorder %s3253_s30, %s2455_s12  ;;  %s2541_s13 = smov [#allocation4]  }
 0x1b2   : > { %s2459_s14 = sshll.u32 %s2541_s13, 4  ;;  %s2460_s14 = int_to_ptr.vmem [resolvable:$false] %s2459_s14 }
 0x1b3   : > { %p2457_p3 = pnand %p2456_p2, %p2607_p4  ;;  %s2461_s21 = scalar_lea.vmem %s2460_s14, 256 }
 0x1b4   : > { %p2462_p6 = scmp.lt.s32.totalorder %s3253_s30, %s2460_s14  ;;  %p2463_p7 = scmp.lt.s32.totalorder %s2461_s21, %s2455_s12 }
 0x1b5   : > { %p2458_p5 = pneg %p2457_p3 }
 0x1b6   : > { %p2464_p9 = por %p2463_p7, %p2462_p6 }
 0x1b8   : > { %p2465_p10 = pnand %p2464_p9, %p2458_p5 }
 0x1ba   : > { %2468 = shalt.err (!%p2465_p10)
}
 0x1bb   : > { %s2469_s29 = scalar_lea.hbm %s3251_s9, 128  ;;  %s2473_s7 = scalar_lea.hbm %s3328_s4, 4096 }
 0x1bc   : > { %p2470_p11 = scmp.ne.s32.totalorder %s3251_s9, %s2469_s29  ;;  %p2474_p0 = scmp.lt.u32.totalorder %s3251_s9, %s3328_s4 }
 0x1bd   : > { %p2475_p1 = scmp.lt.u32.totalorder %s2473_s7, %s2469_s29  ;;  %p2477_p3 = scmp.lt.u32.totalorder %s2469_s29, %s3251_s9 }
 0x1be   : > { %p2471_p12 = pnand %p2470_p11, %p2607_p4 }
 0x1bf   : > { %p2476_p2 = por %p2475_p1, %p2474_p0 }
 0x1c0   : > { %p2472_p13 = pneg %p2471_p12 }
 0x1c1   : > { %p2478_p5 = por %p2477_p3, %p2476_p2 }
 0x1c3   : > { %p2479_p6 = pnand %p2478_p5, %p2472_p13 }
 0x1c5   : > { %2482 = shalt.err (!%p2479_p6)
}
 0x1c6   : > { %2175 = dma.vmem_to_hbm [thread:$0]  (%p2607_p4), %s3253_s30, 128, %s3251_s9, %s1659_s11  }
 0x1c7 PF: > { %p2185_p7 = scmp.ge.s32.totalorder %s2537_s20, 2  ;;  %s1709_s5 = sand.u32 1, %s2517_s15  }
 0x1c8   : > { %s1710_s6 = scalar_lea.sflag [#allocation3], %s1709_s5 }
 0x1c9   : > { %p2179_p9 = pnand %p2185_p7, %p2614_p8 }
 0x1cb   : > { %2508 = dma.done.wait (!%p2179_p9), %s1710_s6, 128  }
 0x1cc   : > { %2510 = vsyncadd (!%p2179_p9), %s1710_s6, 4294967168  ;;  %s1719_s18 = scalar_lea.sflag [#allocation5], %s1709_s5 }
 0x1cd   : > { %2512 = dma.done.wait (!%p2179_p9), %s1719_s18, 128  }
 0x1ce   : > { %2514 = vsyncadd (!%p2179_p9), %s1719_s18, 4294967168  ;;  %s21_s20 = sadd.s32 1, %s2537_s20   ;;  %s3331_s15 = smov %s2521_s16 }
 0x1cf   : > { %p18_p10 = scmp.ge.s32.totalorder %s21_s20, 34   ;;  %s3332_s16 = smov %s2525_s17 }
 0x1d0   : > { %s3333_s17 = smov %s2620_s28  ;;  %s3334_s18 = smov %s2533_s19 }
 0x1d1   : > { %s3335_s19 = smov %s3337_s23  ;;  %20 = sbr.rel (!%p18_p10) target bundleno = 6 (0x6), region = 103 }
 0x1d8   :  { %1724 = vsyncpa [#allocation3], 1 }
 0x1d9   :  { %1726 = vsyncpa [#allocation3 + $0x1], 1 }
 0x1da   :  { %1727 = vsyncpa [#allocation5], 1 }
 0x1db   :  { %1729 = vsyncpa [#allocation5 + $0x1], 1 }

</bundles_post_ra>
